<compile_context>
chip_gen: v7x
topology: tpu7x:2x2x1
jax: 0.10.0
libtpu: 0.0.40
codegen_flags: <defaults>
</compile_context>

<pallas_src>
import functools

import jax
import jax.numpy as jnp
from jax.experimental import pallas as pl
from jax.experimental.pallas import tpu as pltpu


def encoder_kernel(x_ref,
                   w1t_ref, shift1_ref,
                   w2t_ref,
                   w3at_ref, w3bt_ref, shift3_ref,
                   w4t_ref, b4_ref,
                   out_ref,
                   *, groups_per_step, points_per_group):
    T, N = groups_per_step, points_per_group
    x = x_ref[...]                                            # (T*N, 3) f32

    # ---- first_conv: Conv1d(3,128,1) + BN(128) (folded) + ReLU ----
    # K=3 contraction as a single MXU matmul (f32 operands for input precision).
    h1 = jnp.dot(x, w1t_ref[...],
                 preferred_element_type=jnp.float32) + shift1_ref[...]   # (M,128)
    h1 = jnp.maximum(h1, 0.0)

    # ---- first_conv: Conv1d(128,256,1)  (b2 folded into shift3) ----
    f = jnp.dot(h1.astype(jnp.bfloat16), w2t_ref[...],
                preferred_element_type=jnp.float32)                      # (M,256)

    # ---- per-group global max over points (torch.max(feature, dim=2)) ----
    fg = jnp.max(f.reshape(T, N, 256), axis=1)                           # (T,256)

    # ---- second_conv: Conv1d(512,512,1) + BN(512) (folded) + ReLU ----
    # cat([fg.expand(N), f]) @ W3^T == fg @ W3[:, :256]^T + f @ W3[:, 256:]^T
    g_part = jnp.dot(fg.astype(jnp.bfloat16), w3at_ref[...],
                     preferred_element_type=jnp.float32)                 # (T,512)
    pp = jnp.dot(f.astype(jnp.bfloat16), w3bt_ref[...],
                 preferred_element_type=jnp.float32)                     # (M,512)
    # fused add + ReLU + bf16 downcast feeding the final matmul
    h2 = jnp.maximum(pp.reshape(T, N, 512) + g_part[:, None, :]
                     + shift3_ref[...], 0.0).astype(jnp.bfloat16)        # (T,N,512)

    # ---- second_conv: Conv1d(512, C, 1)  (b4 added after the max) ----
    y = jnp.dot(h2.reshape(T * N, 512), w4t_ref[...],
                preferred_element_type=jnp.float32)                      # (M,C)

    C = y.shape[-1]
    out_ref[...] = jnp.max(y.reshape(T, N, C), axis=1) + b4_ref[...]     # (T,C)


def _choose_tiling(num_groups, n, target_rows=2048):
    """Pick groups-per-step T (multiple of 8 when tiling) and padded group count."""
    T = max(8, (target_rows // max(n, 1)) // 8 * 8)
    if T >= num_groups:
        T = num_groups                       # single step: block == full array
    # prefer >=2 grid steps (v7x has 2 TensorCores) while keeping >=512 rows/step
    while (-(-num_groups // T) < 2) and (T % 16 == 0) and ((T // 2) * n >= 512):
        T //= 2
    padded = -(-num_groups // T) * T
    return T, padded


def encoder_forward(point_groups, params):
    """point_groups: (B, G, N, 3) -> (B, G, encoder_channel)"""
    bs, g, n, _ = point_groups.shape
    C = params["w4"].shape[0]
    num_groups = bs * g

    T, padded = _choose_tiling(num_groups, n)

    x = point_groups.reshape(num_groups, n, 3).astype(jnp.float32)
    if padded > num_groups:
        # pad whole groups with zeros; per-group max is unaffected, padded
        # output rows are sliced off below.
        x = jnp.concatenate(
            [x, jnp.zeros((padded - num_groups, n, 3), jnp.float32)], axis=0)
    x_flat = x.reshape(padded * n, 3)

    eps = 1e-5
    # Eval-mode BatchNorm folded into the conv weights/biases.
    s1 = params["bn1_gamma"] / jnp.sqrt(params["bn1_var"] + eps)
    sh1 = params["bn1_beta"] - params["bn1_mean"] * s1
    s3 = params["bn2_gamma"] / jnp.sqrt(params["bn2_var"] + eps)
    sh3 = params["bn2_beta"] - params["bn2_mean"] * s3

    w1t = (params["w1"] * s1[:, None]).T.astype(jnp.float32)       # (3, 128) folded
    shift1 = params["b1"] * s1 + sh1                               # (128,)
    w2t = params["w2"].T.astype(jnp.bfloat16)                      # (128, 256)
    w3f = params["w3"] * s3[:, None]                               # (512, 512) folded, f32
    # exact b2 fold (computed in f32 on the folded w3, before the bf16 cast):
    #   (fg'+b2)@W3a^T + (f'+b2)@W3b^T + b3' == fg'@W3a^T + f'@W3b^T + shift3
    shift3 = (params["b3"] * s3 + sh3
              + (w3f[:, :256] + w3f[:, 256:]) @ params["b2"])      # (512,)
    w3at = w3f[:, :256].T.astype(jnp.bfloat16)                     # (256, 512) global part
    w3bt = w3f[:, 256:].T.astype(jnp.bfloat16)                     # (256, 512) per-point
    w4t = params["w4"].T.astype(jnp.bfloat16)                      # (512, C)

    row = lambda v: v.reshape(1, -1).astype(jnp.float32)
    shift1_r, shift3_r, b4_r = row(shift1), row(shift3), row(params["b4"])

    const = lambda arr: pl.BlockSpec(arr.shape,
                                     lambda i, _nd=arr.ndim: (0,) * _nd)

    kernel = functools.partial(encoder_kernel,
                               groups_per_step=T, points_per_group=n)

    out = pl.pallas_call(
        kernel,
        out_shape=jax.ShapeDtypeStruct((padded, C), jnp.float32),
        grid=(padded // T,),
        in_specs=[
            pl.BlockSpec((T * n, 3), lambda i: (i, 0)),
            const(w1t), const(shift1_r),
            const(w2t),
            const(w3at), const(w3bt), const(shift3_r),
            const(w4t), const(b4_r),
        ],
        out_specs=pl.BlockSpec((T, C), lambda i: (i, 0)),
        compiler_params=pltpu.CompilerParams(
            dimension_semantics=("parallel",),
            vmem_limit_bytes=48 * 1024 * 1024),
    )(x_flat,
      w1t, shift1_r,
      w2t,
      w3at, w3bt, shift3_r,
      w4t, b4_r)

    return out[:num_groups].reshape(bs, g, C)


def encoder_ref(point_groups, params):
    """Pure-JAX f32 reference matching the PyTorch forward (eval-mode BN)."""
    bs, g, n, _ = point_groups.shape
    x = point_groups.reshape(bs * g, n, 3).astype(jnp.float32)
    eps = 1e-5
    h1 = x @ params["w1"].T + params["b1"]
    h1 = (h1 - params["bn1_mean"]) / jnp.sqrt(params["bn1_var"] + eps) \
         * params["bn1_gamma"] + params["bn1_beta"]
    h1 = jnp.maximum(h1, 0.0)
    f = h1 @ params["w2"].T + params["b2"]                     # (BG, N, 256)
    fg = jnp.max(f, axis=1, keepdims=True)                     # (BG, 1, 256)
    cat = jnp.concatenate([jnp.broadcast_to(fg, f.shape), f], axis=-1)
    h2 = cat @ params["w3"].T + params["b3"]
    h2 = (h2 - params["bn2_mean"]) / jnp.sqrt(params["bn2_var"] + eps) \
         * params["bn2_gamma"] + params["bn2_beta"]
    h2 = jnp.maximum(h2, 0.0)
    y = h2 @ params["w4"].T + params["b4"]
    return jnp.max(y, axis=1).reshape(bs, g, -1)


def init_params(key, encoder_channel):
    ks = jax.random.split(key, 8)

    def u(k, shape, fan_in):
        bound = 1.0 / jnp.sqrt(fan_in)
        return jax.random.uniform(k, shape, jnp.float32, -bound, bound)

    return {
        # Conv1d weights (out, in) — kernel_size = 1 is squeezed out
        "w1": u(ks[0], (128, 3), 3.0),                "b1": u(ks[1], (128,), 3.0),
        "w2": u(ks[2], (256, 128), 128.0),            "b2": u(ks[3], (256,), 128.0),
        "w3": u(ks[4], (512, 512), 512.0),            "b3": u(ks[5], (512,), 512.0),
        "w4": u(ks[6], (encoder_channel, 512), 512.0),
        "b4": u(ks[7], (encoder_channel,), 512.0),
        # deterministic (non-trivial) BN eval-mode stats / affine params
        "bn1_gamma": jnp.linspace(0.9, 1.1, 128, dtype=jnp.float32),
        "bn1_beta":  jnp.linspace(-0.1, 0.1, 128, dtype=jnp.float32),
        "bn1_mean":  jnp.linspace(-0.05, 0.05, 128, dtype=jnp.float32),
        "bn1_var":   jnp.linspace(0.8, 1.2, 128, dtype=jnp.float32),
        "bn2_gamma": jnp.linspace(0.95, 1.05, 512, dtype=jnp.float32),
        "bn2_beta":  jnp.linspace(-0.05, 0.05, 512, dtype=jnp.float32),
        "bn2_mean":  jnp.linspace(-0.02, 0.02, 512, dtype=jnp.float32),
        "bn2_var":   jnp.linspace(0.9, 1.1, 512, dtype=jnp.float32),
    }


if __name__ == "__main__":
    # 32 groups of 32 points -> T=16 groups/step (M = 512 rows), grid = 2
    # (both v7x TensorCores get a step under dimension_semantics=("parallel",)).
    B, G, N = 2, 16, 32
    encoder_channel = 256

    key = jax.random.PRNGKey(0)
    k_x, k_p = jax.random.split(key)
    point_groups = jax.random.normal(k_x, (B, G, N, 3), dtype=jnp.float32)
    params = init_params(k_p, encoder_channel)

    out = jax.block_until_ready(encoder_forward(point_groups, params))
    assert out.shape == (B, G, encoder_channel), out.shape

    ref = jax.block_until_ready(encoder_ref(point_groups, params))
    max_err = float(jnp.max(jnp.abs(out - ref)))
    # bf16 MXU operands (f32 accumulation) -> looser tolerance vs the f32 ref.
    assert jnp.allclose(out, ref, atol=3e-2, rtol=3e-2), max_err

    print("KERNEL_OK")
</pallas_src>

<mosaic_0001>
module attributes {stable_mosaic.version = 11 : i64} {
  func.func @encoder_kernel(%arg0: i32, %arg1: memref<512x3xf32, #tpu.memory_space<vmem>>, %arg2: memref<3x128xf32, #tpu.memory_space<vmem>>, %arg3: memref<1x128xf32, #tpu.memory_space<vmem>>, %arg4: memref<128x256xbf16, #tpu.memory_space<vmem>>, %arg5: memref<256x512xbf16, #tpu.memory_space<vmem>>, %arg6: memref<256x512xbf16, #tpu.memory_space<vmem>>, %arg7: memref<1x512xf32, #tpu.memory_space<vmem>>, %arg8: memref<512x256xbf16, #tpu.memory_space<vmem>>, %arg9: memref<1x256xf32, #tpu.memory_space<vmem>>, %arg10: memref<16x256xf32, #tpu.memory_space<vmem>>) attributes {dimension_semantics = [#tpu.dimension_semantics<parallel>], iteration_bounds = array<i64: 2>, scalar_prefetch = 0 : i64, scratch_operands = 0 : i64, tpu.core_type = #tpu.core_type<tc>, window_params = [{transform_indices = @transform_0, window_bounds = array<i64: 512, 3>}, {pipeline_mode = #tpu.pipeline_mode<synchronous>, transform_indices = @transform_1, window_bounds = array<i64: 3, 128>}, {pipeline_mode = #tpu.pipeline_mode<synchronous>, transform_indices = @transform_2, window_bounds = array<i64: 1, 128>}, {pipeline_mode = #tpu.pipeline_mode<synchronous>, transform_indices = @transform_3, window_bounds = array<i64: 128, 256>}, {pipeline_mode = #tpu.pipeline_mode<synchronous>, transform_indices = @transform_4, window_bounds = array<i64: 256, 512>}, {pipeline_mode = #tpu.pipeline_mode<synchronous>, transform_indices = @transform_5, window_bounds = array<i64: 256, 512>}, {pipeline_mode = #tpu.pipeline_mode<synchronous>, transform_indices = @transform_6, window_bounds = array<i64: 1, 512>}, {pipeline_mode = #tpu.pipeline_mode<synchronous>, transform_indices = @transform_7, window_bounds = array<i64: 512, 256>}, {pipeline_mode = #tpu.pipeline_mode<synchronous>, transform_indices = @transform_8, window_bounds = array<i64: 1, 256>}, {transform_indices = @transform_9, window_bounds = array<i64: 16, 256>}]} {
    %c0 = arith.constant 0 : index
    %c0_0 = arith.constant 0 : index
    %0 = vector.load %arg1[%c0, %c0_0] : memref<512x3xf32, #tpu.memory_space<vmem>>, vector<512x3xf32>
    %c0_1 = arith.constant 0 : index
    %c0_2 = arith.constant 0 : index
    %1 = vector.load %arg2[%c0_1, %c0_2] : memref<3x128xf32, #tpu.memory_space<vmem>>, vector<3x128xf32>
    %cst = arith.constant dense<0.000000e+00> : vector<512x128xf32>
    %2 = tpu.matmul %0, %1, %cst {dimension_numbers = #tpu.dot_dimension_numbers<[1], [0], [0], [1], [0, 0, 1, 1], [], []>} : vector<512x3xf32>, vector<3x128xf32>, vector<512x128xf32> -> vector<512x128xf32>
    %c0_3 = arith.constant 0 : index
    %c0_4 = arith.constant 0 : index
    %3 = vector.load %arg3[%c0_3, %c0_4] : memref<1x128xf32, #tpu.memory_space<vmem>>, vector<1x128xf32>
    %4 = vector.broadcast %3 : vector<1x128xf32> to vector<512x128xf32>
    %5 = arith.addf %2, %4 : vector<512x128xf32>
    %cst_5 = arith.constant 0.000000e+00 : f32
    %6 = vector.broadcast %cst_5 : f32 to vector<512x128xf32>
    %7 = arith.maximumf %5, %6 : vector<512x128xf32>
    %8 = arith.truncf %7 : vector<512x128xf32> to vector<512x128xbf16>
    %c0_6 = arith.constant 0 : index
    %c0_7 = arith.constant 0 : index
    %9 = vector.load %arg4[%c0_6, %c0_7] : memref<128x256xbf16, #tpu.memory_space<vmem>>, vector<128x256xbf16>
    %cst_8 = arith.constant dense<0.000000e+00> : vector<512x256xf32>
    %10 = tpu.matmul %8, %9, %cst_8 {dimension_numbers = #tpu.dot_dimension_numbers<[1], [0], [0], [1], [0, 0, 1, 1], [], []>} : vector<512x128xbf16>, vector<128x256xbf16>, vector<512x256xf32> -> vector<512x256xf32>
    %11 = vector.shape_cast %10 : vector<512x256xf32> to vector<16x32x256xf32>
    %cst_9 = arith.constant dense<0xFF800000> : vector<16x256xf32>
    %12 = vector.multi_reduction <maximumf>, %11, %cst_9 [1] : vector<16x32x256xf32> to vector<16x256xf32>
    %13 = arith.truncf %12 : vector<16x256xf32> to vector<16x256xbf16>
    %c0_10 = arith.constant 0 : index
    %c0_11 = arith.constant 0 : index
    %14 = vector.load %arg5[%c0_10, %c0_11] : memref<256x512xbf16, #tpu.memory_space<vmem>>, vector<256x512xbf16>
    %cst_12 = arith.constant dense<0.000000e+00> : vector<16x512xf32>
    %15 = tpu.matmul %13, %14, %cst_12 {dimension_numbers = #tpu.dot_dimension_numbers<[1], [0], [0], [1], [0, 0, 1, 1], [], []>} : vector<16x256xbf16>, vector<256x512xbf16>, vector<16x512xf32> -> vector<16x512xf32>
    %16 = arith.truncf %10 : vector<512x256xf32> to vector<512x256xbf16>
    %c0_13 = arith.constant 0 : index
    %c0_14 = arith.constant 0 : index
    %17 = vector.load %arg6[%c0_13, %c0_14] : memref<256x512xbf16, #tpu.memory_space<vmem>>, vector<256x512xbf16>
    %cst_15 = arith.constant dense<0.000000e+00> : vector<512x512xf32>
    %18 = tpu.matmul %16, %17, %cst_15 {dimension_numbers = #tpu.dot_dimension_numbers<[1], [0], [0], [1], [0, 0, 1, 1], [], []>} : vector<512x256xbf16>, vector<256x512xbf16>, vector<512x512xf32> -> vector<512x512xf32>
    %19 = vector.shape_cast %18 : vector<512x512xf32> to vector<16x32x512xf32>
    %20 = vector.shape_cast %15 : vector<16x512xf32> to vector<16x1x512xf32>
    %21 = vector.broadcast %20 : vector<16x1x512xf32> to vector<16x32x512xf32>
    %22 = arith.addf %19, %21 : vector<16x32x512xf32>
    %c0_16 = arith.constant 0 : index
    %c0_17 = arith.constant 0 : index
    %23 = vector.load %arg7[%c0_16, %c0_17] : memref<1x512xf32, #tpu.memory_space<vmem>>, vector<1x512xf32>
    %24 = vector.shape_cast %23 : vector<1x512xf32> to vector<1x1x512xf32>
    %25 = vector.broadcast %24 : vector<1x1x512xf32> to vector<16x32x512xf32>
    %26 = arith.addf %22, %25 : vector<16x32x512xf32>
    %cst_18 = arith.constant 0.000000e+00 : f32
    %27 = vector.broadcast %cst_18 : f32 to vector<16x32x512xf32>
    %28 = arith.maximumf %26, %27 : vector<16x32x512xf32>
    %29 = arith.truncf %28 : vector<16x32x512xf32> to vector<16x32x512xbf16>
    %30 = vector.shape_cast %29 : vector<16x32x512xbf16> to vector<512x512xbf16>
    %c0_19 = arith.constant 0 : index
    %c0_20 = arith.constant 0 : index
    %31 = vector.load %arg8[%c0_19, %c0_20] : memref<512x256xbf16, #tpu.memory_space<vmem>>, vector<512x256xbf16>
    %cst_21 = arith.constant dense<0.000000e+00> : vector<512x256xf32>
    %32 = tpu.matmul %30, %31, %cst_21 {dimension_numbers = #tpu.dot_dimension_numbers<[1], [0], [0], [1], [0, 0, 1, 1], [], []>} : vector<512x512xbf16>, vector<512x256xbf16>, vector<512x256xf32> -> vector<512x256xf32>
    %33 = vector.shape_cast %32 : vector<512x256xf32> to vector<16x32x256xf32>
    %cst_22 = arith.constant dense<0xFF800000> : vector<16x256xf32>
    %34 = vector.multi_reduction <maximumf>, %33, %cst_22 [1] : vector<16x32x256xf32> to vector<16x256xf32>
    %c0_23 = arith.constant 0 : index
    %c0_24 = arith.constant 0 : index
    %35 = vector.load %arg9[%c0_23, %c0_24] : memref<1x256xf32, #tpu.memory_space<vmem>>, vector<1x256xf32>
    %36 = vector.broadcast %35 : vector<1x256xf32> to vector<16x256xf32>
    %37 = arith.addf %34, %36 : vector<16x256xf32>
    %c0_25 = arith.constant 0 : index
    %c0_26 = arith.constant 0 : index
    %38 = vector.load %arg10[%c0_25, %c0_26] : memref<16x256xf32, #tpu.memory_space<vmem>>, vector<16x256xf32>
    tpu.vector_store %arg10[%c0_25, %c0_26], %37 {strides = array<i32>} : memref<16x256xf32, #tpu.memory_space<vmem>>, vector<16x256xf32>,
    return
  }
  func.func @transform_0(%arg0: i32) -> (i32, i32) {
    %c0_i32 = arith.constant 0 : i32
    %c0_i32_0 = arith.constant 0 : i32
    return %arg0, %c0_i32 : i32, i32
  }
  func.func @transform_1(%arg0: i32) -> (i32, i32) {
    %c0_i32 = arith.constant 0 : i32
    %c0_i32_0 = arith.constant 0 : i32
    %c0_i32_1 = arith.constant 0 : i32
    return %c0_i32, %c0_i32_0 : i32, i32
  }
  func.func @transform_2(%arg0: i32) -> (i32, i32) {
    %c0_i32 = arith.constant 0 : i32
    %c0_i32_0 = arith.constant 0 : i32
    %c0_i32_1 = arith.constant 0 : i32
    return %c0_i32, %c0_i32_0 : i32, i32
  }
  func.func @transform_3(%arg0: i32) -> (i32, i32) {
    %c0_i32 = arith.constant 0 : i32
    %c0_i32_0 = arith.constant 0 : i32
    %c0_i32_1 = arith.constant 0 : i32
    return %c0_i32, %c0_i32_0 : i32, i32
  }
  func.func @transform_4(%arg0: i32) -> (i32, i32) {
    %c0_i32 = arith.constant 0 : i32
    %c0_i32_0 = arith.constant 0 : i32
    %c0_i32_1 = arith.constant 0 : i32
    return %c0_i32, %c0_i32_0 : i32, i32
  }
  func.func @transform_5(%arg0: i32) -> (i32, i32) {
    %c0_i32 = arith.constant 0 : i32
    %c0_i32_0 = arith.constant 0 : i32
    %c0_i32_1 = arith.constant 0 : i32
    return %c0_i32, %c0_i32_0 : i32, i32
  }
  func.func @transform_6(%arg0: i32) -> (i32, i32) {
    %c0_i32 = arith.constant 0 : i32
    %c0_i32_0 = arith.constant 0 : i32
    %c0_i32_1 = arith.constant 0 : i32
    return %c0_i32, %c0_i32_0 : i32, i32
  }
  func.func @transform_7(%arg0: i32) -> (i32, i32) {
    %c0_i32 = arith.constant 0 : i32
    %c0_i32_0 = arith.constant 0 : i32
    %c0_i32_1 = arith.constant 0 : i32
    return %c0_i32, %c0_i32_0 : i32, i32
  }
  func.func @transform_8(%arg0: i32) -> (i32, i32) {
    %c0_i32 = arith.constant 0 : i32
    %c0_i32_0 = arith.constant 0 : i32
    %c0_i32_1 = arith.constant 0 : i32
    return %c0_i32, %c0_i32_0 : i32, i32
  }
  func.func @transform_9(%arg0: i32) -> (i32, i32) {
    %c0_i32 = arith.constant 0 : i32
    %c0_i32_0 = arith.constant 0 : i32
    return %arg0, %c0_i32 : i32, i32
  }
}

</mosaic_0001>

<bundles_post_ra>
// kernel: tpu_custom_call.1
= control target key start
LH: loop header
LB: loop body
LE: loop exit
PB: predicated region body
PF: predicated region fallthrough
CT: control target
= control target key end

     0   :  { %14 = vsyncpa [#allocation3], 0  ;;  %s10919_s0 = inlined_call_operand.vmem [shape: f32[1024,3], index: 0, kind: input, shape index: {}]   ;;  %s10920_s1 = inlined_call_operand.vmem [shape: f32[3,128], index: 1, kind: input, shape index: {}]   ;;  %s10921_s2 = inlined_call_operand.vmem [shape: f32[1,128], index: 2, kind: input, shape index: {}]   ;;  %s10922_s3 = inlined_call_operand.hbm [shape: bf16[128,256], index: 3, kind: input, shape index: {}]   ;;  %s10923_s4 = inlined_call_operand.vmem [shape: bf16[256,512], index: 4, kind: input, shape index: {}]   ;;  %s10924_s5 = inlined_call_operand.vmem [shape: bf16[256,512], index: 5, kind: input, shape index: {}]   ;;  %s10925_s6 = inlined_call_operand.vmem [shape: f32[1,512], index: 6, kind: input, shape index: {}]   ;;  %s10926_s7 = inlined_call_operand.hbm [shape: bf16[512,256], index: 7, kind: input, shape index: {}]   ;;  %s10927_s8 = inlined_call_operand.vmem [shape: f32[1,256], index: 8, kind: input, shape index: {}]   ;;  %s10928_s9 = inlined_call_operand.hbm [shape: f32[32,256], index: 9, kind: output, shape index: {}]  }
   0x1   :  { %15 = vsyncpa [#allocation6], 0 }
   0x2   :  { %16 = vsyncpa [#allocation4], 0 }
   0x3   :  { %18 = vsyncpa [#allocation4 + $0x1], 0  ;;  %s7822_s30 = smov 0   ;;  %s7824_s10 = smov 0  }
   0x4   :  { %s7826_s11 = smov 0   ;;  %s7828_s12 = smov 0  }
   0x5 LB: > { %11014 = sst [smem:[#allocation11_spill]] %s7757_s11  ;;  %s7843_s13 = sadd.s32 4294967295, %s7761_s12   ;;  %s7761_s12 = sphi %s7828_s12, %s11418_s12   ;;  %s7757_s11 = sphi %s7826_s11, %s11420_s11   ;;  %s7753_s10 = sphi %s7824_s10, %s11422_s10   ;;  %s7749_s30 = sphi %s7822_s30, %s11421_s30  }
   0x6   : > { %s6610_s14 = sadd.s32 4294967294, %s7761_s12   ;;  %s7847_s15 = sadd.s32 1, %s7761_s12  }
   0x7   : > { %11015 = sst [smem:[#allocation12_spill]] %s7847_s15  ;;  %s225_s16 = sadd.s32 1, %s7757_s11 }
   0x8   : > { %s222_s17 = ssub.s32 %s7761_s12, %s7847_s15  ;;  %p235_p0 = scmp.ne.s32.totalorder %s7757_s11, %s7753_s10 }
   0x9   : > { %p223_p1 = scmp.eq.s32.totalorder %s222_s17, 0  ;;  %p236_p2 = scmp.eq.s32.totalorder %s7843_s13, 1 }
   0xa   : > { %p241_p3 = scmp.ne.s32.totalorder %s7753_s10, %s7749_s30  ;;  %p242_p4 = scmp.eq.s32.totalorder %s6610_s14, 1 }
   0xb   : > { %s7858_s18 = scalar_select %p223_p1, %s7757_s11, %s225_s16  }
   0xc   : > { %p7860_p5 = por %p236_p2, %p235_p0  ;;  %p7864_p6 = por %p242_p4, %p241_p3 }
   0xd   : > { %11016 = sst [smem:[#allocation13_spill]] %s7858_s18  ;;  %p6611_p7 = scmp.ge.s32.totalorder %s7761_s12, 1 }
   0xe   : > { %s11017_s19 = scalar_select %p7860_p5, 1, 0 }
   0xf   : > { %s11018_s20 = scalar_select %p7864_p6, 1, 0 }
  0x10   : > { %p249_p8 = scmp.lt.s32.totalorder %s7761_s12, 3  ;;  %p10929_p9 = scmp.eq.s32.totalorder %s7843_s13, 0 }
  0x11   : > { %s7763_s22 = smov [#allocation2]   ;;  %s7764_s25 = smov [#allocation5]  }
  0x12   : > { %p7871_p10 = pnand %p6611_p7, %p249_p8  ;;  %s267_s23 = sshll.u32 %s7763_s22, 4  ;;  %s268_s23 = int_to_ptr.vmem [resolvable:$true] %s267_s23 }
  0x13   : > { %s289_s26 = sshll.u32 %s7764_s25, 4  ;;  %s7635_s29 = scalar_lea.hbm %s10922_s3, 2048  ;;  %s7883_s26 = int_to_ptr.vmem [resolvable:$true] %s289_s26 }
  0x14   : > { %s11019_s21 = scalar_select %p7871_p10, 1, 0 }
  0x15   : > { %p7236_p11 = pneg %p7871_p10  ;;  %p7636_p13 = scmp.ne.s32.totalorder %s10922_s3, %s7635_s29 }
  0x16   : > { %p7642_p3 = scmp.lt.u32.totalorder %s7635_s29, %s10922_s3 }
  0x17   : > { %p7879_p12 = pnand %p10929_p9, %p7236_p11 }
  0x19   : > { %p7637_p0 = pneg %p7879_p12 }
  0x1b   : > { %p7638_p1 = pnand %p7637_p0, %p7636_p13 }
  0x1d   : > { %p7639_p2 = pneg %p7638_p1 }
  0x1f   : > { %p7644_p4 = pnand %p7642_p3, %p7639_p2 }
  0x21   : > { %7647 = shalt.err (!%p7644_p4)
}
  0x22   : > { %s7648_s25 = scalar_lea.vmem %s268_s23, 2048  ;;  %p7656_p9 = scmp.lt.s32.totalorder %s268_s23, %s268_s23 }
  0x23   : > { %p7649_p7 = scmp.ne.s32.totalorder %s268_s23, %s7648_s25  ;;  %p7657_p6 = scmp.lt.s32.totalorder %s7648_s25, %s7648_s25 }
  0x25   : > { %p7651_p8 = pnand %p7649_p7, %p7637_p0  ;;  %p7658_p5 = por %p7657_p6, %p7656_p9 }
  0x27   : > { %p7652_p11 = pneg %p7651_p8 }
  0x29   : > { %p7659_p10 = pnand %p7658_p5, %p7652_p11 }
  0x2b   : > { %7662 = shalt.err (!%p7659_p10)
}
  0x2c   : > { %s7765_s27 = smov 128   ;;  %s7766_s28 = smov 8  }
  0x2d   : > { %7239 = dma.hbm_to_vmem [thread:$0]  (!%p7879_p12), %s10922_s3, 2048, %s268_s23, [#allocation3], %s7765_s27, %s7765_s27, %s7766_s28  }
  0x2e   : > { %s7663_s22 = scalar_lea.hbm %s10926_s7, 8192 }
  0x2f   : > { %p7664_p13 = scmp.ne.s32.totalorder %s10926_s7, %s7663_s22  ;;  %p7670_p9 = scmp.lt.u32.totalorder %s7663_s22, %s10926_s7 }
  0x31   : > { %p7666_p5 = pnand %p7664_p13, %p7637_p0 }
  0x33   : > { %p7667_p6 = pneg %p7666_p5 }
  0x35   : > { %p7672_p10 = pnand %p7670_p9, %p7667_p6 }
  0x37   : > { %7675 = shalt.err (!%p7672_p10)
}
  0x38   : > { %s7676_s23 = scalar_lea.vmem %s7883_s26, 8192  ;;  %p7684_p4 = scmp.lt.s32.totalorder %s7883_s26, %s7883_s26 }
  0x39   : > { %p7677_p1 = scmp.ne.s32.totalorder %s7883_s26, %s7676_s23  ;;  %p7685_p7 = scmp.lt.s32.totalorder %s7676_s23, %s7676_s23 }
  0x3b   : > { %p7679_p2 = pnand %p7677_p1, %p7637_p0  ;;  %p7686_p8 = por %p7685_p7, %p7684_p4 }
  0x3d   : > { %p7680_p3 = pneg %p7679_p2 }
  0x3f   : > { %p7687_p11 = pnand %p7686_p8, %p7680_p3 }
  0x41   : > { %7690 = shalt.err (!%p7687_p11)
}
  0x42   : > { %7242 = dma.hbm_to_vmem [thread:$0]  (!%p7879_p12), %s10926_s7, 8192, %s7883_s26, [#allocation6], %s7765_s27, %s7765_s27, %s7766_s28  }
  0x43   : > { %p11021_p13 = scmp.ne.s32.totalorder %s11019_s21, 0 }
  0x45   : > { %317 = sbr.rel (%p11021_p13) target bundleno = 1697 (0x6a1), region = 56 }
  0x4c   : > { %p11022_p5 = scmp.eq.s32.totalorder %s7843_s13, 0 }
  0x4e   : > { %7736 = dma.done.wait (%p11022_p5), [#allocation3], 2048   ;;  %p11023_p0 = pmov %p11022_p5 }
  0x50   : > { %7738 = vsyncadd (%p11023_p0), [#allocation3], 4294965248  ;;  %p11024_p6 = pmov %p11023_p0 }
  0x51   : > { %p11025_p9 = pmov %p11023_p0 }
  0x52   : > { %7740 = dma.done.wait (%p11024_p6), [#allocation6], 8192  }
  0x53   : > { %7742 = vsyncadd (%p11025_p9), [#allocation6], 4294959104  ;;  %s6619_s18 = sshll.u32 %s7843_s13, 6  ;;  %vm630_vm0 = vcmask 1042432   ;;  %vm437_vm1 = vcmask 23552   ;;  %vm2012_vm2 = vcmask 1041409  }
  0x54   : > { %p358_p10 = scmp.lt.s32.totalorder %s6619_s18, 127  ;;  %v429_v0 = vld [vmem:[%s10920_s1] sm:$0x7]  ;;  %v7292_v12 = vld [vmem:[#allocation2 + $0x4] ss:$8 sps:$4 sm:$0xff]   ;;  %vm2014_vm3 = vcmask 1042434  }
  0x55   : > { %6968 = vmatprep.subr.msk.mxu0 %vm630_vm0, %v429_v0  ;;  %v7294_v13 = vld [vmem:[#allocation2] ss:$8 sps:$4 sm:$0xff]   ;;  %1211 = vmatprep.subr.bf16.mxu1 %v7292_v12  ;;  %v7295_v14 = vld [vmem:[#allocation2 + $0x14] ss:$8 sps:$4 sm:$0xff]   ;;  %v7297_v16 = vld [vmem:[#allocation2 + $0x10] ss:$8 sps:$4 sm:$0xff]  }
  0x56   : > { %s11424_s18 = smov (!%p358_p10, %s6619_s18), 127  ;;  %6969 = vmatpush3.msk.msra.mxu0 %vm630_vm0, %v429_v0  ;;  %1212 = vmatpush1.bf16.msra.mxu1 %v7294_v13  ;;  %v7298_v18 = vld [vmem:[#allocation2 + $0x24] ss:$8 sps:$4 sm:$0xff]   ;;  %v7300_v21 = vld [vmem:[#allocation2 + $0x20] ss:$8 sps:$4 sm:$0xff]   ;;  %vm2016_vm4 = vcmask 1043459  }
  0x57   : > { %s6620_s24 = sshll.u32 %s11424_s18, 3  ;;  %1213 = vmatprep.subr.bf16.mxu1 %v7295_v14  ;;  %v7301_v22 = vld [vmem:[#allocation2 + $0x34] ss:$8 sps:$4 sm:$0xff]   ;;  %v7303_v24 = vld [vmem:[#allocation2 + $0x30] ss:$8 sps:$4 sm:$0xff]   ;;  %vm2018_vm5 = vcmask 1044484  }
  0x58   : > { %s7946_s27 = scalar_lea.vmem %s10919_s0, %s6620_s24  ;;  %v7304_v26 = vld [vmem:[#allocation2 + $0x44] ss:$8 sps:$4 sm:$0xff]   ;;  %v7306_v28 = vld [vmem:[#allocation2 + $0x40] ss:$8 sps:$4 sm:$0xff]   ;;  %v7307_v30 = vld [vmem:[#allocation2 + $0x54] ss:$8 sps:$4 sm:$0xff]  }
  0x59   : > { %v365_v1 = vld [vmem:[%s7946_s27] sm:$0xff]  ;;  %v366_v2 = vld [vmem:[%s7946_s27 + $0x8] sm:$0xff]  ;;  %v367_v3 = vld [vmem:[%s7946_s27 + $0x10] sm:$0xff]  ;;  %vm2020_vm6 = vcmask 1045509   ;;  %vm2022_vm7 = vcmask 1046534   ;;  %vm2024_vm8 = vcmask 1047559  }
  0x5a   : > { %6970 = vmatprep.mubr.msk.f32.mxu0 %vm437_vm1, %v365_v1  ;;  %v368_v4 = vld [vmem:[%s7946_s27 + $0x18] sm:$0xff]  ;;  %v369_v5 = vld [vmem:[%s7946_s27 + $0x20] sm:$0xff]  ;;  %v370_v6 = vld [vmem:[%s7946_s27 + $0x28] sm:$0xff]  ;;  %1214 = vmatpush1.bf16.msra.mxu1 %v7297_v16  ;;  %s354_s15 = sand.u32 1, %s7753_s10   ;;  %s6902_s21 = sshll.u32 %s7843_s13, 9 }
  0x5b   : > { %6971 = vmatmul.mubr.msk.f32.vlgmr.msra.gmra.mrb[0].mxu0 %vm437_vm1, %v366_v2  ;;  %v371_v7 = vld [vmem:[%s7946_s27 + $0x30] sm:$0xff]  ;;  %v372_v8 = vld [vmem:[%s7946_s27 + $0x38] sm:$0xff]  ;;  %v373_v9 = vld [vmem:[%s7946_s27 + $0x40] sm:$0xff]  ;;  %1215 = vmatprep.subr.bf16.mxu1 %v7298_v18  ;;  %v7767_v2 = vmov 0   ;;  %s6618_s18 = sshll.u32 %s354_s15, 5  ;;  %s10867_s28 = scalar_lea.hbm %s10928_s9, %s6902_s21 }
  0x5c   : > { %6973 = vmatprep.mubr.msk.f32.mxu0 %vm437_vm1, %v367_v3  ;;  %v374_v10 = vld [vmem:[%s7946_s27 + $0x48] sm:$0xff]  ;;  %v375_v11 = vld [vmem:[%s7946_s27 + $0x50] sm:$0xff]  ;;  %v376_v15 = vld [vmem:[%s7946_s27 + $0x58] sm:$0xff]  ;;  %1243 = vmatprep.mubr.bf16.mxu1 %v7767_v2  ;;  %s10823_s24 = scalar_lea.vmem [#allocation7], %s6618_s18  ;;  %s10878_s29 = scalar_lea.sflag [#allocation4], %s354_s15 }
  0x5d   : > { %v377_v17 = vld [vmem:[%s7946_s27 + $0x60] sm:$0xff]  ;;  %v378_v19 = vld [vmem:[%s7946_s27 + $0x68] sm:$0xff]  ;;  %v379_v20 = vld [vmem:[%s7946_s27 + $0x70] sm:$0xff]  ;;  %s6526_s26 = sshll.u32 %s10823_s24, 4  ;;  %p11416_p1 = scmp.ne.s32.totalorder %s11017_s19, 0  ;;  %s10869_s26 = int_to_ptr.vmem [resolvable:$true] %s6526_s26 }
  0x5e   : > { %v380_v23 = vld [vmem:[%s7946_s27 + $0x78] sm:$0xff]  ;;  %v381_v25 = vld [vmem:[%s7946_s27 + $0x80] sm:$0xff]  ;;  %1216 = vmatpush1.bf16.msra.mxu1 %v7300_v21  ;;  %v382_v27 = vld [vmem:[%s7946_s27 + $0x88] sm:$0xff]  ;;  %s7691_s14 = scalar_lea.vmem %s10869_s26, 512  ;;  %s7769_s16 = smov [#allocation7]  }
  0x5f   : > { %6974 = vmatmul.mubr.msk.f32.gmra.mrb[2].mxu0 %vm437_vm1, %v368_v4  ;;  %1217 = vmatprep.subr.bf16.mxu1 %v7301_v22  ;;  %v383_v29 = vld [vmem:[%s7946_s27 + $0x90] sm:$0xff]  ;;  %v384_v31 = vld [vmem:[%s7946_s27 + $0x98] sm:$0xff]  ;;  %v385_v33 = vld [vmem:[%s7946_s27 + $0xa0] sm:$0xff]  ;;  %p7692_p12 = scmp.ne.s32.totalorder %s10869_s26, %s7691_s14  ;;  %s7695_s17 = sshll.u32 %s7769_s16, 4  ;;  %s7696_s17 = int_to_ptr.vmem [resolvable:$false] %s7695_s17 }
  0x60   : > { %6976 = vmatprep.mubr.msk.f32.mxu0 %vm437_vm1, %v369_v5  ;;  %v7309_v32 = vld [vmem:[#allocation2 + $0x50] ss:$8 sps:$4 sm:$0xff]   ;;  %v386_v34 = vld [vmem:[%s7946_s27 + $0xa8] sm:$0xff]  ;;  %v389_v37 = vld [vmem:[%s7946_s27 + $0xc0] sm:$0xff]  ;;  %s7697_s22 = scalar_lea.vmem %s7696_s17, 1024  ;;  %p7698_p4 = scmp.lt.s32.totalorder %s10869_s26, %s7696_s17 }
  0x61   : > { %v387_v35 = vld [vmem:[%s7946_s27 + $0xb0] sm:$0xff]  ;;  %v388_v36 = vld [vmem:[%s7946_s27 + $0xb8] sm:$0xff]  ;;  %v390_v38 = vld [vmem:[%s7946_s27 + $0xc8] sm:$0xff]  ;;  %p7693_p2 = pnand %p7692_p12, %p11416_p1  ;;  %p7699_p7 = scmp.lt.s32.totalorder %s7697_s22, %s7691_s14 }
  0x62   : > { %1218 = vmatpush1.bf16.msra.mxu1 %v7303_v24  ;;  %v391_v39 = vld [vmem:[%s7946_s27 + $0xd0] sm:$0xff]  ;;  %v392_v40 = vld [vmem:[%s7946_s27 + $0xd8] sm:$0xff]  ;;  %v393_v41 = vld [vmem:[%s7946_s27 + $0xe0] sm:$0xff] }
  0x63   : > { %6977 = vmatmul.mubr.msk.f32.gmra.mrb[4].mxu0 %vm437_vm1, %v370_v6  ;;  %1219 = vmatprep.subr.bf16.mxu1 %v7304_v26  ;;  %v394_v42 = vld [vmem:[%s7946_s27 + $0xe8] sm:$0xff]  ;;  %v395_v43 = vld [vmem:[%s7946_s27 + $0xf0] sm:$0xff]  ;;  %v396_v44 = vld [vmem:[%s7946_s27 + $0xf8] sm:$0xff]  ;;  %p7694_p3 = pneg %p7693_p2  ;;  %p7700_p8 = por %p7699_p7, %p7698_p4 }
  0x64   : > { %6979 = vmatprep.mubr.msk.f32.mxu0 %vm437_vm1, %v371_v7  ;;  %v397_v45 = vld [vmem:[%s7946_s27 + $0x100] sm:$0xff]  ;;  %v398_v46 = vld [vmem:[%s7946_s27 + $0x108] sm:$0xff]  ;;  %v399_v47 = vld [vmem:[%s7946_s27 + $0x110] sm:$0xff] }
  0x65   : > { %v400_v48 = vld [vmem:[%s7946_s27 + $0x118] sm:$0xff]  ;;  %v401_v49 = vld [vmem:[%s7946_s27 + $0x120] sm:$0xff]  ;;  %v402_v50 = vld [vmem:[%s7946_s27 + $0x128] sm:$0xff]  ;;  %p7701_p11 = pnand %p7700_p8, %p7694_p3 }
  0x66   : > { %1220 = vmatpush1.bf16.msra.mxu1 %v7306_v28  ;;  %v403_v51 = vld [vmem:[%s7946_s27 + $0x130] sm:$0xff]  ;;  %v404_v52 = vld [vmem:[%s7946_s27 + $0x138] sm:$0xff]  ;;  %v405_v53 = vld [vmem:[%s7946_s27 + $0x140] sm:$0xff] }
  0x67   : > { %6980 = vmatmul.mubr.msk.f32.gmra.mrb[6].mxu0 %vm437_vm1, %v372_v8  ;;  %1221 = vmatprep.subr.bf16.mxu1 %v7307_v30  ;;  %v406_v54 = vld [vmem:[%s7946_s27 + $0x148] sm:$0xff]  ;;  %v407_v55 = vld [vmem:[%s7946_s27 + $0x150] sm:$0xff]  ;;  %v408_v56 = vld [vmem:[%s7946_s27 + $0x158] sm:$0xff] }
  0x68   : > { %6982 = vmatprep.mubr.msk.f32.mxu0 %vm437_vm1, %v373_v9  ;;  %v409_v57 = vld [vmem:[%s7946_s27 + $0x160] sm:$0xff]  ;;  %v410_v60 = vld [vmem:[%s7946_s27 + $0x168] sm:$0xff]  ;;  %v7313_v61 = vld [vmem:[#allocation2 + $0x74] ss:$8 sps:$4 sm:$0xff]  }
  0x69   : > { %v7310_v58 = vld [vmem:[#allocation2 + $0x64] ss:$8 sps:$4 sm:$0xff]   ;;  %v7312_v59 = vld [vmem:[#allocation2 + $0x60] ss:$8 sps:$4 sm:$0xff]   ;;  %v411_v62 = vld [vmem:[%s7946_s27 + $0x170] sm:$0xff] }
  0x6a   : > { %1222 = vmatpush1.bf16.msra.mxu1 %v7309_v32  ;;  %v7315_v63 = vld [vmem:[#allocation2 + $0x70] ss:$8 sps:$4 sm:$0xff]   ;;  %v413_v1 = vld [vmem:[%s7946_s27 + $0x180] sm:$0xff]  ;;  %v414_v3 = vld [vmem:[%s7946_s27 + $0x188] sm:$0xff] }
  0x6b   : > { %6983 = vmatmul.mubr.msk.f32.gmra.mrb[8].mxu0 %vm437_vm1, %v374_v10  ;;  %1223 = vmatprep.subr.bf16.mxu1 %v7310_v58  ;;  %v412_v0 = vld [vmem:[%s7946_s27 + $0x178] sm:$0xff]  ;;  %v415_v4 = vld [vmem:[%s7946_s27 + $0x190] sm:$0xff]  ;;  %v417_v6 = vld [vmem:[%s7946_s27 + $0x1a0] sm:$0xff] }
  0x6c   : > { %6985 = vmatprep.mubr.msk.f32.mxu0 %vm437_vm1, %v375_v11  ;;  %v416_v5 = vld [vmem:[%s7946_s27 + $0x198] sm:$0xff]  ;;  %v418_v7 = vld [vmem:[%s7946_s27 + $0x1a8] sm:$0xff]  ;;  %v419_v8 = vld [vmem:[%s7946_s27 + $0x1b0] sm:$0xff] }
  0x6d   : > { %v420_v9 = vld [vmem:[%s7946_s27 + $0x1b8] sm:$0xff]  ;;  %v421_v10 = vld [vmem:[%s7946_s27 + $0x1c0] sm:$0xff]  ;;  %v422_v11 = vld [vmem:[%s7946_s27 + $0x1c8] sm:$0xff] }
  0x6e   : > { %1224 = vmatpush1.bf16.msra.mxu1 %v7312_v59  ;;  %v423_v12 = vld [vmem:[%s7946_s27 + $0x1d0] sm:$0xff]  ;;  %v424_v13 = vld [vmem:[%s7946_s27 + $0x1d8] sm:$0xff]  ;;  %v425_v14 = vld [vmem:[%s7946_s27 + $0x1e0] sm:$0xff] }
  0x6f   : > { %6986 = vmatmul.mubr.msk.f32.gmra.mrb[10].mxu0 %vm437_vm1, %v376_v15  ;;  %1225 = vmatprep.subr.bf16.mxu1 %v7313_v61  ;;  %v426_v15 = vld [vmem:[%s7946_s27 + $0x1e8] sm:$0xff]  ;;  %v427_v16 = vld [vmem:[%s7946_s27 + $0x1f0] sm:$0xff]  ;;  %v8083_v18 = vld [vmem:[%s10921_s2] ss:$0 sm:$0xff] }
  0x70   : > { %6988 = vmatprep.mubr.msk.f32.mxu0 %vm437_vm1, %v377_v17  ;;  %v428_v17 = vld [vmem:[%s7946_s27 + $0x1f8] sm:$0xff] }
  0x72   : > { %1226 = vmatpush1.bf16.msra.mxu1 %v7315_v63 }
  0x73   : > { %6989 = vmatmul.mubr.msk.f32.gmra.mrb[12].mxu0 %vm437_vm1, %v378_v19 }
  0x74   : > { %6991 = vmatprep.mubr.msk.f32.mxu0 %vm437_vm1, %v379_v20 }
  0x77   : > { %6992 = vmatmul.mubr.msk.f32.gmra.mrb[14].mxu0 %vm437_vm1, %v380_v23 }
  0x78   : > { %6994 = vmatprep.mubr.msk.f32.mxu0 %vm437_vm1, %v381_v25 }
  0x7b   : > { %6995 = vmatmul.mubr.msk.f32.gmra.mrb[16].mxu0 %vm437_vm1, %v382_v27 }
  0x7c   : > { %6997 = vmatprep.mubr.msk.f32.mxu0 %vm437_vm1, %v383_v29 }
  0x7f   : > { %6998 = vmatmul.mubr.msk.f32.gmra.mrb[18].mxu0 %vm437_vm1, %v384_v31 }
  0x80   : > { %7000 = vmatprep.mubr.msk.f32.mxu0 %vm437_vm1, %v385_v33 }
  0x83   : > { %7001 = vmatmul.mubr.msk.f32.gmra.mrb[20].mxu0 %vm437_vm1, %v386_v34 }
  0x84   : > { %7003 = vmatprep.mubr.msk.f32.mxu0 %vm437_vm1, %v387_v35 }
  0x87   : > { %7004 = vmatmul.mubr.msk.f32.gmra.mrb[22].mxu0 %vm437_vm1, %v388_v36 }
  0x88   : > { %7006 = vmatprep.mubr.msk.f32.mxu0 %vm437_vm1, %v389_v37 }
  0x8b   : > { %7007 = vmatmul.mubr.msk.f32.gmra.mrb[24].mxu0 %vm437_vm1, %v390_v38 }
  0x8c   : > { %7009 = vmatprep.mubr.msk.f32.mxu0 %vm437_vm1, %v391_v39 }
  0x8f   : > { %7010 = vmatmul.mubr.msk.f32.gmra.mrb[26].mxu0 %vm437_vm1, %v392_v40 }
  0x90   : > { %7012 = vmatprep.mubr.msk.f32.mxu0 %vm437_vm1, %v393_v41 }
  0x93   : > { %7013 = vmatmul.mubr.msk.f32.gmra.mrb[28].mxu0 %vm437_vm1, %v394_v42 }
  0x94   : > { %7015 = vmatprep.mubr.msk.f32.mxu0 %vm437_vm1, %v395_v43 }
  0x97   : > { %7016 = vmatmul.mubr.msk.f32.gmra.mrb[30].mxu0 %vm437_vm1, %v396_v44 }
  0x98   : > { %7018 = vmatprep.mubr.msk.f32.mxu0 %vm437_vm1, %v397_v45 }
  0x9b   : > { %7019 = vmatmul.mubr.msk.f32.gmra.mrb[32].mxu0 %vm437_vm1, %v398_v46 }
  0x9c   : > { %7021 = vmatprep.mubr.msk.f32.mxu0 %vm437_vm1, %v399_v47 }
  0x9f   : > { %7022 = vmatmul.mubr.msk.f32.gmra.mrb[34].mxu0 %vm437_vm1, %v400_v48 }
  0xa0   : > { %7024 = vmatprep.mubr.msk.f32.mxu0 %vm437_vm1, %v401_v49 }
  0xa3   : > { %7025 = vmatmul.mubr.msk.f32.gmra.mrb[36].mxu0 %vm437_vm1, %v402_v50 }
  0xa4   : > { %7027 = vmatprep.mubr.msk.f32.mxu0 %vm437_vm1, %v403_v51 }
  0xa7   : > { %7028 = vmatmul.mubr.msk.f32.gmra.mrb[38].mxu0 %vm437_vm1, %v404_v52 }
  0xa8   : > { %7030 = vmatprep.mubr.msk.f32.mxu0 %vm437_vm1, %v405_v53 }
  0xab   : > { %7031 = vmatmul.mubr.msk.f32.gmra.mrb[40].mxu0 %vm437_vm1, %v406_v54 }
  0xac   : > { %7033 = vmatprep.mubr.msk.f32.mxu0 %vm437_vm1, %v407_v55 }
  0xaf   : > { %7034 = vmatmul.mubr.msk.f32.gmra.mrb[42].mxu0 %vm437_vm1, %v408_v56 }
  0xb0   : > { %7036 = vmatprep.mubr.msk.f32.mxu0 %vm437_vm1, %v409_v57 }
  0xb3   : > { %7037 = vmatmul.mubr.msk.f32.gmra.mrb[44].mxu0 %vm437_vm1, %v410_v60 }
  0xb4   : > { %7039 = vmatprep.mubr.msk.f32.mxu0 %vm437_vm1, %v411_v62 }
  0xb7   : > { %7040 = vmatmul.mubr.msk.f32.gmra.mrb[46].mxu0 %vm437_vm1, %v412_v0 }
  0xb8   : > { %7042 = vmatprep.mubr.msk.f32.mxu0 %vm437_vm1, %v413_v1 }
  0xbb   : > { %7043 = vmatmul.mubr.msk.f32.gmra.mrb[48].mxu0 %vm437_vm1, %v414_v3 }
  0xbc   : > { %7045 = vmatprep.mubr.msk.f32.mxu0 %vm437_vm1, %v415_v4 }
  0xbf   : > { %7046 = vmatmul.mubr.msk.f32.gmra.mrb[50].mxu0 %vm437_vm1, %v416_v5 }
  0xc0   : > { %7048 = vmatprep.mubr.msk.f32.mxu0 %vm437_vm1, %v417_v6 }
  0xc3   : > { %7049 = vmatmul.mubr.msk.f32.gmra.mrb[52].mxu0 %vm437_vm1, %v418_v7 }
  0xc4   : > { %7051 = vmatprep.mubr.msk.f32.mxu0 %vm437_vm1, %v419_v8 }
  0xc7   : > { %7052 = vmatmul.mubr.msk.f32.gmra.mrb[54].mxu0 %vm437_vm1, %v420_v9 }
  0xc8   : > { %7054 = vmatprep.mubr.msk.f32.mxu0 %vm437_vm1, %v421_v10 }
  0xcb   : > { %7055 = vmatmul.mubr.msk.f32.gmra.mrb[56].mxu0 %vm437_vm1, %v422_v11 }
  0xcc   : > { %7057 = vmatprep.mubr.msk.f32.mxu0 %vm437_vm1, %v423_v12 }
  0xcf   : > { %7058 = vmatmul.mubr.msk.f32.gmra.mrb[58].mxu0 %vm437_vm1, %v424_v13 }
  0xd0   : > { %7060 = vmatprep.mubr.msk.f32.mxu0 %vm437_vm1, %v425_v14 }
  0xd3   : > { %7061 = vmatmul.mubr.msk.f32.gmra.mrb[60].mxu0 %vm437_vm1, %v426_v15 }
  0xd4   : > { %7063 = vmatprep.mubr.msk.f32.mxu0 %vm437_vm1, %v427_v16 }
  0xd7   : > { %7064 = vmatmul.mubr.msk.f32.gmra.mrb[62].mxu0 %vm437_vm1, %v428_v17 }
 0x12e   : > { %v6972_v19 = vpop.f32.mrb[0].mxu0 }
 0x12f   : > { %v706_v20 = vadd.f32 %v6972_v19, %v8083_v18  ;;  %v700_v21 = vpop.f32.mrb[1].mxu0 }
 0x130   : > { %v701_v22 = vadd.f32 %v8083_v18, %v700_v21 }
 0x131   : > { %v1020_v23 = vmax.f32 %v706_v20, 0.0 }
 0x132   : > { %v1019_v24 = vmax.f32 %v701_v22, 0.0  ;;  %v6975_v25 = vpop.f32.mrb[2].mxu0 }
 0x133   : > { %v716_v26 = vadd.f32 %v6975_v25, %v8083_v18  ;;  %v710_v27 = vpop.f32.mrb[3].mxu0 }
 0x134   : > { %v711_v28 = vadd.f32 %v8083_v18, %v710_v27  ;;  %v1083_v29 = vpack.c.bf16 %v1020_v23, %v1019_v24 }
 0x135   : > { %v1022_v30 = vmax.f32 %v716_v26, 0.0 }
 0x136   : > { %v1021_v31 = vmax.f32 %v711_v28, 0.0  ;;  %1244 = vmatmul.mubr.bf16.vlgmr.msra.gmra.mrb[0].mxu1 %v1083_v29  ;;  %v6978_v32 = vpop.f32.mrb[4].mxu0 }
 0x137   : > { %v726_v33 = vadd.f32 %v6978_v32, %v8083_v18  ;;  %1253 = vmatprep.mubr.bf16.mxu1 %v7767_v2  ;;  %v720_v34 = vpop.f32.mrb[5].mxu0 }
 0x138   : > { %v721_v35 = vadd.f32 %v8083_v18, %v720_v34  ;;  %v1084_v36 = vpack.c.bf16 %v1022_v30, %v1021_v31 }
 0x139   : > { %v1024_v37 = vmax.f32 %v726_v33, 0.0 }
 0x13a   : > { %v1023_v38 = vmax.f32 %v721_v35, 0.0  ;;  %v6981_v39 = vpop.f32.mrb[6].mxu0 }
 0x13b   : > { %v736_v40 = vadd.f32 %v6981_v39, %v8083_v18  ;;  %v730_v41 = vpop.f32.mrb[7].mxu0 }
 0x13c   : > { %v731_v42 = vadd.f32 %v8083_v18, %v730_v41  ;;  %v1085_v43 = vpack.c.bf16 %v1024_v37, %v1023_v38 }
 0x13d   : > { %v1026_v44 = vmax.f32 %v736_v40, 0.0 }
 0x13e   : > { %1254 = vmatmul.mubr.bf16.gmra.mrb[4].mxu1 %v1084_v36  ;;  %v1025_v45 = vmax.f32 %v731_v42, 0.0  ;;  %v6984_v46 = vpop.f32.mrb[8].mxu0 }
 0x13f   : > { %1263 = vmatprep.mubr.bf16.mxu1 %v7767_v2  ;;  %v746_v47 = vadd.f32 %v6984_v46, %v8083_v18  ;;  %v740_v48 = vpop.f32.mrb[9].mxu0 }
 0x140   : > { %v741_v49 = vadd.f32 %v8083_v18, %v740_v48  ;;  %v1086_v50 = vpack.c.bf16 %v1026_v44, %v1025_v45 }
 0x141   : > { %v1028_v51 = vmax.f32 %v746_v47, 0.0 }
 0x142   : > { %v1027_v52 = vmax.f32 %v741_v49, 0.0  ;;  %v6987_v53 = vpop.f32.mrb[10].mxu0 }
 0x143   : > { %v756_v54 = vadd.f32 %v6987_v53, %v8083_v18  ;;  %v750_v55 = vpop.f32.mrb[11].mxu0 }
 0x144   : > { %v751_v56 = vadd.f32 %v8083_v18, %v750_v55  ;;  %v1087_v57 = vpack.c.bf16 %v1028_v51, %v1027_v52 }
 0x145   : > { %v1030_v58 = vmax.f32 %v756_v54, 0.0 }
 0x146   : > { %1264 = vmatmul.mubr.bf16.gmra.mrb[8].mxu1 %v1085_v43  ;;  %v1029_v59 = vmax.f32 %v751_v56, 0.0  ;;  %v6990_v60 = vpop.f32.mrb[12].mxu0 }
 0x147   : > { %1273 = vmatprep.mubr.bf16.mxu1 %v7767_v2  ;;  %v766_v61 = vadd.f32 %v6990_v60, %v8083_v18  ;;  %v760_v62 = vpop.f32.mrb[13].mxu0 }
 0x148   : > { %v761_v63 = vadd.f32 %v8083_v18, %v760_v62  ;;  %v1088_v0 = vpack.c.bf16 %v1030_v58, %v1029_v59 }
 0x149   : > { %v1032_v1 = vmax.f32 %v766_v61, 0.0 }
 0x14a   : > { %v1031_v3 = vmax.f32 %v761_v63, 0.0  ;;  %v6993_v4 = vpop.f32.mrb[14].mxu0 }
 0x14b   : > { %v776_v5 = vadd.f32 %v6993_v4, %v8083_v18  ;;  %v770_v6 = vpop.f32.mrb[15].mxu0 }
 0x14c   : > { %v771_v7 = vadd.f32 %v8083_v18, %v770_v6  ;;  %v1089_v8 = vpack.c.bf16 %v1032_v1, %v1031_v3 }
 0x14d   : > { %v1034_v9 = vmax.f32 %v776_v5, 0.0 }
 0x14e   : > { %1274 = vmatmul.mubr.bf16.gmra.mrb[12].mxu1 %v1086_v50  ;;  %v1033_v10 = vmax.f32 %v771_v7, 0.0  ;;  %v6996_v11 = vpop.f32.mrb[16].mxu0 }
 0x14f   : > { %1283 = vmatprep.mubr.bf16.mxu1 %v7767_v2  ;;  %v786_v12 = vadd.f32 %v6996_v11, %v8083_v18  ;;  %v780_v13 = vpop.f32.mrb[17].mxu0 }
 0x150   : > { %v781_v14 = vadd.f32 %v8083_v18, %v780_v13  ;;  %v1090_v15 = vpack.c.bf16 %v1034_v9, %v1033_v10 }
 0x151   : > { %v1036_v16 = vmax.f32 %v786_v12, 0.0 }
 0x152   : > { %v1035_v17 = vmax.f32 %v781_v14, 0.0  ;;  %v6999_v19 = vpop.f32.mrb[18].mxu0 }
 0x153   : > { %v796_v20 = vadd.f32 %v6999_v19, %v8083_v18  ;;  %v790_v21 = vpop.f32.mrb[19].mxu0 }
 0x154   : > { %v791_v22 = vadd.f32 %v8083_v18, %v790_v21  ;;  %v8109_v23 = vpack.c.bf16 %v1036_v16, %v1035_v17  ;;  %v7318_v17 = vld [vmem:[%s10924_s5 + $0xc] ss:$16 sps:$4 sm:$0xff]  }
 0x155   : > { %v1038_v24 = vmax.f32 %v796_v20, 0.0  ;;  %v7316_v20 = vld [vmem:[%s10924_s5 + $0x8] ss:$16 sps:$4 sm:$0xff]   ;;  %3258 = vmatprep.subr.bf16.mxu1 %v7318_v17 }
 0x156   : > { %1284 = vmatmul.mubr.bf16.gmra.mrb[16].mxu1 %v1087_v57  ;;  %v1037_v25 = vmax.f32 %v791_v22, 0.0  ;;  %v7002_v26 = vpop.f32.mrb[20].mxu0  ;;  %v7334_v17 = vld [vmem:[%s10924_s5 + $0xc8] ss:$16 sps:$4 sm:$0xff]  }
 0x157   : > { %1293 = vmatprep.mubr.bf16.mxu1 %v7767_v2  ;;  %v806_v27 = vadd.f32 %v7002_v26, %v8083_v18  ;;  %v800_v28 = vpop.f32.mrb[21].mxu0  ;;  %3259 = vmatpush1.bf16.msra.mxu1 %v7316_v20 }
 0x158   : > { %v801_v29 = vadd.f32 %v8083_v18, %v800_v28  ;;  %v8114_v30 = vpack.c.bf16 %v1038_v24, %v1037_v25  ;;  %v7321_v24 = vld [vmem:[%s10924_s5 + $0x2c] ss:$16 sps:$4 sm:$0xff]  }
 0x159   : > { %v1040_v31 = vmax.f32 %v806_v27, 0.0  ;;  %v7319_v27 = vld [vmem:[%s10924_s5 + $0x28] ss:$16 sps:$4 sm:$0xff]   ;;  %3260 = vmatprep.subr.bf16.mxu1 %v7321_v24 }
 0x15a   : > { %v1039_v32 = vmax.f32 %v801_v29, 0.0  ;;  %v7005_v33 = vpop.f32.mrb[22].mxu0 }
 0x15b   : > { %v816_v34 = vadd.f32 %v7005_v33, %v8083_v18  ;;  %v810_v35 = vpop.f32.mrb[23].mxu0  ;;  %3261 = vmatpush1.bf16.msra.mxu1 %v7319_v27 }
 0x15c   : > { %v811_v36 = vadd.f32 %v8083_v18, %v810_v35  ;;  %v8118_v37 = vpack.c.bf16 %v1040_v31, %v1039_v32 }
 0x15d   : > { %v1042_v38 = vmax.f32 %v816_v34, 0.0 }
 0x15e   : > { %1294 = vmatmul.mubr.bf16.gmra.mrb[20].mxu1 %v1088_v0  ;;  %v1041_v39 = vmax.f32 %v811_v36, 0.0  ;;  %v7008_v40 = vpop.f32.mrb[24].mxu0 }
 0x15f   : > { %1303 = vmatprep.mubr.bf16.mxu1 %v7767_v2  ;;  %v826_v41 = vadd.f32 %v7008_v40, %v8083_v18  ;;  %v820_v42 = vpop.f32.mrb[25].mxu0  ;;  %v7322_v40 = vld [vmem:[%s10924_s5 + $0x48] ss:$16 sps:$4 sm:$0xff]  }
 0x160   : > { %v821_v43 = vadd.f32 %v8083_v18, %v820_v42  ;;  %v8123_v44 = vpack.c.bf16 %v1042_v38, %v1041_v39  ;;  %v7324_v38 = vld [vmem:[%s10924_s5 + $0x4c] ss:$16 sps:$4 sm:$0xff]  }
 0x161   : > { %v1044_v45 = vmax.f32 %v826_v41, 0.0  ;;  %3262 = vmatprep.subr.bf16.mxu1 %v7324_v38 }
 0x162   : > { %v1043_v46 = vmax.f32 %v821_v43, 0.0  ;;  %v7011_v47 = vpop.f32.mrb[26].mxu0  ;;  %v7327_v43 = vld [vmem:[%s10924_s5 + $0x6c] ss:$16 sps:$4 sm:$0xff]   ;;  %3263 = vmatpush1.bf16.msra.mxu1 %v7322_v40 }
 0x163   : > { %v836_v48 = vadd.f32 %v7011_v47, %v8083_v18  ;;  %v830_v49 = vpop.f32.mrb[27].mxu0  ;;  %v7325_v47 = vld [vmem:[%s10924_s5 + $0x68] ss:$16 sps:$4 sm:$0xff]   ;;  %3264 = vmatprep.subr.bf16.mxu1 %v7327_v43 }
 0x164   : > { %v831_v50 = vadd.f32 %v8083_v18, %v830_v49  ;;  %v8127_v51 = vpack.c.bf16 %v1044_v45, %v1043_v46 }
 0x165   : > { %v1046_v52 = vmax.f32 %v836_v48, 0.0 }
 0x166   : > { %1304 = vmatmul.mubr.bf16.gmra.mrb[24].mxu1 %v1089_v8  ;;  %v1045_v53 = vmax.f32 %v831_v50, 0.0  ;;  %v7014_v54 = vpop.f32.mrb[28].mxu0 }
 0x167   : > { %1313 = vmatprep.mubr.bf16.mxu1 %v7767_v2  ;;  %v846_v55 = vadd.f32 %v7014_v54, %v8083_v18  ;;  %v840_v56 = vpop.f32.mrb[29].mxu0  ;;  %3265 = vmatpush1.bf16.msra.mxu1 %v7325_v47  ;;  %v7345_v47 = vld [vmem:[%s10924_s5 + $0x12c] ss:$16 sps:$4 sm:$0xff]  }
 0x168   : > { %v841_v57 = vadd.f32 %v8083_v18, %v840_v56  ;;  %v8132_v58 = vpack.c.bf16 %v1046_v52, %v1045_v53 }
 0x169   : > { %v1048_v59 = vmax.f32 %v846_v55, 0.0 }
 0x16a   : > { %v1047_v60 = vmax.f32 %v841_v57, 0.0  ;;  %v7017_v61 = vpop.f32.mrb[30].mxu0  ;;  %v7330_v57 = vld [vmem:[%s10924_s5 + $0x8c] ss:$16 sps:$4 sm:$0xff]  }
 0x16b   : > { %v856_v62 = vadd.f32 %v7017_v61, %v8083_v18  ;;  %v850_v63 = vpop.f32.mrb[31].mxu0  ;;  %3266 = vmatprep.subr.bf16.mxu1 %v7330_v57  ;;  %v7348_v57 = vld [vmem:[%s10924_s5 + $0x14c] ss:$16 sps:$4 sm:$0xff]  }
 0x16c   : > { %v851_v0 = vadd.f32 %v8083_v18, %v850_v63  ;;  %v8136_v1 = vpack.c.bf16 %v1048_v59, %v1047_v60  ;;  %v7328_v60 = vld [vmem:[%s10924_s5 + $0x88] ss:$16 sps:$4 sm:$0xff]  }
 0x16d   : > { %v1050_v3 = vmax.f32 %v856_v62, 0.0  ;;  %3267 = vmatpush1.bf16.msra.mxu1 %v7328_v60  ;;  %v7346_v60 = vld [vmem:[%s10924_s5 + $0x148] ss:$16 sps:$4 sm:$0xff]  }
 0x16e   : > { %1314 = vmatmul.mubr.bf16.gmra.mrb[28].mxu1 %v1090_v15  ;;  %v1049_v4 = vmax.f32 %v851_v0, 0.0  ;;  %v7020_v5 = vpop.f32.mrb[32].mxu0 }
 0x16f   : > { %1323 = vmatprep.mubr.bf16.mxu1 %v7767_v2  ;;  %v866_v6 = vadd.f32 %v7020_v5, %v8083_v18  ;;  %v860_v7 = vpop.f32.mrb[33].mxu0  ;;  %v7333_v5 = vld [vmem:[%s10924_s5 + $0xac] ss:$16 sps:$4 sm:$0xff]  }
 0x170   : > { %v861_v8 = vadd.f32 %v8083_v18, %v860_v7  ;;  %v8141_v9 = vpack.c.bf16 %v1050_v3, %v1049_v4  ;;  %3268 = vmatprep.subr.bf16.mxu1 %v7333_v5 }
 0x171   : > { %v1052_v10 = vmax.f32 %v866_v6, 0.0 }
 0x172   : > { %v1051_v11 = vmax.f32 %v861_v8, 0.0  ;;  %v7023_v12 = vpop.f32.mrb[34].mxu0 }
 0x173   : > { %v876_v13 = vadd.f32 %v7023_v12, %v8083_v18  ;;  %v870_v14 = vpop.f32.mrb[35].mxu0 }
 0x174   : > { %v871_v16 = vadd.f32 %v8083_v18, %v870_v14  ;;  %v8145_v15 = vpack.c.bf16 %v1052_v10, %v1051_v11  ;;  %v7336_v14 = vld [vmem:[%s10924_s5 + $0xcc] ss:$16 sps:$4 sm:$0xff]  }
 0x175   : > { %v1054_v19 = vmax.f32 %v876_v13, 0.0 }
 0x176   : > { %1324 = vmatmul.mubr.bf16.gmra.mrb[32].mxu1 %v8109_v23  ;;  %v1053_v21 = vmax.f32 %v871_v16, 0.0  ;;  %v7026_v22 = vpop.f32.mrb[36].mxu0 }
 0x177   : > { %1333 = vmatprep.mubr.bf16.mxu1 %v7767_v2  ;;  %v886_v25 = vadd.f32 %v7026_v22, %v8083_v18  ;;  %v880_v26 = vpop.f32.mrb[37].mxu0 }
 0x178   : > { %v881_v28 = vadd.f32 %v8083_v18, %v880_v26  ;;  %v8163_v23 = vpack.c.bf16 %v1054_v19, %v1053_v21  ;;  %v7339_v26 = vld [vmem:[%s10924_s5 + $0xec] ss:$16 sps:$4 sm:$0xff]  }
 0x179   : > { %v1056_v29 = vmax.f32 %v886_v25, 0.0 }
 0x17a   : > { %v1055_v31 = vmax.f32 %v881_v28, 0.0  ;;  %v7029_v32 = vpop.f32.mrb[38].mxu0 }
 0x17b   : > { %v896_v33 = vadd.f32 %v7029_v32, %v8083_v18  ;;  %v890_v34 = vpop.f32.mrb[39].mxu0 }
 0x17c   : > { %v891_v35 = vadd.f32 %v8083_v18, %v890_v34  ;;  %v8167_v36 = vpack.c.bf16 %v1056_v29, %v1055_v31 }
 0x17d   : > { %v1058_v39 = vmax.f32 %v896_v33, 0.0 }
 0x17e   : > { %1334 = vmatmul.mubr.bf16.gmra.mrb[36].mxu1 %v8114_v30  ;;  %v1057_v41 = vmax.f32 %v891_v35, 0.0  ;;  %v7032_v42 = vpop.f32.mrb[40].mxu0  ;;  %v7342_v35 = vld [vmem:[%s10924_s5 + $0x10c] ss:$16 sps:$4 sm:$0xff]  }
 0x17f   : > { %1343 = vmatprep.mubr.bf16.mxu1 %v7767_v2  ;;  %v906_v45 = vadd.f32 %v7032_v42, %v8083_v18  ;;  %v900_v46 = vpop.f32.mrb[41].mxu0 }
 0x180   : > { %v901_v48 = vadd.f32 %v8083_v18, %v900_v46  ;;  %v8185_v30 = vpack.c.bf16 %v1058_v39, %v1057_v41  ;;  %v7340_v39 = vld [vmem:[%s10924_s5 + $0x108] ss:$16 sps:$4 sm:$0xff]  }
 0x181   : > { %v1060_v49 = vmax.f32 %v906_v45, 0.0 }
 0x182   : > { %v1059_v50 = vmax.f32 %v901_v48, 0.0  ;;  %v7035_v52 = vpop.f32.mrb[42].mxu0 }
 0x183   : > { %v916_v53 = vadd.f32 %v7035_v52, %v8083_v18  ;;  %v910_v54 = vpop.f32.mrb[43].mxu0 }
 0x184   : > { %v911_v55 = vadd.f32 %v8083_v18, %v910_v54  ;;  %v8189_v56 = vpack.c.bf16 %v1060_v49, %v1059_v50 }
 0x185   : > { %v1062_v59 = vmax.f32 %v916_v53, 0.0 }
 0x186   : > { %1344 = vmatmul.mubr.bf16.gmra.mrb[40].mxu1 %v8118_v37  ;;  %v1061_v61 = vmax.f32 %v911_v55, 0.0  ;;  %v7038_v62 = vpop.f32.mrb[44].mxu0  ;;  %v7331_v37 = vld [vmem:[%s10924_s5 + $0xa8] ss:$16 sps:$4 sm:$0xff]  }
 0x187   : > { %1353 = vmatprep.mubr.bf16.mxu1 %v7767_v2  ;;  %v926_v63 = vadd.f32 %v7038_v62, %v8083_v18  ;;  %v920_v0 = vpop.f32.mrb[45].mxu0  ;;  %3269 = vmatpush1.bf16.msra.mxu1 %v7331_v37 }
 0x188   : > { %v921_v3 = vadd.f32 %v8083_v18, %v920_v0  ;;  %v8201_v4 = vpack.c.bf16 %v1062_v59, %v1061_v61  ;;  %3270 = vmatprep.subr.bf16.mxu1 %v7336_v14 }
 0x189   : > { %v1064_v6 = vmax.f32 %v926_v63, 0.0 }
 0x18a   : > { %v1063_v7 = vmax.f32 %v921_v3, 0.0  ;;  %v7041_v8 = vpop.f32.mrb[46].mxu0 }
 0x18b   : > { %v936_v10 = vadd.f32 %v7041_v8, %v8083_v18  ;;  %v930_v11 = vpop.f32.mrb[47].mxu0  ;;  %3271 = vmatpush1.bf16.msra.mxu1 %v7334_v17 }
 0x18c   : > { %v931_v12 = vadd.f32 %v8083_v18, %v930_v11  ;;  %v8211_v13 = vpack.c.bf16 %v1064_v6, %v1063_v7  ;;  %3272 = vmatprep.subr.bf16.mxu1 %v7339_v26  ;;  %v7351_v6 = vld [vmem:[%s10924_s5 + $0x16c] ss:$16 sps:$4 sm:$0xff]  }
 0x18d   : > { %v1066_v16 = vmax.f32 %v936_v10, 0.0 }
 0x18e   : > { %1354 = vmatmul.mubr.bf16.gmra.mrb[44].mxu1 %v8123_v44  ;;  %v1065_v19 = vmax.f32 %v931_v12, 0.0  ;;  %v7044_v20 = vpop.f32.mrb[48].mxu0  ;;  %v7337_v44 = vld [vmem:[%s10924_s5 + $0xe8] ss:$16 sps:$4 sm:$0xff]  }
 0x18f   : > { %1363 = vmatprep.mubr.bf16.mxu1 %v7767_v2  ;;  %v946_v21 = vadd.f32 %v7044_v20, %v8083_v18  ;;  %v940_v22 = vpop.f32.mrb[49].mxu0  ;;  %3273 = vmatpush1.bf16.msra.mxu1 %v7337_v44  ;;  %v7357_v44 = vld [vmem:[%s10924_s5 + $0x1ac] ss:$16 sps:$4 sm:$0xff]  }
 0x190   : > { %v941_v24 = vadd.f32 %v8083_v18, %v940_v22  ;;  %v8223_v25 = vpack.c.bf16 %v1066_v16, %v1065_v19  ;;  %3274 = vmatprep.subr.bf16.mxu1 %v7342_v35  ;;  %v7354_v16 = vld [vmem:[%s10924_s5 + $0x18c] ss:$16 sps:$4 sm:$0xff]   ;;  %v7352_v19 = vld [vmem:[%s10924_s5 + $0x188] ss:$16 sps:$4 sm:$0xff]  }
 0x191   : > { %v1068_v27 = vmax.f32 %v946_v21, 0.0 }
 0x192   : > { %v1067_v28 = vmax.f32 %v941_v24, 0.0  ;;  %v7047_v29 = vpop.f32.mrb[50].mxu0 }
 0x193   : > { %v956_v31 = vadd.f32 %v7047_v29, %v8083_v18  ;;  %v950_v32 = vpop.f32.mrb[51].mxu0  ;;  %3275 = vmatpush1.bf16.msra.mxu1 %v7340_v39  ;;  %v7360_v39 = vld [vmem:[%s10924_s5 + $0x1cc] ss:$16 sps:$4 sm:$0xff]  }
 0x194   : > { %v951_v33 = vadd.f32 %v8083_v18, %v950_v32  ;;  %v8233_v34 = vpack.c.bf16 %v1068_v27, %v1067_v28  ;;  %3276 = vmatprep.subr.bf16.mxu1 %v7345_v47 }
 0x195   : > { %v1070_v38 = vmax.f32 %v956_v31, 0.0 }
 0x196   : > { %1364 = vmatmul.mubr.bf16.gmra.mrb[48].mxu1 %v8127_v51  ;;  %v1069_v40 = vmax.f32 %v951_v33, 0.0  ;;  %v7050_v41 = vpop.f32.mrb[52].mxu0  ;;  %v7343_v51 = vld [vmem:[%s10924_s5 + $0x128] ss:$16 sps:$4 sm:$0xff]  }
 0x197   : > { %1373 = vmatprep.mubr.bf16.mxu1 %v7767_v2  ;;  %v966_v42 = vadd.f32 %v7050_v41, %v8083_v18  ;;  %v960_v43 = vpop.f32.mrb[53].mxu0  ;;  %3277 = vmatpush1.bf16.msra.mxu1 %v7343_v51  ;;  %v7358_v41 = vld [vmem:[%s10924_s5 + $0x1c8] ss:$16 sps:$4 sm:$0xff]  }
 0x198   : > { %v961_v45 = vadd.f32 %v8083_v18, %v960_v43  ;;  %v8245_v46 = vpack.c.bf16 %v1070_v38, %v1069_v40  ;;  %3278 = vmatprep.subr.bf16.mxu1 %v7348_v57 }
 0x199   : > { %v1072_v48 = vmax.f32 %v966_v42, 0.0 }
 0x19a   : > { %v1071_v49 = vmax.f32 %v961_v45, 0.0  ;;  %v7053_v50 = vpop.f32.mrb[54].mxu0  ;;  %v7361_v45 = vld [vmem:[%s10924_s5 + $0x1e8] ss:$16 sps:$4 sm:$0xff]  }
 0x19b   : > { %v976_v52 = vadd.f32 %v7053_v50, %v8083_v18  ;;  %v970_v53 = vpop.f32.mrb[55].mxu0  ;;  %3279 = vmatpush1.bf16.msra.mxu1 %v7346_v60 }
 0x19c   : > { %v971_v54 = vadd.f32 %v8083_v18, %v970_v53  ;;  %v8255_v55 = vpack.c.bf16 %v1072_v48, %v1071_v49  ;;  %3280 = vmatprep.subr.bf16.mxu1 %v7351_v6 }
 0x19d   : > { %v1074_v59 = vmax.f32 %v976_v52, 0.0 }
 0x19e   : > { %1374 = vmatmul.mubr.bf16.gmra.mrb[52].mxu1 %v8132_v58  ;;  %v1073_v61 = vmax.f32 %v971_v54, 0.0  ;;  %v7056_v62 = vpop.f32.mrb[56].mxu0  ;;  %v7349_v58 = vld [vmem:[%s10924_s5 + $0x168] ss:$16 sps:$4 sm:$0xff]  }
 0x19f   : > { %1383 = vmatprep.mubr.bf16.mxu1 %v7767_v2  ;;  %v986_v63 = vadd.f32 %v7056_v62, %v8083_v18  ;;  %v980_v0 = vpop.f32.mrb[57].mxu0  ;;  %3281 = vmatpush1.bf16.msra.mxu1 %v7349_v58 }
 0x1a0   : > { %v981_v3 = vadd.f32 %v8083_v18, %v980_v0  ;;  %v8267_v5 = vpack.c.bf16 %v1074_v59, %v1073_v61  ;;  %3282 = vmatprep.subr.bf16.mxu1 %v7354_v16 }
 0x1a1   : > { %v1076_v37 = vmax.f32 %v986_v63, 0.0 }
 0x1a2   : > { %v1075_v7 = vmax.f32 %v981_v3, 0.0  ;;  %v7059_v8 = vpop.f32.mrb[58].mxu0 }
 0x1a3   : > { %v996_v10 = vadd.f32 %v7059_v8, %v8083_v18  ;;  %v990_v11 = vpop.f32.mrb[59].mxu0  ;;  %3283 = vmatpush1.bf16.msra.mxu1 %v7352_v19 }
 0x1a4   : > { %v991_v12 = vadd.f32 %v8083_v18, %v990_v11  ;;  %v8277_v14 = vpack.c.bf16 %v1076_v37, %v1075_v7  ;;  %3284 = vmatprep.subr.bf16.mxu1 %v7357_v44 }
 0x1a5   : > { %v1078_v17 = vmax.f32 %v996_v10, 0.0 }
 0x1a6   : > { %1384 = vmatmul.mubr.bf16.gmra.mrb[56].mxu1 %v8136_v1  ;;  %v1077_v20 = vmax.f32 %v991_v12, 0.0  ;;  %v7062_v21 = vpop.f32.mrb[60].mxu0  ;;  %v7355_v1 = vld [vmem:[%s10924_s5 + $0x1a8] ss:$16 sps:$4 sm:$0xff]  }
 0x1a7   : > { %1393 = vmatprep.mubr.bf16.mxu1 %v7767_v2  ;;  %v1006_v22 = vadd.f32 %v7062_v21, %v8083_v18  ;;  %v1000_v24 = vpop.f32.mrb[61].mxu0  ;;  %3285 = vmatpush1.bf16.msra.mxu1 %v7355_v1 }
 0x1a8   : > { %v1001_v26 = vadd.f32 %v8083_v18, %v1000_v24  ;;  %v8289_v27 = vpack.c.bf16 %v1078_v17, %v1077_v20  ;;  %3286 = vmatprep.subr.bf16.mxu1 %v7360_v39  ;;  %v7364_v24 = vld [vmem:[%s10923_s4] ss:$16 sps:$4 sm:$0xff]  }
 0x1a9   : > { %v1080_v28 = vmax.f32 %v1006_v22, 0.0 }
 0x1aa   : > { %v1079_v29 = vmax.f32 %v1001_v26, 0.0  ;;  %v7065_v31 = vpop.f32.mrb[62].mxu0  ;;  %v7366_v26 = vld [vmem:[%s10923_s4 + $0x4] ss:$16 sps:$4 sm:$0xff]  }
 0x1ab   : > { %v1016_v32 = vadd.f32 %v7065_v31, %v8083_v18  ;;  %v1010_v33 = vpop.f32.mrb[63].mxu0  ;;  %3287 = vmatpush1.bf16.msra.mxu1 %v7358_v41  ;;  %2371 = vmatprep.subr.bf16.mxu0 %v7366_v26 }
 0x1ac   : > { %v1011_v35 = vadd.f32 %v8083_v18, %v1010_v33  ;;  %v8299_v38 = vpack.c.bf16 %v1080_v28, %v1079_v29  ;;  %v7363_v18 = vld [vmem:[%s10924_s5 + $0x1ec] ss:$16 sps:$4 sm:$0xff]   ;;  %2372 = vmatpush1.bf16.msra.mxu0 %v7364_v24 }
 0x1ad   : > { %v1082_v40 = vmax.f32 %v1016_v32, 0.0  ;;  %3288 = vmatprep.subr.bf16.mxu1 %v7363_v18 }
 0x1ae   : > { %1394 = vmatmul.mubr.bf16.gmra.mrb[60].mxu1 %v8141_v9  ;;  %v1081_v42 = vmax.f32 %v1011_v35, 0.0 }
 0x1af   : > { %1403 = vmatprep.mubr.bf16.mxu1 %v7767_v2  ;;  %3289 = vmatpush1.bf16.msra.mxu1 %v7361_v45 }
 0x1b0   : > { %v8309_v43 = vpack.c.bf16 %v1082_v40, %v1081_v42 }
 0x1b6   : > { %1404 = vmatmul.mubr.bf16.gmra.mrb[64].mxu1 %v8145_v15 }
 0x1b7   : > { %1413 = vmatprep.mubr.bf16.mxu1 %v7767_v2 }
 0x1be   : > { %1414 = vmatmul.mubr.bf16.gmra.mrb[68].mxu1 %v8163_v23 }
 0x1bf   : > { %1423 = vmatprep.mubr.bf16.mxu1 %v7767_v2 }
 0x1c6   : > { %1424 = vmatmul.mubr.bf16.gmra.mrb[72].mxu1 %v8167_v36 }
 0x1c7   : > { %1433 = vmatprep.mubr.bf16.mxu1 %v7767_v2 }
 0x1ce   : > { %1434 = vmatmul.mubr.bf16.gmra.mrb[76].mxu1 %v8185_v30 }
 0x1cf   : > { %1443 = vmatprep.mubr.bf16.mxu1 %v7767_v2 }
 0x1d6   : > { %1444 = vmatmul.mubr.bf16.gmra.mrb[80].mxu1 %v8189_v56 }
 0x1d7   : > { %1453 = vmatprep.mubr.bf16.mxu1 %v7767_v2 }
 0x1de   : > { %1454 = vmatmul.mubr.bf16.gmra.mrb[84].mxu1 %v8201_v4 }
 0x1df   : > { %1463 = vmatprep.mubr.bf16.mxu1 %v7767_v2 }
 0x1e6   : > { %1464 = vmatmul.mubr.bf16.gmra.mrb[88].mxu1 %v8211_v13 }
 0x1e7   : > { %1473 = vmatprep.mubr.bf16.mxu1 %v7767_v2 }
 0x1ee   : > { %1474 = vmatmul.mubr.bf16.gmra.mrb[92].mxu1 %v8223_v25 }
 0x1ef   : > { %1483 = vmatprep.mubr.bf16.mxu1 %v7767_v2 }
 0x1f6   : > { %1484 = vmatmul.mubr.bf16.gmra.mrb[96].mxu1 %v8233_v34 }
 0x1f7   : > { %1493 = vmatprep.mubr.bf16.mxu1 %v7767_v2 }
 0x1fe   : > { %1494 = vmatmul.mubr.bf16.gmra.mrb[100].mxu1 %v8245_v46 }
 0x1ff   : > { %1503 = vmatprep.mubr.bf16.mxu1 %v7767_v2 }
 0x206   : > { %1504 = vmatmul.mubr.bf16.gmra.mrb[104].mxu1 %v8255_v55 }
 0x207   : > { %1513 = vmatprep.mubr.bf16.mxu1 %v7767_v2 }
 0x209   : > { %v1245_v9 = vpop.f32.mrb[0].mxu1 }
 0x20a   : > { %v1247_v15 = vpop.f32.mrb[1].mxu1 }
 0x20b   : > { %v1249_v23 = vpop.f32.mrb[2].mxu1 }
 0x20c   : > { %v1564_v36 = vmax.f32 %v1245_v9, %v1249_v23  ;;  %v8339_v30 = vpack.c.bf16 %v1249_v23, %v1245_v9  ;;  %v1251_v56 = vpop.f32.mrb[3].mxu1 }
 0x20d   : > { %v1573_v4 = vmax.f32 %v1247_v15, %v1251_v56  ;;  %v8341_v13 = vpack.c.bf16 %v1251_v56, %v1247_v15 }
 0x20e   : > { %1514 = vmatmul.mubr.bf16.gmra.mrb[108].mxu1 %v8267_v5 }
 0x20f   : > { %1523 = vmatprep.mubr.bf16.mxu1 %v7767_v2 }
 0x211   : > { %v1255_v25 = vpop.f32.mrb[4].mxu1 }
 0x212   : > { %v1565_v34 = vmax.f32 %v1564_v36, %v1255_v25  ;;  %v1257_v46 = vpop.f32.mrb[5].mxu1 }
 0x213   : > { %v1574_v47 = vmax.f32 %v1573_v4, %v1257_v46  ;;  %v1259_v48 = vpop.f32.mrb[6].mxu1 }
 0x214   : > { %v1566_v51 = vmax.f32 %v1565_v34, %v1259_v48  ;;  %v1261_v49 = vpop.f32.mrb[7].mxu1  ;;  %v8345_v50 = vpack.c.bf16 %v1259_v48, %v1255_v25 }
 0x215   : > { %v1575_v52 = vmax.f32 %v1574_v47, %v1261_v49  ;;  %v8347_v53 = vpack.c.bf16 %v1261_v49, %v1257_v46 }
 0x216   : > { %1524 = vmatmul.mubr.bf16.gmra.mrb[112].mxu1 %v8277_v14  ;;  %v1567_v54 = vrot.slane %v1566_v51, 4 }
 0x217   : > { %1533 = vmatprep.mubr.bf16.mxu1 %v7767_v2  ;;  %v1576_v55 = vrot.slane %v1575_v52, 4 }
 0x218   : > { %v1568_v61 = vmax.f32 %v1566_v51, %v1567_v54 }
 0x219   : > { %v1265_v57 = vpop.f32.mrb[8].mxu1  ;;  %v1577_v3 = vmax.f32 %v1575_v52, %v1576_v55 }
 0x21a   : > { %v1267_v59 = vpop.f32.mrb[9].mxu1  ;;  %v1569_v37 = vrot.slane %v1568_v61, 2 }
 0x21b   : > { %v1269_v60 = vpop.f32.mrb[10].mxu1  ;;  %v1578_v58 = vrot.slane %v1577_v3, 2 }
 0x21c   : > { %v1582_v62 = vmax.f32 %v1265_v57, %v1269_v60  ;;  %v1271_v63 = vpop.f32.mrb[11].mxu1  ;;  %v8351_v0 = vpack.c.bf16 %v1269_v60, %v1265_v57  ;;  %v1570_v14 = vmax.f32 %v1568_v61, %v1569_v37 }
 0x21d   : > { %v1591_v5 = vmax.f32 %v1267_v59, %v1271_v63  ;;  %v8353_v6 = vpack.c.bf16 %v1271_v63, %v1267_v59  ;;  %v1579_v20 = vmax.f32 %v1577_v3, %v1578_v58 }
 0x21e   : > { %1534 = vmatmul.mubr.bf16.gmra.mrb[116].mxu1 %v8289_v27  ;;  %v1571_v28 = vrot.slane %v1570_v14, 1 }
 0x21f   : > { %1543 = vmatprep.mubr.bf16.mxu1 %v7767_v2  ;;  %v1580_v29 = vrot.slane %v1579_v20, 1 }
 0x220   : > { %v1572_v41 = vmax.f32 %v1570_v14, %v1571_v28 }
 0x221   : > { %v1275_v7 = vpop.f32.mrb[12].mxu1 }
 0x222   : > { %v1583_v8 = vmax.f32 %v1582_v62, %v1275_v7  ;;  %v1277_v10 = vpop.f32.mrb[13].mxu1  ;;  %v1852_v4 = vpack.c.bf16 %v1572_v41, %v1572_v41 }
 0x223   : > { %v1592_v11 = vmax.f32 %v1591_v5, %v1277_v10  ;;  %v1279_v12 = vpop.f32.mrb[14].mxu1 }
 0x224   : > { %v1584_v16 = vmax.f32 %v1583_v8, %v1279_v12  ;;  %v1281_v17 = vpop.f32.mrb[15].mxu1  ;;  %v8357_v19 = vpack.c.bf16 %v1279_v12, %v1275_v7  ;;  %v1980_v57 = vunpack.c.l.b16 %v1852_v4  ;;  %v7367_v7 = vld [vmem:[%s10923_s4 + $0x20] ss:$16 sps:$4 sm:$0xff]   ;;  %v7369_v8 = vld [vmem:[%s10923_s4 + $0x24] ss:$16 sps:$4 sm:$0xff]  }
 0x225   : > { %v1593_v21 = vmax.f32 %v1592_v11, %v1281_v17  ;;  %v8359_v22 = vpack.c.bf16 %v1281_v17, %v1277_v10  ;;  %v7372_v12 = vld [vmem:[%s10923_s4 + $0x44] ss:$16 sps:$4 sm:$0xff]   ;;  %2373 = vmatprep.subr.bf16.mxu0 %v7369_v8 }
 0x226   : > { %v1585_v27 = vrot.slane %v1584_v16, 4  ;;  %1544 = vmatmul.mubr.bf16.gmra.mrb[120].mxu1 %v8299_v38  ;;  %v1581_v38 = vmax.f32 %v1579_v20, %v1580_v29  ;;  %2374 = vmatpush1.bf16.msra.mxu0 %v7367_v7  ;;  %v7370_v20 = vld [vmem:[%s10923_s4 + $0x40] ss:$16 sps:$4 sm:$0xff]  }
 0x227   : > { %v1594_v44 = vrot.slane %v1593_v21, 4  ;;  %1553 = vmatprep.mubr.bf16.mxu1 %v7767_v2  ;;  %2375 = vmatprep.subr.bf16.mxu0 %v7372_v12 }
 0x228   : > { %v1586_v1 = vmax.f32 %v1584_v16, %v1585_v27  ;;  %v1853_v34 = vpack.c.bf16 %v1581_v38, %v1581_v38 }
 0x229   : > { %v1595_v31 = vmax.f32 %v1593_v21, %v1594_v44  ;;  %v1285_v32 = vpop.f32.mrb[16].mxu1 }
 0x22a   : > { %v1587_v33 = vrot.slane %v1586_v1, 2  ;;  %v1287_v35 = vpop.f32.mrb[17].mxu1  ;;  %v1981_v62 = vunpack.c.l.b16 %v1853_v34  ;;  %2376 = vmatpush1.bf16.msra.mxu0 %v7370_v20 }
 0x22b   : > { %v1596_v39 = vrot.slane %v1595_v31, 2  ;;  %v1289_v40 = vpop.f32.mrb[18].mxu1 }
 0x22c   : > { %v1588_v42 = vmax.f32 %v1586_v1, %v1587_v33  ;;  %v1600_v18 = vmax.f32 %v1285_v32, %v1289_v40  ;;  %v1291_v45 = vpop.f32.mrb[19].mxu1  ;;  %v8369_v9 = vpack.c.bf16 %v1289_v40, %v1285_v32 }
 0x22d   : > { %v1597_v15 = vmax.f32 %v1595_v31, %v1596_v39  ;;  %v1609_v2 = vmax.f32 %v1287_v35, %v1291_v45  ;;  %v8371_v23 = vpack.c.bf16 %v1291_v45, %v1287_v35 }
 0x22e   : > { %v1589_v36 = vrot.slane %v1588_v42, 1  ;;  %1554 = vmatmul.mubr.bf16.gmra.mrb[124].mxu1 %v8309_v43 }
 0x22f   : > { %v1598_v56 = vrot.slane %v1597_v15, 1  ;;  %3290 = vmatprep.mubr.bf16.mxu1 %v8341_v13 }
 0x230   : > { %v1590_v25 = vmax.f32 %v1588_v42, %v1589_v36 }
 0x231   : > { %v1599_v46 = vmax.f32 %v1597_v15, %v1598_v56  ;;  %v1295_v47 = vpop.f32.mrb[20].mxu1 }
 0x232   : > { %v1854_v48 = vpack.c.bf16 %v1590_v25, %v1590_v25  ;;  %v1601_v51 = vmax.f32 %v1600_v18, %v1295_v47  ;;  %v1297_v49 = vpop.f32.mrb[21].mxu1 }
 0x233   : > { %v1855_v52 = vpack.c.bf16 %v1599_v46, %v1599_v46  ;;  %v1610_v54 = vmax.f32 %v1609_v2, %v1297_v49  ;;  %v1299_v55 = vpop.f32.mrb[22].mxu1 }
 0x234   : > { %v1982_v59 = vunpack.c.l.b16 %v1854_v48  ;;  %v1602_v60 = vmax.f32 %v1601_v51, %v1299_v55  ;;  %v1301_v61 = vpop.f32.mrb[23].mxu1  ;;  %v8375_v43 = vpack.c.bf16 %v1299_v55, %v1295_v47 }
 0x235   : > { %v1983_v63 = vunpack.c.l.b16 %v1855_v52  ;;  %v1611_v3 = vmax.f32 %v1610_v54, %v1301_v61  ;;  %v8377_v5 = vpack.c.bf16 %v1301_v61, %v1297_v49  ;;  %v7373_v52 = vld [vmem:[%s10923_s4 + $0x60] ss:$16 sps:$4 sm:$0xff]   ;;  %v7375_v54 = vld [vmem:[%s10923_s4 + $0x64] ss:$16 sps:$4 sm:$0xff]  }
 0x236   : > { %v2013_v37 = vsel %vm2012_vm2, %v1982_v59, %v1980_v57  ;;  %v1603_v58 = vrot.slane %v1602_v60, 4  ;;  %3291 = vmatmul.mubr.bf16.vlgmr.msra.gmra.mrb[128].mxu1 %v8339_v30  ;;  %v7378_v57 = vld [vmem:[%s10923_s4 + $0x84] ss:$16 sps:$4 sm:$0xff]   ;;  %2377 = vmatprep.subr.bf16.mxu0 %v7375_v54 }
 0x237   : > { %v2026_v10 = vsel %vm2012_vm2, %v1983_v63, %v1981_v62  ;;  %v1612_v11 = vrot.slane %v1611_v3, 4  ;;  %3300 = vmatprep.mubr.bf16.mxu1 %v8347_v53  ;;  %2378 = vmatpush1.bf16.msra.mxu0 %v7373_v52  ;;  %v7376_v63 = vld [vmem:[%s10923_s4 + $0x80] ss:$16 sps:$4 sm:$0xff]  }
 0x238   : > { %v1604_v14 = vmax.f32 %v1602_v60, %v1603_v58  ;;  %2379 = vmatprep.subr.bf16.mxu0 %v7378_v57  ;;  %v7382_v52 = vld [vmem:[%s10923_s4 + $0xc0] ss:$16 sps:$4 sm:$0xff]  }
 0x239   : > { %v1613_v16 = vmax.f32 %v1611_v3, %v1612_v11  ;;  %v1305_v17 = vpop.f32.mrb[24].mxu1 }
 0x23a   : > { %v1605_v21 = vrot.slane %v1604_v14, 2  ;;  %v1307_v24 = vpop.f32.mrb[25].mxu1 }
 0x23b   : > { %v1614_v26 = vrot.slane %v1613_v16, 2  ;;  %v1309_v27 = vpop.f32.mrb[26].mxu1  ;;  %2380 = vmatpush1.bf16.msra.mxu0 %v7376_v63 }
 0x23c   : > { %v1606_v44 = vmax.f32 %v1604_v14, %v1605_v21  ;;  %v1618_v28 = vmax.f32 %v1305_v17, %v1309_v27  ;;  %v1311_v1 = vpop.f32.mrb[27].mxu1  ;;  %v8395_v29 = vpack.c.bf16 %v1309_v27, %v1305_v17 }
 0x23d   : > { %v1615_v31 = vmax.f32 %v1613_v16, %v1614_v26  ;;  %v1627_v32 = vmax.f32 %v1307_v24, %v1311_v1  ;;  %v8397_v33 = vpack.c.bf16 %v1311_v1, %v1307_v24 }
 0x23e   : > { %v1607_v35 = vrot.slane %v1606_v44, 1  ;;  %3301 = vmatmul.mubr.bf16.gmra.mrb[132].mxu1 %v8345_v50 }
 0x23f   : > { %v1616_v39 = vrot.slane %v1615_v31, 1  ;;  %3310 = vmatprep.mubr.bf16.mxu1 %v8353_v6 }
 0x240   : > { %v1608_v40 = vmax.f32 %v1606_v44, %v1607_v35 }
 0x241   : > { %v1617_v41 = vmax.f32 %v1615_v31, %v1616_v39  ;;  %v1315_v42 = vpop.f32.mrb[28].mxu1 }
 0x242   : > { %v1856_v18 = vpack.c.bf16 %v1608_v40, %v1608_v40  ;;  %v1619_v45 = vmax.f32 %v1618_v28, %v1315_v42  ;;  %v1317_v38 = vpop.f32.mrb[29].mxu1 }
 0x243   : > { %v1857_v15 = vpack.c.bf16 %v1617_v41, %v1617_v41  ;;  %v1628_v2 = vmax.f32 %v1627_v32, %v1317_v38  ;;  %v1319_v36 = vpop.f32.mrb[30].mxu1 }
 0x244   : > { %v1984_v56 = vunpack.c.l.b16 %v1856_v18  ;;  %v1620_v4 = vmax.f32 %v1619_v45, %v1319_v36  ;;  %v1321_v25 = vpop.f32.mrb[31].mxu1  ;;  %v8401_v34 = vpack.c.bf16 %v1319_v36, %v1315_v42  ;;  %v7379_v36 = vld [vmem:[%s10923_s4 + $0xa0] ss:$16 sps:$4 sm:$0xff]  }
 0x245   : > { %v1985_v46 = vunpack.c.l.b16 %v1857_v15  ;;  %v1629_v47 = vmax.f32 %v1628_v2, %v1321_v25  ;;  %v8403_v48 = vpack.c.bf16 %v1321_v25, %v1317_v38  ;;  %v7384_v25 = vld [vmem:[%s10923_s4 + $0xc4] ss:$16 sps:$4 sm:$0xff]  }
 0x246   : > { %v2015_v51 = vsel %vm2014_vm3, %v1984_v56, %v2013_v37  ;;  %v1621_v49 = vrot.slane %v1620_v4, 4  ;;  %3311 = vmatmul.mubr.bf16.gmra.mrb[136].mxu1 %v8351_v0  ;;  %v7381_v56 = vld [vmem:[%s10923_s4 + $0xa4] ss:$16 sps:$4 sm:$0xff]  }
 0x247   : > { %v1630_v55 = vrot.slane %v1629_v47, 4  ;;  %3320 = vmatprep.mubr.bf16.mxu1 %v8359_v22  ;;  %v2027_v59 = vsel %vm2014_vm3, %v1985_v46, %v2026_v10  ;;  %2381 = vmatprep.subr.bf16.mxu0 %v7381_v56 }
 0x248   : > { %v1622_v60 = vmax.f32 %v1620_v4, %v1621_v49  ;;  %2382 = vmatpush1.bf16.msra.mxu0 %v7379_v36  ;;  %v7390_v36 = vld [vmem:[%s10923_s4 + $0x104] ss:$16 sps:$4 sm:$0xff]  }
 0x249   : > { %v1631_v61 = vmax.f32 %v1629_v47, %v1630_v55  ;;  %v1325_v62 = vpop.f32.mrb[32].mxu1  ;;  %2383 = vmatprep.subr.bf16.mxu0 %v7384_v25 }
 0x24a   : > { %v1623_v3 = vrot.slane %v1622_v60, 2  ;;  %v1327_v37 = vpop.f32.mrb[33].mxu1 }
 0x24b   : > { %v1632_v58 = vrot.slane %v1631_v61, 2  ;;  %v1329_v7 = vpop.f32.mrb[34].mxu1 }
 0x24c   : > { %v1624_v8 = vmax.f32 %v1622_v60, %v1623_v3  ;;  %v1636_v11 = vmax.f32 %v1325_v62, %v1329_v7  ;;  %v1331_v12 = vpop.f32.mrb[35].mxu1  ;;  %v8421_v14 = vpack.c.bf16 %v1329_v7, %v1325_v62  ;;  %2384 = vmatpush1.bf16.msra.mxu0 %v7382_v52 }
 0x24d   : > { %v1633_v10 = vmax.f32 %v1631_v61, %v1632_v58  ;;  %v1645_v16 = vmax.f32 %v1327_v37, %v1331_v12  ;;  %v8423_v17 = vpack.c.bf16 %v1331_v12, %v1327_v37 }
 0x24e   : > { %v1625_v20 = vrot.slane %v1624_v8, 1  ;;  %3321 = vmatmul.mubr.bf16.gmra.mrb[140].mxu1 %v8357_v19 }
 0x24f   : > { %v1634_v21 = vrot.slane %v1633_v10, 1  ;;  %3330 = vmatprep.mubr.bf16.mxu1 %v8371_v23 }
 0x250   : > { %v1626_v24 = vmax.f32 %v1624_v8, %v1625_v20 }
 0x251   : > { %v1635_v26 = vmax.f32 %v1633_v10, %v1634_v21  ;;  %v1335_v27 = vpop.f32.mrb[36].mxu1 }
 0x252   : > { %v1858_v44 = vpack.c.bf16 %v1626_v24, %v1626_v24  ;;  %v1637_v28 = vmax.f32 %v1636_v11, %v1335_v27  ;;  %v1337_v1 = vpop.f32.mrb[37].mxu1 }
 0x253   : > { %v1859_v31 = vpack.c.bf16 %v1635_v26, %v1635_v26  ;;  %v1646_v32 = vmax.f32 %v1645_v16, %v1337_v1  ;;  %v1339_v35 = vpop.f32.mrb[38].mxu1 }
 0x254   : > { %v1986_v39 = vunpack.c.l.b16 %v1858_v44  ;;  %v1638_v40 = vmax.f32 %v1637_v28, %v1339_v35  ;;  %v1341_v41 = vpop.f32.mrb[39].mxu1  ;;  %v8427_v42 = vpack.c.bf16 %v1339_v35, %v1335_v27 }
 0x255   : > { %v1987_v18 = vunpack.c.l.b16 %v1859_v31  ;;  %v1647_v45 = vmax.f32 %v1646_v32, %v1341_v41  ;;  %v8429_v38 = vpack.c.bf16 %v1341_v41, %v1337_v1 }
 0x256   : > { %v2017_v15 = vsel %vm2016_vm4, %v1986_v39, %v2015_v51  ;;  %v1639_v2 = vrot.slane %v1638_v40, 4  ;;  %3331 = vmatmul.mubr.bf16.gmra.mrb[144].mxu1 %v8369_v9 }
 0x257   : > { %v1648_v4 = vrot.slane %v1647_v45, 4  ;;  %3340 = vmatprep.mubr.bf16.mxu1 %v8377_v5  ;;  %v2028_v46 = vsel %vm2016_vm4, %v1987_v18, %v2027_v59  ;;  %v7385_v18 = vld [vmem:[%s10923_s4 + $0xe0] ss:$16 sps:$4 sm:$0xff]  }
 0x258   : > { %v1640_v47 = vmax.f32 %v1638_v40, %v1639_v2 }
 0x259   : > { %v1649_v51 = vmax.f32 %v1647_v45, %v1648_v4  ;;  %v1345_v49 = vpop.f32.mrb[40].mxu1  ;;  %v7387_v45 = vld [vmem:[%s10923_s4 + $0xe4] ss:$16 sps:$4 sm:$0xff]  }
 0x25a   : > { %v1641_v54 = vrot.slane %v1640_v47, 2  ;;  %v1347_v55 = vpop.f32.mrb[41].mxu1  ;;  %2385 = vmatprep.subr.bf16.mxu0 %v7387_v45  ;;  %v7391_v45 = vld [vmem:[%s10923_s4 + $0x120] ss:$16 sps:$4 sm:$0xff]  }
 0x25b   : > { %v1650_v57 = vrot.slane %v1649_v51, 2  ;;  %v1349_v60 = vpop.f32.mrb[42].mxu1  ;;  %2386 = vmatpush1.bf16.msra.mxu0 %v7385_v18 }
 0x25c   : > { %v1642_v61 = vmax.f32 %v1640_v47, %v1641_v54  ;;  %v1654_v62 = vmax.f32 %v1345_v49, %v1349_v60  ;;  %v1351_v63 = vpop.f32.mrb[43].mxu1  ;;  %v8447_v3 = vpack.c.bf16 %v1349_v60, %v1345_v49  ;;  %v7388_v47 = vld [vmem:[%s10923_s4 + $0x100] ss:$16 sps:$4 sm:$0xff]   ;;  %2387 = vmatprep.subr.bf16.mxu0 %v7390_v36 }
 0x25d   : > { %v1651_v59 = vmax.f32 %v1649_v51, %v1650_v57  ;;  %v1663_v37 = vmax.f32 %v1347_v55, %v1351_v63  ;;  %v8449_v58 = vpack.c.bf16 %v1351_v63, %v1347_v55 }
 0x25e   : > { %v1643_v7 = vrot.slane %v1642_v61, 1  ;;  %3341 = vmatmul.mubr.bf16.gmra.mrb[148].mxu1 %v8375_v43 }
 0x25f   : > { %v1652_v8 = vrot.slane %v1651_v59, 1  ;;  %3350 = vmatprep.mubr.bf16.mxu1 %v8397_v33  ;;  %2388 = vmatpush1.bf16.msra.mxu0 %v7388_v47 }
 0x260   : > { %v1644_v11 = vmax.f32 %v1642_v61, %v1643_v7 }
 0x261   : > { %v1653_v12 = vmax.f32 %v1651_v59, %v1652_v8  ;;  %v1355_v10 = vpop.f32.mrb[44].mxu1 }
 0x262   : > { %v1860_v16 = vpack.c.bf16 %v1644_v11, %v1644_v11  ;;  %v1655_v20 = vmax.f32 %v1654_v62, %v1355_v10  ;;  %v1357_v21 = vpop.f32.mrb[45].mxu1 }
 0x263   : > { %v1861_v24 = vpack.c.bf16 %v1653_v12, %v1653_v12  ;;  %v1664_v26 = vmax.f32 %v1663_v37, %v1357_v21  ;;  %v1359_v27 = vpop.f32.mrb[46].mxu1 }
 0x264   : > { %v1988_v44 = vunpack.c.l.b16 %v1860_v16  ;;  %v1656_v28 = vmax.f32 %v1655_v20, %v1359_v27  ;;  %v1361_v1 = vpop.f32.mrb[47].mxu1  ;;  %v8453_v31 = vpack.c.bf16 %v1359_v27, %v1355_v10 }
 0x265   : > { %v1989_v32 = vunpack.c.l.b16 %v1861_v24  ;;  %v1665_v35 = vmax.f32 %v1664_v26, %v1361_v1  ;;  %v8455_v39 = vpack.c.bf16 %v1361_v1, %v1357_v21 }
 0x266   : > { %v2019_v40 = vsel %vm2018_vm5, %v1988_v44, %v2017_v15  ;;  %v1657_v41 = vrot.slane %v1656_v28, 4  ;;  %3351 = vmatmul.mubr.bf16.gmra.mrb[152].mxu1 %v8395_v29 }
 0x267   : > { %v1666_v2 = vrot.slane %v1665_v35, 4  ;;  %3360 = vmatprep.mubr.bf16.mxu1 %v8403_v48  ;;  %v2029_v15 = vsel %vm2018_vm5, %v1989_v32, %v2028_v46 }
 0x268   : > { %v1658_v56 = vmax.f32 %v1656_v28, %v1657_v41 }
 0x269   : > { %v1667_v4 = vmax.f32 %v1665_v35, %v1666_v2  ;;  %v1365_v25 = vpop.f32.mrb[48].mxu1  ;;  %v7393_v2 = vld [vmem:[%s10923_s4 + $0x124] ss:$16 sps:$4 sm:$0xff]  }
 0x26a   : > { %v1659_v51 = vrot.slane %v1658_v56, 2  ;;  %v1367_v49 = vpop.f32.mrb[49].mxu1  ;;  %2389 = vmatprep.subr.bf16.mxu0 %v7393_v2  ;;  %v7399_v2 = vld [vmem:[%s10923_s4 + $0x164] ss:$16 sps:$4 sm:$0xff]  }
 0x26b   : > { %v1668_v52 = vrot.slane %v1667_v4, 2  ;;  %v1369_v54 = vpop.f32.mrb[50].mxu1  ;;  %2390 = vmatpush1.bf16.msra.mxu0 %v7391_v45  ;;  %v7397_v45 = vld [vmem:[%s10923_s4 + $0x160] ss:$16 sps:$4 sm:$0xff]  }
 0x26c   : > { %v1660_v55 = vmax.f32 %v1658_v56, %v1659_v51  ;;  %v1672_v57 = vmax.f32 %v1365_v25, %v1369_v54  ;;  %v1371_v60 = vpop.f32.mrb[51].mxu1  ;;  %v8473_v61 = vpack.c.bf16 %v1369_v54, %v1365_v25  ;;  %v7396_v56 = vld [vmem:[%s10923_s4 + $0x144] ss:$16 sps:$4 sm:$0xff]   ;;  %v7394_v51 = vld [vmem:[%s10923_s4 + $0x140] ss:$16 sps:$4 sm:$0xff]  }
 0x26d   : > { %v1669_v46 = vmax.f32 %v1667_v4, %v1668_v52  ;;  %v1681_v62 = vmax.f32 %v1367_v49, %v1371_v60  ;;  %v8475_v63 = vpack.c.bf16 %v1371_v60, %v1367_v49  ;;  %2391 = vmatprep.subr.bf16.mxu0 %v7396_v56 }
 0x26e   : > { %v1661_v59 = vrot.slane %v1660_v55, 1  ;;  %3361 = vmatmul.mubr.bf16.gmra.mrb[156].mxu1 %v8401_v34 }
 0x26f   : > { %v1670_v37 = vrot.slane %v1669_v46, 1  ;;  %3370 = vmatprep.mubr.bf16.mxu1 %v8423_v17  ;;  %2392 = vmatpush1.bf16.msra.mxu0 %v7394_v51 }
 0x270   : > { %v1662_v7 = vmax.f32 %v1660_v55, %v1661_v59  ;;  %2393 = vmatprep.subr.bf16.mxu0 %v7399_v2 }
 0x271   : > { %v1671_v8 = vmax.f32 %v1669_v46, %v1670_v37  ;;  %v1375_v11 = vpop.f32.mrb[52].mxu1 }
 0x272   : > { %v1862_v12 = vpack.c.bf16 %v1662_v7, %v1662_v7  ;;  %v1673_v10 = vmax.f32 %v1672_v57, %v1375_v11  ;;  %v1377_v16 = vpop.f32.mrb[53].mxu1 }
 0x273   : > { %v1863_v20 = vpack.c.bf16 %v1671_v8, %v1671_v8  ;;  %v1682_v21 = vmax.f32 %v1681_v62, %v1377_v16  ;;  %v1379_v24 = vpop.f32.mrb[54].mxu1  ;;  %2394 = vmatpush1.bf16.msra.mxu0 %v7397_v45 }
 0x274   : > { %v1990_v26 = vunpack.c.l.b16 %v1862_v12  ;;  %v1674_v27 = vmax.f32 %v1673_v10, %v1379_v24  ;;  %v1381_v44 = vpop.f32.mrb[55].mxu1  ;;  %v8479_v28 = vpack.c.bf16 %v1379_v24, %v1375_v11 }
 0x275   : > { %v1991_v1 = vunpack.c.l.b16 %v1863_v20  ;;  %v1683_v32 = vmax.f32 %v1682_v21, %v1381_v44  ;;  %v8481_v35 = vpack.c.bf16 %v1381_v44, %v1377_v16 }
 0x276   : > { %11026 = vst [vmem:[#allocation14_spill] sm:$0xff] %v8479_v28  ;;  %v2021_v41 = vsel %vm2020_vm6, %v1990_v26, %v2019_v40  ;;  %v1675_v18 = vrot.slane %v1674_v27, 4  ;;  %3371 = vmatmul.mubr.bf16.gmra.mrb[160].mxu1 %v8421_v14 }
 0x277   : > { %11027 = vst [vmem:[#allocation15_spill] sm:$0xff] %v8481_v35  ;;  %v1684_v36 = vrot.slane %v1683_v32, 4  ;;  %3380 = vmatprep.mubr.bf16.mxu1 %v8429_v38  ;;  %v2030_v40 = vsel %vm2020_vm6, %v1991_v1, %v2029_v15 }
 0x278   : > { %v1676_v4 = vmax.f32 %v1674_v27, %v1675_v18 }
 0x279   : > { %v1685_v25 = vmax.f32 %v1683_v32, %v1684_v36  ;;  %v1385_v47 = vpop.f32.mrb[56].mxu1 }
 0x27a   : > { %v1677_v49 = vrot.slane %v1676_v4, 2  ;;  %v1387_v52 = vpop.f32.mrb[57].mxu1 }
 0x27b   : > { %v1686_v54 = vrot.slane %v1685_v25, 2  ;;  %v1389_v55 = vpop.f32.mrb[58].mxu1 }
 0x27c   : > { %v1678_v57 = vmax.f32 %v1676_v4, %v1677_v49  ;;  %v1690_v60 = vmax.f32 %v1385_v47, %v1389_v55  ;;  %v1391_v46 = vpop.f32.mrb[59].mxu1  ;;  %v8499_v62 = vpack.c.bf16 %v1389_v55, %v1385_v47  ;;  %v7402_v4 = vld [vmem:[%s10923_s4 + $0x184] ss:$16 sps:$4 sm:$0xff]  }
 0x27d   : > { %v1687_v15 = vmax.f32 %v1685_v25, %v1686_v54  ;;  %v1699_v59 = vmax.f32 %v1387_v52, %v1391_v46  ;;  %v8501_v37 = vpack.c.bf16 %v1391_v46, %v1387_v52  ;;  %v7400_v52 = vld [vmem:[%s10923_s4 + $0x180] ss:$16 sps:$4 sm:$0xff]   ;;  %2395 = vmatprep.subr.bf16.mxu0 %v7402_v4 }
 0x27e   : > { %11028 = vst [vmem:[#allocation16_spill] sm:$0xff] %v8499_v62  ;;  %v1679_v7 = vrot.slane %v1678_v57, 1  ;;  %3381 = vmatmul.mubr.bf16.gmra.mrb[164].mxu1 %v8427_v42  ;;  %2396 = vmatpush1.bf16.msra.mxu0 %v7400_v52 }
 0x27f   : > { %11029 = vst [vmem:[#allocation17_spill] sm:$0xff] %v8501_v37  ;;  %v1688_v8 = vrot.slane %v1687_v15, 1  ;;  %3390 = vmatprep.mubr.bf16.mxu1 %v8449_v58 }
 0x280   : > { %v1680_v11 = vmax.f32 %v1678_v57, %v1679_v7 }
 0x281   : > { %v1689_v12 = vmax.f32 %v1687_v15, %v1688_v8  ;;  %v1395_v10 = vpop.f32.mrb[60].mxu1 }
 0x282   : > { %v1864_v16 = vpack.c.bf16 %v1680_v11, %v1680_v11  ;;  %v1691_v20 = vmax.f32 %v1690_v60, %v1395_v10  ;;  %v1397_v21 = vpop.f32.mrb[61].mxu1 }
 0x283   : > { %v1700_v24 = vmax.f32 %v1699_v59, %v1397_v21  ;;  %v1399_v26 = vpop.f32.mrb[62].mxu1  ;;  %v1865_v27 = vpack.c.bf16 %v1689_v12, %v1689_v12 }
 0x284   : > { %v1992_v44 = vunpack.c.l.b16 %v1864_v16  ;;  %v1692_v1 = vmax.f32 %v1691_v20, %v1399_v26  ;;  %v1401_v32 = vpop.f32.mrb[63].mxu1  ;;  %v8505_v18 = vpack.c.bf16 %v1399_v26, %v1395_v10  ;;  %v7405_v10 = vld [vmem:[%s10923_s4 + $0x1a4] ss:$16 sps:$4 sm:$0xff]  }
 0x285   : > { %v1701_v36 = vmax.f32 %v1700_v24, %v1401_v32  ;;  %v8513_v56 = vpack.c.bf16 %v1401_v32, %v1397_v21  ;;  %v1993_v25 = vunpack.c.l.b16 %v1865_v27  ;;  %v7403_v21 = vld [vmem:[%s10923_s4 + $0x1a0] ss:$16 sps:$4 sm:$0xff]   ;;  %2397 = vmatprep.subr.bf16.mxu0 %v7405_v10 }
 0x286   : > { %11030 = vst [vmem:[#allocation18_spill] sm:$0xff] %v8505_v18  ;;  %v1693_v47 = vrot.slane %v1692_v1, 4  ;;  %3391 = vmatmul.mubr.bf16.gmra.mrb[168].mxu1 %v8447_v3  ;;  %v2023_v51 = vsel %vm2022_vm7, %v1992_v44, %v2021_v41  ;;  %2398 = vmatpush1.bf16.msra.mxu0 %v7403_v21  ;;  %v7408_v44 = vld [vmem:[%s10923_s4 + $0x1c4] ss:$16 sps:$4 sm:$0xff]   ;;  %v7406_v32 = vld [vmem:[%s10923_s4 + $0x1c0] ss:$16 sps:$4 sm:$0xff]  }
 0x287   : > { %11031 = vst [vmem:[#allocation19_spill] sm:$0xff] %v8513_v56  ;;  %v1702_v49 = vrot.slane %v1701_v36, 4  ;;  %3400 = vmatprep.mubr.bf16.mxu1 %v8455_v39  ;;  %v2031_v54 = vsel %vm2022_vm7, %v1993_v25, %v2030_v40  ;;  %2399 = vmatprep.subr.bf16.mxu0 %v7408_v44 }
 0x288   : > { %v1694_v55 = vmax.f32 %v1692_v1, %v1693_v47 }
 0x289   : > { %v1703_v57 = vmax.f32 %v1701_v36, %v1702_v49  ;;  %v1405_v60 = vpop.f32.mrb[64].mxu1 }
 0x28a   : > { %v1695_v46 = vrot.slane %v1694_v55, 2  ;;  %v1407_v15 = vpop.f32.mrb[65].mxu1  ;;  %2400 = vmatpush1.bf16.msra.mxu0 %v7406_v32 }
 0x28b   : > { %v1704_v59 = vrot.slane %v1703_v57, 2  ;;  %v1409_v7 = vpop.f32.mrb[66].mxu1 }
 0x28c   : > { %v1696_v41 = vmax.f32 %v1694_v55, %v1695_v46  ;;  %v1708_v8 = vmax.f32 %v1405_v60, %v1409_v7  ;;  %v1411_v11 = vpop.f32.mrb[67].mxu1  ;;  %v8525_v12 = vpack.c.bf16 %v1409_v7, %v1405_v60  ;;  %v7411_v46 = vld [vmem:[%s10923_s4 + $0x1e4] ss:$16 sps:$4 sm:$0xff]   ;;  %v7409_v7 = vld [vmem:[%s10923_s4 + $0x1e0] ss:$16 sps:$4 sm:$0xff]  }
 0x28d   : > { %v1705_v16 = vmax.f32 %v1703_v57, %v1704_v59  ;;  %v1717_v40 = vmax.f32 %v1407_v15, %v1411_v11  ;;  %v8530_v20 = vpack.c.bf16 %v1411_v11, %v1407_v15  ;;  %2401 = vmatprep.subr.bf16.mxu0 %v7411_v46 }
 0x28e   : > { %v1697_v24 = vrot.slane %v1696_v41, 1  ;;  %3401 = vmatmul.mubr.bf16.gmra.mrb[172].mxu1 %v8453_v31  ;;  %2402 = vmatpush1.bf16.msra.mxu0 %v7409_v7 }
 0x28f   : > { %11032 = vst [vmem:[#allocation20_spill] sm:$0xff] %v8530_v20  ;;  %v1706_v26 = vrot.slane %v1705_v16, 1  ;;  %3410 = vmatprep.mubr.bf16.mxu1 %v8475_v63 }
 0x290   : > { %v1698_v27 = vmax.f32 %v1696_v41, %v1697_v24 }
 0x291   : > { %v1415_v1 = vpop.f32.mrb[68].mxu1  ;;  %v1707_v45 = vmax.f32 %v1705_v16, %v1706_v26  ;;  %v7414_v16 = vld [vmem:[%s10923_s4 + $0xc] ss:$16 sps:$4 sm:$0xff]  }
 0x292   : > { %v1866_v2 = vpack.c.bf16 %v1698_v27, %v1698_v27  ;;  %v1709_v36 = vmax.f32 %v1708_v8, %v1415_v1  ;;  %v1417_v4 = vpop.f32.mrb[69].mxu1  ;;  %2414 = vmatprep.subr.bf16.mxu0 %v7414_v16 }
 0x293   : > { %v1718_v25 = vmax.f32 %v1717_v40, %v1417_v4  ;;  %v1419_v47 = vpop.f32.mrb[70].mxu1  ;;  %v1867_v49 = vpack.c.bf16 %v1707_v45, %v1707_v45 }
 0x294   : > { %v1994_v52 = vunpack.c.l.b16 %v1866_v2  ;;  %v1710_v55 = vmax.f32 %v1709_v36, %v1419_v47  ;;  %v1421_v57 = vpop.f32.mrb[71].mxu1  ;;  %v8543_v60 = vpack.c.bf16 %v1419_v47, %v1415_v1 }
 0x295   : > { %v1719_v15 = vmax.f32 %v1718_v25, %v1421_v57  ;;  %v8548_v59 = vpack.c.bf16 %v1421_v57, %v1417_v4  ;;  %v1995_v41 = vunpack.c.l.b16 %v1867_v49 }
 0x296   : > { %11033 = vst [vmem:[#allocation21_spill] sm:$0xff] %v8543_v60  ;;  %3411 = vmatmul.mubr.bf16.gmra.mrb[176].mxu1 %v8473_v61  ;;  %v8555_v8 = vsel %vm2024_vm8, %v1994_v52, %v2023_v51  ;;  %v1711_v10 = vrot.slane %v1710_v55, 4 }
 0x297   : > { %11034 = vst [vmem:[#allocation22_spill] sm:$0xff] %v8548_v59  ;;  %3420 = vmatprep.mubr.bf16.mxu1 %v8481_v35  ;;  %v8559_v11 = vsel %vm2024_vm8, %v1995_v41, %v2031_v54  ;;  %v1720_v40 = vrot.slane %v1719_v15, 4 }
 0x298   : > { %v1712_v27 = vmax.f32 %v1710_v55, %v1711_v10 }
 0x299   : > { %v1425_v21 = vpop.f32.mrb[72].mxu1  ;;  %v1721_v32 = vmax.f32 %v1719_v15, %v1720_v40 }
 0x29a   : > { %v1427_v24 = vpop.f32.mrb[73].mxu1  ;;  %v1713_v54 = vrot.slane %v1712_v27, 2 }
 0x29b   : > { %v1429_v26 = vpop.f32.mrb[74].mxu1  ;;  %v1722_v36 = vrot.slane %v1721_v32, 2 }
 0x29c   : > { %v1726_v44 = vmax.f32 %v1425_v21, %v1429_v26  ;;  %v1431_v51 = vpop.f32.mrb[75].mxu1  ;;  %v8564_v1 = vpack.c.bf16 %v1429_v26, %v1425_v21  ;;  %v1714_v55 = vmax.f32 %v1712_v27, %v1713_v54 }
 0x29d   : > { %v1735_v45 = vmax.f32 %v1427_v24, %v1431_v51  ;;  %v8566_v2 = vpack.c.bf16 %v1431_v51, %v1427_v24  ;;  %v1723_v15 = vmax.f32 %v1721_v32, %v1722_v36 }
 0x29e   : > { %11035 = vst [vmem:[#allocation23_spill] sm:$0xff] %v8564_v1  ;;  %3421 = vmatmul.mubr.bf16.gmra.mrb[180].mxu1 %v8479_v28  ;;  %v1715_v21 = vrot.slane %v1714_v55, 1 }
 0x29f   : > { %11036 = vst [vmem:[#allocation24_spill] sm:$0xff] %v8566_v2  ;;  %3430 = vmatprep.mubr.bf16.mxu1 %v8501_v37  ;;  %v1724_v26 = vrot.slane %v1723_v15, 1 }
 0x2a1   : > { %v1435_v4 = vpop.f32.mrb[76].mxu1 }
 0x2a2   : > { %v1727_v25 = vmax.f32 %v1726_v44, %v1435_v4  ;;  %v1437_v47 = vpop.f32.mrb[77].mxu1 }
 0x2a3   : > { %v1736_v49 = vmax.f32 %v1735_v45, %v1437_v47  ;;  %v1439_v52 = vpop.f32.mrb[78].mxu1 }
 0x2a4   : > { %v1728_v57 = vmax.f32 %v1727_v25, %v1439_v52  ;;  %v1441_v46 = vpop.f32.mrb[79].mxu1  ;;  %v8570_v7 = vpack.c.bf16 %v1439_v52, %v1435_v4  ;;  %v1716_v25 = vmax.f32 %v1714_v55, %v1715_v21  ;;  %v1725_v52 = vmax.f32 %v1723_v15, %v1724_v26 }
 0x2a5   : > { %v1737_v41 = vmax.f32 %v1736_v49, %v1441_v46  ;;  %v8572_v10 = vpack.c.bf16 %v1441_v46, %v1437_v47 }
 0x2a6   : > { %11037 = vst [vmem:[#allocation25_spill] sm:$0xff] %v8570_v7  ;;  %v1729_v16 = vrot.slane %v1728_v57, 4  ;;  %3431 = vmatmul.mubr.bf16.gmra.mrb[184].mxu1 %v8499_v62 }
 0x2a7   : > { %11038 = vst [vmem:[#allocation26_spill] sm:$0xff] %v8572_v10  ;;  %v1738_v40 = vrot.slane %v1737_v41, 4  ;;  %3440 = vmatprep.mubr.bf16.mxu1 %v8513_v56 }
 0x2a8   : > { %v1730_v24 = vmax.f32 %v1728_v57, %v1729_v16 }
 0x2a9   : > { %v1739_v44 = vmax.f32 %v1737_v41, %v1738_v40  ;;  %v1445_v51 = vpop.f32.mrb[80].mxu1  ;;  %v1868_v41 = vpack.c.bf16 %v1716_v25, %v1716_v25  ;;  %v1869_v40 = vpack.c.bf16 %v1725_v52, %v1725_v52 }
 0x2aa   : > { %v1731_v27 = vrot.slane %v1730_v24, 2  ;;  %v1447_v45 = vpop.f32.mrb[81].mxu1 }
 0x2ab   : > { %v1740_v54 = vrot.slane %v1739_v44, 2  ;;  %v1449_v4 = vpop.f32.mrb[82].mxu1 }
 0x2ac   : > { %v1732_v32 = vmax.f32 %v1730_v24, %v1731_v27  ;;  %v1744_v36 = vmax.f32 %v1445_v51, %v1449_v4  ;;  %v1451_v47 = vpop.f32.mrb[83].mxu1  ;;  %v8576_v49 = vpack.c.bf16 %v1449_v4, %v1445_v51 }
 0x2ad   : > { %v1741_v46 = vmax.f32 %v1739_v44, %v1740_v54  ;;  %v1753_v62 = vmax.f32 %v1447_v45, %v1451_v47  ;;  %v8578_v37 = vpack.c.bf16 %v1451_v47, %v1447_v45  ;;  %v1996_v44 = vunpack.c.l.b16 %v1868_v41 }
 0x2ae   : > { %11039 = vst [vmem:[#allocation27_spill] sm:$0xff] %v8576_v49  ;;  %v1733_v56 = vrot.slane %v1732_v32, 1  ;;  %3441 = vmatmul.mubr.bf16.gmra.mrb[188].mxu1 %v8505_v18  ;;  %v1997_v18 = vunpack.c.l.b16 %v1869_v40 }
 0x2af   : > { %11040 = vst [vmem:[#allocation28_spill] sm:$0xff] %v8578_v37  ;;  %v1742_v57 = vrot.slane %v1741_v46, 1  ;;  %3450 = vmatprep.mubr.bf16.mxu1 %v8530_v20 }
 0x2b0   : > { %v1734_v16 = vmax.f32 %v1732_v32, %v1733_v56 }
 0x2b1   : > { %v1743_v55 = vmax.f32 %v1741_v46, %v1742_v57  ;;  %v1455_v21 = vpop.f32.mrb[84].mxu1 }
 0x2b2   : > { %v1870_v24 = vpack.c.bf16 %v1734_v16, %v1734_v16  ;;  %v1745_v27 = vmax.f32 %v1744_v36, %v1455_v21  ;;  %v1457_v51 = vpop.f32.mrb[85].mxu1 }
 0x2b3   : > { %v1871_v4 = vpack.c.bf16 %v1743_v55, %v1743_v55  ;;  %v1754_v15 = vmax.f32 %v1753_v62, %v1457_v51  ;;  %v1459_v26 = vpop.f32.mrb[86].mxu1 }
 0x2b4   : > { %v1998_v45 = vunpack.c.l.b16 %v1870_v24  ;;  %v1746_v54 = vmax.f32 %v1745_v27, %v1459_v26  ;;  %v1461_v47 = vpop.f32.mrb[87].mxu1  ;;  %v8582_v28 = vpack.c.bf16 %v1459_v26, %v1455_v21 }
 0x2b5   : > { %v1999_v35 = vunpack.c.l.b16 %v1871_v4  ;;  %v1755_v20 = vmax.f32 %v1754_v15, %v1461_v47  ;;  %v8584_v25 = vpack.c.bf16 %v1461_v47, %v1457_v51 }
 0x2b6   : > { %11041 = vst [vmem:[#allocation29_spill] sm:$0xff] %v8582_v28  ;;  %v2033_v56 = vsel %vm2012_vm2, %v1998_v45, %v1996_v44  ;;  %v1747_v32 = vrot.slane %v1746_v54, 4  ;;  %3451 = vmatmul.mubr.bf16.gmra.mrb[192].mxu1 %v8525_v12 }
 0x2b7   : > { %11042 = vst [vmem:[#allocation30_spill] sm:$0xff] %v8584_v25  ;;  %v2040_v36 = vsel %vm2012_vm2, %v1999_v35, %v1997_v18  ;;  %v1756_v62 = vrot.slane %v1755_v20, 4  ;;  %3460 = vmatprep.mubr.bf16.mxu1 %v8548_v59 }
 0x2b8   : > { %v1748_v52 = vmax.f32 %v1746_v54, %v1747_v32 }
 0x2b9   : > { %v1757_v46 = vmax.f32 %v1755_v20, %v1756_v62  ;;  %v1465_v57 = vpop.f32.mrb[88].mxu1 }
 0x2ba   : > { %v1749_v41 = vrot.slane %v1748_v52, 2  ;;  %v1467_v16 = vpop.f32.mrb[89].mxu1 }
 0x2bb   : > { %v1758_v40 = vrot.slane %v1757_v46, 2  ;;  %v1469_v55 = vpop.f32.mrb[90].mxu1 }
 0x2bc   : > { %v1750_v21 = vmax.f32 %v1748_v52, %v1749_v41  ;;  %v1762_v24 = vmax.f32 %v1465_v57, %v1469_v55  ;;  %v1471_v27 = vpop.f32.mrb[91].mxu1  ;;  %v8590_v51 = vpack.c.bf16 %v1469_v55, %v1465_v57 }
 0x2bd   : > { %v1759_v4 = vmax.f32 %v1757_v46, %v1758_v40  ;;  %v1771_v15 = vmax.f32 %v1467_v16, %v1471_v27  ;;  %v8592_v26 = vpack.c.bf16 %v1471_v27, %v1467_v16 }
 0x2be   : > { %11043 = vst [vmem:[#allocation31_spill] sm:$0xff] %v8590_v51  ;;  %v1751_v35 = vrot.slane %v1750_v21, 1  ;;  %3461 = vmatmul.mubr.bf16.gmra.mrb[196].mxu1 %v8543_v60 }
 0x2bf   : > { %11044 = vst [vmem:[#allocation32_spill] sm:$0xff] %v8592_v26  ;;  %v1760_v18 = vrot.slane %v1759_v4, 1  ;;  %3470 = vmatprep.mubr.bf16.mxu1 %v8566_v2 }
 0x2c0   : > { %v1752_v20 = vmax.f32 %v1750_v21, %v1751_v35 }
 0x2c1   : > { %v1761_v44 = vmax.f32 %v1759_v4, %v1760_v18  ;;  %v1475_v45 = vpop.f32.mrb[92].mxu1 }
 0x2c2   : > { %v1872_v54 = vpack.c.bf16 %v1752_v20, %v1752_v20  ;;  %v1763_v47 = vmax.f32 %v1762_v24, %v1475_v45  ;;  %v1477_v32 = vpop.f32.mrb[93].mxu1 }
 0x2c3   : > { %v1873_v62 = vpack.c.bf16 %v1761_v44, %v1761_v44  ;;  %v1772_v52 = vmax.f32 %v1771_v15, %v1477_v32  ;;  %v1479_v57 = vpop.f32.mrb[94].mxu1 }
 0x2c4   : > { %v2000_v41 = vunpack.c.l.b16 %v1872_v54  ;;  %v1764_v46 = vmax.f32 %v1763_v47, %v1479_v57  ;;  %v1481_v40 = vpop.f32.mrb[95].mxu1  ;;  %v8596_v16 = vpack.c.bf16 %v1479_v57, %v1475_v45 }
 0x2c5   : > { %v2001_v55 = vunpack.c.l.b16 %v1873_v62  ;;  %v1773_v27 = vmax.f32 %v1772_v52, %v1481_v40  ;;  %v8598_v60 = vpack.c.bf16 %v1481_v40, %v1477_v32 }
 0x2c6   : > { %11045 = vst [vmem:[#allocation33_spill] sm:$0xff] %v8596_v16  ;;  %v2034_v2 = vsel %vm2014_vm3, %v2000_v41, %v2033_v56  ;;  %v1765_v21 = vrot.slane %v1764_v46, 4  ;;  %3471 = vmatmul.mubr.bf16.gmra.mrb[200].mxu1 %v8564_v1 }
 0x2c7   : > { %11046 = vst [vmem:[#allocation34_spill] sm:$0xff] %v8598_v60  ;;  %v1774_v4 = vrot.slane %v1773_v27, 4  ;;  %3480 = vmatprep.mubr.bf16.mxu1 %v8572_v10  ;;  %v2041_v24 = vsel %vm2014_vm3, %v2001_v55, %v2040_v36 }
 0x2c8   : > { %v1766_v15 = vmax.f32 %v1764_v46, %v1765_v21 }
 0x2c9   : > { %v1775_v35 = vmax.f32 %v1773_v27, %v1774_v4  ;;  %v1485_v18 = vpop.f32.mrb[96].mxu1 }
 0x2ca   : > { %v1767_v20 = vrot.slane %v1766_v15, 2  ;;  %v1487_v44 = vpop.f32.mrb[97].mxu1 }
 0x2cb   : > { %v1776_v45 = vrot.slane %v1775_v35, 2  ;;  %v1489_v54 = vpop.f32.mrb[98].mxu1 }
 0x2cc   : > { %v1768_v47 = vmax.f32 %v1766_v15, %v1767_v20  ;;  %v1780_v32 = vmax.f32 %v1485_v18, %v1489_v54  ;;  %v1491_v62 = vpop.f32.mrb[99].mxu1  ;;  %v8604_v52 = vpack.c.bf16 %v1489_v54, %v1485_v18 }
 0x2cd   : > { %v1777_v56 = vmax.f32 %v1775_v35, %v1776_v45  ;;  %v1789_v57 = vmax.f32 %v1487_v44, %v1491_v62  ;;  %v8606_v41 = vpack.c.bf16 %v1491_v62, %v1487_v44 }
 0x2ce   : > { %11047 = vst [vmem:[#allocation35_spill] sm:$0xff] %v8604_v52  ;;  %v1769_v40 = vrot.slane %v1768_v47, 1  ;;  %3481 = vmatmul.mubr.bf16.gmra.mrb[204].mxu1 %v8570_v7 }
 0x2cf   : > { %11048 = vst [vmem:[#allocation36_spill] sm:$0xff] %v8606_v41  ;;  %v1778_v36 = vrot.slane %v1777_v56, 1  ;;  %3490 = vmatprep.mubr.bf16.mxu1 %v8578_v37 }
 0x2d0   : > { %v1770_v46 = vmax.f32 %v1768_v47, %v1769_v40 }
 0x2d1   : > { %v1779_v55 = vmax.f32 %v1777_v56, %v1778_v36  ;;  %v1495_v27 = vpop.f32.mrb[100].mxu1 }
 0x2d2   : > { %v1874_v21 = vpack.c.bf16 %v1770_v46, %v1770_v46  ;;  %v1781_v4 = vmax.f32 %v1780_v32, %v1495_v27  ;;  %v1497_v15 = vpop.f32.mrb[101].mxu1 }
 0x2d3   : > { %v1875_v20 = vpack.c.bf16 %v1779_v55, %v1779_v55  ;;  %v1790_v10 = vmax.f32 %v1789_v57, %v1497_v15  ;;  %v1499_v18 = vpop.f32.mrb[102].mxu1 }
 0x2d4   : > { %v2002_v54 = vunpack.c.l.b16 %v1874_v21  ;;  %v1782_v35 = vmax.f32 %v1781_v4, %v1499_v18  ;;  %v1501_v45 = vpop.f32.mrb[103].mxu1  ;;  %v8610_v44 = vpack.c.bf16 %v1499_v18, %v1495_v27 }
 0x2d5   : > { %v2003_v62 = vunpack.c.l.b16 %v1875_v20  ;;  %v1791_v1 = vmax.f32 %v1790_v10, %v1501_v45  ;;  %v8612_v7 = vpack.c.bf16 %v1501_v45, %v1497_v15 }
 0x2d6   : > { %11049 = vst [vmem:[#allocation37_spill] sm:$0xff] %v8610_v44  ;;  %v2035_v37 = vsel %vm2016_vm4, %v2002_v54, %v2034_v2  ;;  %v1783_v47 = vrot.slane %v1782_v35, 4  ;;  %3491 = vmatmul.mubr.bf16.gmra.mrb[208].mxu1 %v8576_v49 }
 0x2d7   : > { %11050 = vst [vmem:[#allocation38_spill] sm:$0xff] %v8612_v7  ;;  %v1792_v56 = vrot.slane %v1791_v1, 4  ;;  %3500 = vmatprep.mubr.bf16.mxu1 %v8584_v25  ;;  %v2042_v32 = vsel %vm2016_vm4, %v2003_v62, %v2041_v24 }
 0x2d8   : > { %v1784_v57 = vmax.f32 %v1782_v35, %v1783_v47 }
 0x2d9   : > { %v1793_v40 = vmax.f32 %v1791_v1, %v1792_v56  ;;  %v1505_v36 = vpop.f32.mrb[104].mxu1 }
 0x2da   : > { %v1785_v46 = vrot.slane %v1784_v57, 2  ;;  %v1507_v55 = vpop.f32.mrb[105].mxu1 }
 0x2db   : > { %v1794_v27 = vrot.slane %v1793_v40, 2  ;;  %v1509_v21 = vpop.f32.mrb[106].mxu1 }
 0x2dc   : > { %v1786_v10 = vmax.f32 %v1784_v57, %v1785_v46  ;;  %v1798_v4 = vmax.f32 %v1505_v36, %v1509_v21  ;;  %v1511_v15 = vpop.f32.mrb[107].mxu1  ;;  %v8618_v20 = vpack.c.bf16 %v1509_v21, %v1505_v36 }
 0x2dd   : > { %v1795_v2 = vmax.f32 %v1793_v40, %v1794_v27  ;;  %v1807_v18 = vmax.f32 %v1507_v55, %v1511_v15  ;;  %v8620_v54 = vpack.c.bf16 %v1511_v15, %v1507_v55 }
 0x2de   : > { %11051 = vst [vmem:[#allocation39_spill] sm:$0xff] %v8618_v20  ;;  %v1787_v45 = vrot.slane %v1786_v10, 1  ;;  %3501 = vmatmul.mubr.bf16.gmra.mrb[212].mxu1 %v8582_v28 }
 0x2df   : > { %11052 = vst [vmem:[#allocation40_spill] sm:$0xff] %v8620_v54  ;;  %v1796_v24 = vrot.slane %v1795_v2, 1  ;;  %3510 = vmatprep.mubr.bf16.mxu1 %v8592_v26 }
 0x2e0   : > { %v1788_v1 = vmax.f32 %v1786_v10, %v1787_v45 }
 0x2e1   : > { %v1797_v35 = vmax.f32 %v1795_v2, %v1796_v24  ;;  %v1515_v62 = vpop.f32.mrb[108].mxu1 }
 0x2e2   : > { %v1876_v47 = vpack.c.bf16 %v1788_v1, %v1788_v1  ;;  %v1799_v56 = vmax.f32 %v1798_v4, %v1515_v62  ;;  %v1517_v57 = vpop.f32.mrb[109].mxu1 }
 0x2e3   : > { %v1877_v46 = vpack.c.bf16 %v1797_v35, %v1797_v35  ;;  %v1808_v25 = vmax.f32 %v1807_v18, %v1517_v57  ;;  %v1519_v36 = vpop.f32.mrb[110].mxu1 }
 0x2e4   : > { %v2004_v21 = vunpack.c.l.b16 %v1876_v47  ;;  %v1800_v40 = vmax.f32 %v1799_v56, %v1519_v36  ;;  %v1521_v27 = vpop.f32.mrb[111].mxu1  ;;  %v8624_v55 = vpack.c.bf16 %v1519_v36, %v1515_v62 }
 0x2e5   : > { %v2005_v15 = vunpack.c.l.b16 %v1877_v46  ;;  %v1809_v49 = vmax.f32 %v1808_v25, %v1521_v27  ;;  %v8626_v28 = vpack.c.bf16 %v1521_v27, %v1517_v57 }
 0x2e6   : > { %11053 = vst [vmem:[#allocation41_spill] sm:$0xff] %v8624_v55  ;;  %v2036_v26 = vsel %vm2018_vm5, %v2004_v21, %v2035_v37  ;;  %v1801_v10 = vrot.slane %v1800_v40, 4  ;;  %3511 = vmatmul.mubr.bf16.gmra.mrb[216].mxu1 %v8590_v51 }
 0x2e7   : > { %11054 = vst [vmem:[#allocation42_spill] sm:$0xff] %v8626_v28  ;;  %v1810_v2 = vrot.slane %v1809_v49, 4  ;;  %3520 = vmatprep.mubr.bf16.mxu1 %v8598_v60  ;;  %v2043_v4 = vsel %vm2018_vm5, %v2005_v15, %v2042_v32 }
 0x2e8   : > { %v1802_v18 = vmax.f32 %v1800_v40, %v1801_v10 }
 0x2e9   : > { %v1811_v45 = vmax.f32 %v1809_v49, %v1810_v2  ;;  %v1525_v24 = vpop.f32.mrb[112].mxu1 }
 0x2ea   : > { %v1803_v1 = vrot.slane %v1802_v18, 2  ;;  %v1527_v35 = vpop.f32.mrb[113].mxu1 }
 0x2eb   : > { %v1812_v62 = vrot.slane %v1811_v45, 2  ;;  %v1529_v47 = vpop.f32.mrb[114].mxu1 }
 0x2ec   : > { %v1804_v25 = vmax.f32 %v1802_v18, %v1803_v1  ;;  %v1816_v56 = vmax.f32 %v1525_v24, %v1529_v47  ;;  %v1531_v57 = vpop.f32.mrb[115].mxu1  ;;  %v8632_v46 = vpack.c.bf16 %v1529_v47, %v1525_v24 }
 0x2ed   : > { %v1813_v37 = vmax.f32 %v1811_v45, %v1812_v62  ;;  %v1825_v36 = vmax.f32 %v1527_v35, %v1531_v57  ;;  %v8634_v21 = vpack.c.bf16 %v1531_v57, %v1527_v35 }
 0x2ee   : > { %11055 = vst [vmem:[#allocation43_spill] sm:$0xff] %v8632_v46  ;;  %v1805_v27 = vrot.slane %v1804_v25, 1  ;;  %3521 = vmatmul.mubr.bf16.gmra.mrb[220].mxu1 %v8596_v16 }
 0x2ef   : > { %11056 = vst [vmem:[#allocation44_spill] sm:$0xff] %v8634_v21  ;;  %v1814_v32 = vrot.slane %v1813_v37, 1  ;;  %3530 = vmatprep.mubr.bf16.mxu1 %v8606_v41 }
 0x2f0   : > { %v1806_v49 = vmax.f32 %v1804_v25, %v1805_v27 }
 0x2f1   : > { %v1815_v40 = vmax.f32 %v1813_v37, %v1814_v32  ;;  %v1535_v15 = vpop.f32.mrb[116].mxu1 }
 0x2f2   : > { %v1878_v10 = vpack.c.bf16 %v1806_v49, %v1806_v49  ;;  %v1817_v2 = vmax.f32 %v1816_v56, %v1535_v15  ;;  %v1537_v18 = vpop.f32.mrb[117].mxu1 }
 0x2f3   : > { %v1879_v1 = vpack.c.bf16 %v1815_v40, %v1815_v40  ;;  %v1826_v60 = vmax.f32 %v1825_v36, %v1537_v18  ;;  %v1539_v24 = vpop.f32.mrb[118].mxu1 }
 0x2f4   : > { %v2006_v47 = vunpack.c.l.b16 %v1878_v10  ;;  %v1818_v45 = vmax.f32 %v1817_v2, %v1539_v24  ;;  %v1541_v62 = vpop.f32.mrb[119].mxu1  ;;  %v8638_v35 = vpack.c.bf16 %v1539_v24, %v1535_v15 }
 0x2f5   : > { %v2007_v57 = vunpack.c.l.b16 %v1879_v1  ;;  %v1827_v51 = vmax.f32 %v1826_v60, %v1541_v62  ;;  %v8640_v16 = vpack.c.bf16 %v1541_v62, %v1537_v18 }
 0x2f6   : > { %11057 = vst [vmem:[#allocation45_spill] sm:$0xff] %v8638_v35  ;;  %v2037_v41 = vsel %vm2020_vm6, %v2006_v47, %v2036_v26  ;;  %v1819_v25 = vrot.slane %v1818_v45, 4  ;;  %3531 = vmatmul.mubr.bf16.gmra.mrb[224].mxu1 %v8604_v52 }
 0x2f7   : > { %11058 = vst [vmem:[#allocation46_spill] sm:$0xff] %v8640_v16  ;;  %v1828_v37 = vrot.slane %v1827_v51, 4  ;;  %3540 = vmatprep.mubr.bf16.mxu1 %v8612_v7  ;;  %v2044_v56 = vsel %vm2020_vm6, %v2007_v57, %v2043_v4 }
 0x2f8   : > { %v1820_v36 = vmax.f32 %v1818_v45, %v1819_v25 }
 0x2f9   : > { %v1829_v27 = vmax.f32 %v1827_v51, %v1828_v37  ;;  %v1545_v32 = vpop.f32.mrb[120].mxu1 }
 0x2fa   : > { %v1821_v49 = vrot.slane %v1820_v36, 2  ;;  %v1547_v40 = vpop.f32.mrb[121].mxu1 }
 0x2fb   : > { %v1830_v15 = vrot.slane %v1829_v27, 2  ;;  %v1549_v10 = vpop.f32.mrb[122].mxu1 }
 0x2fc   : > { %v1822_v60 = vmax.f32 %v1820_v36, %v1821_v49  ;;  %v1834_v2 = vmax.f32 %v1545_v32, %v1549_v10  ;;  %v8646_v18 = vpack.c.bf16 %v1549_v10, %v1545_v32  ;;  %v1551_v26 = vpop.f32.mrb[123].mxu1 }
 0x2fd   : > { %v1831_v1 = vmax.f32 %v1829_v27, %v1830_v15  ;;  %v1843_v24 = vmax.f32 %v1547_v40, %v1551_v26  ;;  %v8648_v47 = vpack.c.bf16 %v1551_v26, %v1547_v40 }
 0x2fe   : > { %11059 = vst [vmem:[#allocation47_spill] sm:$0xff] %v8646_v18  ;;  %v1823_v62 = vrot.slane %v1822_v60, 1  ;;  %3541 = vmatmul.mubr.bf16.gmra.mrb[228].mxu1 %v8610_v44 }
 0x2ff   : > { %11060 = vst [vmem:[#allocation48_spill] sm:$0xff] %v8648_v47  ;;  %v1832_v4 = vrot.slane %v1831_v1, 1  ;;  %3550 = vmatprep.mubr.bf16.mxu1 %v8620_v54  ;;  %v7454_v54 = vld [vmem:[%s10923_s4 + $0x1c8] ss:$16 sps:$4 sm:$0xff]  }
 0x300   : > { %v1824_v51 = vmax.f32 %v1822_v60, %v1823_v62 }
 0x301   : > { %v1833_v45 = vmax.f32 %v1831_v1, %v1832_v4  ;;  %v1555_v57 = vpop.f32.mrb[124].mxu1 }
 0x302   : > { %v1880_v25 = vpack.c.bf16 %v1824_v51, %v1824_v51  ;;  %v1835_v37 = vmax.f32 %v1834_v2, %v1555_v57  ;;  %v1557_v36 = vpop.f32.mrb[125].mxu1 }
 0x303   : > { %v1844_v49 = vmax.f32 %v1843_v24, %v1557_v36  ;;  %v1559_v32 = vpop.f32.mrb[126].mxu1  ;;  %v1881_v10 = vpack.c.bf16 %v1833_v45, %v1833_v45 }
 0x304   : > { %v2008_v7 = vunpack.c.l.b16 %v1880_v25  ;;  %v1836_v27 = vmax.f32 %v1835_v37, %v1559_v32  ;;  %v8652_v15 = vpack.c.bf16 %v1559_v32, %v1555_v57  ;;  %v1561_v40 = vpop.f32.mrb[127].mxu1 }
 0x305   : > { %v1845_v26 = vmax.f32 %v1844_v49, %v1561_v40  ;;  %v8654_v52 = vpack.c.bf16 %v1561_v40, %v1557_v36  ;;  %v2009_v44 = vunpack.c.l.b16 %v1881_v10 }
 0x306   : > { %11061 = vst [vmem:[#allocation49_spill] sm:$0xff] %v8652_v15  ;;  %v1837_v59 = vrot.slane %v1836_v27, 4  ;;  %3551 = vmatmul.mubr.bf16.gmra.mrb[232].mxu1 %v8618_v20  ;;  %v2038_v60 = vsel %vm2022_vm7, %v2008_v7, %v2037_v41  ;;  %v7525_v20 = vld [vmem:[#allocation5 + $0x114] ss:$8 sps:$4 sm:$0xff]  }
 0x307   : > { %11062 = vst [vmem:[#allocation50_spill] sm:$0xff] %v8654_v52  ;;  %v1846_v1 = vrot.slane %v1845_v26, 4  ;;  %3560 = vmatprep.mubr.bf16.mxu1 %v8626_v28  ;;  %v2045_v2 = vsel %vm2022_vm7, %v2009_v44, %v2044_v56  ;;  %v7523_v28 = vld [vmem:[#allocation5 + $0x110] ss:$8 sps:$4 sm:$0xff]  }
 0x308   : > { %v1838_v24 = vmax.f32 %v1836_v27, %v1837_v59 }
 0x309   : > { %v1847_v62 = vmax.f32 %v1845_v26, %v1846_v1  ;;  %v8660_v4 = vpop.f32.mrb[128].mxu1 }
 0x30a   : > { %11063 = vst [vmem:[#allocation51_spill] sm:$0xff] %v8660_v4  ;;  %v1839_v51 = vrot.slane %v1838_v24, 2  ;;  %v8662_v45 = vpop.f32.mrb[129].mxu1 }
 0x30b   : > { %11064 = vst [vmem:[#allocation52_spill] sm:$0xff] %v8662_v45  ;;  %v1848_v57 = vrot.slane %v1847_v62, 2  ;;  %v8664_v25 = vpop.f32.mrb[130].mxu1  ;;  %v7436_v45 = vld [vmem:[%s10923_s4 + $0x108] ss:$16 sps:$4 sm:$0xff]  }
 0x30c   : > { %11065 = vst [vmem:[#allocation53_spill] sm:$0xff] %v8664_v25  ;;  %v1840_v37 = vmax.f32 %v1838_v24, %v1839_v51  ;;  %v8666_v36 = vpop.f32.mrb[131].mxu1 }
 0x30d   : > { %11066 = vst [vmem:[#allocation54_spill] sm:$0xff] %v8666_v36  ;;  %v1849_v49 = vmax.f32 %v1847_v62, %v1848_v57 }
 0x30e   : > { %v1841_v7 = vrot.slane %v1840_v37, 1  ;;  %3561 = vmatmul.mubr.bf16.gmra.mrb[236].mxu1 %v8624_v55 }
 0x30f   : > { %v1850_v41 = vrot.slane %v1849_v49, 1  ;;  %3570 = vmatprep.mubr.bf16.mxu1 %v8634_v21 }
 0x310   : > { %v1842_v59 = vmax.f32 %v1840_v37, %v1841_v7 }
 0x311   : > { %v1851_v44 = vmax.f32 %v1849_v49, %v1850_v41  ;;  %v8670_v56 = vpop.f32.mrb[132].mxu1  ;;  %v7412_v49 = vld [vmem:[%s10923_s4 + $0x8] ss:$16 sps:$4 sm:$0xff]   ;;  %v7417_v41 = vld [vmem:[%s10923_s4 + $0x2c] ss:$16 sps:$4 sm:$0xff]  }
 0x312   : > { %11067 = vst [vmem:[#allocation55_spill] sm:$0xff] %v8670_v56  ;;  %v1882_v32 = vpack.c.bf16 %v1842_v59, %v1842_v59  ;;  %v8672_v10 = vpop.f32.mrb[133].mxu1  ;;  %v7420_v59 = vld [vmem:[%s10923_s4 + $0x4c] ss:$16 sps:$4 sm:$0xff]  }
 0x313   : > { %11068 = vst [vmem:[#allocation56_spill] sm:$0xff] %v8672_v10  ;;  %v1883_v27 = vpack.c.bf16 %v1851_v44, %v1851_v44  ;;  %v8674_v40 = vpop.f32.mrb[134].mxu1  ;;  %v7418_v44 = vld [vmem:[%s10923_s4 + $0x48] ss:$16 sps:$4 sm:$0xff]  }
 0x314   : > { %11069 = vst [vmem:[#allocation57_spill] sm:$0xff] %v8674_v40  ;;  %v2010_v26 = vunpack.c.l.b16 %v1882_v32  ;;  %v8676_v1 = vpop.f32.mrb[135].mxu1  ;;  %v7430_v40 = vld [vmem:[%s10923_s4 + $0xc8] ss:$16 sps:$4 sm:$0xff]  }
 0x315   : > { %11070 = vst [vmem:[#allocation58_spill] sm:$0xff] %v8676_v1  ;;  %v2011_v24 = vunpack.c.l.b16 %v1883_v27  ;;  %v7423_v27 = vld [vmem:[%s10923_s4 + $0x6c] ss:$16 sps:$4 sm:$0xff]  }
 0x316   : > { %3571 = vmatmul.mubr.bf16.gmra.mrb[240].mxu1 %v8632_v46  ;;  %v2039_v62 = vsel %vm2024_vm8, %v2010_v26, %v2038_v60 }
 0x317   : > { %3580 = vmatprep.mubr.bf16.mxu1 %v8640_v16  ;;  %v2046_v51 = vsel %vm2024_vm8, %v2011_v24, %v2045_v2  ;;  %v8683_v57 = vpack.c.b16 %v2039_v62, %v8555_v8 }
 0x318   : > { %v2048_v37 = vpack.c.b16 %v2046_v51, %v8559_v11  ;;  %v7415_v11 = vld [vmem:[%s10923_s4 + $0x28] ss:$16 sps:$4 sm:$0xff]  }
 0x319   : > { %v8689_v7 = vpop.f32.mrb[136].mxu1  ;;  %v7421_v51 = vld [vmem:[%s10923_s4 + $0x68] ss:$16 sps:$4 sm:$0xff]  }
 0x31a   : > { %2403 = vmatprep.mubr.bf16.mxu0 %v2048_v37  ;;  %v8694_v60 = vpop.f32.mrb[137].mxu1 }
 0x31b   : > { %2404 = vmatmul.mubr.bf16.vlgmr.msra.gmra.mrb[64].mxu0 %v8683_v57  ;;  %v8697_v2 = vpop.f32.mrb[138].mxu1 }
 0x31c   : > { %2415 = vmatpush1.bf16.msra.mxu0 %v7412_v49  ;;  %2446 = vmatprep.mubr.bf16.mxu0 %v2048_v37  ;;  %v8699_v8 = vpop.f32.mrb[139].mxu1  ;;  %v7426_v37 = vld [vmem:[%s10923_s4 + $0x8c] ss:$16 sps:$4 sm:$0xff]   ;;  %v7424_v49 = vld [vmem:[%s10923_s4 + $0x88] ss:$16 sps:$4 sm:$0xff]  }
 0x31d   : > { %2416 = vmatprep.subr.bf16.mxu0 %v7417_v41 }
 0x31e   : > { %3581 = vmatmul.mubr.bf16.gmra.mrb[244].mxu1 %v8638_v35 }
 0x31f   : > { %3590 = vmatprep.mubr.bf16.mxu1 %v8648_v47 }
 0x320   : > { %2417 = vmatpush1.bf16.msra.mxu0 %v7415_v11  ;;  %v7429_v11 = vld [vmem:[%s10923_s4 + $0xac] ss:$16 sps:$4 sm:$0xff]  }
 0x321   : > { %v8712_v32 = vpop.f32.mrb[140].mxu1  ;;  %2418 = vmatprep.subr.bf16.mxu0 %v7420_v59 }
 0x322   : > { %v8717_v26 = vpop.f32.mrb[141].mxu1 }
 0x323   : > { %v8719_v24 = vpop.f32.mrb[142].mxu1 }
 0x324   : > { %2419 = vmatpush1.bf16.msra.mxu0 %v7418_v44  ;;  %v8721_v62 = vpop.f32.mrb[143].mxu1 }
 0x325   : > { %2420 = vmatprep.subr.bf16.mxu0 %v7423_v27 }
 0x326   : > { %3591 = vmatmul.mubr.bf16.gmra.mrb[248].mxu1 %v8646_v18  ;;  %v7442_v18 = vld [vmem:[%s10923_s4 + $0x148] ss:$16 sps:$4 sm:$0xff]  }
 0x327   : > { %3600 = vmatprep.mubr.bf16.mxu1 %v8654_v52  ;;  %v8789_v52 = vld [vmem:[#allocation5 + $0x104] ss:$8 sps:$4 sm:$0xff]  }
 0x328   : > { %2421 = vmatpush1.bf16.msra.mxu0 %v7421_v51  ;;  %v7427_v51 = vld [vmem:[%s10923_s4 + $0xa8] ss:$16 sps:$4 sm:$0xff]   ;;  %7066 = vmatprep.subr.bf16.mxu1 %v8789_v52 }
 0x329   : > { %v8734_v41 = vpop.f32.mrb[144].mxu1  ;;  %2422 = vmatprep.subr.bf16.mxu0 %v7426_v37  ;;  %v7432_v37 = vld [vmem:[%s10923_s4 + $0xcc] ss:$16 sps:$4 sm:$0xff]  }
 0x32a   : > { %v8739_v59 = vpop.f32.mrb[145].mxu1 }
 0x32b   : > { %v8741_v44 = vpop.f32.mrb[146].mxu1 }
 0x32c   : > { %2423 = vmatpush1.bf16.msra.mxu0 %v7424_v49  ;;  %v8743_v27 = vpop.f32.mrb[147].mxu1  ;;  %v7435_v49 = vld [vmem:[%s10923_s4 + $0xec] ss:$16 sps:$4 sm:$0xff]  }
 0x32d   : > { %2424 = vmatprep.subr.bf16.mxu0 %v7429_v11 }
 0x32e   : > { %3601 = vmatmul.mubr.bf16.gmra.mrb[252].mxu1 %v8652_v15  ;;  %v7517_v15 = vld [vmem:[#allocation5 + $0x100] ss:$8 sps:$4 sm:$0xff]  }
 0x32f   : > { %7082 = vmatpush1.bf16.msra.mxu1 %v7517_v15  ;;  %v7445_v15 = vld [vmem:[%s10923_s4 + $0x168] ss:$16 sps:$4 sm:$0xff]  }
 0x330   : > { %2425 = vmatpush1.bf16.msra.mxu0 %v7427_v51  ;;  %v7433_v51 = vld [vmem:[%s10923_s4 + $0xe8] ss:$16 sps:$4 sm:$0xff]   ;;  %7067 = vmatprep.subr.bf16.mxu1 %v7525_v20  ;;  %v7462_v20 = vld [vmem:[%s10924_s5 + $0x4] ss:$16 sps:$4 sm:$0xff]  }
 0x331   : > { %v8755_v1 = vpop.f32.mrb[148].mxu1  ;;  %2426 = vmatprep.subr.bf16.mxu0 %v7432_v37  ;;  %v7438_v37 = vld [vmem:[%s10923_s4 + $0x10c] ss:$16 sps:$4 sm:$0xff]  }
 0x332   : > { %v8760_v10 = vpop.f32.mrb[149].mxu1 }
 0x333   : > { %v8762_v11 = vpop.f32.mrb[150].mxu1  ;;  %7083 = vmatpush1.bf16.msra.mxu1 %v7523_v28  ;;  %v7457_v28 = vld [vmem:[%s10923_s4 + $0x1e8] ss:$16 sps:$4 sm:$0xff]  }
 0x334   : > { %2427 = vmatpush1.bf16.msra.mxu0 %v7430_v40  ;;  %v8764_v36 = vpop.f32.mrb[151].mxu1  ;;  %v7441_v40 = vld [vmem:[%s10923_s4 + $0x12c] ss:$16 sps:$4 sm:$0xff]  }
 0x335   : > { %2428 = vmatprep.subr.bf16.mxu0 %v7435_v49  ;;  %v7439_v49 = vld [vmem:[%s10923_s4 + $0x128] ss:$16 sps:$4 sm:$0xff]  }
 0x338   : > { %2429 = vmatpush1.bf16.msra.mxu0 %v7433_v51 }
 0x339   : > { %v8775_v56 = vpop.f32.mrb[152].mxu1  ;;  %2430 = vmatprep.subr.bf16.mxu0 %v7438_v37  ;;  %v7444_v37 = vld [vmem:[%s10923_s4 + $0x14c] ss:$16 sps:$4 sm:$0xff]  }
 0x33a   : > { %v8780_v25 = vpop.f32.mrb[153].mxu1 }
 0x33b   : > { %v8782_v4 = vpop.f32.mrb[154].mxu1 }
 0x33c   : > { %2431 = vmatpush1.bf16.msra.mxu0 %v7436_v45  ;;  %v8787_v51 = vpop.f32.mrb[155].mxu1  ;;  %v7447_v45 = vld [vmem:[%s10923_s4 + $0x16c] ss:$16 sps:$4 sm:$0xff]  }
 0x33d   : > { %2432 = vmatprep.subr.bf16.mxu0 %v7441_v40 }
 0x340   : > { %2433 = vmatpush1.bf16.msra.mxu0 %v7439_v49  ;;  %v7450_v49 = vld [vmem:[%s10923_s4 + $0x18c] ss:$16 sps:$4 sm:$0xff]  }
 0x341   : > { %v8798_v47 = vpop.f32.mrb[156].mxu1  ;;  %2434 = vmatprep.subr.bf16.mxu0 %v7444_v37  ;;  %v7448_v37 = vld [vmem:[%s10923_s4 + $0x188] ss:$16 sps:$4 sm:$0xff]  }
 0x342   : > { %v8803_v40 = vpop.f32.mrb[157].mxu1 }
 0x343   : > { %v8805_v35 = vpop.f32.mrb[158].mxu1 }
 0x344   : > { %2435 = vmatpush1.bf16.msra.mxu0 %v7442_v18  ;;  %v8807_v16 = vpop.f32.mrb[159].mxu1  ;;  %v7453_v18 = vld [vmem:[%s10923_s4 + $0x1ac] ss:$16 sps:$4 sm:$0xff]  }
 0x345   : > { %2436 = vmatprep.subr.bf16.mxu0 %v7447_v45  ;;  %v7451_v45 = vld [vmem:[%s10923_s4 + $0x1a8] ss:$16 sps:$4 sm:$0xff]  }
 0x348   : > { %2437 = vmatpush1.bf16.msra.mxu0 %v7445_v15 }
 0x349   : > { %v8818_v46 = vpop.f32.mrb[160].mxu1  ;;  %2438 = vmatprep.subr.bf16.mxu0 %v7450_v49  ;;  %v7456_v49 = vld [vmem:[%s10923_s4 + $0x1cc] ss:$16 sps:$4 sm:$0xff]  }
 0x34a   : > { %11071 = vst [vmem:[#allocation59_spill] sm:$0xff] %v8818_v46  ;;  %v8823_v21 = vpop.f32.mrb[161].mxu1 }
 0x34b   : > { %v8825_v55 = vpop.f32.mrb[162].mxu1 }
 0x34c   : > { %11072 = vst [vmem:[#allocation60_spill] sm:$0xff] %v8825_v55  ;;  %2439 = vmatpush1.bf16.msra.mxu0 %v7448_v37  ;;  %v8830_v15 = vpop.f32.mrb[163].mxu1  ;;  %v7459_v37 = vld [vmem:[%s10923_s4 + $0x1ec] ss:$16 sps:$4 sm:$0xff]  }
 0x34d   : > { %11073 = vst [vmem:[#allocation61_spill] sm:$0xff] %v8830_v15  ;;  %2440 = vmatprep.subr.bf16.mxu0 %v7453_v18 }
 0x350   : > { %2441 = vmatpush1.bf16.msra.mxu0 %v7451_v45  ;;  %v7460_v45 = vld [vmem:[%s10924_s5] ss:$16 sps:$4 sm:$0xff]  }
 0x351   : > { %v8838_v55 = vpop.f32.mrb[164].mxu1  ;;  %2442 = vmatprep.subr.bf16.mxu0 %v7456_v49 }
 0x352   : > { %11074 = vst [vmem:[#allocation62_spill] sm:$0xff] %v8838_v55  ;;  %v8843_v46 = vpop.f32.mrb[165].mxu1 }
 0x353   : > { %11075 = vst [vmem:[#allocation63_spill] sm:$0xff] %v8843_v46  ;;  %v8845_v18 = vpop.f32.mrb[166].mxu1 }
 0x354   : > { %11076 = vst [vmem:[#allocation64_spill] sm:$0xff] %v8845_v18  ;;  %2443 = vmatpush1.bf16.msra.mxu0 %v7454_v54  ;;  %v8847_v15 = vpop.f32.mrb[167].mxu1  ;;  %v7465_v54 = vld [vmem:[%s10924_s5 + $0x24] ss:$16 sps:$4 sm:$0xff]  }
 0x355   : > { %11077 = vst [vmem:[#allocation65_spill] sm:$0xff] %v8847_v15  ;;  %2444 = vmatprep.subr.bf16.mxu0 %v7459_v37  ;;  %v7555_v15 = vld [vmem:[#allocation5 + $0x164] ss:$8 sps:$4 sm:$0xff]  }
 0x358   : > { %2445 = vmatpush1.bf16.msra.mxu0 %v7457_v28  ;;  %v7463_v28 = vld [vmem:[%s10924_s5 + $0x20] ss:$16 sps:$4 sm:$0xff]  }
 0x359   : > { %v8858_v49 = vpop.f32.mrb[168].mxu1  ;;  %2905 = vmatprep.subr.bf16.mxu0 %v7462_v20  ;;  %v7529_v20 = vld [vmem:[#allocation5 + $0x120] ss:$8 sps:$4 sm:$0xff]  }
 0x35a   : > { %11078 = vst [vmem:[#allocation66_spill] sm:$0xff] %v8858_v49  ;;  %v8863_v18 = vpop.f32.mrb[169].mxu1  ;;  %v7531_v49 = vld [vmem:[#allocation5 + $0x124] ss:$8 sps:$4 sm:$0xff]  }
 0x35b   : > { %11079 = vst [vmem:[#allocation67_spill] sm:$0xff] %v8863_v18  ;;  %2447 = vmatmul.mubr.bf16.vlgmr.msra.gmra.mrb[68].mxu0 %v8683_v57  ;;  %v8866_v37 = vpop.f32.mrb[170].mxu1  ;;  %v7468_v18 = vld [vmem:[%s10924_s5 + $0x44] ss:$16 sps:$4 sm:$0xff]   ;;  %7068 = vmatprep.subr.bf16.mxu1 %v7531_v49  ;;  %v7466_v57 = vld [vmem:[%s10924_s5 + $0x40] ss:$16 sps:$4 sm:$0xff]  }
 0x35c   : > { %11080 = vst [vmem:[#allocation68_spill] sm:$0xff] %v8866_v37  ;;  %2906 = vmatpush1.bf16.msra.mxu0 %v7460_v45  ;;  %2937 = vmatprep.mubr.bf16.mxu0 %v8341_v13  ;;  %v8872_v55 = vpop.f32.mrb[171].mxu1  ;;  %v7471_v13 = vld [vmem:[%s10924_s5 + $0x64] ss:$16 sps:$4 sm:$0xff]   ;;  %v7469_v49 = vld [vmem:[%s10924_s5 + $0x60] ss:$16 sps:$4 sm:$0xff]  }
 0x35d   : > { %11081 = vst [vmem:[#allocation69_spill] sm:$0xff] %v8872_v55  ;;  %2907 = vmatprep.subr.bf16.mxu0 %v7465_v54  ;;  %7084 = vmatpush1.bf16.msra.mxu1 %v7529_v20 }
 0x360   : > { %2908 = vmatpush1.bf16.msra.mxu0 %v7463_v28  ;;  %v7472_v28 = vld [vmem:[%s10924_s5 + $0x80] ss:$16 sps:$4 sm:$0xff]  }
 0x361   : > { %v8880_v37 = vpop.f32.mrb[172].mxu1  ;;  %2909 = vmatprep.subr.bf16.mxu0 %v7468_v18  ;;  %v7474_v18 = vld [vmem:[%s10924_s5 + $0x84] ss:$16 sps:$4 sm:$0xff]  }
 0x362   : > { %11082 = vst [vmem:[#allocation70_spill] sm:$0xff] %v8880_v37  ;;  %v8885_v45 = vpop.f32.mrb[173].mxu1 }
 0x363   : > { %11083 = vst [vmem:[#allocation71_spill] sm:$0xff] %v8885_v45  ;;  %v8887_v54 = vpop.f32.mrb[174].mxu1  ;;  %v7537_v45 = vld [vmem:[#allocation5 + $0x134] ss:$8 sps:$4 sm:$0xff]  }
 0x364   : > { %11084 = vst [vmem:[#allocation72_spill] sm:$0xff] %v8887_v54  ;;  %2910 = vmatpush1.bf16.msra.mxu0 %v7466_v57  ;;  %v8889_v55 = vpop.f32.mrb[175].mxu1  ;;  %v7477_v57 = vld [vmem:[%s10924_s5 + $0xa4] ss:$16 sps:$4 sm:$0xff]   ;;  %7069 = vmatprep.subr.bf16.mxu1 %v7537_v45 }
 0x365   : > { %11085 = vst [vmem:[#allocation73_spill] sm:$0xff] %v8889_v55  ;;  %2911 = vmatprep.subr.bf16.mxu0 %v7471_v13  ;;  %v7475_v13 = vld [vmem:[%s10924_s5 + $0xa0] ss:$16 sps:$4 sm:$0xff]   ;;  %v7486_v45 = vld [vmem:[%s10924_s5 + $0x104] ss:$16 sps:$4 sm:$0xff]  }
 0x366   : > { %v7535_v55 = vld [vmem:[#allocation5 + $0x130] ss:$8 sps:$4 sm:$0xff]  }
 0x367   : > { %7085 = vmatpush1.bf16.msra.mxu1 %v7535_v55  ;;  %v7481_v55 = vld [vmem:[%s10924_s5 + $0xe0] ss:$16 sps:$4 sm:$0xff]  }
 0x368   : > { %2912 = vmatpush1.bf16.msra.mxu0 %v7469_v49 }
 0x369   : > { %v8900_v20 = vpop.f32.mrb[176].mxu1  ;;  %2913 = vmatprep.subr.bf16.mxu0 %v7474_v18  ;;  %v7480_v18 = vld [vmem:[%s10924_s5 + $0xc4] ss:$16 sps:$4 sm:$0xff]  }
 0x36a   : > { %11086 = vst [vmem:[#allocation74_spill] sm:$0xff] %v8900_v20  ;;  %v8905_v54 = vpop.f32.mrb[177].mxu1 }
 0x36b   : > { %11087 = vst [vmem:[#allocation75_spill] sm:$0xff] %v8905_v54  ;;  %v8907_v37 = vpop.f32.mrb[178].mxu1 }
 0x36c   : > { %11088 = vst [vmem:[#allocation76_spill] sm:$0xff] %v8907_v37  ;;  %2914 = vmatpush1.bf16.msra.mxu0 %v7472_v28  ;;  %v8912_v49 = vpop.f32.mrb[179].mxu1  ;;  %v7478_v37 = vld [vmem:[%s10924_s5 + $0xc0] ss:$16 sps:$4 sm:$0xff]   ;;  %v7483_v28 = vld [vmem:[%s10924_s5 + $0xe4] ss:$16 sps:$4 sm:$0xff]  }
 0x36d   : > { %11089 = vst [vmem:[#allocation77_spill] sm:$0xff] %v8912_v49  ;;  %2915 = vmatprep.subr.bf16.mxu0 %v7477_v57 }
 0x370   : > { %2916 = vmatpush1.bf16.msra.mxu0 %v7475_v13  ;;  %v7484_v13 = vld [vmem:[%s10924_s5 + $0x100] ss:$16 sps:$4 sm:$0xff]  }
 0x371   : > { %v8920_v20 = vpop.f32.mrb[180].mxu1  ;;  %2917 = vmatprep.subr.bf16.mxu0 %v7480_v18 }
 0x372   : > { %11090 = vst [vmem:[#allocation78_spill] sm:$0xff] %v8920_v20  ;;  %v8925_v49 = vpop.f32.mrb[181].mxu1 }
 0x373   : > { %11091 = vst [vmem:[#allocation79_spill] sm:$0xff] %v8925_v49  ;;  %v8927_v57 = vpop.f32.mrb[182].mxu1  ;;  %v7543_v49 = vld [vmem:[#allocation5 + $0x144] ss:$8 sps:$4 sm:$0xff]  }
 0x374   : > { %11092 = vst [vmem:[#allocation80_spill] sm:$0xff] %v8927_v57  ;;  %2918 = vmatpush1.bf16.msra.mxu0 %v7478_v37  ;;  %v8929_v54 = vpop.f32.mrb[183].mxu1  ;;  %v7489_v37 = vld [vmem:[%s10924_s5 + $0x124] ss:$16 sps:$4 sm:$0xff]   ;;  %7070 = vmatprep.subr.bf16.mxu1 %v7543_v49 }
 0x375   : > { %11093 = vst [vmem:[#allocation81_spill] sm:$0xff] %v8929_v54  ;;  %2919 = vmatprep.subr.bf16.mxu0 %v7483_v28  ;;  %v7487_v28 = vld [vmem:[%s10924_s5 + $0x120] ss:$16 sps:$4 sm:$0xff]   ;;  %v7498_v49 = vld [vmem:[%s10924_s5 + $0x184] ss:$16 sps:$4 sm:$0xff]  }
 0x376   : > { %v7541_v54 = vld [vmem:[#allocation5 + $0x140] ss:$8 sps:$4 sm:$0xff]  }
 0x377   : > { %7086 = vmatpush1.bf16.msra.mxu1 %v7541_v54  ;;  %v7493_v54 = vld [vmem:[%s10924_s5 + $0x160] ss:$16 sps:$4 sm:$0xff]  }
 0x378   : > { %2920 = vmatpush1.bf16.msra.mxu0 %v7481_v55 }
 0x379   : > { %v8940_v18 = vpop.f32.mrb[184].mxu1  ;;  %2921 = vmatprep.subr.bf16.mxu0 %v7486_v45  ;;  %v7492_v45 = vld [vmem:[%s10924_s5 + $0x144] ss:$16 sps:$4 sm:$0xff]  }
 0x37a   : > { %11094 = vst [vmem:[#allocation82_spill] sm:$0xff] %v8940_v18  ;;  %v8945_v57 = vpop.f32.mrb[185].mxu1 }
 0x37b   : > { %11095 = vst [vmem:[#allocation83_spill] sm:$0xff] %v8945_v57  ;;  %v8947_v20 = vpop.f32.mrb[186].mxu1 }
 0x37c   : > { %11096 = vst [vmem:[#allocation84_spill] sm:$0xff] %v8947_v20  ;;  %2922 = vmatpush1.bf16.msra.mxu0 %v7484_v13  ;;  %v8952_v55 = vpop.f32.mrb[187].mxu1  ;;  %v7490_v20 = vld [vmem:[%s10924_s5 + $0x140] ss:$16 sps:$4 sm:$0xff]   ;;  %v7495_v13 = vld [vmem:[%s10924_s5 + $0x164] ss:$16 sps:$4 sm:$0xff]  }
 0x37d   : > { %11097 = vst [vmem:[#allocation85_spill] sm:$0xff] %v8952_v55  ;;  %2923 = vmatprep.subr.bf16.mxu0 %v7489_v37 }
 0x380   : > { %2924 = vmatpush1.bf16.msra.mxu0 %v7487_v28  ;;  %v7496_v28 = vld [vmem:[%s10924_s5 + $0x180] ss:$16 sps:$4 sm:$0xff]  }
 0x381   : > { %v8960_v18 = vpop.f32.mrb[188].mxu1  ;;  %2925 = vmatprep.subr.bf16.mxu0 %v7492_v45 }
 0x382   : > { %11098 = vst [vmem:[#allocation86_spill] sm:$0xff] %v8960_v18  ;;  %v8965_v55 = vpop.f32.mrb[189].mxu1 }
 0x383   : > { %11099 = vst [vmem:[#allocation87_spill] sm:$0xff] %v8965_v55  ;;  %v8967_v37 = vpop.f32.mrb[190].mxu1  ;;  %v7549_v55 = vld [vmem:[#allocation5 + $0x154] ss:$8 sps:$4 sm:$0xff]  }
 0x384   : > { %11100 = vst [vmem:[#allocation88_spill] sm:$0xff] %v8967_v37  ;;  %2926 = vmatpush1.bf16.msra.mxu0 %v7490_v20  ;;  %v8969_v57 = vpop.f32.mrb[191].mxu1  ;;  %v7501_v20 = vld [vmem:[%s10924_s5 + $0x1a4] ss:$16 sps:$4 sm:$0xff]   ;;  %7071 = vmatprep.subr.bf16.mxu1 %v7549_v55 }
 0x385   : > { %11101 = vst [vmem:[#allocation89_spill] sm:$0xff] %v8969_v57  ;;  %2927 = vmatprep.subr.bf16.mxu0 %v7495_v13  ;;  %v7499_v13 = vld [vmem:[%s10924_s5 + $0x1a0] ss:$16 sps:$4 sm:$0xff]   ;;  %v7510_v55 = vld [vmem:[#allocation5 + $0x4] ss:$8 sps:$4 sm:$0xff]  }
 0x386   : > { %v7547_v57 = vld [vmem:[#allocation5 + $0x150] ss:$8 sps:$4 sm:$0xff]  }
 0x387   : > { %7087 = vmatpush1.bf16.msra.mxu1 %v7547_v57  ;;  %v7505_v57 = vld [vmem:[%s10924_s5 + $0x1e0] ss:$16 sps:$4 sm:$0xff]  }
 0x388   : > { %2928 = vmatpush1.bf16.msra.mxu0 %v7493_v54  ;;  %7072 = vmatprep.subr.bf16.mxu1 %v7555_v15  ;;  %v7561_v15 = vld [vmem:[#allocation5 + $0x184] ss:$8 sps:$4 sm:$0xff]  }
 0x389   : > { %v8980_v45 = vpop.f32.mrb[192].mxu1  ;;  %2929 = vmatprep.subr.bf16.mxu0 %v7498_v49  ;;  %v7504_v49 = vld [vmem:[%s10924_s5 + $0x1c4] ss:$16 sps:$4 sm:$0xff]  }
 0x38a   : > { %11102 = vst [vmem:[#allocation90_spill] sm:$0xff] %v8980_v45  ;;  %v8985_v37 = vpop.f32.mrb[193].mxu1 }
 0x38b   : > { %11103 = vst [vmem:[#allocation91_spill] sm:$0xff] %v8985_v37  ;;  %v8987_v18 = vpop.f32.mrb[194].mxu1 }
 0x38c   : > { %11104 = vst [vmem:[#allocation92_spill] sm:$0xff] %v8987_v18  ;;  %2930 = vmatpush1.bf16.msra.mxu0 %v7496_v28  ;;  %v8992_v54 = vpop.f32.mrb[195].mxu1  ;;  %v7502_v18 = vld [vmem:[%s10924_s5 + $0x1c0] ss:$16 sps:$4 sm:$0xff]   ;;  %v7507_v28 = vld [vmem:[%s10924_s5 + $0x1e4] ss:$16 sps:$4 sm:$0xff]  }
 0x38d   : > { %11105 = vst [vmem:[#allocation93_spill] sm:$0xff] %v8992_v54  ;;  %2931 = vmatprep.subr.bf16.mxu0 %v7501_v20 }
 0x390   : > { %2932 = vmatpush1.bf16.msra.mxu0 %v7499_v13  ;;  %v7508_v13 = vld [vmem:[#allocation5] ss:$8 sps:$4 sm:$0xff]  }
 0x391   : > { %v9000_v45 = vpop.f32.mrb[196].mxu1  ;;  %2933 = vmatprep.subr.bf16.mxu0 %v7504_v49 }
 0x392   : > { %11106 = vst [vmem:[#allocation94_spill] sm:$0xff] %v9000_v45  ;;  %v9005_v54 = vpop.f32.mrb[197].mxu1  ;;  %v7513_v45 = vld [vmem:[#allocation5 + $0x14] ss:$8 sps:$4 sm:$0xff]  }
 0x393   : > { %11107 = vst [vmem:[#allocation95_spill] sm:$0xff] %v9005_v54  ;;  %v9007_v20 = vpop.f32.mrb[198].mxu1  ;;  %v7553_v54 = vld [vmem:[#allocation5 + $0x160] ss:$8 sps:$4 sm:$0xff]  }
 0x394   : > { %11108 = vst [vmem:[#allocation96_spill] sm:$0xff] %v9007_v20  ;;  %2934 = vmatpush1.bf16.msra.mxu0 %v7502_v18  ;;  %v9009_v37 = vpop.f32.mrb[199].mxu1  ;;  %v7558_v20 = vld [vmem:[#allocation5 + $0x174] ss:$8 sps:$4 sm:$0xff]   ;;  %7088 = vmatpush1.bf16.msra.mxu1 %v7553_v54  ;;  %v7520_v54 = vld [vmem:[#allocation5 + $0x30] ss:$8 sps:$4 sm:$0xff]  }
 0x395   : > { %11109 = vst [vmem:[#allocation97_spill] sm:$0xff] %v9009_v37  ;;  %2935 = vmatprep.subr.bf16.mxu0 %v7507_v28  ;;  %7073 = vmatprep.subr.bf16.mxu1 %v7558_v20  ;;  %v7564_v20 = vld [vmem:[#allocation5 + $0x194] ss:$8 sps:$4 sm:$0xff]  }
 0x398   : > { %2936 = vmatpush1.bf16.msra.mxu0 %v7505_v57  ;;  %v7511_v57 = vld [vmem:[#allocation5 + $0x10] ss:$8 sps:$4 sm:$0xff]  }
 0x399   : > { %v9014_v49 = vpop.f32.mrb[200].mxu1  ;;  %5377 = vmatprep.subr.bf16.mxu0 %v7510_v55  ;;  %v7556_v55 = vld [vmem:[#allocation5 + $0x170] ss:$8 sps:$4 sm:$0xff]  }
 0x39a   : > { %11110 = vst [vmem:[#allocation98_spill] sm:$0xff] %v9014_v49  ;;  %v9016_v46 = vpop.f32.mrb[201].mxu1  ;;  %v7516_v49 = vld [vmem:[#allocation5 + $0x24] ss:$8 sps:$4 sm:$0xff]   ;;  %7089 = vmatpush1.bf16.msra.mxu1 %v7556_v55  ;;  %v7526_v55 = vld [vmem:[#allocation5 + $0x40] ss:$8 sps:$4 sm:$0xff]  }
 0x39b   : > { %11111 = vst [vmem:[#allocation99_spill] sm:$0xff] %v9016_v46  ;;  %2938 = vmatmul.mubr.bf16.vlgmr.msra.gmra.mrb[72].mxu0 %v8339_v30  ;;  %v9019_v18 = vpop.f32.mrb[202].mxu1  ;;  %v7514_v46 = vld [vmem:[#allocation5 + $0x20] ss:$8 sps:$4 sm:$0xff]   ;;  %v7522_v30 = vld [vmem:[#allocation5 + $0x34] ss:$8 sps:$4 sm:$0xff]   ;;  %7074 = vmatprep.subr.bf16.mxu1 %v7561_v15 }
 0x39c   : > { %11112 = vst [vmem:[#allocation100_spill] sm:$0xff] %v9019_v18  ;;  %2947 = vmatprep.mubr.bf16.mxu0 %v8347_v53  ;;  %5378 = vmatpush1.bf16.msra.mxu0 %v7508_v13  ;;  %v9022_v28 = vpop.f32.mrb[203].mxu1  ;;  %v7559_v53 = vld [vmem:[#allocation5 + $0x180] ss:$8 sps:$4 sm:$0xff]   ;;  %v7570_v15 = vld [vmem:[#allocation5 + $0x1a4] ss:$8 sps:$4 sm:$0xff]  }
 0x39d   : > { %11113 = vst [vmem:[#allocation101_spill] sm:$0xff] %v9022_v28  ;;  %5379 = vmatprep.subr.bf16.mxu0 %v7513_v45 }
 0x39e   : > { %7090 = vmatpush1.bf16.msra.mxu1 %v7559_v53  ;;  %v7532_v53 = vld [vmem:[#allocation5 + $0x50] ss:$8 sps:$4 sm:$0xff]  }
 0x39f   : > { %7075 = vmatprep.subr.bf16.mxu1 %v7564_v20  ;;  %v7573_v20 = vld [vmem:[#allocation5 + $0x1b4] ss:$8 sps:$4 sm:$0xff]  }
 0x3a0   : > { %5380 = vmatpush1.bf16.msra.mxu0 %v7511_v57  ;;  %v7562_v57 = vld [vmem:[#allocation5 + $0x190] ss:$8 sps:$4 sm:$0xff]  }
 0x3a1   : > { %v9024_v37 = vpop.f32.mrb[204].mxu1  ;;  %5381 = vmatprep.subr.bf16.mxu0 %v7516_v49  ;;  %v7528_v49 = vld [vmem:[#allocation5 + $0x44] ss:$8 sps:$4 sm:$0xff]  }
 0x3a2   : > { %11114 = vst [vmem:[#allocation102_spill] sm:$0xff] %v9024_v37  ;;  %v9026_v18 = vpop.f32.mrb[205].mxu1  ;;  %7091 = vmatpush1.bf16.msra.mxu1 %v7562_v57  ;;  %v7538_v57 = vld [vmem:[#allocation5 + $0x60] ss:$8 sps:$4 sm:$0xff]  }
 0x3a3   : > { %11115 = vst [vmem:[#allocation103_spill] sm:$0xff] %v9026_v18  ;;  %2948 = vmatmul.mubr.bf16.gmra.mrb[76].mxu0 %v8345_v50  ;;  %v9029_v13 = vpop.f32.mrb[206].mxu1  ;;  %v7534_v50 = vld [vmem:[#allocation5 + $0x54] ss:$8 sps:$4 sm:$0xff]   ;;  %7076 = vmatprep.subr.bf16.mxu1 %v7570_v15 }
 0x3a4   : > { %11116 = vst [vmem:[#allocation104_spill] sm:$0xff] %v9029_v13  ;;  %2957 = vmatprep.mubr.bf16.mxu0 %v8353_v6  ;;  %v9032_v45 = vpop.f32.mrb[207].mxu1  ;;  %5382 = vmatpush1.bf16.msra.mxu0 %v7514_v46  ;;  %v7568_v6 = vld [vmem:[#allocation5 + $0x1a0] ss:$8 sps:$4 sm:$0xff]  }
 0x3a5   : > { %11117 = vst [vmem:[#allocation105_spill] sm:$0xff] %v9032_v45  ;;  %5383 = vmatprep.subr.bf16.mxu0 %v7522_v30 }
 0x3a6   : > { %7092 = vmatpush1.bf16.msra.mxu1 %v7568_v6  ;;  %v7552_v6 = vld [vmem:[#allocation5 + $0x84] ss:$8 sps:$4 sm:$0xff]  }
 0x3a7   : > { %7077 = vmatprep.subr.bf16.mxu1 %v7573_v20  ;;  %v7550_v20 = vld [vmem:[#allocation5 + $0x80] ss:$8 sps:$4 sm:$0xff]  }
 0x3a8   : > { %5384 = vmatpush1.bf16.msra.mxu0 %v7520_v54  ;;  %v7540_v54 = vld [vmem:[#allocation5 + $0x64] ss:$8 sps:$4 sm:$0xff]  }
 0x3a9   : > { %v9034_v37 = vpop.f32.mrb[208].mxu1  ;;  %5385 = vmatprep.subr.bf16.mxu0 %v7528_v49  ;;  %v7571_v49 = vld [vmem:[#allocation5 + $0x1b0] ss:$8 sps:$4 sm:$0xff]  }
 0x3aa   : > { %11118 = vst [vmem:[#allocation106_spill] sm:$0xff] %v9034_v37  ;;  %v9036_v13 = vpop.f32.mrb[209].mxu1  ;;  %7093 = vmatpush1.bf16.msra.mxu1 %v7571_v49  ;;  %v7567_v49 = vld [vmem:[#allocation5 + $0x94] ss:$8 sps:$4 sm:$0xff]  }
 0x3ab   : > { %11119 = vst [vmem:[#allocation107_spill] sm:$0xff] %v9036_v13  ;;  %2958 = vmatmul.mubr.bf16.gmra.mrb[80].mxu0 %v8351_v0  ;;  %v9039_v46 = vpop.f32.mrb[210].mxu1  ;;  %v7546_v0 = vld [vmem:[#allocation5 + $0x74] ss:$8 sps:$4 sm:$0xff]  }
 0x3ac   : > { %11120 = vst [vmem:[#allocation108_spill] sm:$0xff] %v9039_v46  ;;  %2967 = vmatprep.mubr.bf16.mxu0 %v8359_v22  ;;  %v9042_v30 = vpop.f32.mrb[211].mxu1  ;;  %5386 = vmatpush1.bf16.msra.mxu0 %v7526_v55 }
 0x3ad   : > { %11121 = vst [vmem:[#allocation109_spill] sm:$0xff] %v9042_v30  ;;  %5387 = vmatprep.subr.bf16.mxu0 %v7534_v50  ;;  %v7544_v50 = vld [vmem:[#allocation5 + $0x70] ss:$8 sps:$4 sm:$0xff]   ;;  %v11191_v30 = vld [vmem:[#allocation30_spill] sm:$0xff] }
 0x3b0   : > { %5388 = vmatpush1.bf16.msra.mxu0 %v7532_v53  ;;  %v7576_v53 = vld [vmem:[#allocation5 + $0x1c4] ss:$8 sps:$4 sm:$0xff]  }
 0x3b1   : > { %v9044_v37 = vpop.f32.mrb[212].mxu1  ;;  %5389 = vmatprep.subr.bf16.mxu0 %v7540_v54  ;;  %v7574_v54 = vld [vmem:[#allocation5 + $0x1c0] ss:$8 sps:$4 sm:$0xff]   ;;  %7078 = vmatprep.subr.bf16.mxu1 %v7576_v53 }
 0x3b2   : > { %11122 = vst [vmem:[#allocation110_spill] sm:$0xff] %v9044_v37  ;;  %v9046_v15 = vpop.f32.mrb[213].mxu1  ;;  %7094 = vmatpush1.bf16.msra.mxu1 %v7574_v54  ;;  %v7583_v53 = vld [vmem:[#allocation5 + $0x1e0] ss:$8 sps:$4 sm:$0xff]  }
 0x3b3   : > { %11123 = vst [vmem:[#allocation111_spill] sm:$0xff] %v9046_v15  ;;  %2968 = vmatmul.mubr.bf16.gmra.mrb[84].mxu0 %v8357_v19  ;;  %v9049_v22 = vpop.f32.mrb[214].mxu1  ;;  %v7580_v54 = vld [vmem:[#allocation5 + $0xa0] ss:$8 sps:$4 sm:$0xff]  }
 0x3b4   : > { %11124 = vst [vmem:[#allocation112_spill] sm:$0xff] %v9049_v22  ;;  %2977 = vmatprep.mubr.bf16.mxu0 %v8371_v23  ;;  %v9052_v55 = vpop.f32.mrb[215].mxu1  ;;  %5390 = vmatpush1.bf16.msra.mxu0 %v7538_v57  ;;  %v7579_v57 = vld [vmem:[#allocation5 + $0x1d4] ss:$8 sps:$4 sm:$0xff]   ;;  %v7577_v22 = vld [vmem:[#allocation5 + $0x1d0] ss:$8 sps:$4 sm:$0xff]  }
 0x3b5   : > { %11125 = vst [vmem:[#allocation113_spill] sm:$0xff] %v9052_v55  ;;  %5391 = vmatprep.subr.bf16.mxu0 %v7546_v0  ;;  %7079 = vmatprep.subr.bf16.mxu1 %v7579_v57  ;;  %v11188_v55 = vld [vmem:[#allocation27_spill] sm:$0xff] }
 0x3b6   : > { %7095 = vmatpush1.bf16.msra.mxu1 %v7577_v22 }
 0x3b8   : > { %5392 = vmatpush1.bf16.msra.mxu0 %v7544_v50  ;;  %v7565_v50 = vld [vmem:[#allocation5 + $0x90] ss:$8 sps:$4 sm:$0xff]  }
 0x3b9   : > { %v9054_v37 = vpop.f32.mrb[216].mxu1  ;;  %5393 = vmatprep.subr.bf16.mxu0 %v7552_v6  ;;  %v7585_v6 = vld [vmem:[#allocation5 + $0x1e4] ss:$8 sps:$4 sm:$0xff]  }
 0x3ba   : > { %11126 = vst [vmem:[#allocation114_spill] sm:$0xff] %v9054_v37  ;;  %v9056_v19 = vpop.f32.mrb[217].mxu1  ;;  %7080 = vmatprep.subr.bf16.mxu1 %v7585_v6  ;;  %v7589_v6 = vld [vmem:[#allocation5 + $0xb0] ss:$8 sps:$4 sm:$0xff]  }
 0x3bb   : > { %11127 = vst [vmem:[#allocation115_spill] sm:$0xff] %v9056_v19  ;;  %2978 = vmatmul.mubr.bf16.gmra.mrb[88].mxu0 %v8369_v9  ;;  %v9059_v23 = vpop.f32.mrb[218].mxu1  ;;  %v7582_v9 = vld [vmem:[#allocation5 + $0xa4] ss:$8 sps:$4 sm:$0xff]   ;;  %7096 = vmatpush1.bf16.msra.mxu1 %v7583_v53  ;;  %v7588_v19 = vld [vmem:[#allocation5 + $0x1f4] ss:$8 sps:$4 sm:$0xff]  }
 0x3bc   : > { %11128 = vst [vmem:[#allocation116_spill] sm:$0xff] %v9059_v23  ;;  %2987 = vmatprep.mubr.bf16.mxu0 %v8377_v5  ;;  %v9062_v0 = vpop.f32.mrb[219].mxu1  ;;  %5394 = vmatpush1.bf16.msra.mxu0 %v7550_v20  ;;  %v7586_v5 = vld [vmem:[#allocation5 + $0x1f0] ss:$8 sps:$4 sm:$0xff]  }
 0x3bd   : > { %11129 = vst [vmem:[#allocation117_spill] sm:$0xff] %v9062_v0  ;;  %5395 = vmatprep.subr.bf16.mxu0 %v7567_v49  ;;  %7081 = vmatprep.subr.bf16.mxu1 %v7588_v19 }
 0x3bf   : > { %7097 = vmatpush1.bf16.msra.mxu1 %v7586_v5 }
 0x3c0   : > { %5396 = vmatpush1.bf16.msra.mxu0 %v7565_v50 }
 0x3c1   : > { %v9064_v37 = vpop.f32.mrb[220].mxu1  ;;  %5397 = vmatprep.subr.bf16.mxu0 %v7582_v9 }
 0x3c2   : > { %11130 = vst [vmem:[#allocation118_spill] sm:$0xff] %v9064_v37  ;;  %v9066_v23 = vpop.f32.mrb[221].mxu1 }
 0x3c3   : > { %11131 = vst [vmem:[#allocation119_spill] sm:$0xff] %v9066_v23  ;;  %2988 = vmatmul.mubr.bf16.gmra.mrb[92].mxu0 %v8375_v43  ;;  %v9069_v20 = vpop.f32.mrb[222].mxu1  ;;  %v7591_v43 = vld [vmem:[#allocation5 + $0xb4] ss:$8 sps:$4 sm:$0xff]  }
 0x3c4   : > { %11132 = vst [vmem:[#allocation120_spill] sm:$0xff] %v9069_v20  ;;  %2997 = vmatprep.mubr.bf16.mxu0 %v8397_v33  ;;  %v9072_v22 = vpop.f32.mrb[223].mxu1  ;;  %5398 = vmatpush1.bf16.msra.mxu0 %v7580_v54 }
 0x3c5   : > { %11133 = vst [vmem:[#allocation121_spill] sm:$0xff] %v9072_v22  ;;  %5399 = vmatprep.subr.bf16.mxu0 %v7591_v43  ;;  %v7594_v43 = vld [vmem:[#allocation5 + $0xc4] ss:$8 sps:$4 sm:$0xff]  }
 0x3c8   : > { %5400 = vmatpush1.bf16.msra.mxu0 %v7589_v6  ;;  %v7592_v6 = vld [vmem:[#allocation5 + $0xc0] ss:$8 sps:$4 sm:$0xff]  }
 0x3c9   : > { %v9074_v49 = vpop.f32.mrb[224].mxu1  ;;  %5401 = vmatprep.subr.bf16.mxu0 %v7594_v43  ;;  %v7597_v43 = vld [vmem:[#allocation5 + $0xd4] ss:$8 sps:$4 sm:$0xff]  }
 0x3ca   : > { %11134 = vst [vmem:[#allocation122_spill] sm:$0xff] %v9074_v49  ;;  %v9076_v57 = vpop.f32.mrb[225].mxu1 }
 0x3cb   : > { %11135 = vst [vmem:[#allocation123_spill] sm:$0xff] %v9076_v57  ;;  %2998 = vmatmul.mubr.bf16.gmra.mrb[96].mxu0 %v8395_v29  ;;  %v9079_v50 = vpop.f32.mrb[226].mxu1 }
 0x3cc   : > { %11136 = vst [vmem:[#allocation124_spill] sm:$0xff] %v9079_v50  ;;  %3007 = vmatprep.mubr.bf16.mxu0 %v8403_v48  ;;  %v9082_v53 = vpop.f32.mrb[227].mxu1  ;;  %5402 = vmatpush1.bf16.msra.mxu0 %v7592_v6  ;;  %v7595_v6 = vld [vmem:[#allocation5 + $0xd0] ss:$8 sps:$4 sm:$0xff]  }
 0x3cd   : > { %11137 = vst [vmem:[#allocation125_spill] sm:$0xff] %v9082_v53  ;;  %5403 = vmatprep.subr.bf16.mxu0 %v7597_v43 }
 0x3d0   : > { %5404 = vmatpush1.bf16.msra.mxu0 %v7595_v6 }
 0x3d1   : > { %v9084_v33 = vpop.f32.mrb[228].mxu1 }
 0x3d2   : > { %11138 = vst [vmem:[#allocation126_spill] sm:$0xff] %v9084_v33  ;;  %v9086_v19 = vpop.f32.mrb[229].mxu1 }
 0x3d3   : > { %11139 = vst [vmem:[#allocation127_spill] sm:$0xff] %v9086_v19  ;;  %3008 = vmatmul.mubr.bf16.gmra.mrb[100].mxu0 %v8401_v34  ;;  %v9089_v54 = vpop.f32.mrb[230].mxu1 }
 0x3d4   : > { %11140 = vst [vmem:[#allocation128_spill] sm:$0xff] %v9089_v54  ;;  %3017 = vmatprep.mubr.bf16.mxu0 %v8423_v17  ;;  %v9092_v29 = vpop.f32.mrb[231].mxu1 }
 0x3d5   : > { %11141 = vst [vmem:[#allocation129_spill] sm:$0xff] %v9092_v29 }
 0x3d9   : > { %v9094_v9 = vpop.f32.mrb[232].mxu1 }
 0x3da   : > { %11142 = vst [vmem:[#allocation130_spill] sm:$0xff] %v9094_v9  ;;  %v9096_v5 = vpop.f32.mrb[233].mxu1 }
 0x3db   : > { %11143 = vst [vmem:[#allocation131_spill] sm:$0xff] %v9096_v5  ;;  %3018 = vmatmul.mubr.bf16.gmra.mrb[104].mxu0 %v8421_v14  ;;  %v9099_v48 = vpop.f32.mrb[234].mxu1 }
 0x3dc   : > { %11144 = vst [vmem:[#allocation132_spill] sm:$0xff] %v9099_v48  ;;  %3027 = vmatprep.mubr.bf16.mxu0 %v8429_v38  ;;  %v9102_v33 = vpop.f32.mrb[235].mxu1 }
 0x3dd   : > { %11145 = vst [vmem:[#allocation133_spill] sm:$0xff] %v9102_v33 }
 0x3e1   : > { %v9104_v34 = vpop.f32.mrb[236].mxu1 }
 0x3e2   : > { %11146 = vst [vmem:[#allocation134_spill] sm:$0xff] %v9104_v34  ;;  %v9106_v17 = vpop.f32.mrb[237].mxu1 }
 0x3e3   : > { %11147 = vst [vmem:[#allocation135_spill] sm:$0xff] %v9106_v17  ;;  %3028 = vmatmul.mubr.bf16.gmra.mrb[108].mxu0 %v8427_v42  ;;  %v9109_v9 = vpop.f32.mrb[238].mxu1 }
 0x3e4   : > { %11148 = vst [vmem:[#allocation136_spill] sm:$0xff] %v9109_v9  ;;  %3037 = vmatprep.mubr.bf16.mxu0 %v8449_v58  ;;  %v9112_v14 = vpop.f32.mrb[239].mxu1 }
 0x3e5   : > { %11149 = vst [vmem:[#allocation137_spill] sm:$0xff] %v9112_v14 }
 0x3e9   : > { %v9114_v48 = vpop.f32.mrb[240].mxu1 }
 0x3ea   : > { %11150 = vst [vmem:[#allocation138_spill] sm:$0xff] %v9114_v48  ;;  %v9116_v5 = vpop.f32.mrb[241].mxu1 }
 0x3eb   : > { %11151 = vst [vmem:[#allocation139_spill] sm:$0xff] %v9116_v5  ;;  %3038 = vmatmul.mubr.bf16.gmra.mrb[112].mxu0 %v8447_v3  ;;  %v9119_v38 = vpop.f32.mrb[242].mxu1 }
 0x3ec   : > { %11152 = vst [vmem:[#allocation140_spill] sm:$0xff] %v9119_v38  ;;  %3047 = vmatprep.mubr.bf16.mxu0 %v8455_v39  ;;  %v9122_v34 = vpop.f32.mrb[243].mxu1 }
 0x3ed   : > { %11153 = vst [vmem:[#allocation141_spill] sm:$0xff] %v9122_v34  ;;  %v7603_v34 = vld [vmem:[#allocation5 + $0xf4] ss:$8 sps:$4 sm:$0xff]  }
 0x3ee   : > { %v2405_v42 = vpop.f32.mrb[64].mxu0 }
 0x3ef   : > { %v2407_v58 = vpop.f32.mrb[65].mxu0 }
 0x3f0   : > { %v3619_v9 = vcombine.low %v2405_v42, %v2407_v58  ;;  %v3620_v14 = vcombine.high %v2405_v42, %v2407_v58  ;;  %v9124_v17 = vpop.f32.mrb[66].mxu0 }
 0x3f1   : > { %v9126_v48 = vpop.f32.mrb[67].mxu0  ;;  %v9128_v5 = vpop.f32.mrb[244].mxu1 }
 0x3f2   : > { %11154 = vst [vmem:[#allocation142_spill] sm:$0xff] %v9128_v5  ;;  %v9134_v38 = vpop.f32.mrb[245].mxu1  ;;  %v11161_v5 = vld [vmem:[#allocation15_spill] sm:$0xff] }
 0x3f3   : > { %11155 = vst [vmem:[#allocation143_spill] sm:$0xff] %v9134_v38  ;;  %3048 = vmatmul.mubr.bf16.gmra.mrb[116].mxu0 %v8453_v31  ;;  %v9137_v6 = vpop.f32.mrb[246].mxu1  ;;  %v7598_v38 = vld [vmem:[#allocation5 + $0xe0] ss:$8 sps:$4 sm:$0xff]   ;;  %v7600_v31 = vld [vmem:[#allocation5 + $0xe4] ss:$8 sps:$4 sm:$0xff]  }
 0x3f4   : > { %11156 = vst [vmem:[#allocation144_spill] sm:$0xff] %v9137_v6  ;;  %3057 = vmatprep.mubr.bf16.mxu0 %v8475_v63  ;;  %v9140_v43 = vpop.f32.mrb[247].mxu1  ;;  %5405 = vmatprep.subr.bf16.mxu0 %v7600_v31  ;;  %v11172_v31 = vld [vmem:[#allocation20_spill] sm:$0xff] }
 0x3f5   : > { %11157 = vst [vmem:[#allocation145_spill] sm:$0xff] %v9140_v43  ;;  %5406 = vmatpush1.bf16.msra.mxu0 %v7598_v38  ;;  %v11165_v43 = vld [vmem:[#allocation14_spill] sm:$0xff] }
 0x3f6   : > { %5407 = vmatprep.subr.bf16.mxu0 %v7603_v34  ;;  %v11171_v38 = vld [vmem:[#allocation18_spill] sm:$0xff] }
 0x3f9   : > { %v9142_v42 = vpop.f32.mrb[248].mxu1 }
 0x3fa   : > { %11158 = vst [vmem:[#allocation146_spill] sm:$0xff] %v9142_v42  ;;  %v9144_v58 = vpop.f32.mrb[249].mxu1 }
 0x3fb   : > { %11159 = vst [vmem:[#allocation147_spill] sm:$0xff] %v9144_v58  ;;  %3058 = vmatmul.mubr.bf16.gmra.mrb[120].mxu0 %v8473_v61  ;;  %v9147_v3 = vpop.f32.mrb[250].mxu1  ;;  %v11167_v58 = vld [vmem:[#allocation17_spill] sm:$0xff] }
 0x3fc   : > { %11160 = vst [vmem:[#allocation148_spill] sm:$0xff] %v9147_v3  ;;  %3067 = vmatprep.mubr.bf16.mxu0 %v11161_v5  ;;  %v9150_v39 = vpop.f32.mrb[251].mxu1  ;;  %v11169_v3 = vld [vmem:[#allocation16_spill] sm:$0xff]  ;;  %v11170_v5 = vld [vmem:[#allocation19_spill] sm:$0xff] }
 0x3fd   : > { %11162 = vst [vmem:[#allocation15_spill] sm:$0xff] %v9150_v39  ;;  %v7601_v39 = vld [vmem:[#allocation5 + $0xf0] ss:$8 sps:$4 sm:$0xff]  }
 0x3fe   : > { %5408 = vmatpush1.bf16.msra.mxu0 %v7601_v39  ;;  %v11176_v39 = vld [vmem:[#allocation23_spill] sm:$0xff] }
 0x3ff   : > { %5730 = vmatprep.subr.bf16.mxu0 %v8789_v52  ;;  %v11177_v52 = vld [vmem:[#allocation26_spill] sm:$0xff] }
 0x401   : > { %v9152_v6 = vpop.f32.mrb[252].mxu1 }
 0x402   : > { %11163 = vst [vmem:[#allocation149_spill] sm:$0xff] %v9152_v6  ;;  %v9154_v63 = vpop.f32.mrb[253].mxu1  ;;  %v3626_v6 = vlaneseq }
 0x403   : > { %11164 = vst [vmem:[#allocation150_spill] sm:$0xff] %v9154_v63  ;;  %3068 = vmatmul.mubr.bf16.gmra.mrb[124].mxu0 %v11165_v43  ;;  %v9157_v42 = vpop.f32.mrb[254].mxu1  ;;  %v11173_v43 = vld [vmem:[#allocation22_spill] sm:$0xff] }
 0x404   : > { %11166 = vst [vmem:[#allocation14_spill] sm:$0xff] %v9157_v42  ;;  %3077 = vmatprep.mubr.bf16.mxu0 %v11167_v58  ;;  %v9160_v61 = vpop.f32.mrb[255].mxu1  ;;  %v11174_v58 = vld [vmem:[#allocation21_spill] sm:$0xff]  ;;  %v11175_v42 = vld [vmem:[#allocation24_spill] sm:$0xff]  ;;  %v3627_v34 = vshrl.u32 %v3626_v6, 7 }
 0x405   : > { %11168 = vst [vmem:[#allocation17_spill] sm:$0xff] %v9160_v61 }
 0x406   : > { %v9180_v19 = vsub.s32 0, %v3627_v34  ;;  %v9182_v50 = vsub.s32 1, %v3627_v34 }
 0x408   : > { %11179 = vst [vmem:[#allocation19_spill] sm:$0xff] %v9180_v19  ;;  %11180 = vst [vmem:[#allocation18_spill] sm:$0xff] %v9182_v50 }
 0x40b   : > { %3078 = vmatmul.mubr.bf16.gmra.mrb[128].mxu0 %v11169_v3  ;;  %v7768_v3 = vmov 1966171168  }
 0x40c   : > { %3087 = vmatprep.mubr.bf16.mxu0 %v11170_v5  ;;  %v3624_v5 = vunpack.c.l.s4 %v7768_v3  ;;  %v9176_v3 = vsub.s32 2, %v3627_v34 }
 0x40e   : > { %v3625_v61 = vunpack.c.0.s8 %v3624_v5  ;;  %11178 = vst [vmem:[#allocation16_spill] sm:$0xff] %v9176_v3  ;;  %v9178_v5 = vsub.s32 3, %v3627_v34 }
 0x413   : > { %3088 = vmatmul.mubr.bf16.gmra.mrb[132].mxu0 %v11171_v38  ;;  %v3628_v38 = vsub.s32 %v3625_v61, %v3627_v34  ;;  %v11184_v34 = vcombine.high %v9124_v17, %v9126_v48 }
 0x414   : > { %3097 = vmatprep.mubr.bf16.mxu0 %v11172_v31 }
 0x415   : > { %v3636_v54 = vrot.slane %v3620_v14, %v3628_v38 }
 0x41b   : > { %3098 = vmatmul.mubr.bf16.gmra.mrb[136].mxu0 %v8525_v12  ;;  %v4331_v12 = vld [vmem:[%s10925_s6] sm:$0xf] }
 0x41c   : > { %3107 = vmatprep.mubr.bf16.mxu0 %v11173_v43  ;;  %v9185_v49 = vrot.slane %v4331_v12, %v9178_v5 }
 0x423   : > { %3108 = vmatmul.mubr.bf16.gmra.mrb[140].mxu0 %v11174_v58 }
 0x424   : > { %3117 = vmatprep.mubr.bf16.mxu0 %v11175_v42  ;;  %v3629_v42 = vrot.slane %v3619_v9, %v3628_v38  ;;  %v11181_v9 = vld [vmem:[#allocation25_spill] sm:$0xff] }
 0x42b   : > { %3118 = vmatmul.mubr.bf16.gmra.mrb[144].mxu0 %v11176_v39 }
 0x42c   : > { %3127 = vmatprep.mubr.bf16.mxu0 %v11177_v52 }
 0x42e   : > { %v2448_v63 = vpop.f32.mrb[68].mxu0 }
 0x42f   : > { %v2450_v31 = vpop.f32.mrb[69].mxu0 }
 0x430   : > { %v3621_v43 = vcombine.low %v2448_v63, %v2450_v31  ;;  %v3622_v58 = vcombine.high %v2448_v63, %v2450_v31  ;;  %v2452_v33 = vpop.f32.mrb[70].mxu0  ;;  %v9188_v63 = vrot.slane %v4331_v12, %v9176_v3 }
 0x431   : > { %v2454_v6 = vpop.f32.mrb[71].mxu0 }
 0x432   : > { %v3643_v39 = vrot.slane %v3621_v43, %v3628_v38  ;;  %v3650_v29 = vrot.slane %v3622_v58, %v3628_v38  ;;  %v3689_v52 = vcombine.low %v2452_v33, %v2454_v6  ;;  %v3690_v61 = vcombine.high %v2452_v33, %v2454_v6  ;;  %v11182_v43 = vld [vmem:[#allocation28_spill] sm:$0xff] }
 0x433   : > { %3128 = vmatmul.mubr.bf16.gmra.mrb[148].mxu0 %v11181_v9  ;;  %v11183_v33 = vcombine.low %v9124_v17, %v9126_v48  ;;  %v3704_v6 = vrot.slane %v11184_v34, %v3628_v38  ;;  %v9219_v17 = vrot.slane %v4331_v12, %v9180_v19 }
 0x434   : > { %v3651_v14 = vcombine.low %v3629_v42, %v3643_v39  ;;  %v3652_v31 = vcombine.high %v3629_v42, %v3643_v39  ;;  %v3653_v53 = vcombine.low %v3636_v54, %v3650_v29  ;;  %v3654_v57 = vcombine.high %v3636_v54, %v3650_v29  ;;  %3137 = vmatprep.mubr.bf16.mxu0 %v11182_v43 }
 0x435   : > { %v3697_v58 = vrot.slane %v11183_v33, %v3628_v38  ;;  %v3711_v20 = vrot.slane %v3689_v52, %v3628_v38  ;;  %v3718_v37 = vrot.slane %v3690_v61, %v3628_v38  ;;  %v9232_v52 = vrot.slane %v4331_v12, %v9182_v50 }
 0x436   : > { %v9198_v22 = vrot.slane %v3651_v14, %v3628_v38  ;;  %v9200_v23 = vrot.slane %v3653_v53, %v3628_v38  ;;  %v9202_v9 = vrot.slane %v3652_v31, %v3628_v38  ;;  %v9204_v42 = vrot.slane %v3654_v57, %v3628_v38 }
 0x437   : > { %v3719_v54 = vcombine.low %v3697_v58, %v3711_v20  ;;  %v3720_v29 = vcombine.high %v3697_v58, %v3711_v20  ;;  %v3721_v39 = vcombine.low %v3704_v6, %v3718_v37  ;;  %v3722_v43 = vcombine.high %v3704_v6, %v3718_v37 }
 0x438   : > { %11185 = vst [vmem:[#allocation20_spill] sm:$0xff] %v9198_v22  ;;  %v9208_v33 = vcombine.high %v9198_v22, %v9198_v22  ;;  %v9212_v48 = vcombine.high %v9200_v23, %v9200_v23  ;;  %v9216_v53 = vcombine.high %v9202_v9, %v9202_v9  ;;  %v9223_v20 = vcombine.high %v9204_v42, %v9204_v42 }
 0x439   : > { %v3782_v37 = vrot.slane %v9202_v9, %v9176_v3  ;;  %v9229_v57 = vrot.slane %v9200_v23, %v9176_v3  ;;  %v9244_v31 = vrot.slane %v9204_v42, %v9176_v3  ;;  %v9252_v6 = vrot.slane %v3719_v54, %v3628_v38 }
 0x43a   : > { %v9236_v61 = vrot.slane %v9208_v33, %v9176_v3  ;;  %v9240_v14 = vrot.slane %v9216_v53, %v9176_v3  ;;  %v9248_v58 = vrot.slane %v9212_v48, %v9176_v3  ;;  %v9254_v0 = vrot.slane %v3721_v39, %v3628_v38 }
 0x43b   : > { %v4093_v34 = vadd.f32 %v3782_v37, %v8689_v7  ;;  %v4097_v12 = vadd.f32 %v3782_v37, %v8697_v2  ;;  %11186 = vst [vmem:[#allocation22_spill] sm:$0xff] %v9252_v6  ;;  %3138 = vmatmul.mubr.bf16.gmra.mrb[152].mxu0 %v11188_v55  ;;  %v9257_v15 = vrot.slane %v3720_v29, %v3628_v38 }
 0x43c   : > { %11187 = vst [vmem:[#allocation21_spill] sm:$0xff] %v9254_v0  ;;  %v9259_v46 = vrot.slane %v3722_v43, %v3628_v38  ;;  %3147 = vmatprep.mubr.bf16.mxu0 %v11191_v30  ;;  %v3786_v13 = vrot.slane %v9202_v9, %v9178_v5  ;;  %v4101_v45 = vadd.f32 %v3782_v37, %v8712_v32 }
 0x43d   : > { %11189 = vst [vmem:[#allocation24_spill] sm:$0xff] %v9257_v15  ;;  %v4371_v7 = vadd.f32 %v9188_v63, %v4093_v34  ;;  %v4375_v2 = vadd.f32 %v9188_v63, %v4097_v12  ;;  %v9269_v54 = vcombine.high %v9252_v6, %v9252_v6  ;;  %v9273_v55 = vcombine.high %v9254_v0, %v9254_v0 }
 0x43e   : > { %11190 = vst [vmem:[#allocation23_spill] sm:$0xff] %v9259_v46  ;;  %v9277_v30 = vrot.slane %v9223_v20, %v9176_v3  ;;  %v9281_v38 = vcombine.high %v9257_v15, %v9257_v15  ;;  %v9285_v32 = vcombine.high %v9259_v46, %v9259_v46  ;;  %v9289_v29 = vrot.slane %v9252_v6, %v9176_v3 }
 0x43f   : > { %11192 = vst [vmem:[#allocation26_spill] sm:$0xff] %v9269_v54  ;;  %11193 = vst [vmem:[#allocation25_spill] sm:$0xff] %v9273_v55  ;;  %v4627_v39 = vmax.f32 %v4371_v7, 0.0  ;;  %v4631_v43 = vmax.f32 %v4375_v2, 0.0  ;;  %v9293_v34 = vrot.slane %v9257_v15, %v9176_v3  ;;  %v9297_v12 = vrot.slane %v9269_v54, %v9176_v3 }
 0x440   : > { %11194 = vst [vmem:[#allocation28_spill] sm:$0xff] %v9281_v38  ;;  %11195 = vst [vmem:[#allocation27_spill] sm:$0xff] %v9285_v32  ;;  %v9301_v18 = vrot.slane %v9281_v38, %v9176_v3  ;;  %v9305_v28 = vrot.slane %v9254_v0, %v9176_v3  ;;  %v9309_v7 = vrot.slane %v9259_v46, %v9176_v3 }
 0x441   : > { %11196 = vst [vmem:[#allocation30_spill] sm:$0xff] %v9293_v34  ;;  %11197 = vst [vmem:[#allocation151_spill] sm:$0xff] %v9297_v12  ;;  %v9313_v2 = vrot.slane %v9273_v55, %v9176_v3  ;;  %v4875_v34 = vpack.c.bf16 %v4631_v43, %v4627_v39  ;;  %v4094_v54 = vadd.f32 %v3786_v13, %v8694_v60  ;;  %v11202_v39 = vld [vmem:[#allocation29_spill] sm:$0xff] }
 0x442   : > { %11198 = vst [vmem:[#allocation152_spill] sm:$0xff] %v9301_v18  ;;  %11199 = vst [vmem:[#allocation153_spill] sm:$0xff] %v9305_v28  ;;  %v4098_v12 = vadd.f32 %v3786_v13, %v8699_v8  ;;  %v4102_v38 = vadd.f32 %v3786_v13, %v8717_v26  ;;  %v4106_v18 = vadd.f32 %v3786_v13, %v8721_v62  ;;  %v11203_v26 = vld [vmem:[#allocation32_spill] sm:$0xff] }
 0x443   : > { %11200 = vst [vmem:[#allocation154_spill] sm:$0xff] %v9309_v7  ;;  %11201 = vst [vmem:[#allocation155_spill] sm:$0xff] %v9313_v2  ;;  %v4105_v0 = vadd.f32 %v3782_v37, %v8719_v24  ;;  %v4379_v28 = vadd.f32 %v9188_v63, %v4101_v45  ;;  %v3802_v7 = vrot.slane %v9208_v33, %v9178_v5  ;;  %3148 = vmatmul.mubr.bf16.gmra.mrb[156].mxu0 %v11202_v39 }
 0x444   : > { %v4372_v46 = vadd.f32 %v9185_v49, %v4094_v54  ;;  %v4376_v2 = vadd.f32 %v9185_v49, %v4098_v12  ;;  %v4380_v60 = vadd.f32 %v9185_v49, %v4102_v38  ;;  %v4109_v8 = vadd.f32 %v9236_v61, %v8734_v41  ;;  %3157 = vmatprep.mubr.bf16.mxu0 %v11203_v26 }
 0x445   : > { %v4384_v24 = vadd.f32 %v9185_v49, %v4106_v18  ;;  %v4383_v62 = vadd.f32 %v9188_v63, %v4105_v0  ;;  %v4635_v13 = vmax.f32 %v4379_v28, 0.0  ;;  %v4110_v45 = vadd.f32 %v3802_v7, %v8739_v59 }
 0x446   : > { %v4628_v37 = vmax.f32 %v4372_v46, 0.0  ;;  %v4632_v54 = vmax.f32 %v4376_v2, 0.0  ;;  %v4636_v43 = vmax.f32 %v4380_v60, 0.0  ;;  %v4114_v12 = vadd.f32 %v3802_v7, %v8743_v27 }
 0x447   : > { %v4640_v39 = vmax.f32 %v4384_v24, 0.0  ;;  %v4639_v55 = vmax.f32 %v4383_v62, 0.0  ;;  %v4388_v38 = vadd.f32 %v9185_v49, %v4110_v45  ;;  %v4113_v41 = vadd.f32 %v9236_v61, %v8741_v44 }
 0x448   : > { %v4876_v26 = vpack.c.bf16 %v4632_v54, %v4628_v37  ;;  %v4392_v18 = vadd.f32 %v9185_v49, %v4114_v12  ;;  %v4387_v0 = vadd.f32 %v9188_v63, %v4109_v8  ;;  %v4118_v28 = vadd.f32 %v3802_v7, %v8760_v10  ;;  %v11204_v8 = vld [vmem:[#allocation31_spill] sm:$0xff] }
 0x449   : > { %v4880_v59 = vpack.c.bf16 %v4640_v39, %v4636_v43  ;;  %v4879_v46 = vpack.c.bf16 %v4639_v55, %v4635_v13  ;;  %v4644_v2 = vmax.f32 %v4388_v38, 0.0  ;;  %v4391_v60 = vadd.f32 %v9188_v63, %v4113_v41 }
 0x44a   : > { %5782 = vmatprep.mubr.bf16.mxu1 %v4876_v26  ;;  %v4648_v27 = vmax.f32 %v4392_v18, 0.0  ;;  %v4643_v24 = vmax.f32 %v4387_v0, 0.0  ;;  %v4122_v62 = vadd.f32 %v3802_v7, %v8764_v36  ;;  %v4396_v45 = vadd.f32 %v9185_v49, %v4118_v28  ;;  %v11205_v7 = vld [vmem:[#allocation34_spill] sm:$0xff] }
 0x44b   : > { %5783 = vmatmul.mubr.bf16.vlgmr.msra.gmra.mrb[0].mxu1 %v4875_v34  ;;  %v4647_v44 = vmax.f32 %v4391_v60, 0.0  ;;  %v4117_v37 = vadd.f32 %v9236_v61, %v8755_v1  ;;  %v4121_v10 = vadd.f32 %v9236_v61, %v8762_v11  ;;  %v3818_v55 = vrot.slane %v9216_v53, %v9178_v5  ;;  %3158 = vmatmul.mubr.bf16.gmra.mrb[160].mxu0 %v11204_v8 }
 0x44c   : > { %5792 = vmatprep.mubr.bf16.mxu1 %v4880_v59  ;;  %v4884_v13 = vpack.c.bf16 %v4648_v27, %v4644_v2  ;;  %v4400_v54 = vadd.f32 %v9185_v49, %v4122_v62  ;;  %v4652_v36 = vmax.f32 %v4396_v45, 0.0  ;;  %v4125_v34 = vadd.f32 %v9240_v14, %v8775_v56  ;;  %3167 = vmatprep.mubr.bf16.mxu0 %v11205_v7 }
 0x44d   : > { %v4883_v43 = vpack.c.bf16 %v4647_v44, %v4643_v24  ;;  %v4395_v1 = vadd.f32 %v9188_v63, %v4117_v37  ;;  %v4399_v11 = vadd.f32 %v9188_v63, %v4121_v10  ;;  %v4126_v61 = vadd.f32 %v3818_v55, %v8780_v25 }
 0x44e   : > { %v4656_v12 = vmax.f32 %v4400_v54, 0.0  ;;  %v4130_v39 = vadd.f32 %v3818_v55, %v8787_v51  ;;  %v4129_v38 = vadd.f32 %v9240_v14, %v8782_v4  ;;  %v4403_v41 = vadd.f32 %v9188_v63, %v4125_v34  ;;  %v11209_v34 = vld [vmem:[#allocation61_spill] sm:$0xff] }
 0x44f   : > { %v4651_v26 = vmax.f32 %v4395_v1, 0.0  ;;  %v4655_v18 = vmax.f32 %v4399_v11, 0.0  ;;  %v4404_v56 = vadd.f32 %v9185_v49, %v4126_v61  ;;  %v4134_v0 = vadd.f32 %v3818_v55, %v8803_v40  ;;  %v11210_v11 = vld [vmem:[#allocation59_spill] sm:$0xff] }
 0x450   : > { %v4888_v28 = vpack.c.bf16 %v4656_v12, %v4652_v36  ;;  %v4408_v59 = vadd.f32 %v9185_v49, %v4130_v39  ;;  %v4407_v2 = vadd.f32 %v9188_v63, %v4129_v38  ;;  %v4659_v25 = vmax.f32 %v4403_v41, 0.0  ;;  %v11211_v12 = vld [vmem:[#allocation60_spill] sm:$0xff] }
 0x451   : > { %v9365_v60 = vpack.c.bf16 %v4655_v18, %v4651_v26  ;;  %v4660_v51 = vmax.f32 %v4404_v56, 0.0  ;;  %v4138_v27 = vadd.f32 %v3818_v55, %v8807_v16  ;;  %v4412_v4 = vadd.f32 %v9185_v49, %v4134_v0  ;;  %v11207_v55 = vld [vmem:[#allocation33_spill] sm:$0xff]  ;;  %v11212_v0 = vld [vmem:[#allocation63_spill] sm:$0xff] }
 0x452   : > { %v4664_v24 = vmax.f32 %v4408_v59, 0.0  ;;  %v4663_v62 = vmax.f32 %v4407_v2, 0.0  ;;  %v4133_v45 = vadd.f32 %v9240_v14, %v8798_v47  ;;  %v4137_v40 = vadd.f32 %v9240_v14, %v8805_v35  ;;  %v11208_v14 = vld [vmem:[#allocation36_spill] sm:$0xff]  ;;  %v11213_v2 = vld [vmem:[#allocation65_spill] sm:$0xff] }
 0x453   : > { %v9375_v44 = vrot.slane %v9285_v32, %v9176_v3  ;;  %5793 = vmatmul.mubr.bf16.gmra.mrb[4].mxu1 %v4879_v46  ;;  %v4416_v37 = vadd.f32 %v9185_v49, %v4138_v27  ;;  %v4668_v10 = vmax.f32 %v4412_v4, 0.0  ;;  %v3834_v16 = vrot.slane %v9200_v23, %v9178_v5  ;;  %3168 = vmatmul.mubr.bf16.gmra.mrb[164].mxu0 %v11207_v55 }
 0x454   : > { %5802 = vmatprep.mubr.bf16.mxu1 %v4884_v13  ;;  %v9381_v8 = vpack.c.bf16 %v4664_v24, %v4660_v51  ;;  %v9383_v47 = vpack.c.bf16 %v4663_v62, %v4659_v25  ;;  %v4411_v35 = vadd.f32 %v9188_v63, %v4133_v45  ;;  %3177 = vmatprep.mubr.bf16.mxu0 %v11208_v14  ;;  %v11214_v24 = vld [vmem:[#allocation62_spill] sm:$0xff] }
 0x455   : > { %11206 = vst [vmem:[#allocation29_spill] sm:$0xff] %v9375_v44  ;;  %v4672_v54 = vmax.f32 %v4416_v37, 0.0  ;;  %v4415_v46 = vadd.f32 %v9188_v63, %v4137_v40  ;;  %v4142_v36 = vadd.f32 %v3834_v16, %v8823_v21  ;;  %v4146_v7 = vadd.f32 %v3834_v16, %v11209_v34 }
 0x456   : > { %v4667_v1 = vmax.f32 %v4411_v35, 0.0  ;;  %v9392_v13 = vrot.slane %v9198_v22, %v9180_v19  ;;  %v4141_v61 = vadd.f32 %v9229_v57, %v11210_v11  ;;  %v4145_v39 = vadd.f32 %v9229_v57, %v11211_v12  ;;  %v11215_v35 = vld [vmem:[#allocation64_spill] sm:$0xff] }
 0x457   : > { %v9398_v38 = vpack.c.bf16 %v4672_v54, %v4668_v10  ;;  %v4671_v41 = vmax.f32 %v4415_v46, 0.0  ;;  %v4420_v26 = vadd.f32 %v9185_v49, %v4142_v36  ;;  %v4424_v21 = vadd.f32 %v9185_v49, %v4146_v7  ;;  %v11216_v46 = vld [vmem:[#allocation35_spill] sm:$0xff] }
 0x458   : > { %v4419_v18 = vadd.f32 %v9188_v63, %v4141_v61  ;;  %v4423_v56 = vadd.f32 %v9188_v63, %v4145_v39  ;;  %v4150_v59 = vadd.f32 %v3834_v16, %v11212_v0  ;;  %v4154_v25 = vadd.f32 %v3834_v16, %v11213_v2  ;;  %v11218_v61 = vld [vmem:[#allocation67_spill] sm:$0xff]  ;;  %v11219_v39 = vld [vmem:[#allocation69_spill] sm:$0xff] }
 0x459   : > { %v9406_v51 = vpack.c.bf16 %v4671_v41, %v4667_v1  ;;  %v4676_v27 = vmax.f32 %v4420_v26, 0.0  ;;  %v4680_v4 = vmax.f32 %v4424_v21, 0.0  ;;  %v4149_v62 = vadd.f32 %v9229_v57, %v11214_v24  ;;  %v11217_v1 = vld [vmem:[#allocation38_spill] sm:$0xff] }
 0x45a   : > { %v4675_v45 = vmax.f32 %v4419_v18, 0.0  ;;  %v4679_v40 = vmax.f32 %v4423_v56, 0.0  ;;  %v4428_v37 = vadd.f32 %v9185_v49, %v4150_v59  ;;  %v4432_v10 = vadd.f32 %v9185_v49, %v4154_v25  ;;  %v11220_v21 = vld [vmem:[#allocation66_spill] sm:$0xff]  ;;  %v11221_v56 = vld [vmem:[#allocation68_spill] sm:$0xff] }
 0x45b   : > { %5803 = vmatmul.mubr.bf16.gmra.mrb[8].mxu1 %v4883_v43  ;;  %v9412_v55 = vpack.c.bf16 %v4680_v4, %v4676_v27  ;;  %v4153_v14 = vadd.f32 %v9229_v57, %v11215_v35  ;;  %v4427_v16 = vadd.f32 %v9188_v63, %v4149_v62  ;;  %v3850_v54 = vrot.slane %v9204_v42, %v9178_v5  ;;  %v11222_v27 = vld [vmem:[#allocation71_spill] sm:$0xff] }
 0x45c   : > { %5812 = vmatprep.mubr.bf16.mxu1 %v4888_v28  ;;  %3178 = vmatmul.mubr.bf16.gmra.mrb[168].mxu0 %v11216_v46  ;;  %v9422_v36 = vrot.slane %v9198_v22, %v9182_v50  ;;  %v9424_v34 = vpack.c.bf16 %v4679_v40, %v4675_v45  ;;  %v4684_v43 = vmax.f32 %v4428_v37, 0.0  ;;  %v4688_v7 = vmax.f32 %v4432_v10, 0.0  ;;  %v11223_v45 = vld [vmem:[#allocation73_spill] sm:$0xff]  ;;  %v11224_v37 = vld [vmem:[#allocation70_spill] sm:$0xff] }
 0x45d   : > { %3187 = vmatprep.mubr.bf16.mxu0 %v11217_v1  ;;  %v4431_v57 = vadd.f32 %v9188_v63, %v4153_v14  ;;  %v4683_v11 = vmax.f32 %v4427_v16, 0.0  ;;  %v4158_v12 = vadd.f32 %v3850_v54, %v11218_v61  ;;  %v4162_v41 = vadd.f32 %v3850_v54, %v11219_v39 }
 0x45e   : > { %v9430_v28 = vpack.c.bf16 %v4688_v7, %v4684_v43  ;;  %v9434_v26 = vrot.slane %v9202_v9, %v9180_v19  ;;  %v4157_v18 = vadd.f32 %v9244_v31, %v11220_v21  ;;  %v4161_v0 = vadd.f32 %v9244_v31, %v11221_v56  ;;  %v11227_v56 = vld [vmem:[#allocation40_spill] sm:$0xff] }
 0x45f   : > { %v4687_v59 = vmax.f32 %v4431_v57, 0.0  ;;  %v4436_v2 = vadd.f32 %v9185_v49, %v4158_v12  ;;  %v4440_v25 = vadd.f32 %v9185_v49, %v4162_v41  ;;  %v4166_v4 = vadd.f32 %v3850_v54, %v11222_v27  ;;  %v11225_v57 = vld [vmem:[#allocation72_spill] sm:$0xff]  ;;  %v11226_v41 = vld [vmem:[#allocation37_spill] sm:$0xff] }
 0x460   : > { %v4435_v24 = vadd.f32 %v9188_v63, %v4157_v18  ;;  %v4439_v62 = vadd.f32 %v9188_v63, %v4161_v0  ;;  %v4170_v40 = vadd.f32 %v3850_v54, %v11223_v45  ;;  %v4165_v10 = vadd.f32 %v9244_v31, %v11224_v37  ;;  %v11231_v45 = vld [vmem:[#allocation76_spill] sm:$0xff] }
 0x461   : > { %v9448_v35 = vpack.c.bf16 %v4687_v59, %v4683_v11  ;;  %v4692_v14 = vmax.f32 %v4436_v2, 0.0  ;;  %v4696_v16 = vmax.f32 %v4440_v25, 0.0  ;;  %v4444_v46 = vadd.f32 %v9185_v49, %v4166_v4  ;;  %v11228_v59 = vld [vmem:[#allocation75_spill] sm:$0xff]  ;;  %v11229_v25 = vld [vmem:[#allocation77_spill] sm:$0xff] }
 0x462   : > { %v4691_v43 = vmax.f32 %v4435_v24, 0.0  ;;  %v4695_v7 = vmax.f32 %v4439_v62, 0.0  ;;  %v4448_v1 = vadd.f32 %v9185_v49, %v4170_v40  ;;  %v4169_v61 = vadd.f32 %v9244_v31, %v11225_v57  ;;  %v11230_v24 = vld [vmem:[#allocation74_spill] sm:$0xff] }
 0x463   : > { %5813 = vmatmul.mubr.bf16.gmra.mrb[12].mxu1 %v9365_v60  ;;  %v9455_v12 = vpack.c.bf16 %v4696_v16, %v4692_v14  ;;  %v4700_v54 = vmax.f32 %v4444_v46, 0.0  ;;  %v4443_v39 = vadd.f32 %v9188_v63, %v4165_v10  ;;  %v3866_v11 = vrot.slane %v9212_v48, %v9178_v5  ;;  %v11232_v14 = vld [vmem:[#allocation79_spill] sm:$0xff]  ;;  %v11233_v46 = vld [vmem:[#allocation81_spill] sm:$0xff] }
 0x464   : > { %5822 = vmatprep.mubr.bf16.mxu1 %v9381_v8  ;;  %3188 = vmatmul.mubr.bf16.gmra.mrb[172].mxu0 %v11226_v41  ;;  %v9464_v21 = vrot.slane %v9202_v9, %v9182_v50  ;;  %v9466_v18 = vpack.c.bf16 %v4695_v7, %v4691_v43  ;;  %v4704_v31 = vmax.f32 %v4448_v1, 0.0  ;;  %v4447_v60 = vadd.f32 %v9188_v63, %v4169_v61  ;;  %v11234_v61 = vld [vmem:[#allocation78_spill] sm:$0xff] }
 0x465   : > { %3197 = vmatprep.mubr.bf16.mxu0 %v11227_v56  ;;  %v4699_v0 = vmax.f32 %v4443_v39, 0.0  ;;  %v4174_v2 = vadd.f32 %v3866_v11, %v11228_v59  ;;  %v4178_v27 = vadd.f32 %v3866_v11, %v11229_v25  ;;  %v9474_v8 = vrot.slane %v9208_v33, %v9180_v19 }
 0x466   : > { %v9476_v4 = vpack.c.bf16 %v4704_v31, %v4700_v54  ;;  %v4703_v9 = vmax.f32 %v4447_v60, 0.0  ;;  %v4173_v62 = vadd.f32 %v9248_v58, %v11230_v24  ;;  %v4177_v40 = vadd.f32 %v9248_v58, %v11231_v45 }
 0x467   : > { %v4452_v37 = vadd.f32 %v9185_v49, %v4174_v2  ;;  %v4456_v10 = vadd.f32 %v9185_v49, %v4178_v27  ;;  %v4182_v16 = vadd.f32 %v3866_v11, %v11232_v14  ;;  %v4186_v43 = vadd.f32 %v3866_v11, %v11233_v46  ;;  %v11235_v2 = vld [vmem:[#allocation80_spill] sm:$0xff]  ;;  %v11238_v14 = vld [vmem:[#allocation83_spill] sm:$0xff]  ;;  %v11239_v46 = vld [vmem:[#allocation85_spill] sm:$0xff] }
 0x468   : > { %v9486_v7 = vpack.c.bf16 %v4703_v9, %v4699_v0  ;;  %v4451_v1 = vadd.f32 %v9188_v63, %v4173_v62  ;;  %v4455_v57 = vadd.f32 %v9188_v63, %v4177_v40  ;;  %v4181_v54 = vadd.f32 %v9248_v58, %v11234_v61  ;;  %v11236_v62 = vld [vmem:[#allocation39_spill] sm:$0xff]  ;;  %v11241_v61 = vld [vmem:[#allocation84_spill] sm:$0xff] }
 0x469   : > { %v4708_v39 = vmax.f32 %v4452_v37, 0.0  ;;  %v4712_v41 = vmax.f32 %v4456_v10, 0.0  ;;  %v4460_v31 = vadd.f32 %v9185_v49, %v4182_v16  ;;  %v4464_v60 = vadd.f32 %v9185_v49, %v4186_v43  ;;  %v11237_v37 = vld [vmem:[#allocation42_spill] sm:$0xff] }
 0x46a   : > { %v4707_v56 = vmax.f32 %v4451_v1, 0.0  ;;  %v4711_v59 = vmax.f32 %v4455_v57, 0.0  ;;  %v4185_v11 = vadd.f32 %v9248_v58, %v11235_v2  ;;  %v4459_v0 = vadd.f32 %v9188_v63, %v4181_v54 }
 0x46b   : > { %5823 = vmatmul.mubr.bf16.gmra.mrb[16].mxu1 %v9383_v47  ;;  %v9498_v25 = vpack.c.bf16 %v4712_v41, %v4708_v39  ;;  %v4716_v27 = vmax.f32 %v4460_v31, 0.0  ;;  %v4720_v9 = vmax.f32 %v4464_v60, 0.0  ;;  %v3882_v24 = vrot.slane %v9223_v20, %v9178_v5  ;;  %v11242_v39 = vld [vmem:[#allocation87_spill] sm:$0xff] }
 0x46c   : > { %5832 = vmatprep.mubr.bf16.mxu1 %v9398_v38  ;;  %3198 = vmatmul.mubr.bf16.gmra.mrb[176].mxu0 %v11236_v62  ;;  %v9506_v45 = vrot.slane %v9208_v33, %v9182_v50  ;;  %v9508_v58 = vpack.c.bf16 %v4711_v59, %v4707_v56  ;;  %v4463_v40 = vadd.f32 %v9188_v63, %v4185_v11  ;;  %v4715_v47 = vmax.f32 %v4459_v0, 0.0  ;;  %v11240_v33 = vld [vmem:[#allocation82_spill] sm:$0xff]  ;;  %v11243_v59 = vld [vmem:[#allocation89_spill] sm:$0xff] }
 0x46d   : > { %3207 = vmatprep.mubr.bf16.mxu0 %v11237_v37  ;;  %v9512_v10 = vpack.c.bf16 %v4720_v9, %v4716_v27  ;;  %v4190_v16 = vadd.f32 %v3882_v24, %v11238_v14  ;;  %v4194_v43 = vadd.f32 %v3882_v24, %v11239_v46  ;;  %v9518_v38 = vrot.slane %v9216_v53, %v9180_v19  ;;  %v11244_v11 = vld [vmem:[#allocation86_spill] sm:$0xff] }
 0x46e   : > { %v4719_v1 = vmax.f32 %v4463_v40, 0.0  ;;  %v4189_v57 = vadd.f32 %v9277_v30, %v11240_v33  ;;  %v4193_v54 = vadd.f32 %v9277_v30, %v11241_v61  ;;  %v4198_v41 = vadd.f32 %v3882_v24, %v11242_v39  ;;  %v2939_v31 = vpop.f32.mrb[72].mxu0 }
 0x46f   : > { %v4468_v60 = vadd.f32 %v9185_v49, %v4190_v16  ;;  %v4472_v56 = vadd.f32 %v9185_v49, %v4194_v43  ;;  %v4202_v2 = vadd.f32 %v3882_v24, %v11243_v59  ;;  %v4197_v0 = vadd.f32 %v9277_v30, %v11244_v11  ;;  %v2941_v9 = vpop.f32.mrb[73].mxu0 }
 0x470   : > { %v4075_v27 = vadd.f32 %v9392_v13, %v2939_v31  ;;  %v9531_v62 = vpack.c.bf16 %v4719_v1, %v4715_v47  ;;  %v4467_v40 = vadd.f32 %v9188_v63, %v4189_v57  ;;  %v4471_v37 = vadd.f32 %v9188_v63, %v4193_v54  ;;  %v2943_v46 = vpop.f32.mrb[74].mxu0 }
 0x471   : > { %v4076_v14 = vadd.f32 %v9422_v36, %v2941_v9  ;;  %v4724_v16 = vmax.f32 %v4468_v60, 0.0  ;;  %v4728_v33 = vmax.f32 %v4472_v56, 0.0  ;;  %v4476_v43 = vadd.f32 %v9185_v49, %v4198_v41  ;;  %v2945_v39 = vpop.f32.mrb[75].mxu0  ;;  %v11245_v60 = vld [vmem:[#allocation41_spill] sm:$0xff] }
 0x472   : > { %v4353_v24 = vadd.f32 %v9219_v17, %v4075_v27  ;;  %v4079_v61 = vadd.f32 %v9392_v13, %v2943_v46  ;;  %v4723_v31 = vmax.f32 %v4467_v40, 0.0  ;;  %v4727_v59 = vmax.f32 %v4471_v37, 0.0  ;;  %v11246_v40 = vld [vmem:[#allocation44_spill] sm:$0xff] }
 0x473   : > { %5833 = vmatmul.mubr.bf16.gmra.mrb[20].mxu1 %v9406_v51  ;;  %v4354_v47 = vadd.f32 %v9232_v52, %v4076_v14  ;;  %v4080_v1 = vadd.f32 %v9422_v36, %v2945_v39  ;;  %v9542_v57 = vpack.c.bf16 %v4728_v33, %v4724_v16  ;;  %v4480_v54 = vadd.f32 %v9185_v49, %v4202_v2  ;;  %v11247_v2 = vld [vmem:[#allocation88_spill] sm:$0xff] }
 0x474   : > { %5842 = vmatprep.mubr.bf16.mxu1 %v9412_v55  ;;  %v4357_v41 = vadd.f32 %v9219_v17, %v4079_v61  ;;  %3208 = vmatmul.mubr.bf16.gmra.mrb[180].mxu0 %v11245_v60  ;;  %v9550_v56 = vrot.slane %v9216_v53, %v9182_v50  ;;  %v9552_v11 = vpack.c.bf16 %v4727_v59, %v4723_v31  ;;  %v4732_v51 = vmax.f32 %v4476_v43, 0.0 }
 0x475   : > { %v4609_v27 = vmax.f32 %v4353_v24, 0.0  ;;  %v4358_v9 = vadd.f32 %v9232_v52, %v4080_v1  ;;  %3217 = vmatprep.mubr.bf16.mxu0 %v11246_v40  ;;  %v4736_v37 = vmax.f32 %v4480_v54, 0.0  ;;  %v4201_v55 = vadd.f32 %v9277_v30, %v11247_v2 }
 0x476   : > { %v4610_v14 = vmax.f32 %v4354_v47, 0.0  ;;  %v4613_v46 = vmax.f32 %v4357_v41, 0.0  ;;  %v4475_v16 = vadd.f32 %v9188_v63, %v4197_v0  ;;  %v3898_v53 = vrot.slane %v9252_v6, %v9178_v5  ;;  %v2949_v61 = vpop.f32.mrb[76].mxu0  ;;  %v11248_v0 = vld [vmem:[#allocation91_spill] sm:$0xff] }
 0x477   : > { %v4614_v33 = vmax.f32 %v4358_v9, 0.0  ;;  %v9561_v39 = vpack.c.bf16 %v4736_v37, %v4732_v51  ;;  %v4479_v43 = vadd.f32 %v9188_v63, %v4201_v55  ;;  %v9566_v24 = vrot.slane %v9200_v23, %v9180_v19  ;;  %v2951_v59 = vpop.f32.mrb[77].mxu0  ;;  %v11249_v9 = vld [vmem:[#allocation93_spill] sm:$0xff] }
 0x478   : > { %v9568_v31 = vpack.c.bf16 %v4613_v46, %v4609_v27  ;;  %v4083_v30 = vadd.f32 %v9392_v13, %v2949_v61  ;;  %v4731_v47 = vmax.f32 %v4475_v16, 0.0  ;;  %v4206_v1 = vadd.f32 %v3898_v53, %v11248_v0  ;;  %v2953_v41 = vpop.f32.mrb[78].mxu0  ;;  %v11250_v46 = vld [vmem:[#allocation90_spill] sm:$0xff] }
 0x479   : > { %v4084_v54 = vadd.f32 %v9422_v36, %v2951_v59  ;;  %v9573_v60 = vpack.c.bf16 %v4614_v33, %v4610_v14  ;;  %v4735_v51 = vmax.f32 %v4479_v43, 0.0  ;;  %v4210_v40 = vadd.f32 %v3898_v53, %v11249_v9  ;;  %v2955_v27 = vpop.f32.mrb[79].mxu0  ;;  %v11251_v59 = vld [vmem:[#allocation43_spill] sm:$0xff]  ;;  %v11253_v9 = vld [vmem:[#allocation46_spill] sm:$0xff] }
 0x47a   : > { %v4361_v37 = vadd.f32 %v9219_v17, %v4083_v30  ;;  %v4087_v2 = vadd.f32 %v9392_v13, %v2953_v41  ;;  %v4484_v55 = vadd.f32 %v9185_v49, %v4206_v1  ;;  %v4205_v16 = vadd.f32 %v9289_v29, %v11250_v46  ;;  %v11252_v1 = vld [vmem:[#allocation92_spill] sm:$0xff] }
 0x47b   : > { %5843 = vmatmul.mubr.bf16.gmra.mrb[24].mxu1 %v9424_v34  ;;  %v4362_v61 = vadd.f32 %v9232_v52, %v4084_v54  ;;  %v4088_v14 = vadd.f32 %v9422_v36, %v2955_v27  ;;  %v9584_v33 = vpack.c.bf16 %v4735_v51, %v4731_v47  ;;  %v4488_v43 = vadd.f32 %v9185_v49, %v4210_v40  ;;  %v11254_v40 = vld [vmem:[#allocation95_spill] sm:$0xff] }
 0x47c   : > { %5852 = vmatprep.mubr.bf16.mxu1 %v9430_v28  ;;  %v4617_v30 = vmax.f32 %v4361_v37, 0.0  ;;  %v4365_v13 = vadd.f32 %v9219_v17, %v4087_v2  ;;  %3218 = vmatmul.mubr.bf16.gmra.mrb[184].mxu0 %v11251_v59  ;;  %v4740_v0 = vmax.f32 %v4484_v55, 0.0  ;;  %v4209_v41 = vadd.f32 %v9289_v29, %v11252_v1  ;;  %v11255_v2 = vld [vmem:[#allocation97_spill] sm:$0xff] }
 0x47d   : > { %v4618_v34 = vmax.f32 %v4362_v61, 0.0  ;;  %v4366_v54 = vadd.f32 %v9232_v52, %v4088_v14  ;;  %3227 = vmatprep.mubr.bf16.mxu0 %v11253_v9  ;;  %v4744_v36 = vmax.f32 %v4488_v43, 0.0  ;;  %v4483_v47 = vadd.f32 %v9188_v63, %v4205_v16  ;;  %v11256_v61 = vld [vmem:[#allocation94_spill] sm:$0xff] }
 0x47e   : > { %v4621_v51 = vmax.f32 %v4365_v13, 0.0  ;;  %v4487_v28 = vadd.f32 %v9188_v63, %v4209_v41  ;;  %v4214_v37 = vadd.f32 %v3898_v53, %v11254_v40  ;;  %v4218_v27 = vadd.f32 %v3898_v53, %v11255_v2  ;;  %v2959_v55 = vpop.f32.mrb[80].mxu0 }
 0x47f   : > { %v4622_v46 = vmax.f32 %v4366_v54, 0.0  ;;  %v9598_v59 = vpack.c.bf16 %v4744_v36, %v4740_v0  ;;  %v4739_v1 = vmax.f32 %v4483_v47, 0.0  ;;  %v4213_v14 = vadd.f32 %v9289_v29, %v11256_v61  ;;  %v2961_v43 = vpop.f32.mrb[81].mxu0  ;;  %v11257_v54 = vld [vmem:[#allocation96_spill] sm:$0xff] }
 0x480   : > { %v4091_v9 = vadd.f32 %v9434_v26, %v2959_v55  ;;  %v9603_v6 = vpack.c.bf16 %v4621_v51, %v4617_v30  ;;  %v4743_v16 = vmax.f32 %v4487_v28, 0.0  ;;  %v4492_v13 = vadd.f32 %v9185_v49, %v4214_v37  ;;  %v2963_v40 = vpop.f32.mrb[82].mxu0 }
 0x481   : > { %v4092_v41 = vadd.f32 %v9464_v21, %v2961_v43  ;;  %v9607_v53 = vpack.c.bf16 %v4622_v46, %v4618_v34  ;;  %v4496_v0 = vadd.f32 %v9185_v49, %v4218_v27  ;;  %v4217_v36 = vadd.f32 %v9289_v29, %v11257_v54  ;;  %v2965_v55 = vpop.f32.mrb[83].mxu0  ;;  %v11258_v46 = vld [vmem:[#allocation45_spill] sm:$0xff]  ;;  %v11259_v43 = vld [vmem:[#allocation48_spill] sm:$0xff] }
 0x482   : > { %v4369_v47 = vadd.f32 %v9219_v17, %v4091_v9  ;;  %v4095_v2 = vadd.f32 %v9434_v26, %v2963_v40  ;;  %v9614_v30 = vpack.c.bf16 %v4743_v16, %v4739_v1  ;;  %v4748_v51 = vmax.f32 %v4492_v13, 0.0 }
 0x483   : > { %5853 = vmatmul.mubr.bf16.gmra.mrb[28].mxu1 %v9448_v35  ;;  %v4370_v28 = vadd.f32 %v9232_v52, %v4092_v41  ;;  %v4096_v34 = vadd.f32 %v9464_v21, %v2965_v55  ;;  %v4752_v37 = vmax.f32 %v4496_v0, 0.0  ;;  %v4491_v27 = vadd.f32 %v9188_v63, %v4213_v14  ;;  %v11261_v0 = vld [vmem:[#allocation101_spill] sm:$0xff] }
 0x484   : > { %5862 = vmatprep.mubr.bf16.mxu1 %v9455_v12  ;;  %v4373_v29 = vadd.f32 %v9219_v17, %v4095_v2  ;;  %3228 = vmatmul.mubr.bf16.gmra.mrb[188].mxu0 %v11258_v46  ;;  %v4495_v61 = vadd.f32 %v9188_v63, %v4217_v36  ;;  %v3914_v1 = vrot.slane %v9257_v15, %v9178_v5  ;;  %v4625_v9 = vmax.f32 %v4369_v47, 0.0  ;;  %v11260_v12 = vld [vmem:[#allocation99_spill] sm:$0xff]  ;;  %v11262_v47 = vld [vmem:[#allocation98_spill] sm:$0xff] }
 0x485   : > { %v4374_v35 = vadd.f32 %v9232_v52, %v4096_v34  ;;  %3237 = vmatprep.mubr.bf16.mxu0 %v11259_v43  ;;  %v9628_v16 = vpack.c.bf16 %v4752_v37, %v4748_v51  ;;  %v4747_v13 = vmax.f32 %v4491_v27, 0.0  ;;  %v4626_v2 = vmax.f32 %v4370_v28, 0.0  ;;  %v11263_v34 = vld [vmem:[#allocation30_spill] sm:$0xff] }
 0x486   : > { %v4629_v14 = vmax.f32 %v4373_v29, 0.0  ;;  %v4751_v41 = vmax.f32 %v4495_v61, 0.0  ;;  %v4222_v40 = vadd.f32 %v3914_v1, %v11260_v12  ;;  %v4226_v54 = vadd.f32 %v3914_v1, %v11261_v0  ;;  %v2969_v36 = vpop.f32.mrb[84].mxu0  ;;  %v11264_v12 = vld [vmem:[#allocation100_spill] sm:$0xff] }
 0x487   : > { %v4630_v55 = vmax.f32 %v4374_v35, 0.0  ;;  %v9634_v46 = vrot.slane %v9200_v23, %v9182_v50  ;;  %v4221_v15 = vadd.f32 %v11263_v34, %v11262_v47  ;;  %v4099_v51 = vadd.f32 %v9434_v26, %v2969_v36  ;;  %v2971_v37 = vpop.f32.mrb[85].mxu0 }
 0x488   : > { %v9639_v27 = vpack.c.bf16 %v4629_v14, %v4625_v9  ;;  %v9641_v29 = vpack.c.bf16 %v4751_v41, %v4747_v13  ;;  %v4500_v61 = vadd.f32 %v9185_v49, %v4222_v40  ;;  %v4100_v28 = vadd.f32 %v9464_v21, %v2971_v37  ;;  %v2973_v35 = vpop.f32.mrb[86].mxu0  ;;  %v11265_v37 = vld [vmem:[#allocation47_spill] sm:$0xff] }
 0x489   : > { %v9645_v43 = vpack.c.bf16 %v4630_v55, %v4626_v2  ;;  %v4504_v23 = vadd.f32 %v9185_v49, %v4226_v54  ;;  %v4225_v0 = vadd.f32 %v11263_v34, %v11264_v12  ;;  %v4377_v47 = vadd.f32 %v9219_v17, %v4099_v51  ;;  %v2975_v9 = vpop.f32.mrb[87].mxu0  ;;  %v11267_v12 = vld [vmem:[#allocation50_spill] sm:$0xff] }
 0x48a   : > { %v4103_v36 = vadd.f32 %v9434_v26, %v2973_v35  ;;  %v4756_v14 = vmax.f32 %v4500_v61, 0.0  ;;  %v4499_v13 = vadd.f32 %v9188_v63, %v4221_v15  ;;  %v4378_v41 = vadd.f32 %v9232_v52, %v4100_v28  ;;  %v11266_v61 = vld [vmem:[#allocation103_spill] sm:$0xff] }
 0x48b   : > { %5863 = vmatmul.mubr.bf16.gmra.mrb[32].mxu1 %v9466_v18  ;;  %v4104_v40 = vadd.f32 %v9464_v21, %v2975_v9  ;;  %v4760_v2 = vmax.f32 %v4504_v23, 0.0  ;;  %v4503_v54 = vadd.f32 %v9188_v63, %v4225_v0  ;;  %v4633_v55 = vmax.f32 %v4377_v47, 0.0  ;;  %v11268_v0 = vld [vmem:[#allocation105_spill] sm:$0xff]  ;;  %v11269_v47 = vld [vmem:[#allocation102_spill] sm:$0xff] }
 0x48c   : > { %5872 = vmatprep.mubr.bf16.mxu1 %v9476_v4  ;;  %v4381_v51 = vadd.f32 %v9219_v17, %v4103_v36  ;;  %3238 = vmatmul.mubr.bf16.gmra.mrb[192].mxu0 %v11265_v37  ;;  %v4755_v26 = vmax.f32 %v4499_v13, 0.0  ;;  %v4230_v35 = vadd.f32 %v3914_v1, %v11266_v61  ;;  %v4634_v15 = vmax.f32 %v4378_v41, 0.0  ;;  %v11270_v41 = vld [vmem:[#allocation104_spill] sm:$0xff]  ;;  %v11271_v61 = vld [vmem:[#allocation26_spill] sm:$0xff] }
 0x48d   : > { %v4382_v18 = vadd.f32 %v9232_v52, %v4104_v40  ;;  %3247 = vmatprep.mubr.bf16.mxu0 %v11267_v12  ;;  %v9663_v28 = vpack.c.bf16 %v4760_v2, %v4756_v14  ;;  %v4759_v21 = vmax.f32 %v4503_v54, 0.0  ;;  %v4234_v9 = vadd.f32 %v3914_v1, %v11268_v0 }
 0x48e   : > { %v4637_v23 = vmax.f32 %v4381_v51, 0.0  ;;  %v4508_v4 = vadd.f32 %v9185_v49, %v4230_v35  ;;  %v4229_v36 = vadd.f32 %v11263_v34, %v11269_v47  ;;  %v2979_v13 = vpop.f32.mrb[88].mxu0  ;;  %v4233_v40 = vadd.f32 %v11263_v34, %v11270_v41 }
 0x48f   : > { %v4638_v37 = vmax.f32 %v4382_v18, 0.0  ;;  %v9669_v22 = vpack.c.bf16 %v4759_v21, %v4755_v26  ;;  %v3930_v14 = vrot.slane %v11271_v61, %v9178_v5  ;;  %v4107_v2 = vadd.f32 %v9474_v8, %v2979_v13  ;;  %v2981_v54 = vpop.f32.mrb[89].mxu0 }
 0x490   : > { %v9676_v51 = vpack.c.bf16 %v4637_v23, %v4633_v55  ;;  %v4512_v1 = vadd.f32 %v9185_v49, %v4234_v9  ;;  %v4764_v35 = vmax.f32 %v4508_v4, 0.0  ;;  %v4108_v12 = vadd.f32 %v9506_v45, %v2981_v54  ;;  %v2983_v18 = vpop.f32.mrb[90].mxu0  ;;  %v11272_v55 = vld [vmem:[#allocation107_spill] sm:$0xff]  ;;  %v11274_v54 = vld [vmem:[#allocation109_spill] sm:$0xff] }
 0x491   : > { %v9680_v0 = vpack.c.bf16 %v4638_v37, %v4634_v15  ;;  %v4507_v26 = vadd.f32 %v9188_v63, %v4229_v36  ;;  %v4511_v34 = vadd.f32 %v9188_v63, %v4233_v40  ;;  %v4385_v21 = vadd.f32 %v9219_v17, %v4107_v2  ;;  %v2985_v13 = vpop.f32.mrb[91].mxu0  ;;  %v11273_v40 = vld [vmem:[#allocation49_spill] sm:$0xff] }
 0x492   : > { %v4111_v47 = vadd.f32 %v9474_v8, %v2983_v18  ;;  %v4768_v41 = vmax.f32 %v4512_v1, 0.0  ;;  %v4238_v23 = vadd.f32 %v3930_v14, %v11272_v55  ;;  %v4386_v9 = vadd.f32 %v9232_v52, %v4108_v12 }
 0x493   : > { %5873 = vmatmul.mubr.bf16.gmra.mrb[36].mxu1 %v9486_v7  ;;  %v4112_v4 = vadd.f32 %v9506_v45, %v2985_v13  ;;  %v4763_v15 = vmax.f32 %v4507_v26, 0.0  ;;  %v4767_v37 = vmax.f32 %v4511_v34, 0.0  ;;  %v4242_v1 = vadd.f32 %v3930_v14, %v11274_v54 }
 0x494   : > { %5882 = vmatprep.mubr.bf16.mxu1 %v9498_v25  ;;  %v4389_v36 = vadd.f32 %v9219_v17, %v4111_v47  ;;  %3248 = vmatmul.mubr.bf16.gmra.mrb[196].mxu0 %v11273_v40  ;;  %v9693_v2 = vpack.c.bf16 %v4768_v41, %v4764_v35  ;;  %v9700_v7 = vrot.slane %v9204_v42, %v9180_v19  ;;  %v4641_v26 = vmax.f32 %v4385_v21, 0.0  ;;  %v11275_v40 = vld [vmem:[#allocation106_spill] sm:$0xff]  ;;  %v11278_v21 = vld [vmem:[#allocation111_spill] sm:$0xff] }
 0x495   : > { %v4390_v18 = vadd.f32 %v9232_v52, %v4112_v4  ;;  %5409 = vmatprep.mubr.bf16.mxu0 %v9573_v60  ;;  %v9702_v12 = vpack.c.bf16 %v4767_v37, %v4763_v15  ;;  %v4516_v25 = vadd.f32 %v9185_v49, %v4238_v23  ;;  %v4642_v34 = vmax.f32 %v4386_v9, 0.0  ;;  %v11276_v4 = vld [vmem:[#allocation151_spill] sm:$0xff]  ;;  %v11277_v60 = vld [vmem:[#allocation108_spill] sm:$0xff] }
 0x496   : > { %v4645_v47 = vmax.f32 %v4389_v36, 0.0  ;;  %v4520_v35 = vadd.f32 %v9185_v49, %v4242_v1  ;;  %v2989_v41 = vpop.f32.mrb[92].mxu0  ;;  %v4237_v54 = vadd.f32 %v11276_v4, %v11275_v40  ;;  %v4241_v61 = vadd.f32 %v11276_v4, %v11277_v60 }
 0x497   : > { %v4646_v13 = vmax.f32 %v4390_v18, 0.0  ;;  %v4772_v55 = vmax.f32 %v4516_v25, 0.0  ;;  %v4115_v3 = vadd.f32 %v9474_v8, %v2989_v41  ;;  %v2991_v15 = vpop.f32.mrb[93].mxu0  ;;  %v4246_v9 = vadd.f32 %v3930_v14, %v11278_v21  ;;  %v7605_v21 = vld [vmem:[#allocation5 + $0x114] ss:$8 sps:$4 sm:$0xff]  }
 0x498   : > { %v9711_v37 = vpack.c.bf16 %v4645_v47, %v4641_v26  ;;  %v4776_v23 = vmax.f32 %v4520_v35, 0.0  ;;  %v4116_v36 = vadd.f32 %v9506_v45, %v2991_v15  ;;  %v2993_v1 = vpop.f32.mrb[94].mxu0  ;;  %v4515_v25 = vadd.f32 %v9188_v63, %v4237_v54  ;;  %v11279_v26 = vld [vmem:[#allocation113_spill] sm:$0xff]  ;;  %v11280_v54 = vld [vmem:[#allocation110_spill] sm:$0xff] }
 0x499   : > { %v9715_v18 = vpack.c.bf16 %v4646_v13, %v4642_v34  ;;  %v4519_v40 = vadd.f32 %v9188_v63, %v4241_v61  ;;  %v4393_v44 = vadd.f32 %v9219_v17, %v4115_v3  ;;  %v4119_v60 = vadd.f32 %v9474_v8, %v2993_v1  ;;  %v2995_v41 = vpop.f32.mrb[95].mxu0 }
 0x49a   : > { %v9721_v32 = vpack.c.bf16 %v4776_v23, %v4772_v55  ;;  %v4250_v47 = vadd.f32 %v3930_v14, %v11279_v26  ;;  %v4394_v35 = vadd.f32 %v9232_v52, %v4116_v36  ;;  %v4120_v34 = vadd.f32 %v9506_v45, %v2995_v41 }
 0x49b   : > { %5883 = vmatmul.mubr.bf16.gmra.mrb[40].mxu1 %v9508_v58  ;;  %v4771_v13 = vmax.f32 %v4515_v25, 0.0  ;;  %v4775_v15 = vmax.f32 %v4519_v40, 0.0  ;;  %v4397_v61 = vadd.f32 %v9219_v17, %v4119_v60  ;;  %v4524_v3 = vadd.f32 %v9185_v49, %v4246_v9  ;;  %v7604_v58 = vld [vmem:[#allocation5 + $0x100] ss:$8 sps:$4 sm:$0xff]   ;;  %v11281_v9 = vld [vmem:[#allocation112_spill] sm:$0xff] }
 0x49c   : > { %5892 = vmatprep.mubr.bf16.mxu1 %v9512_v10  ;;  %5410 = vmatmul.mubr.bf16.vlgmr.msra.gmra.mrb[200].mxu0 %v9568_v31  ;;  %v4528_v8 = vadd.f32 %v9185_v49, %v4250_v47  ;;  %v4649_v55 = vmax.f32 %v4393_v44, 0.0  ;;  %v4398_v14 = vadd.f32 %v9232_v52, %v4120_v34  ;;  %v4245_v10 = vadd.f32 %v11276_v4, %v11280_v54  ;;  %v11282_v60 = vld [vmem:[#allocation28_spill] sm:$0xff] }
 0x49d   : > { %5419 = vmatprep.mubr.bf16.mxu0 %v9607_v53  ;;  %5731 = vmatpush1.bf16.msra.mxu0 %v7604_v58  ;;  %v9734_v45 = vpack.c.bf16 %v4775_v15, %v4771_v13  ;;  %v4653_v23 = vmax.f32 %v4397_v61, 0.0  ;;  %v4780_v31 = vmax.f32 %v4524_v3, 0.0  ;;  %v4249_v1 = vadd.f32 %v11276_v4, %v11281_v9 }
 0x49e   : > { %5732 = vmatprep.subr.bf16.mxu0 %v7605_v21  ;;  %v4784_v36 = vmax.f32 %v4528_v8, 0.0  ;;  %v4650_v44 = vmax.f32 %v4394_v35, 0.0  ;;  %v4654_v25 = vmax.f32 %v4398_v14, 0.0  ;;  %v2999_v40 = vpop.f32.mrb[96].mxu0  ;;  %v4523_v53 = vadd.f32 %v9188_v63, %v4245_v10  ;;  %v7606_v35 = vld [vmem:[#allocation5 + $0x110] ss:$8 sps:$4 sm:$0xff]  }
 0x49f   : > { %v3946_v41 = vrot.slane %v11282_v60, %v9178_v5  ;;  %v4123_v26 = vadd.f32 %v9518_v38, %v2999_v40  ;;  %v3001_v47 = vpop.f32.mrb[97].mxu0  ;;  %v9744_v34 = vpack.c.bf16 %v4653_v23, %v4649_v55  ;;  %v4527_v15 = vadd.f32 %v9188_v63, %v4249_v1  ;;  %v11283_v14 = vld [vmem:[#allocation115_spill] sm:$0xff] }
 0x4a0   : > { %v9746_v13 = vpack.c.bf16 %v4784_v36, %v4780_v31  ;;  %v4124_v61 = vadd.f32 %v9550_v56, %v3001_v47  ;;  %v3003_v4 = vpop.f32.mrb[98].mxu0  ;;  %v9750_v3 = vpack.c.bf16 %v4654_v25, %v4650_v44  ;;  %v4779_v8 = vmax.f32 %v4523_v53, 0.0  ;;  %v7607_v23 = vld [vmem:[#allocation5 + $0x124] ss:$8 sps:$4 sm:$0xff]   ;;  %v11284_v31 = vld [vmem:[#allocation117_spill] sm:$0xff] }
 0x4a1   : > { %5733 = vmatpush1.bf16.msra.mxu0 %v7606_v35  ;;  %v4254_v58 = vadd.f32 %v3946_v41, %v11283_v14  ;;  %v4401_v54 = vadd.f32 %v9219_v17, %v4123_v26  ;;  %v4127_v10 = vadd.f32 %v9518_v38, %v3003_v4  ;;  %v3005_v55 = vpop.f32.mrb[99].mxu0  ;;  %v4783_v21 = vmax.f32 %v4527_v15, 0.0  ;;  %v11285_v4 = vld [vmem:[#allocation114_spill] sm:$0xff]  ;;  %v11286_v35 = vld [vmem:[#allocation152_spill] sm:$0xff] }
 0x4a2   : > { %5734 = vmatprep.subr.bf16.mxu0 %v7607_v23  ;;  %v4258_v36 = vadd.f32 %v3946_v41, %v11284_v31  ;;  %v4402_v9 = vadd.f32 %v9232_v52, %v4124_v61  ;;  %v4128_v1 = vadd.f32 %v9550_v56, %v3005_v55  ;;  %v9761_v44 = vrot.slane %v9204_v42, %v9182_v50  ;;  %v7608_v42 = vld [vmem:[#allocation5 + $0x120] ss:$8 sps:$4 sm:$0xff]  }
 0x4a3   : > { %5893 = vmatmul.mubr.bf16.gmra.mrb[44].mxu1 %v9531_v62  ;;  %v4532_v25 = vadd.f32 %v9185_v49, %v4254_v58  ;;  %v4657_v40 = vmax.f32 %v4401_v54, 0.0  ;;  %v4405_v53 = vadd.f32 %v9219_v17, %v4127_v10  ;;  %v9767_v26 = vpack.c.bf16 %v4783_v21, %v4779_v8  ;;  %v7609_v58 = vld [vmem:[#allocation5 + $0x134] ss:$8 sps:$4 sm:$0xff]   ;;  %v11288_v10 = vld [vmem:[#allocation119_spill] sm:$0xff] }
 0x4a4   : > { %5902 = vmatprep.mubr.bf16.mxu1 %v9542_v57  ;;  %5420 = vmatmul.mubr.bf16.gmra.mrb[204].mxu0 %v9603_v6  ;;  %v4536_v62 = vadd.f32 %v9185_v49, %v4258_v36  ;;  %v4658_v47 = vmax.f32 %v4402_v9, 0.0  ;;  %v4406_v15 = vadd.f32 %v9232_v52, %v4128_v1  ;;  %v4253_v57 = vadd.f32 %v11286_v35, %v11285_v4  ;;  %v11287_v6 = vld [vmem:[#allocation116_spill] sm:$0xff]  ;;  %v11290_v9 = vld [vmem:[#allocation118_spill] sm:$0xff] }
 0x4a5   : > { %5429 = vmatprep.mubr.bf16.mxu0 %v9645_v43  ;;  %5735 = vmatpush1.bf16.msra.mxu0 %v7608_v42  ;;  %v4788_v61 = vmax.f32 %v4532_v25, 0.0  ;;  %v4661_v14 = vmax.f32 %v4405_v53, 0.0  ;;  %v4257_v8 = vadd.f32 %v11286_v35, %v11287_v6  ;;  %v4262_v55 = vadd.f32 %v3946_v41, %v11288_v10  ;;  %v11289_v43 = vld [vmem:[#allocation121_spill] sm:$0xff] }
 0x4a6   : > { %5736 = vmatprep.subr.bf16.mxu0 %v7609_v58  ;;  %v4792_v54 = vmax.f32 %v4536_v62, 0.0  ;;  %v4662_v23 = vmax.f32 %v4406_v15, 0.0  ;;  %v3009_v21 = vpop.f32.mrb[100].mxu0  ;;  %v4531_v31 = vadd.f32 %v9188_v63, %v4253_v57  ;;  %v4266_v36 = vadd.f32 %v3946_v41, %v11289_v43  ;;  %v7610_v57 = vld [vmem:[#allocation5 + $0x130] ss:$8 sps:$4 sm:$0xff]  }
 0x4a7   : > { %v4261_v1 = vadd.f32 %v11286_v35, %v11290_v9  ;;  %v4131_v25 = vadd.f32 %v9518_v38, %v3009_v21  ;;  %v3011_v53 = vpop.f32.mrb[101].mxu0  ;;  %v9782_v42 = vpack.c.bf16 %v4661_v14, %v4657_v40  ;;  %v4535_v4 = vadd.f32 %v9188_v63, %v4257_v8  ;;  %v7611_v14 = vld [vmem:[#allocation5 + $0x144] ss:$8 sps:$4 sm:$0xff]  }
 0x4a8   : > { %v9784_v62 = vpack.c.bf16 %v4792_v54, %v4788_v61  ;;  %v4132_v58 = vadd.f32 %v9550_v56, %v3011_v53  ;;  %v3013_v15 = vpop.f32.mrb[102].mxu0  ;;  %v9788_v6 = vpack.c.bf16 %v4662_v23, %v4658_v47  ;;  %v4787_v41 = vmax.f32 %v4531_v31, 0.0  ;;  %v11291_v31 = vld [vmem:[#allocation120_spill] sm:$0xff] }
 0x4a9   : > { %5737 = vmatpush1.bf16.msra.mxu0 %v7610_v57  ;;  %v4540_v10 = vadd.f32 %v9185_v49, %v4262_v55  ;;  %v4409_v43 = vadd.f32 %v9219_v17, %v4131_v25  ;;  %v4135_v21 = vadd.f32 %v9518_v38, %v3013_v15  ;;  %v3015_v40 = vpop.f32.mrb[103].mxu0  ;;  %v4791_v61 = vmax.f32 %v4535_v4, 0.0  ;;  %v11292_v15 = vld [vmem:[#allocation21_spill] sm:$0xff] }
 0x4aa   : > { %5738 = vmatprep.subr.bf16.mxu0 %v7611_v14  ;;  %v4544_v54 = vadd.f32 %v9185_v49, %v4266_v36  ;;  %v4410_v47 = vadd.f32 %v9232_v52, %v4132_v58  ;;  %v4136_v8 = vadd.f32 %v9550_v56, %v3015_v40  ;;  %v4265_v55 = vadd.f32 %v11286_v35, %v11291_v31  ;;  %v7612_v56 = vld [vmem:[#allocation5 + $0x140] ss:$8 sps:$4 sm:$0xff]   ;;  %v7613_v58 = vld [vmem:[#allocation5 + $0x154] ss:$8 sps:$4 sm:$0xff]  }
 0x4ab   : > { %5903 = vmatmul.mubr.bf16.gmra.mrb[48].mxu1 %v9552_v11  ;;  %v4796_v23 = vmax.f32 %v4540_v10, 0.0  ;;  %v4413_v38 = vadd.f32 %v9219_v17, %v4135_v21  ;;  %v9804_v9 = vrot.slane %v9212_v48, %v9180_v19  ;;  %v9806_v36 = vpack.c.bf16 %v4791_v61, %v4787_v41 }
 0x4ac   : > { %5912 = vmatprep.mubr.bf16.mxu1 %v9561_v39  ;;  %5430 = vmatmul.mubr.bf16.gmra.mrb[208].mxu0 %v9639_v27  ;;  %v4800_v11 = vmax.f32 %v4544_v54, 0.0  ;;  %v4414_v25 = vadd.f32 %v9232_v52, %v4136_v8  ;;  %v4539_v35 = vadd.f32 %v9188_v63, %v4261_v1  ;;  %v4543_v39 = vadd.f32 %v9188_v63, %v4265_v55  ;;  %v11293_v54 = vld [vmem:[#allocation123_spill] sm:$0xff]  ;;  %v11294_v8 = vld [vmem:[#allocation125_spill] sm:$0xff] }
 0x4ad   : > { %5439 = vmatprep.mubr.bf16.mxu0 %v9680_v0  ;;  %5739 = vmatpush1.bf16.msra.mxu0 %v7612_v56  ;;  %v4665_v53 = vmax.f32 %v4409_v43, 0.0  ;;  %v4669_v4 = vmax.f32 %v4413_v38, 0.0  ;;  %v3962_v57 = vrot.slane %v11292_v15, %v9178_v5  ;;  %v4666_v41 = vmax.f32 %v4410_v47, 0.0  ;;  %v7614_v47 = vld [vmem:[#allocation5 + $0x150] ss:$8 sps:$4 sm:$0xff]  }
 0x4ae   : > { %v9812_v27 = vpack.c.bf16 %v4800_v11, %v4796_v23  ;;  %5740 = vmatprep.subr.bf16.mxu0 %v7613_v58  ;;  %v4670_v10 = vmax.f32 %v4414_v25, 0.0  ;;  %v3019_v21 = vpop.f32.mrb[104].mxu0  ;;  %v4795_v40 = vmax.f32 %v4539_v35, 0.0  ;;  %v4799_v0 = vmax.f32 %v4543_v39, 0.0  ;;  %v11295_v25 = vld [vmem:[#allocation122_spill] sm:$0xff]  ;;  %v11296_v56 = vld [vmem:[#allocation153_spill] sm:$0xff] }
 0x4af   : > { %v4139_v14 = vadd.f32 %v9566_v24, %v3019_v21  ;;  %v3021_v61 = vpop.f32.mrb[105].mxu0  ;;  %v9817_v1 = vpack.c.bf16 %v4669_v4, %v4665_v53  ;;  %v4270_v43 = vadd.f32 %v3962_v57, %v11293_v54  ;;  %v4274_v23 = vadd.f32 %v3962_v57, %v11294_v8 }
 0x4b0   : > { %v4140_v31 = vadd.f32 %v9634_v46, %v3021_v61  ;;  %v3023_v55 = vpop.f32.mrb[106].mxu0  ;;  %v9822_v38 = vpack.c.bf16 %v4670_v10, %v4666_v41  ;;  %v9824_v11 = vpack.c.bf16 %v4799_v0, %v4795_v40  ;;  %v4269_v35 = vadd.f32 %v11296_v56, %v11295_v25  ;;  %v7615_v61 = vld [vmem:[#allocation5 + $0x164] ss:$8 sps:$4 sm:$0xff]   ;;  %v11297_v40 = vld [vmem:[#allocation124_spill] sm:$0xff]  ;;  %v7616_v25 = vld [vmem:[#allocation5 + $0x160] ss:$8 sps:$4 sm:$0xff]  }
 0x4b1   : > { %5741 = vmatpush1.bf16.msra.mxu0 %v7614_v47  ;;  %v4417_v39 = vadd.f32 %v9219_v17, %v4139_v14  ;;  %v4143_v53 = vadd.f32 %v9566_v24, %v3023_v55  ;;  %v3025_v4 = vpop.f32.mrb[107].mxu0  ;;  %v4548_v58 = vadd.f32 %v9185_v49, %v4270_v43  ;;  %v4552_v21 = vadd.f32 %v9185_v49, %v4274_v23 }
 0x4b2   : > { %5742 = vmatprep.subr.bf16.mxu0 %v7615_v61  ;;  %v4418_v41 = vadd.f32 %v9232_v52, %v4140_v31  ;;  %v4144_v10 = vadd.f32 %v9634_v46, %v3025_v4  ;;  %v4273_v0 = vadd.f32 %v11296_v56, %v11297_v40  ;;  %v4547_v14 = vadd.f32 %v9188_v63, %v4269_v35  ;;  %v11301_v40 = vld [vmem:[#allocation128_spill] sm:$0xff] }
 0x4b3   : > { %5913 = vmatmul.mubr.bf16.gmra.mrb[52].mxu1 %v9584_v33  ;;  %v4673_v54 = vmax.f32 %v4417_v39, 0.0  ;;  %v4421_v43 = vadd.f32 %v9219_v17, %v4143_v53  ;;  %v4804_v8 = vmax.f32 %v4548_v58, 0.0  ;;  %v4808_v23 = vmax.f32 %v4552_v21, 0.0  ;;  %v11299_v53 = vld [vmem:[#allocation129_spill] sm:$0xff] }
 0x4b4   : > { %5922 = vmatprep.mubr.bf16.mxu1 %v9598_v59  ;;  %5440 = vmatmul.mubr.bf16.gmra.mrb[212].mxu0 %v9676_v51  ;;  %v4674_v55 = vmax.f32 %v4418_v41, 0.0  ;;  %v4422_v33 = vadd.f32 %v9232_v52, %v4144_v10  ;;  %v4551_v31 = vadd.f32 %v9188_v63, %v4273_v0  ;;  %v4803_v47 = vmax.f32 %v4547_v14, 0.0  ;;  %v11298_v59 = vld [vmem:[#allocation127_spill] sm:$0xff]  ;;  %v7617_v51 = vld [vmem:[#allocation5 + $0x174] ss:$8 sps:$4 sm:$0xff]   ;;  %v11300_v10 = vld [vmem:[#allocation126_spill] sm:$0xff] }
 0x4b5   : > { %5449 = vmatprep.mubr.bf16.mxu0 %v9715_v18  ;;  %5743 = vmatpush1.bf16.msra.mxu0 %v7616_v25  ;;  %v4677_v35 = vmax.f32 %v4421_v43, 0.0  ;;  %v9844_v4 = vpack.c.bf16 %v4808_v23, %v4804_v8  ;;  %v4278_v39 = vadd.f32 %v3962_v57, %v11298_v59  ;;  %v4282_v61 = vadd.f32 %v3962_v57, %v11299_v53 }
 0x4b6   : > { %5744 = vmatprep.subr.bf16.mxu0 %v7617_v51  ;;  %v4678_v58 = vmax.f32 %v4422_v33, 0.0  ;;  %v3029_v21 = vpop.f32.mrb[108].mxu0  ;;  %v4807_v41 = vmax.f32 %v4551_v31, 0.0  ;;  %v4277_v18 = vadd.f32 %v11296_v56, %v11300_v10  ;;  %v4281_v0 = vadd.f32 %v11296_v56, %v11301_v40  ;;  %v7618_v51 = vld [vmem:[#allocation5 + $0x170] ss:$8 sps:$4 sm:$0xff]  }
 0x4b7   : > { %v4147_v14 = vadd.f32 %v9566_v24, %v3029_v21  ;;  %v3031_v43 = vpop.f32.mrb[109].mxu0  ;;  %v9853_v8 = vpack.c.bf16 %v4677_v35, %v4673_v54  ;;  %v4556_v23 = vadd.f32 %v9185_v49, %v4278_v39  ;;  %v4560_v57 = vadd.f32 %v9185_v49, %v4282_v61  ;;  %v7619_v10 = vld [vmem:[#allocation5 + $0x184] ss:$8 sps:$4 sm:$0xff]  }
 0x4b8   : > { %v4148_v25 = vadd.f32 %v9634_v46, %v3031_v43  ;;  %v3033_v33 = vpop.f32.mrb[110].mxu0  ;;  %v9858_v59 = vpack.c.bf16 %v4678_v58, %v4674_v55  ;;  %v9860_v31 = vpack.c.bf16 %v4807_v41, %v4803_v47  ;;  %v4555_v53 = vadd.f32 %v9188_v63, %v4277_v18  ;;  %v11302_v18 = vld [vmem:[#allocation23_spill] sm:$0xff] }
 0x4b9   : > { %5745 = vmatpush1.bf16.msra.mxu0 %v7618_v51  ;;  %v4425_v56 = vadd.f32 %v9219_v17, %v4147_v14  ;;  %v4151_v54 = vadd.f32 %v9566_v24, %v3033_v33  ;;  %v3035_v35 = vpop.f32.mrb[111].mxu0  ;;  %v4812_v21 = vmax.f32 %v4556_v23, 0.0  ;;  %v4816_v39 = vmax.f32 %v4560_v57, 0.0 }
 0x4ba   : > { %5746 = vmatprep.subr.bf16.mxu0 %v7619_v10  ;;  %v4426_v55 = vadd.f32 %v9232_v52, %v4148_v25  ;;  %v4152_v47 = vadd.f32 %v9634_v46, %v3035_v35  ;;  %v4559_v61 = vadd.f32 %v9188_v63, %v4281_v0  ;;  %v4811_v58 = vmax.f32 %v4555_v53, 0.0  ;;  %v11304_v25 = vld [vmem:[#allocation133_spill] sm:$0xff]  ;;  %v11306_v35 = vld [vmem:[#allocation154_spill] sm:$0xff] }
 0x4bb   : > { %5923 = vmatmul.mubr.bf16.gmra.mrb[56].mxu1 %v9614_v30  ;;  %v4429_v41 = vadd.f32 %v9219_v17, %v4151_v54  ;;  %v9872_v24 = vpack.c.bf16 %v4816_v39, %v4812_v21  ;;  %v3978_v40 = vrot.slane %v11302_v18, %v9178_v5  ;;  %v4681_v14 = vmax.f32 %v4425_v56, 0.0  ;;  %v7621_v53 = vld [vmem:[#allocation5 + $0x194] ss:$8 sps:$4 sm:$0xff]  }
 0x4bc   : > { %5932 = vmatprep.mubr.bf16.mxu1 %v9628_v16  ;;  %5450 = vmatmul.mubr.bf16.gmra.mrb[216].mxu0 %v9711_v37  ;;  %v4430_v30 = vadd.f32 %v9232_v52, %v4152_v47  ;;  %v9880_v46 = vrot.slane %v9212_v48, %v9182_v50  ;;  %v4815_v0 = vmax.f32 %v4559_v61, 0.0  ;;  %v7620_v16 = vld [vmem:[#allocation5 + $0x180] ss:$8 sps:$4 sm:$0xff]   ;;  %v4682_v43 = vmax.f32 %v4426_v55, 0.0  ;;  %v11307_v48 = vld [vmem:[#allocation132_spill] sm:$0xff] }
 0x4bd   : > { %5459 = vmatprep.mubr.bf16.mxu0 %v9750_v3  ;;  %5747 = vmatpush1.bf16.msra.mxu0 %v7620_v16  ;;  %v4685_v23 = vmax.f32 %v4429_v41, 0.0  ;;  %v11303_v37 = vld [vmem:[#allocation131_spill] sm:$0xff]  ;;  %v4290_v33 = vadd.f32 %v3978_v40, %v11304_v25  ;;  %v11305_v3 = vld [vmem:[#allocation130_spill] sm:$0xff]  ;;  %v4289_v39 = vadd.f32 %v11306_v35, %v11307_v48  ;;  %v7622_v25 = vld [vmem:[#allocation5 + $0x190] ss:$8 sps:$4 sm:$0xff]  }
 0x4be   : > { %v4286_v57 = vadd.f32 %v3978_v40, %v11303_v37  ;;  %5748 = vmatprep.subr.bf16.mxu0 %v7621_v53  ;;  %v4686_v51 = vmax.f32 %v4430_v30, 0.0  ;;  %v3039_v56 = vpop.f32.mrb[112].mxu0  ;;  %v9884_v54 = vpack.c.bf16 %v4815_v0, %v4811_v58  ;;  %v4285_v21 = vadd.f32 %v11306_v35, %v11305_v3  ;;  %v7623_v3 = vld [vmem:[#allocation5 + $0x1a4] ss:$8 sps:$4 sm:$0xff]  }
 0x4bf   : > { %v4155_v10 = vadd.f32 %v9700_v7, %v3039_v56  ;;  %v3041_v55 = vpop.f32.mrb[113].mxu0  ;;  %v9891_v47 = vpack.c.bf16 %v4685_v23, %v4681_v14  ;;  %v4568_v41 = vadd.f32 %v9185_v49, %v4290_v33  ;;  %v4567_v37 = vadd.f32 %v9188_v63, %v4289_v39 }
 0x4c0   : > { %v4564_v61 = vadd.f32 %v9185_v49, %v4286_v57  ;;  %v4156_v30 = vadd.f32 %v9761_v44, %v3041_v55  ;;  %v3043_v16 = vpop.f32.mrb[114].mxu0  ;;  %v9896_v58 = vpack.c.bf16 %v4686_v51, %v4682_v43  ;;  %v4563_v0 = vadd.f32 %v9188_v63, %v4285_v21 }
 0x4c1   : > { %5749 = vmatpush1.bf16.msra.mxu0 %v7622_v25  ;;  %v4433_v53 = vadd.f32 %v9219_v17, %v4155_v10  ;;  %v4159_v14 = vadd.f32 %v9700_v7, %v3043_v16  ;;  %v3045_v23 = vpop.f32.mrb[115].mxu0  ;;  %v4824_v57 = vmax.f32 %v4568_v41, 0.0  ;;  %v4823_v21 = vmax.f32 %v4567_v37, 0.0  ;;  %v11308_v10 = vld [vmem:[#allocation135_spill] sm:$0xff]  ;;  %v11310_v25 = vld [vmem:[#allocation134_spill] sm:$0xff] }
 0x4c2   : > { %v4820_v56 = vmax.f32 %v4564_v61, 0.0  ;;  %5750 = vmatprep.subr.bf16.mxu0 %v7623_v3  ;;  %v4434_v43 = vadd.f32 %v9232_v52, %v4156_v30  ;;  %v4160_v33 = vadd.f32 %v9761_v44, %v3045_v23  ;;  %v4819_v51 = vmax.f32 %v4563_v0, 0.0  ;;  %v11309_v30 = vld [vmem:[#allocation137_spill] sm:$0xff]  ;;  %v7624_v0 = vld [vmem:[#allocation5 + $0x1a0] ss:$8 sps:$4 sm:$0xff]  }
 0x4c3   : > { %5933 = vmatmul.mubr.bf16.gmra.mrb[60].mxu1 %v9641_v29  ;;  %v4437_v48 = vadd.f32 %v9219_v17, %v4159_v14  ;;  %v4294_v55 = vadd.f32 %v3978_v40, %v11308_v10  ;;  %v4689_v61 = vmax.f32 %v4433_v53, 0.0  ;;  %v4298_v16 = vadd.f32 %v3978_v40, %v11309_v30  ;;  %v11311_v14 = vld [vmem:[#allocation136_spill] sm:$0xff]  ;;  %v11312_v40 = vld [vmem:[#allocation25_spill] sm:$0xff] }
 0x4c4   : > { %5942 = vmatprep.mubr.bf16.mxu1 %v9663_v28  ;;  %5460 = vmatmul.mubr.bf16.gmra.mrb[220].mxu0 %v9744_v34  ;;  %v9908_v39 = vpack.c.bf16 %v4824_v57, %v4820_v56  ;;  %v4438_v41 = vadd.f32 %v9232_v52, %v4160_v33  ;;  %v9913_v29 = vpack.c.bf16 %v4823_v21, %v4819_v51  ;;  %v7625_v53 = vld [vmem:[#allocation5 + $0x1b4] ss:$8 sps:$4 sm:$0xff]   ;;  %v4690_v56 = vmax.f32 %v4434_v43, 0.0 }
 0x4c5   : > { %5469 = vmatprep.mubr.bf16.mxu0 %v9788_v6  ;;  %5751 = vmatpush1.bf16.msra.mxu0 %v7624_v0  ;;  %v4693_v28 = vmax.f32 %v4437_v48, 0.0  ;;  %v4572_v37 = vadd.f32 %v9185_v49, %v4294_v55  ;;  %v4293_v34 = vadd.f32 %v11306_v35, %v11310_v25  ;;  %v4297_v23 = vadd.f32 %v11306_v35, %v11311_v14 }
 0x4c6   : > { %5752 = vmatprep.subr.bf16.mxu0 %v7625_v53  ;;  %v4694_v57 = vmax.f32 %v4438_v41, 0.0  ;;  %v3049_v6 = vpop.f32.mrb[116].mxu0  ;;  %v4576_v3 = vadd.f32 %v9185_v49, %v4298_v16  ;;  %v3994_v33 = vrot.slane %v11312_v40, %v9178_v5  ;;  %v7626_v16 = vld [vmem:[#allocation5 + $0x1b0] ss:$8 sps:$4 sm:$0xff]  }
 0x4c7   : > { %v4163_v51 = vadd.f32 %v9700_v7, %v3049_v6  ;;  %v3051_v21 = vpop.f32.mrb[117].mxu0  ;;  %v9925_v48 = vpack.c.bf16 %v4693_v28, %v4689_v61  ;;  %v4828_v10 = vmax.f32 %v4572_v37, 0.0  ;;  %v4571_v55 = vadd.f32 %v9188_v63, %v4293_v34  ;;  %v11313_v28 = vld [vmem:[#allocation139_spill] sm:$0xff] }
 0x4c8   : > { %v4164_v35 = vadd.f32 %v9761_v44, %v3051_v21  ;;  %v3053_v30 = vpop.f32.mrb[118].mxu0  ;;  %v9929_v0 = vpack.c.bf16 %v4694_v57, %v4690_v56  ;;  %v4832_v43 = vmax.f32 %v4576_v3, 0.0  ;;  %v4575_v41 = vadd.f32 %v9188_v63, %v4297_v23  ;;  %v7627_v6 = vld [vmem:[#allocation5 + $0x1c4] ss:$8 sps:$4 sm:$0xff]  }
 0x4c9   : > { %5753 = vmatpush1.bf16.msra.mxu0 %v7626_v16  ;;  %v4441_v25 = vadd.f32 %v9219_v17, %v4163_v51  ;;  %v4167_v14 = vadd.f32 %v9700_v7, %v3053_v30  ;;  %v3055_v53 = vpop.f32.mrb[119].mxu0  ;;  %v4827_v61 = vmax.f32 %v4571_v55, 0.0  ;;  %v4302_v37 = vadd.f32 %v3994_v33, %v11313_v28  ;;  %v11314_v7 = vld [vmem:[#allocation141_spill] sm:$0xff]  ;;  %v11317_v28 = vld [vmem:[#allocation140_spill] sm:$0xff] }
 0x4ca   : > { %5754 = vmatprep.subr.bf16.mxu0 %v7627_v6  ;;  %v4442_v34 = vadd.f32 %v9232_v52, %v4164_v35  ;;  %v4168_v56 = vadd.f32 %v9761_v44, %v3055_v53  ;;  %v9938_v57 = vpack.c.bf16 %v4832_v43, %v4828_v10  ;;  %v4831_v23 = vmax.f32 %v4575_v41, 0.0  ;;  %v7628_v10 = vld [vmem:[#allocation5 + $0x1c0] ss:$8 sps:$4 sm:$0xff]  }
 0x4cb   : > { %5943 = vmatmul.mubr.bf16.gmra.mrb[64].mxu1 %v9669_v22  ;;  %v4445_v3 = vadd.f32 %v9219_v17, %v4167_v14  ;;  %v4306_v51 = vadd.f32 %v3994_v33, %v11314_v7  ;;  %v4580_v21 = vadd.f32 %v9185_v49, %v4302_v37  ;;  %v4697_v55 = vmax.f32 %v4441_v25, 0.0  ;;  %v11315_v41 = vld [vmem:[#allocation138_spill] sm:$0xff]  ;;  %v7629_v14 = vld [vmem:[#allocation5 + $0x1d4] ss:$8 sps:$4 sm:$0xff]   ;;  %v11318_v6 = vld [vmem:[#allocation143_spill] sm:$0xff] }
 0x4cc   : > { %5952 = vmatprep.mubr.bf16.mxu1 %v9693_v2  ;;  %5470 = vmatmul.mubr.bf16.gmra.mrb[224].mxu0 %v9782_v42  ;;  %v4698_v30 = vmax.f32 %v4442_v34, 0.0  ;;  %v4446_v22 = vadd.f32 %v9232_v52, %v4168_v56  ;;  %v9947_v44 = vpack.c.bf16 %v4831_v23, %v4827_v61  ;;  %v11316_v42 = vld [vmem:[#allocation155_spill] sm:$0xff]  ;;  %v11319_v61 = vld [vmem:[#allocation145_spill] sm:$0xff] }
 0x4cd   : > { %5479 = vmatprep.mubr.bf16.mxu0 %v9822_v38  ;;  %5755 = vmatpush1.bf16.msra.mxu0 %v7628_v10  ;;  %v4701_v35 = vmax.f32 %v4445_v3, 0.0  ;;  %v4584_v2 = vadd.f32 %v9185_v49, %v4306_v51  ;;  %v4836_v43 = vmax.f32 %v4580_v21, 0.0  ;;  %v4301_v16 = vadd.f32 %v11316_v42, %v11315_v41 }
 0x4ce   : > { %5756 = vmatprep.subr.bf16.mxu0 %v7629_v14  ;;  %v4702_v53 = vmax.f32 %v4446_v22, 0.0  ;;  %v3059_v25 = vpop.f32.mrb[120].mxu0  ;;  %v4305_v37 = vadd.f32 %v11316_v42, %v11317_v28  ;;  %v4310_v38 = vadd.f32 %v3994_v33, %v11318_v6  ;;  %v4314_v34 = vadd.f32 %v3994_v33, %v11319_v61  ;;  %v7630_v28 = vld [vmem:[#allocation5 + $0x1d0] ss:$8 sps:$4 sm:$0xff]  }
 0x4cf   : > { %v4171_v56 = vadd.f32 %v9804_v9, %v3059_v25  ;;  %v3061_v23 = vpop.f32.mrb[121].mxu0  ;;  %v9957_v3 = vpack.c.bf16 %v4701_v35, %v4697_v55  ;;  %v4840_v7 = vmax.f32 %v4584_v2, 0.0  ;;  %v4579_v51 = vadd.f32 %v9188_v63, %v4301_v16  ;;  %v7631_v16 = vld [vmem:[#allocation5 + $0x1e4] ss:$8 sps:$4 sm:$0xff]  }
 0x4d0   : > { %v4172_v21 = vadd.f32 %v9880_v46, %v3061_v23  ;;  %v3063_v10 = vpop.f32.mrb[122].mxu0  ;;  %v9961_v22 = vpack.c.bf16 %v4702_v53, %v4698_v30  ;;  %v4583_v41 = vadd.f32 %v9188_v63, %v4305_v37  ;;  %v4588_v14 = vadd.f32 %v9185_v49, %v4310_v38 }
 0x4d1   : > { %5757 = vmatpush1.bf16.msra.mxu0 %v7630_v28  ;;  %v4449_v33 = vadd.f32 %v9219_v17, %v4171_v56  ;;  %v4175_v25 = vadd.f32 %v9804_v9, %v3063_v10  ;;  %v3065_v55 = vpop.f32.mrb[123].mxu0  ;;  %v9967_v35 = vpack.c.bf16 %v4840_v7, %v4836_v43  ;;  %v4835_v2 = vmax.f32 %v4579_v51, 0.0  ;;  %v11320_v56 = vld [vmem:[#allocation142_spill] sm:$0xff] }
 0x4d2   : > { %5758 = vmatprep.subr.bf16.mxu0 %v7631_v16  ;;  %v4450_v30 = vadd.f32 %v9232_v52, %v4172_v21  ;;  %v4176_v53 = vadd.f32 %v9880_v46, %v3065_v55  ;;  %v4839_v37 = vmax.f32 %v4583_v41, 0.0  ;;  %v4592_v6 = vadd.f32 %v9185_v49, %v4314_v34  ;;  %v7632_v51 = vld [vmem:[#allocation5 + $0x1e0] ss:$8 sps:$4 sm:$0xff]  }
 0x4d3   : > { %5953 = vmatmul.mubr.bf16.gmra.mrb[68].mxu1 %v9702_v12  ;;  %v4453_v38 = vadd.f32 %v9219_v17, %v4175_v25  ;;  %v9978_v43 = vrot.slane %v9223_v20, %v9180_v19  ;;  %v4844_v61 = vmax.f32 %v4588_v14, 0.0  ;;  %v4309_v12 = vadd.f32 %v11316_v42, %v11320_v56  ;;  %v11322_v14 = vld [vmem:[#allocation27_spill] sm:$0xff]  ;;  %v7633_v25 = vld [vmem:[#allocation5 + $0x1f4] ss:$8 sps:$4 sm:$0xff]  }
 0x4d4   : > { %5962 = vmatprep.mubr.bf16.mxu1 %v9721_v32  ;;  %5480 = vmatmul.mubr.bf16.gmra.mrb[228].mxu0 %v9817_v1  ;;  %v4705_v23 = vmax.f32 %v4449_v33, 0.0  ;;  %v4454_v7 = vadd.f32 %v9232_v52, %v4176_v53  ;;  %v9984_v34 = vpack.c.bf16 %v4839_v37, %v4835_v2  ;;  %v4848_v32 = vmax.f32 %v4592_v6, 0.0  ;;  %v11321_v1 = vld [vmem:[#allocation144_spill] sm:$0xff] }
 0x4d5   : > { %5489 = vmatprep.mubr.bf16.mxu0 %v9858_v59  ;;  %5759 = vmatpush1.bf16.msra.mxu0 %v7632_v51  ;;  %v4709_v21 = vmax.f32 %v4453_v38, 0.0  ;;  %v4313_v10 = vadd.f32 %v11316_v42, %v11321_v1  ;;  %v4587_v41 = vadd.f32 %v9188_v63, %v4309_v12  ;;  %v4010_v28 = vrot.slane %v11322_v14, %v9178_v5  ;;  %v11324_v1 = vld [vmem:[#allocation15_spill] sm:$0xff] }
 0x4d6   : > { %5760 = vmatprep.subr.bf16.mxu0 %v7633_v25  ;;  %v4706_v33 = vmax.f32 %v4450_v30, 0.0  ;;  %v4710_v55 = vmax.f32 %v4454_v7, 0.0  ;;  %v3069_v16 = vpop.f32.mrb[124].mxu0  ;;  %v9993_v59 = vrot.slane %v9223_v20, %v9182_v50  ;;  %v9995_v2 = vpack.c.bf16 %v4848_v32, %v4844_v61  ;;  %v11323_v7 = vld [vmem:[#allocation147_spill] sm:$0xff]  ;;  %v7634_v25 = vld [vmem:[#allocation5 + $0x1f0] ss:$8 sps:$4 sm:$0xff]  }
 0x4d7   : > { %v4179_v53 = vadd.f32 %v9804_v9, %v3069_v16  ;;  %v3071_v37 = vpop.f32.mrb[125].mxu0  ;;  %v9998_v42 = vpack.c.bf16 %v4709_v21, %v4705_v23  ;;  %v4591_v6 = vadd.f32 %v9188_v63, %v4313_v10  ;;  %v4843_v38 = vmax.f32 %v4587_v41, 0.0  ;;  %v11325_v16 = vld [vmem:[#allocation146_spill] sm:$0xff]  ;;  %v11326_v10 = vld [vmem:[#allocation29_spill] sm:$0xff] }
 0x4d8   : > { %v4180_v56 = vadd.f32 %v9880_v46, %v3071_v37  ;;  %v3073_v12 = vpop.f32.mrb[126].mxu0  ;;  %v10002_v30 = vpack.c.bf16 %v4710_v55, %v4706_v33  ;;  %v4318_v51 = vadd.f32 %v4010_v28, %v11323_v7  ;;  %v4322_v20 = vadd.f32 %v4010_v28, %v11324_v1 }
 0x4d9   : > { %5761 = vmatpush1.bf16.msra.mxu0 %v7634_v25  ;;  %v4457_v61 = vadd.f32 %v9219_v17, %v4179_v53  ;;  %v4183_v32 = vadd.f32 %v9804_v9, %v3073_v12  ;;  %v3075_v23 = vpop.f32.mrb[127].mxu0  ;;  %v4847_v21 = vmax.f32 %v4591_v6, 0.0  ;;  %v4317_v41 = vadd.f32 %v11326_v10, %v11325_v16  ;;  %v11327_v12 = vld [vmem:[#allocation148_spill] sm:$0xff] }
 0x4da   : > { %v4458_v33 = vadd.f32 %v9232_v52, %v4180_v56  ;;  %v4184_v55 = vadd.f32 %v9880_v46, %v3075_v23  ;;  %v4596_v37 = vadd.f32 %v9185_v49, %v4318_v51  ;;  %v4600_v7 = vadd.f32 %v9185_v49, %v4322_v20 }
 0x4db   : > { %5963 = vmatmul.mubr.bf16.gmra.mrb[72].mxu1 %v9734_v45  ;;  %v4713_v53 = vmax.f32 %v4457_v61, 0.0  ;;  %v4461_v9 = vadd.f32 %v9219_v17, %v4183_v32  ;;  %v10018_v6 = vpack.c.bf16 %v4847_v21, %v4843_v38  ;;  %v4321_v45 = vadd.f32 %v11326_v10, %v11327_v12  ;;  %v11328_v61 = vld [vmem:[#allocation150_spill] sm:$0xff]  ;;  %v11329_v21 = vld [vmem:[#allocation17_spill] sm:$0xff] }
 0x4dc   : > { %5972 = vmatprep.mubr.bf16.mxu1 %v9746_v13  ;;  %5490 = vmatmul.mubr.bf16.gmra.mrb[232].mxu0 %v9853_v8  ;;  %v4714_v1 = vmax.f32 %v4458_v33, 0.0  ;;  %v4462_v56 = vadd.f32 %v9232_v52, %v4184_v55  ;;  %v4852_v46 = vmax.f32 %v4596_v37, 0.0  ;;  %v4856_v51 = vmax.f32 %v4600_v7, 0.0  ;;  %v11330_v33 = vld [vmem:[#allocation149_spill] sm:$0xff] }
 0x4dd   : > { %5499 = vmatprep.mubr.bf16.mxu0 %v9896_v58  ;;  %v4717_v20 = vmax.f32 %v4461_v9, 0.0  ;;  %v4595_v13 = vadd.f32 %v9188_v63, %v4317_v41  ;;  %v4599_v25 = vadd.f32 %v9188_v63, %v4321_v45  ;;  %v4326_v32 = vadd.f32 %v4010_v28, %v11328_v61 }
 0x4de   : > { %v4718_v8 = vmax.f32 %v4462_v56, 0.0  ;;  %v3079_v38 = vpop.f32.mrb[128].mxu0  ;;  %v10027_v23 = vpack.c.bf16 %v4856_v51, %v4852_v46  ;;  %v4330_v16 = vadd.f32 %v4010_v28, %v11329_v21  ;;  %v4325_v55 = vadd.f32 %v11326_v10, %v11330_v33 }
 0x4df   : > { %v4187_v58 = vadd.f32 %v9978_v43, %v3079_v38  ;;  %v3081_v37 = vpop.f32.mrb[129].mxu0  ;;  %v10033_v7 = vpack.c.bf16 %v4717_v20, %v4713_v53  ;;  %v4851_v9 = vmax.f32 %v4595_v13, 0.0  ;;  %v4855_v41 = vmax.f32 %v4599_v25, 0.0  ;;  %v11331_v53 = vld [vmem:[#allocation14_spill] sm:$0xff] }
 0x4e0   : > { %v4188_v12 = vadd.f32 %v9993_v59, %v3081_v37  ;;  %v3083_v45 = vpop.f32.mrb[130].mxu0  ;;  %v10036_v61 = vpack.c.bf16 %v4718_v8, %v4714_v1  ;;  %v4604_v56 = vadd.f32 %v9185_v49, %v4326_v32  ;;  %v4608_v46 = vadd.f32 %v9185_v49, %v4330_v16 }
 0x4e1   : > { %v4465_v28 = vadd.f32 %v9219_v17, %v4187_v58  ;;  %v4191_v51 = vadd.f32 %v9978_v43, %v3083_v45  ;;  %v3085_v21 = vpop.f32.mrb[131].mxu0  ;;  %v10042_v38 = vpack.c.bf16 %v4855_v41, %v4851_v9  ;;  %v4329_v20 = vadd.f32 %v11326_v10, %v11331_v53  ;;  %v11332_v58 = vld [vmem:[#allocation16_spill] sm:$0xff] }
 0x4e2   : > { %v4466_v13 = vadd.f32 %v9232_v52, %v4188_v12  ;;  %v4192_v1 = vadd.f32 %v9993_v59, %v3085_v21  ;;  %v4860_v25 = vmax.f32 %v4604_v56, 0.0  ;;  %v4864_v32 = vmax.f32 %v4608_v46, 0.0  ;;  %v11333_v10 = vld [vmem:[#allocation20_spill] sm:$0xff] }
 0x4e3   : > { %5973 = vmatmul.mubr.bf16.gmra.mrb[76].mxu1 %v9767_v26  ;;  %v4469_v8 = vadd.f32 %v9219_v17, %v4191_v51  ;;  %v4603_v16 = vadd.f32 %v9188_v63, %v4325_v55  ;;  %v4607_v33 = vadd.f32 %v9188_v63, %v4329_v20  ;;  %v10056_v37 = vrot.slane %v11333_v10, %v11332_v58  ;;  %v11335_v58 = vld [vmem:[#allocation51_spill] sm:$0xff] }
 0x4e4   : > { %5982 = vmatprep.mubr.bf16.mxu1 %v9784_v62  ;;  %5500 = vmatmul.mubr.bf16.gmra.mrb[236].mxu0 %v9891_v47  ;;  %v4470_v26 = vadd.f32 %v9232_v52, %v4192_v1  ;;  %v10060_v9 = vpack.c.bf16 %v4864_v32, %v4860_v25  ;;  %v4721_v41 = vmax.f32 %v4465_v28, 0.0  ;;  %v4722_v56 = vmax.f32 %v4466_v13, 0.0 }
 0x4e5   : > { %5509 = vmatprep.mubr.bf16.mxu0 %v9929_v0  ;;  %v4725_v62 = vmax.f32 %v4469_v8, 0.0  ;;  %v4859_v12 = vmax.f32 %v4603_v16, 0.0  ;;  %v4863_v45 = vmax.f32 %v4607_v33, 0.0  ;;  %v11334_v0 = vld [vmem:[#allocation22_spill] sm:$0xff]  ;;  %v3770_v33 = vrot.slane %v11333_v10, %v9178_v5  ;;  %v11338_v10 = vld [vmem:[#allocation52_spill] sm:$0xff] }
 0x4e6   : > { %v4726_v47 = vmax.f32 %v4470_v26, 0.0  ;;  %v3089_v46 = vpop.f32.mrb[132].mxu0  ;;  %v10070_v25 = vrot.slane %v11334_v0, %v9180_v19  ;;  %v10074_v28 = vrot.slane %v11334_v0, %v9182_v50  ;;  %v4077_v26 = vadd.f32 %v10056_v37, %v11335_v58 }
 0x4e7   : > { %v10062_v55 = vpack.c.bf16 %v4725_v62, %v4721_v41  ;;  %v4195_v51 = vadd.f32 %v9978_v43, %v3089_v46  ;;  %v3091_v21 = vpop.f32.mrb[133].mxu0  ;;  %v10065_v53 = vpack.c.bf16 %v4863_v45, %v4859_v12  ;;  %v11336_v12 = vld [vmem:[#allocation53_spill] sm:$0xff]  ;;  %v4078_v46 = vadd.f32 %v3770_v33, %v11338_v10 }
 0x4e8   : > { %v4196_v20 = vadd.f32 %v9993_v59, %v3091_v21  ;;  %v3093_v1 = vpop.f32.mrb[134].mxu0  ;;  %v10076_v13 = vpack.c.bf16 %v4726_v47, %v4722_v56  ;;  %v4081_v45 = vadd.f32 %v10056_v37, %v11336_v12  ;;  %v11337_v56 = vld [vmem:[#allocation55_spill] sm:$0xff] }
 0x4e9   : > { %v4473_v32 = vadd.f32 %v9219_v17, %v4195_v51  ;;  %v4199_v8 = vadd.f32 %v9978_v43, %v3093_v1  ;;  %v3095_v16 = vpop.f32.mrb[135].mxu0  ;;  %v4085_v47 = vadd.f32 %v10056_v37, %v11337_v56 }
 0x4ea   : > { %v4474_v41 = vadd.f32 %v9232_v52, %v4196_v20  ;;  %v4200_v62 = vadd.f32 %v9993_v59, %v3095_v16  ;;  %v4355_v20 = vadd.f32 %v9188_v63, %v4077_v26  ;;  %v4359_v1 = vadd.f32 %v9188_v63, %v4081_v45 }
 0x4eb   : > { %5983 = vmatmul.mubr.bf16.gmra.mrb[80].mxu1 %v9806_v36  ;;  %v4729_v43 = vmax.f32 %v4473_v32, 0.0  ;;  %v4477_v5 = vadd.f32 %v9219_v17, %v4199_v8  ;;  %v11339_v36 = vld [vmem:[#allocation54_spill] sm:$0xff]  ;;  %v11340_v8 = vld [vmem:[#allocation56_spill] sm:$0xff] }
 0x4ec   : > { %5992 = vmatprep.mubr.bf16.mxu1 %v9812_v27  ;;  %5510 = vmatmul.mubr.bf16.gmra.mrb[240].mxu0 %v9925_v48  ;;  %v4082_v51 = vadd.f32 %v3770_v33, %v11339_v36  ;;  %v4730_v21 = vmax.f32 %v4474_v41, 0.0  ;;  %v4478_v59 = vadd.f32 %v9232_v52, %v4200_v62  ;;  %v4356_v27 = vadd.f32 %v9185_v49, %v4078_v46  ;;  %v11341_v41 = vld [vmem:[#allocation58_spill] sm:$0xff] }
 0x4ed   : > { %5519 = vmatprep.mubr.bf16.mxu0 %v9961_v22  ;;  %v4733_v0 = vmax.f32 %v4477_v5, 0.0  ;;  %v4086_v48 = vadd.f32 %v3770_v33, %v11340_v8  ;;  %v4611_v12 = vmax.f32 %v4355_v20, 0.0  ;;  %v4615_v56 = vmax.f32 %v4359_v1, 0.0  ;;  %v11342_v8 = vld [vmem:[#allocation57_spill] sm:$0xff] }
 0x4ee   : > { %v4360_v32 = vadd.f32 %v9185_v49, %v4082_v51  ;;  %v4734_v16 = vmax.f32 %v4478_v59, 0.0  ;;  %v3099_v58 = vpop.f32.mrb[136].mxu0  ;;  %v4090_v10 = vadd.f32 %v3770_v33, %v11341_v41  ;;  %v4612_v36 = vmax.f32 %v4356_v27, 0.0 }
 0x4ef   : > { %v10104_v62 = vpack.c.bf16 %v4733_v0, %v4729_v43  ;;  %v4203_v22 = vadd.f32 %v10070_v25, %v3099_v58  ;;  %v3101_v26 = vpop.f32.mrb[137].mxu0  ;;  %v10110_v51 = vpack.c.bf16 %v4615_v56, %v4611_v12  ;;  %v4364_v59 = vadd.f32 %v9185_v49, %v4086_v48 }
 0x4f0   : > { %v4616_v45 = vmax.f32 %v4360_v32, 0.0  ;;  %v4204_v5 = vadd.f32 %v10074_v28, %v3101_v26  ;;  %v3103_v46 = vpop.f32.mrb[138].mxu0  ;;  %v10108_v14 = vpack.c.bf16 %v4734_v16, %v4730_v21  ;;  %v4368_v0 = vadd.f32 %v9185_v49, %v4090_v10 }
 0x4f1   : > { %v4481_v20 = vadd.f32 %v9219_v17, %v4203_v22  ;;  %v4207_v33 = vadd.f32 %v10070_v25, %v3103_v46  ;;  %v3105_v43 = vpop.f32.mrb[139].mxu0  ;;  %v4620_v32 = vmax.f32 %v4364_v59, 0.0  ;;  %v4089_v16 = vadd.f32 %v10056_v37, %v11342_v8 }
 0x4f2   : > { %v10115_v1 = vpack.c.bf16 %v4616_v45, %v4612_v36  ;;  %v4482_v27 = vadd.f32 %v9232_v52, %v4204_v5  ;;  %v4208_v21 = vadd.f32 %v10074_v28, %v3105_v43  ;;  %v4624_v58 = vmax.f32 %v4368_v0, 0.0 }
 0x4f3   : > { %5993 = vmatmul.mubr.bf16.gmra.mrb[84].mxu1 %v9824_v11  ;;  %v4485_v48 = vadd.f32 %v9219_v17, %v4207_v33  ;;  %v4363_v12 = vadd.f32 %v9188_v63, %v4085_v47  ;;  %v4367_v11 = vadd.f32 %v9188_v63, %v4089_v16  ;;  %v4737_v56 = vmax.f32 %v4481_v20, 0.0 }
 0x4f4   : > { %6002 = vmatprep.mubr.bf16.mxu1 %v9844_v4  ;;  %5520 = vmatmul.mubr.bf16.gmra.mrb[244].mxu0 %v9957_v3  ;;  %v4486_v49 = vadd.f32 %v9232_v52, %v4208_v21  ;;  %v10130_v10 = vpack.c.bf16 %v4624_v58, %v4620_v32  ;;  %v4738_v22 = vmax.f32 %v4482_v27, 0.0 }
 0x4f5   : > { %5529 = vmatprep.mubr.bf16.mxu0 %v10002_v30  ;;  %v4741_v41 = vmax.f32 %v4485_v48, 0.0  ;;  %v4619_v37 = vmax.f32 %v4363_v12, 0.0  ;;  %v4623_v36 = vmax.f32 %v4367_v11, 0.0 }
 0x4f6   : > { %v4742_v4 = vmax.f32 %v4486_v49, 0.0  ;;  %v3109_v26 = vpop.f32.mrb[140].mxu0 }
 0x4f7   : > { %v10132_v45 = vpack.c.bf16 %v4741_v41, %v4737_v56  ;;  %v4211_v3 = vadd.f32 %v10070_v25, %v3109_v26  ;;  %v3111_v47 = vpop.f32.mrb[141].mxu0  ;;  %v10138_v63 = vpack.c.bf16 %v4623_v36, %v4619_v37 }
 0x4f8   : > { %v4212_v5 = vadd.f32 %v10074_v28, %v3111_v47  ;;  %v3113_v46 = vpop.f32.mrb[142].mxu0  ;;  %v10136_v30 = vpack.c.bf16 %v4742_v4, %v4738_v22 }
 0x4f9   : > { %v4489_v59 = vadd.f32 %v9219_v17, %v4211_v3  ;;  %v4215_v20 = vadd.f32 %v10070_v25, %v3113_v46  ;;  %v3115_v33 = vpop.f32.mrb[143].mxu0  ;;  %v11343_v25 = vld [vmem:[#allocation24_spill] sm:$0xff] }
 0x4fa   : > { %v4490_v43 = vadd.f32 %v9232_v52, %v4212_v5  ;;  %v4216_v0 = vadd.f32 %v10074_v28, %v3115_v33  ;;  %v3902_v16 = vrot.slane %v11343_v25, %v9180_v19  ;;  %v3906_v28 = vrot.slane %v11343_v25, %v9182_v50 }
 0x4fb   : > { %6003 = vmatmul.mubr.bf16.gmra.mrb[88].mxu1 %v9860_v31  ;;  %v4493_v27 = vadd.f32 %v9219_v17, %v4215_v20  ;;  %v4745_v32 = vmax.f32 %v4489_v59, 0.0 }
 0x4fc   : > { %6012 = vmatprep.mubr.bf16.mxu1 %v9872_v24  ;;  %5530 = vmatmul.mubr.bf16.gmra.mrb[248].mxu0 %v9998_v42  ;;  %v4494_v21 = vadd.f32 %v9232_v52, %v4216_v0  ;;  %v4746_v31 = vmax.f32 %v4490_v43, 0.0 }
 0x4fd   : > { %5539 = vmatprep.mubr.bf16.mxu0 %v10036_v61  ;;  %v4749_v8 = vmax.f32 %v4493_v27, 0.0 }
 0x4fe   : > { %v4750_v48 = vmax.f32 %v4494_v21, 0.0  ;;  %v3119_v58 = vpop.f32.mrb[144].mxu0 }
 0x4ff   : > { %v10154_v24 = vpack.c.bf16 %v4749_v8, %v4745_v32  ;;  %v4219_v12 = vadd.f32 %v3902_v16, %v3119_v58  ;;  %v3121_v49 = vpop.f32.mrb[145].mxu0 }
 0x500   : > { %v4220_v42 = vadd.f32 %v3906_v28, %v3121_v49  ;;  %v3123_v11 = vpop.f32.mrb[146].mxu0  ;;  %v10156_v56 = vpack.c.bf16 %v4750_v48, %v4746_v31 }
 0x501   : > { %v4497_v61 = vadd.f32 %v9219_v17, %v4219_v12  ;;  %v4223_v41 = vadd.f32 %v3902_v16, %v3123_v11  ;;  %v3125_v37 = vpop.f32.mrb[147].mxu0 }
 0x502   : > { %v4498_v22 = vadd.f32 %v9232_v52, %v4220_v42  ;;  %v4224_v4 = vadd.f32 %v3906_v28, %v3125_v37 }
 0x503   : > { %6013 = vmatmul.mubr.bf16.gmra.mrb[92].mxu1 %v9884_v54  ;;  %v4501_v26 = vadd.f32 %v9219_v17, %v4223_v41  ;;  %v4753_v3 = vmax.f32 %v4497_v61, 0.0 }
 0x504   : > { %6022 = vmatprep.mubr.bf16.mxu1 %v9908_v39  ;;  %5540 = vmatmul.mubr.bf16.gmra.mrb[252].mxu0 %v10033_v7  ;;  %v4502_v36 = vadd.f32 %v9232_v52, %v4224_v4  ;;  %v4754_v5 = vmax.f32 %v4498_v22, 0.0 }
 0x505   : > { %5549 = vmatprep.mubr.bf16.mxu0 %v10076_v13  ;;  %v4757_v47 = vmax.f32 %v4501_v26, 0.0 }
 0x506   : > { %v4758_v46 = vmax.f32 %v4502_v36, 0.0  ;;  %v3129_v59 = vpop.f32.mrb[148].mxu0 }
 0x507   : > { %v10166_v20 = vpack.c.bf16 %v4757_v47, %v4753_v3  ;;  %v4227_v54 = vadd.f32 %v3902_v16, %v3129_v59  ;;  %v3131_v33 = vpop.f32.mrb[149].mxu0 }
 0x508   : > { %v4228_v43 = vadd.f32 %v3906_v28, %v3131_v33  ;;  %v3133_v0 = vpop.f32.mrb[150].mxu0  ;;  %v10168_v39 = vpack.c.bf16 %v4758_v46, %v4754_v5 }
 0x509   : > { %v4505_v27 = vadd.f32 %v9219_v17, %v4227_v54  ;;  %v4231_v7 = vadd.f32 %v3902_v16, %v3133_v0  ;;  %v3135_v21 = vpop.f32.mrb[151].mxu0  ;;  %v11344_v16 = vld [vmem:[#allocation26_spill] sm:$0xff] }
 0x50a   : > { %v4506_v13 = vadd.f32 %v9232_v52, %v4228_v43  ;;  %v4232_v32 = vadd.f32 %v3906_v28, %v3135_v21  ;;  %v3918_v58 = vrot.slane %v11344_v16, %v9180_v19  ;;  %v3922_v28 = vrot.slane %v11344_v16, %v9182_v50 }
 0x50b   : > { %6023 = vmatmul.mubr.bf16.gmra.mrb[96].mxu1 %v9913_v29  ;;  %v4509_v8 = vadd.f32 %v9219_v17, %v4231_v7  ;;  %v4761_v31 = vmax.f32 %v4505_v27, 0.0 }
 0x50c   : > { %6032 = vmatprep.mubr.bf16.mxu1 %v9938_v57  ;;  %5550 = vmatmul.mubr.bf16.gmra.mrb[0].mxu0 %v10062_v55  ;;  %v4510_v25 = vadd.f32 %v9232_v52, %v4232_v32  ;;  %v4762_v12 = vmax.f32 %v4506_v13, 0.0 }
 0x50d   : > { %5559 = vmatprep.mubr.bf16.mxu0 %v10108_v14  ;;  %v4765_v48 = vmax.f32 %v4509_v8, 0.0 }
 0x50e   : > { %v4766_v29 = vmax.f32 %v4510_v25, 0.0  ;;  %v3139_v49 = vpop.f32.mrb[152].mxu0 }
 0x50f   : > { %v10182_v57 = vpack.c.bf16 %v4765_v48, %v4761_v31  ;;  %v4235_v42 = vadd.f32 %v3918_v58, %v3139_v49  ;;  %v3141_v11 = vpop.f32.mrb[153].mxu0 }
 0x510   : > { %v4236_v55 = vadd.f32 %v3922_v28, %v3141_v11  ;;  %v3143_v61 = vpop.f32.mrb[154].mxu0  ;;  %v10184_v41 = vpack.c.bf16 %v4766_v29, %v4762_v12  ;;  %v3938_v29 = vrot.slane %v11282_v60, %v9182_v50 }
 0x511   : > { %v4513_v14 = vadd.f32 %v9219_v17, %v4235_v42  ;;  %v4239_v37 = vadd.f32 %v3918_v58, %v3143_v61  ;;  %v3145_v22 = vpop.f32.mrb[155].mxu0 }
 0x512   : > { %v4514_v4 = vadd.f32 %v9232_v52, %v4236_v55  ;;  %v4240_v26 = vadd.f32 %v3922_v28, %v3145_v22 }
 0x513   : > { %6033 = vmatmul.mubr.bf16.gmra.mrb[100].mxu1 %v9947_v44  ;;  %v4517_v36 = vadd.f32 %v9219_v17, %v4239_v37  ;;  %v4769_v47 = vmax.f32 %v4513_v14, 0.0 }
 0x514   : > { %6042 = vmatprep.mubr.bf16.mxu1 %v9967_v35  ;;  %5560 = vmatmul.mubr.bf16.gmra.mrb[4].mxu0 %v10104_v62  ;;  %v4518_v3 = vadd.f32 %v9232_v52, %v4240_v26  ;;  %v4770_v46 = vmax.f32 %v4514_v4, 0.0 }
 0x515   : > { %5569 = vmatprep.mubr.bf16.mxu0 %v10136_v30  ;;  %v4773_v5 = vmax.f32 %v4517_v36, 0.0 }
 0x516   : > { %v4774_v59 = vmax.f32 %v4518_v3, 0.0  ;;  %v3149_v54 = vpop.f32.mrb[156].mxu0 }
 0x517   : > { %v10194_v33 = vpack.c.bf16 %v4773_v5, %v4769_v47  ;;  %v4243_v44 = vadd.f32 %v3918_v58, %v3149_v54  ;;  %v3151_v43 = vpop.f32.mrb[157].mxu0 }
 0x518   : > { %v4244_v0 = vadd.f32 %v3922_v28, %v3151_v43  ;;  %v3153_v27 = vpop.f32.mrb[158].mxu0  ;;  %v10196_v35 = vpack.c.bf16 %v4774_v59, %v4770_v46 }
 0x519   : > { %v4521_v7 = vadd.f32 %v9219_v17, %v4243_v44  ;;  %v4247_v62 = vadd.f32 %v3918_v58, %v3153_v27  ;;  %v3155_v21 = vpop.f32.mrb[159].mxu0 }
 0x51a   : > { %v4522_v30 = vadd.f32 %v9232_v52, %v4244_v0  ;;  %v4248_v13 = vadd.f32 %v3922_v28, %v3155_v21 }
 0x51b   : > { %6043 = vmatmul.mubr.bf16.gmra.mrb[104].mxu1 %v9984_v34  ;;  %v4525_v32 = vadd.f32 %v9219_v17, %v4247_v62  ;;  %v4777_v25 = vmax.f32 %v4521_v7, 0.0  ;;  %v3934_v34 = vrot.slane %v11282_v60, %v9180_v19 }
 0x51c   : > { %6052 = vmatprep.mubr.bf16.mxu1 %v9995_v2  ;;  %5570 = vmatmul.mubr.bf16.gmra.mrb[8].mxu0 %v10132_v45  ;;  %v4526_v8 = vadd.f32 %v9232_v52, %v4248_v13  ;;  %v4778_v16 = vmax.f32 %v4522_v30, 0.0 }
 0x51d   : > { %5579 = vmatprep.mubr.bf16.mxu0 %v10156_v56  ;;  %v4781_v48 = vmax.f32 %v4525_v32, 0.0 }
 0x51e   : > { %v10206_v31 = vpop.f32.mrb[0].mxu1  ;;  %v4782_v12 = vmax.f32 %v4526_v8, 0.0  ;;  %v3159_v2 = vpop.f32.mrb[160].mxu0 }
 0x51f   : > { %v10210_v58 = vpop.f32.mrb[1].mxu1  ;;  %v10214_v45 = vpack.c.bf16 %v4781_v48, %v4777_v25  ;;  %v4251_v56 = vadd.f32 %v3934_v34, %v3159_v2  ;;  %v3161_v28 = vpop.f32.mrb[161].mxu0 }
 0x520   : > { %v10216_v49 = vpop.f32.mrb[2].mxu1  ;;  %v4252_v11 = vadd.f32 %v3938_v29, %v3161_v28  ;;  %v3163_v55 = vpop.f32.mrb[162].mxu0  ;;  %v10220_v61 = vpack.c.bf16 %v4782_v12, %v4778_v16 }
 0x521   : > { %v10218_v42 = vpop.f32.mrb[3].mxu1  ;;  %v4529_v14 = vadd.f32 %v9219_v17, %v4251_v56  ;;  %v4255_v37 = vadd.f32 %v3934_v34, %v3163_v55  ;;  %v3165_v22 = vpop.f32.mrb[163].mxu0  ;;  %v3954_v56 = vrot.slane %v11292_v15, %v9182_v50 }
 0x522   : > { %v4530_v60 = vadd.f32 %v9232_v52, %v4252_v11  ;;  %v4256_v4 = vadd.f32 %v3938_v29, %v3165_v22 }
 0x523   : > { %6053 = vmatmul.mubr.bf16.gmra.mrb[108].mxu1 %v10018_v6  ;;  %v4533_v26 = vadd.f32 %v9219_v17, %v4255_v37  ;;  %v4785_v3 = vmax.f32 %v4529_v14, 0.0 }
 0x524   : > { %6062 = vmatprep.mubr.bf16.mxu1 %v10027_v23  ;;  %5580 = vmatmul.mubr.bf16.gmra.mrb[12].mxu0 %v10154_v24  ;;  %v4534_v36 = vadd.f32 %v9232_v52, %v4256_v4  ;;  %v4786_v46 = vmax.f32 %v4530_v60, 0.0 }
 0x525   : > { %5589 = vmatprep.mubr.bf16.mxu0 %v10168_v39  ;;  %v4789_v5 = vmax.f32 %v4533_v26, 0.0 }
 0x526   : > { %v10230_v47 = vpop.f32.mrb[4].mxu1  ;;  %v4790_v6 = vmax.f32 %v4534_v36, 0.0  ;;  %v3169_v54 = vpop.f32.mrb[164].mxu0 }
 0x527   : > { %v10232_v59 = vpop.f32.mrb[5].mxu1  ;;  %v10234_v44 = vpack.c.bf16 %v4789_v5, %v4785_v3  ;;  %v4259_v43 = vadd.f32 %v3934_v34, %v3169_v54  ;;  %v3171_v0 = vpop.f32.mrb[165].mxu0 }
 0x528   : > { %v10236_v23 = vpop.f32.mrb[6].mxu1  ;;  %v4260_v27 = vadd.f32 %v3938_v29, %v3171_v0  ;;  %v3173_v7 = vpop.f32.mrb[166].mxu0  ;;  %v10240_v39 = vpack.c.bf16 %v4790_v6, %v4786_v46 }
 0x529   : > { %v10238_v24 = vpop.f32.mrb[7].mxu1  ;;  %v4537_v62 = vadd.f32 %v9219_v17, %v4259_v43  ;;  %v4263_v21 = vadd.f32 %v3934_v34, %v3173_v7  ;;  %v3175_v30 = vpop.f32.mrb[167].mxu0 }
 0x52a   : > { %v4538_v13 = vadd.f32 %v9232_v52, %v4260_v27  ;;  %v4264_v32 = vadd.f32 %v3938_v29, %v3175_v30 }
 0x52b   : > { %6063 = vmatmul.mubr.bf16.gmra.mrb[112].mxu1 %v10042_v38  ;;  %v4541_v8 = vadd.f32 %v9219_v17, %v4263_v21  ;;  %v4793_v48 = vmax.f32 %v4537_v62, 0.0  ;;  %v3950_v38 = vrot.slane %v11292_v15, %v9180_v19 }
 0x52c   : > { %6072 = vmatprep.mubr.bf16.mxu1 %v10060_v9  ;;  %5590 = vmatmul.mubr.bf16.gmra.mrb[16].mxu0 %v10166_v20  ;;  %v4542_v25 = vadd.f32 %v9232_v52, %v4264_v32  ;;  %v4794_v12 = vmax.f32 %v4538_v13, 0.0 }
 0x52d   : > { %5599 = vmatprep.mubr.bf16.mxu0 %v10184_v41  ;;  %v4797_v34 = vmax.f32 %v4541_v8, 0.0 }
 0x52e   : > { %v10250_v16 = vpop.f32.mrb[8].mxu1  ;;  %v4798_v29 = vmax.f32 %v4542_v25, 0.0 }
 0x52f   : > { %v10254_v2 = vpop.f32.mrb[9].mxu1  ;;  %v3179_v9 = vpop.f32.mrb[168].mxu0  ;;  %v10258_v20 = vpack.c.bf16 %v4797_v34, %v4793_v48 }
 0x530   : > { %v10260_v28 = vpop.f32.mrb[10].mxu1  ;;  %v4267_v41 = vadd.f32 %v3950_v38, %v3179_v9  ;;  %v3181_v11 = vpop.f32.mrb[169].mxu0  ;;  %v10264_v22 = vpack.c.bf16 %v4798_v29, %v4794_v12 }
 0x531   : > { %v10262_v55 = vpop.f32.mrb[11].mxu1  ;;  %v4268_v14 = vadd.f32 %v3954_v56, %v3181_v11  ;;  %v3183_v37 = vpop.f32.mrb[170].mxu0 }
 0x532   : > { %v4545_v60 = vadd.f32 %v9219_v17, %v4267_v41  ;;  %v4271_v4 = vadd.f32 %v3950_v38, %v3183_v37  ;;  %v3185_v26 = vpop.f32.mrb[171].mxu0  ;;  %v3966_v37 = vrot.slane %v11302_v18, %v9180_v19 }
 0x533   : > { %6073 = vmatmul.mubr.bf16.gmra.mrb[116].mxu1 %v10065_v53  ;;  %v4546_v15 = vadd.f32 %v9232_v52, %v4268_v14  ;;  %v4272_v36 = vadd.f32 %v3954_v56, %v3185_v26  ;;  %v3970_v26 = vrot.slane %v11302_v18, %v9182_v50 }
 0x534   : > { %v4549_v3 = vadd.f32 %v9219_v17, %v4271_v4  ;;  %5600 = vmatmul.mubr.bf16.gmra.mrb[20].mxu0 %v10182_v57  ;;  %v4801_v46 = vmax.f32 %v4545_v60, 0.0 }
 0x535   : > { %v4550_v5 = vadd.f32 %v9232_v52, %v4272_v36  ;;  %5609 = vmatprep.mubr.bf16.mxu0 %v10196_v35  ;;  %v4802_v43 = vmax.f32 %v4546_v15, 0.0 }
 0x536   : > { %v10273_v6 = vpop.f32.mrb[12].mxu1  ;;  %v4805_v54 = vmax.f32 %v4549_v3, 0.0 }
 0x537   : > { %v10275_v0 = vpop.f32.mrb[13].mxu1  ;;  %v4806_v27 = vmax.f32 %v4550_v5, 0.0  ;;  %v3189_v53 = vpop.f32.mrb[172].mxu0 }
 0x538   : > { %v10277_v7 = vpack.c.bf16 %v4805_v54, %v4801_v46  ;;  %v10279_v62 = vpop.f32.mrb[14].mxu1  ;;  %v4275_v21 = vadd.f32 %v3950_v38, %v3189_v53  ;;  %v3191_v30 = vpop.f32.mrb[173].mxu0 }
 0x539   : > { %v10281_v57 = vpop.f32.mrb[15].mxu1  ;;  %v4276_v13 = vadd.f32 %v3954_v56, %v3191_v30  ;;  %v3193_v32 = vpop.f32.mrb[174].mxu0  ;;  %v10283_v35 = vpack.c.bf16 %v4806_v27, %v4802_v43 }
 0x53a   : > { %v4553_v8 = vadd.f32 %v9219_v17, %v4275_v21  ;;  %v4279_v25 = vadd.f32 %v3950_v38, %v3193_v32  ;;  %v3195_v48 = vpop.f32.mrb[175].mxu0 }
 0x53b   : > { %v4554_v34 = vadd.f32 %v9232_v52, %v4276_v13  ;;  %v4280_v12 = vadd.f32 %v3954_v56, %v3195_v48 }
 0x53c   : > { %v4557_v29 = vadd.f32 %v9219_v17, %v4279_v25  ;;  %5610 = vmatmul.mubr.bf16.gmra.mrb[24].mxu0 %v10194_v33  ;;  %v4809_v41 = vmax.f32 %v4553_v8, 0.0 }
 0x53d   : > { %v4558_v9 = vadd.f32 %v9232_v52, %v4280_v12  ;;  %5619 = vmatprep.mubr.bf16.mxu0 %v10220_v61  ;;  %v4810_v38 = vmax.f32 %v4554_v34, 0.0 }
 0x53e   : > { %v10291_v11 = vpop.f32.mrb[16].mxu1  ;;  %v4813_v14 = vmax.f32 %v4557_v29, 0.0 }
 0x53f   : > { %v10295_v60 = vpop.f32.mrb[17].mxu1  ;;  %v4814_v4 = vmax.f32 %v4558_v9, 0.0  ;;  %v3199_v56 = vpop.f32.mrb[176].mxu0 }
 0x540   : > { %v10299_v33 = vpack.c.bf16 %v4813_v14, %v4809_v41  ;;  %v10301_v15 = vpop.f32.mrb[18].mxu1  ;;  %v4283_v61 = vadd.f32 %v3966_v37, %v3199_v56  ;;  %v3201_v36 = vpop.f32.mrb[177].mxu0 }
 0x541   : > { %v10303_v3 = vpop.f32.mrb[19].mxu1  ;;  %v4284_v5 = vadd.f32 %v3970_v26, %v3201_v36  ;;  %v3203_v46 = vpop.f32.mrb[178].mxu0  ;;  %v10305_v54 = vpack.c.bf16 %v4814_v4, %v4810_v38 }
 0x542   : > { %v4561_v43 = vadd.f32 %v9219_v17, %v4283_v61  ;;  %v4287_v27 = vadd.f32 %v3966_v37, %v3203_v46  ;;  %v3205_v53 = vpop.f32.mrb[179].mxu0 }
 0x543   : > { %v4562_v21 = vadd.f32 %v9232_v52, %v4284_v5  ;;  %v4288_v30 = vadd.f32 %v3970_v26, %v3205_v53 }
 0x544   : > { %v4565_v18 = vadd.f32 %v9219_v17, %v4287_v27  ;;  %5620 = vmatmul.mubr.bf16.gmra.mrb[28].mxu0 %v10214_v45  ;;  %v4817_v32 = vmax.f32 %v4561_v43, 0.0 }
 0x545   : > { %v4566_v13 = vadd.f32 %v9232_v52, %v4288_v30  ;;  %5629 = vmatprep.mubr.bf16.mxu0 %v10240_v39  ;;  %v4818_v48 = vmax.f32 %v4562_v21, 0.0 }
 0x546   : > { %v10313_v8 = vpop.f32.mrb[20].mxu1  ;;  %v4821_v25 = vmax.f32 %v4565_v18, 0.0 }
 0x547   : > { %v10315_v34 = vpop.f32.mrb[21].mxu1  ;;  %v4822_v12 = vmax.f32 %v4566_v13, 0.0  ;;  %v3209_v29 = vpop.f32.mrb[180].mxu0  ;;  %v3982_v13 = vrot.slane %v11312_v40, %v9180_v19 }
 0x548   : > { %v10317_v9 = vpack.c.bf16 %v4821_v25, %v4817_v32  ;;  %v10319_v41 = vpop.f32.mrb[22].mxu1  ;;  %v4291_v14 = vadd.f32 %v3966_v37, %v3209_v29  ;;  %v3211_v38 = vpop.f32.mrb[181].mxu0 }
 0x549   : > { %v10321_v45 = vpop.f32.mrb[23].mxu1  ;;  %v4292_v4 = vadd.f32 %v3970_v26, %v3211_v38  ;;  %v3213_v56 = vpop.f32.mrb[182].mxu0  ;;  %v10323_v39 = vpack.c.bf16 %v4822_v12, %v4818_v48  ;;  %v3986_v48 = vrot.slane %v11312_v40, %v9182_v50 }
 0x54a   : > { %v4569_v61 = vadd.f32 %v9219_v17, %v4291_v14  ;;  %v4295_v36 = vadd.f32 %v3966_v37, %v3213_v56  ;;  %v3215_v5 = vpop.f32.mrb[183].mxu0 }
 0x54b   : > { %v4570_v46 = vadd.f32 %v9232_v52, %v4292_v4  ;;  %v4296_v43 = vadd.f32 %v3970_v26, %v3215_v5 }
 0x54c   : > { %v4573_v27 = vadd.f32 %v9219_v17, %v4295_v36  ;;  %5630 = vmatmul.mubr.bf16.gmra.mrb[32].mxu0 %v10234_v44  ;;  %v4825_v21 = vmax.f32 %v4569_v61, 0.0 }
 0x54d   : > { %v4574_v53 = vadd.f32 %v9232_v52, %v4296_v43  ;;  %5639 = vmatprep.mubr.bf16.mxu0 %v10264_v22  ;;  %v4826_v37 = vmax.f32 %v4570_v46, 0.0 }
 0x54e   : > { %v10331_v30 = vpop.f32.mrb[24].mxu1  ;;  %v4829_v18 = vmax.f32 %v4573_v27, 0.0 }
 0x54f   : > { %v10335_v32 = vpop.f32.mrb[25].mxu1  ;;  %v4830_v25 = vmax.f32 %v4574_v53, 0.0  ;;  %v3219_v26 = vpop.f32.mrb[184].mxu0 }
 0x550   : > { %v10339_v44 = vpack.c.bf16 %v4829_v18, %v4825_v21  ;;  %v10341_v12 = vpop.f32.mrb[26].mxu1  ;;  %v4299_v22 = vadd.f32 %v3982_v13, %v3219_v26  ;;  %v3221_v29 = vpop.f32.mrb[185].mxu0 }
 0x551   : > { %v10343_v14 = vpop.f32.mrb[27].mxu1  ;;  %v4300_v38 = vadd.f32 %v3986_v48, %v3221_v29  ;;  %v3223_v4 = vpop.f32.mrb[186].mxu0  ;;  %v10345_v56 = vpack.c.bf16 %v4830_v25, %v4826_v37 }
 0x552   : > { %v4577_v61 = vadd.f32 %v9219_v17, %v4299_v22  ;;  %v4303_v36 = vadd.f32 %v3982_v13, %v3223_v4  ;;  %v3225_v5 = vpop.f32.mrb[187].mxu0 }
 0x553   : > { %v4578_v46 = vadd.f32 %v9232_v52, %v4300_v38  ;;  %v4304_v43 = vadd.f32 %v3986_v48, %v3225_v5 }
 0x554   : > { %v4581_v40 = vadd.f32 %v9219_v17, %v4303_v36  ;;  %5640 = vmatmul.mubr.bf16.gmra.mrb[36].mxu0 %v10258_v20  ;;  %v4833_v53 = vmax.f32 %v4577_v61, 0.0 }
 0x555   : > { %v4582_v27 = vadd.f32 %v9232_v52, %v4304_v43  ;;  %5649 = vmatprep.mubr.bf16.mxu0 %v10283_v35  ;;  %v4834_v37 = vmax.f32 %v4578_v46, 0.0 }
 0x556   : > { %v10353_v21 = vpop.f32.mrb[28].mxu1  ;;  %v4837_v18 = vmax.f32 %v4581_v40, 0.0 }
 0x557   : > { %v10355_v25 = vpop.f32.mrb[29].mxu1  ;;  %v4838_v26 = vmax.f32 %v4582_v27, 0.0  ;;  %v3229_v22 = vpop.f32.mrb[188].mxu0 }
 0x558   : > { %11345 = vst [vmem:[#allocation32_spill] sm:$0xff] %v10355_v25  ;;  %v10357_v29 = vpack.c.bf16 %v4837_v18, %v4833_v53  ;;  %v10359_v38 = vpop.f32.mrb[30].mxu1  ;;  %v4307_v4 = vadd.f32 %v3982_v13, %v3229_v22  ;;  %v3231_v36 = vpop.f32.mrb[189].mxu0 }
 0x559   : > { %11346 = vst [vmem:[#allocation31_spill] sm:$0xff] %v10359_v38  ;;  %v10361_v20 = vpop.f32.mrb[31].mxu1  ;;  %v4308_v5 = vadd.f32 %v3986_v48, %v3231_v36  ;;  %v3233_v43 = vpop.f32.mrb[190].mxu0  ;;  %v10363_v35 = vpack.c.bf16 %v4838_v26, %v4834_v37  ;;  %v11349_v26 = vld [vmem:[#allocation27_spill] sm:$0xff] }
 0x55a   : > { %11347 = vst [vmem:[#allocation34_spill] sm:$0xff] %v10361_v20  ;;  %v4585_v61 = vadd.f32 %v9219_v17, %v4307_v4  ;;  %v4311_v40 = vadd.f32 %v3982_v13, %v3233_v43  ;;  %v3235_v46 = vpop.f32.mrb[191].mxu0  ;;  %v3998_v4 = vrot.slane %v11349_v26, %v9180_v19 }
 0x55b   : > { %v4586_v25 = vadd.f32 %v9232_v52, %v4308_v5  ;;  %v4312_v27 = vadd.f32 %v3986_v48, %v3235_v46 }
 0x55c   : > { %v4589_v53 = vadd.f32 %v9219_v17, %v4311_v40  ;;  %5650 = vmatmul.mubr.bf16.gmra.mrb[40].mxu0 %v10277_v7  ;;  %v4841_v22 = vmax.f32 %v4585_v61, 0.0  ;;  %v4002_v40 = vrot.slane %v11349_v26, %v9182_v50 }
 0x55d   : > { %v4590_v18 = vadd.f32 %v9232_v52, %v4312_v27  ;;  %5659 = vmatprep.mubr.bf16.mxu0 %v10305_v54  ;;  %v4842_v13 = vmax.f32 %v4586_v25, 0.0 }
 0x55e   : > { %v10371_v36 = vpop.f32.mrb[32].mxu1  ;;  %v4845_v37 = vmax.f32 %v4589_v53, 0.0 }
 0x55f   : > { %11348 = vst [vmem:[#allocation33_spill] sm:$0xff] %v10371_v36  ;;  %v10375_v43 = vpop.f32.mrb[33].mxu1  ;;  %v4846_v5 = vmax.f32 %v4590_v18, 0.0  ;;  %v3239_v48 = vpop.f32.mrb[192].mxu0 }
 0x560   : > { %11350 = vst [vmem:[#allocation36_spill] sm:$0xff] %v10375_v43  ;;  %v10379_v7 = vpack.c.bf16 %v4845_v37, %v4841_v22  ;;  %v10381_v46 = vpop.f32.mrb[34].mxu1  ;;  %v4315_v54 = vadd.f32 %v3998_v4, %v3239_v48  ;;  %v3241_v61 = vpop.f32.mrb[193].mxu0 }
 0x561   : > { %v10383_v27 = vpop.f32.mrb[35].mxu1  ;;  %v4316_v53 = vadd.f32 %v4002_v40, %v3241_v61  ;;  %v3243_v36 = vpop.f32.mrb[194].mxu0  ;;  %v4982_v20 = vpack.c.bf16 %v4846_v5, %v4842_v13 }
 0x562   : > { %11351 = vst [vmem:[#allocation61_spill] sm:$0xff] %v10383_v27  ;;  %v4593_v25 = vadd.f32 %v9219_v17, %v4315_v54  ;;  %v4319_v19 = vadd.f32 %v3998_v4, %v3243_v36  ;;  %v3245_v43 = vpop.f32.mrb[195].mxu0 }
 0x563   : > { %v4594_v18 = vadd.f32 %v9232_v52, %v4316_v53  ;;  %v4320_v38 = vadd.f32 %v4002_v40, %v3245_v43 }
 0x564   : > { %v4597_v26 = vadd.f32 %v9219_v17, %v4319_v19  ;;  %5660 = vmatmul.mubr.bf16.gmra.mrb[44].mxu0 %v10299_v33  ;;  %v4849_v37 = vmax.f32 %v4593_v25, 0.0 }
 0x565   : > { %v4598_v22 = vadd.f32 %v9232_v52, %v4320_v38  ;;  %5669 = vmatprep.mubr.bf16.mxu0 %v10323_v39  ;;  %v4850_v13 = vmax.f32 %v4594_v18, 0.0 }
 0x566   : > { %v10391_v48 = vpop.f32.mrb[36].mxu1  ;;  %v4853_v61 = vmax.f32 %v4597_v26, 0.0 }
 0x567   : > { %11352 = vst [vmem:[#allocation59_spill] sm:$0xff] %v10391_v48  ;;  %v10393_v5 = vpop.f32.mrb[37].mxu1  ;;  %v4854_v36 = vmax.f32 %v4598_v22, 0.0  ;;  %v3249_v54 = vpop.f32.mrb[196].mxu0 }
 0x568   : > { %11353 = vst [vmem:[#allocation60_spill] sm:$0xff] %v10393_v5  ;;  %v10395_v50 = vpack.c.bf16 %v4853_v61, %v4849_v37  ;;  %v10397_v43 = vpop.f32.mrb[38].mxu1  ;;  %v4323_v19 = vadd.f32 %v3998_v4, %v3249_v54  ;;  %v3251_v53 = vpop.f32.mrb[197].mxu0 }
 0x569   : > { %v10399_v33 = vpop.f32.mrb[39].mxu1  ;;  %v4324_v38 = vadd.f32 %v4002_v40, %v3251_v53  ;;  %v3253_v27 = vpop.f32.mrb[198].mxu0  ;;  %v4986_v39 = vpack.c.bf16 %v4854_v36, %v4850_v13 }
 0x56a   : > { %v4601_v25 = vadd.f32 %v9219_v17, %v4323_v19  ;;  %v4327_v48 = vadd.f32 %v3998_v4, %v3253_v27  ;;  %v3255_v26 = vpop.f32.mrb[199].mxu0 }
 0x56b   : > { %v4602_v18 = vadd.f32 %v9232_v52, %v4324_v38  ;;  %v4328_v5 = vadd.f32 %v4002_v40, %v3255_v26 }
 0x56c   : > { %v4605_v22 = vadd.f32 %v9219_v17, %v4327_v48  ;;  %5670 = vmatmul.mubr.bf16.gmra.mrb[48].mxu0 %v10317_v9  ;;  %v4857_v61 = vmax.f32 %v4601_v25, 0.0 }
 0x56d   : > { %v4606_v37 = vadd.f32 %v9232_v52, %v4328_v5  ;;  %5679 = vmatprep.mubr.bf16.mxu0 %v10345_v56  ;;  %v4858_v13 = vmax.f32 %v4602_v18, 0.0 }
 0x56e   : > { %v10407_v54 = vpop.f32.mrb[40].mxu1  ;;  %v4861_v53 = vmax.f32 %v4605_v22, 0.0 }
 0x56f   : > { %v10409_v36 = vpop.f32.mrb[41].mxu1  ;;  %v4862_v4 = vmax.f32 %v4606_v37, 0.0 }
 0x570   : > { %v4989_v27 = vpack.c.bf16 %v4861_v53, %v4857_v61  ;;  %v10411_v19 = vpop.f32.mrb[42].mxu1 }
 0x571   : > { %v10413_v40 = vpop.f32.mrb[43].mxu1  ;;  %v4990_v17 = vpack.c.bf16 %v4862_v4, %v4858_v13 }
 0x574   : > { %5680 = vmatmul.mubr.bf16.gmra.mrb[52].mxu0 %v10339_v44 }
 0x575   : > { %5689 = vmatprep.mubr.bf16.mxu0 %v10363_v35 }
 0x576   : > { %v10417_v52 = vpop.f32.mrb[44].mxu1 }
 0x577   : > { %v10419_v9 = vpop.f32.mrb[45].mxu1 }
 0x578   : > { %v10421_v56 = vpop.f32.mrb[46].mxu1 }
 0x579   : > { %v10423_v48 = vpop.f32.mrb[47].mxu1 }
 0x57c   : > { %5690 = vmatmul.mubr.bf16.gmra.mrb[56].mxu0 %v10357_v29 }
 0x57d   : > { %5699 = vmatprep.mubr.bf16.mxu0 %v4982_v20 }
 0x57e   : > { %v10426_v5 = vpop.f32.mrb[48].mxu1 }
 0x57f   : > { %v10428_v38 = vpop.f32.mrb[49].mxu1  ;;  %v5431_v25 = vpop.f32.mrb[208].mxu0 }
 0x580   : > { %v10430_v26 = vpop.f32.mrb[50].mxu1  ;;  %v5785_v44 = vadd.f32 %v10206_v31, %v5431_v25  ;;  %v5433_v35 = vpop.f32.mrb[209].mxu0 }
 0x581   : > { %11354 = vst [vmem:[#allocation63_spill] sm:$0xff] %v10430_v26  ;;  %v10433_v18 = vpop.f32.mrb[51].mxu1  ;;  %v5787_v22 = vadd.f32 %v10210_v58, %v5433_v35  ;;  %v5435_v37 = vpop.f32.mrb[210].mxu0 }
 0x582   : > { %11355 = vst [vmem:[#allocation65_spill] sm:$0xff] %v10433_v18  ;;  %v5789_v61 = vadd.f32 %v10216_v49, %v5435_v37  ;;  %v5437_v53 = vpop.f32.mrb[211].mxu0 }
 0x583   : > { %v5791_v29 = vadd.f32 %v10218_v42, %v5437_v53 }
 0x584   : > { %v6101_v20 = vmax.f32 %v5785_v44, %v5789_v61  ;;  %5700 = vmatmul.mubr.bf16.gmra.mrb[60].mxu0 %v10379_v7 }
 0x585   : > { %v6110_v13 = vmax.f32 %v5787_v22, %v5791_v29  ;;  %5709 = vmatprep.mubr.bf16.mxu0 %v4986_v39 }
 0x586   : > { %v10439_v4 = vpop.f32.mrb[52].mxu1 }
 0x587   : > { %v10441_v26 = vpop.f32.mrb[53].mxu1  ;;  %v5441_v31 = vpop.f32.mrb[212].mxu0 }
 0x588   : > { %v10443_v25 = vpop.f32.mrb[54].mxu1  ;;  %v5795_v58 = vadd.f32 %v10230_v47, %v5441_v31  ;;  %v5443_v35 = vpop.f32.mrb[213].mxu0 }
 0x589   : > { %v10446_v18 = vpop.f32.mrb[55].mxu1  ;;  %v5797_v49 = vadd.f32 %v10232_v59, %v5443_v35  ;;  %v5445_v42 = vpop.f32.mrb[214].mxu0 }
 0x58a   : > { %v6102_v44 = vmax.f32 %v6101_v20, %v5795_v58  ;;  %v5799_v7 = vadd.f32 %v10236_v23, %v5445_v42  ;;  %v5447_v22 = vpop.f32.mrb[215].mxu0 }
 0x58b   : > { %v6111_v39 = vmax.f32 %v6110_v13, %v5797_v49  ;;  %v5801_v37 = vadd.f32 %v10238_v24, %v5447_v22 }
 0x58c   : > { %v10451_v61 = vmax.f32 %v6102_v44, %v5799_v7  ;;  %5710 = vmatmul.mubr.bf16.gmra.mrb[64].mxu0 %v10395_v50 }
 0x58d   : > { %v10454_v53 = vmax.f32 %v6111_v39, %v5801_v37  ;;  %5719 = vmatprep.mubr.bf16.mxu0 %v4990_v17 }
 0x58e   : > { %11356 = vst [vmem:[#allocation62_spill] sm:$0xff] %v10451_v61  ;;  %v10456_v47 = vpop.f32.mrb[56].mxu1 }
 0x58f   : > { %11357 = vst [vmem:[#allocation64_spill] sm:$0xff] %v10454_v53  ;;  %v10458_v29 = vpop.f32.mrb[57].mxu1  ;;  %v5451_v59 = vpop.f32.mrb[216].mxu0 }
 0x590   : > { %v10460_v31 = vpop.f32.mrb[58].mxu1  ;;  %v5805_v23 = vadd.f32 %v10250_v16, %v5451_v59  ;;  %v5453_v20 = vpop.f32.mrb[217].mxu0 }
 0x591   : > { %v10463_v13 = vpop.f32.mrb[59].mxu1  ;;  %v5807_v24 = vadd.f32 %v10254_v2, %v5453_v20  ;;  %v5455_v58 = vpop.f32.mrb[218].mxu0 }
 0x592   : > { %v5809_v50 = vadd.f32 %v10260_v28, %v5455_v58  ;;  %v5457_v35 = vpop.f32.mrb[219].mxu0 }
 0x593   : > { %v5811_v17 = vadd.f32 %v10262_v55, %v5457_v35 }
 0x594   : > { %v6119_v49 = vmax.f32 %v5805_v23, %v5809_v50  ;;  %5720 = vmatmul.mubr.bf16.gmra.mrb[68].mxu0 %v4989_v27 }
 0x595   : > { %v6128_v42 = vmax.f32 %v5807_v24, %v5811_v17  ;;  %5762 = vmatprep.mubr.bf16.mxu0 %v10115_v1 }
 0x596   : > { %v10469_v44 = vpop.f32.mrb[60].mxu1 }
 0x597   : > { %v10471_v7 = vpop.f32.mrb[61].mxu1  ;;  %v5461_v16 = vpop.f32.mrb[220].mxu0 }
 0x598   : > { %v10473_v22 = vpop.f32.mrb[62].mxu1  ;;  %v5815_v2 = vadd.f32 %v10273_v6, %v5461_v16  ;;  %v5463_v39 = vpop.f32.mrb[221].mxu0 }
 0x599   : > { %v10476_v37 = vpop.f32.mrb[63].mxu1  ;;  %v5817_v28 = vadd.f32 %v10275_v0, %v5463_v39  ;;  %v5465_v55 = vpop.f32.mrb[222].mxu0 }
 0x59a   : > { %v6120_v59 = vmax.f32 %v6119_v49, %v5815_v2  ;;  %v5819_v27 = vadd.f32 %v10279_v62, %v5465_v55  ;;  %v5467_v23 = vpop.f32.mrb[223].mxu0 }
 0x59b   : > { %v6129_v1 = vmax.f32 %v6128_v42, %v5817_v28  ;;  %v5821_v20 = vadd.f32 %v10281_v57, %v5467_v23 }
 0x59c   : > { %v10481_v24 = vmax.f32 %v6120_v59, %v5819_v27  ;;  %5763 = vmatmul.mubr.bf16.vlgmr.msra.gmra.mrb[200].mxu0 %v10110_v51 }
 0x59d   : > { %v10484_v58 = vmax.f32 %v6129_v1, %v5821_v20  ;;  %5772 = vmatprep.mubr.bf16.mxu0 %v10130_v10 }
 0x59e   : > { %11358 = vst [vmem:[#allocation35_spill] sm:$0xff] %v10481_v24  ;;  %v10487_v6 = vpop.f32.mrb[64].mxu1 }
 0x59f   : > { %11359 = vst [vmem:[#allocation38_spill] sm:$0xff] %v10484_v58  ;;  %v10489_v50 = vpop.f32.mrb[65].mxu1  ;;  %v5471_v0 = vpop.f32.mrb[224].mxu0 }
 0x5a0   : > { %v10491_v35 = vpop.f32.mrb[66].mxu1  ;;  %v5825_v62 = vadd.f32 %v10291_v11, %v5471_v0  ;;  %v5473_v17 = vpop.f32.mrb[225].mxu0 }
 0x5a1   : > { %v10494_v49 = vpop.f32.mrb[67].mxu1  ;;  %v5827_v57 = vadd.f32 %v10295_v60, %v5473_v17  ;;  %v5475_v42 = vpop.f32.mrb[226].mxu0 }
 0x5a2   : > { %v5829_v51 = vadd.f32 %v10301_v15, %v5475_v42  ;;  %v5477_v16 = vpop.f32.mrb[227].mxu0 }
 0x5a3   : > { %v5831_v10 = vadd.f32 %v10303_v3, %v5477_v16 }
 0x5a4   : > { %v6137_v2 = vmax.f32 %v5825_v62, %v5829_v51  ;;  %5773 = vmatmul.mubr.bf16.gmra.mrb[204].mxu0 %v10138_v63 }
 0x5a5   : > { %v6146_v39 = vmax.f32 %v5827_v57, %v5831_v10 }
 0x5a6   : > { %v10500_v28 = vpop.f32.mrb[68].mxu1 }
 0x5a7   : > { %v10502_v55 = vpop.f32.mrb[69].mxu1  ;;  %v5481_v11 = vpop.f32.mrb[228].mxu0 }
 0x5a8   : > { %v10504_v59 = vpop.f32.mrb[70].mxu1  ;;  %v5835_v27 = vadd.f32 %v10313_v8, %v5481_v11  ;;  %v5483_v60 = vpop.f32.mrb[229].mxu0 }
 0x5a9   : > { %v10507_v23 = vpop.f32.mrb[71].mxu1  ;;  %v5837_v15 = vadd.f32 %v10315_v34, %v5483_v60  ;;  %v5485_v1 = vpop.f32.mrb[230].mxu0 }
 0x5aa   : > { %v6138_v3 = vmax.f32 %v6137_v2, %v5835_v27  ;;  %v5839_v20 = vadd.f32 %v10319_v41, %v5485_v1  ;;  %v5487_v63 = vpop.f32.mrb[231].mxu0 }
 0x5ab   : > { %v6147_v0 = vmax.f32 %v6146_v39, %v5837_v15  ;;  %v5841_v62 = vadd.f32 %v10321_v45, %v5487_v63 }
 0x5ac   : > { %v10512_v17 = vmax.f32 %v6138_v3, %v5839_v20 }
 0x5ad   : > { %v10514_v57 = vmax.f32 %v6147_v0, %v5841_v62 }
 0x5ae   : > { %11360 = vst [vmem:[#allocation67_spill] sm:$0xff] %v10512_v17  ;;  %v10516_v42 = vpop.f32.mrb[72].mxu1 }
 0x5af   : > { %11361 = vst [vmem:[#allocation69_spill] sm:$0xff] %v10514_v57  ;;  %v10518_v8 = vpop.f32.mrb[73].mxu1  ;;  %v5491_v51 = vpop.f32.mrb[232].mxu0 }
 0x5b0   : > { %v10520_v16 = vpop.f32.mrb[74].mxu1  ;;  %v5845_v34 = vadd.f32 %v10331_v30, %v5491_v51  ;;  %v5493_v10 = vpop.f32.mrb[233].mxu0 }
 0x5b1   : > { %v10523_v2 = vpop.f32.mrb[75].mxu1  ;;  %v5847_v41 = vadd.f32 %v10335_v32, %v5493_v10  ;;  %v5495_v39 = vpop.f32.mrb[234].mxu0  ;;  %v11362_v32 = vld [vmem:[#allocation32_spill] sm:$0xff] }
 0x5b2   : > { %v5849_v45 = vadd.f32 %v10341_v12, %v5495_v39  ;;  %v5497_v11 = vpop.f32.mrb[235].mxu0  ;;  %v11363_v39 = vld [vmem:[#allocation31_spill] sm:$0xff] }
 0x5b3   : > { %v5851_v27 = vadd.f32 %v10343_v14, %v5497_v11 }
 0x5b4   : > { %v6155_v60 = vmax.f32 %v5845_v34, %v5849_v45  ;;  %v11364_v45 = vld [vmem:[#allocation34_spill] sm:$0xff] }
 0x5b5   : > { %v6164_v15 = vmax.f32 %v5847_v41, %v5851_v27 }
 0x5b6   : > { %v10528_v1 = vpop.f32.mrb[76].mxu1 }
 0x5b7   : > { %v10530_v3 = vpop.f32.mrb[77].mxu1  ;;  %v5501_v20 = vpop.f32.mrb[236].mxu0 }
 0x5b8   : > { %v10532_v63 = vpop.f32.mrb[78].mxu1  ;;  %v5855_v30 = vadd.f32 %v10353_v21, %v5501_v20  ;;  %v5503_v0 = vpop.f32.mrb[237].mxu0 }
 0x5b9   : > { %v10535_v62 = vpop.f32.mrb[79].mxu1  ;;  %v5857_v51 = vadd.f32 %v11362_v32, %v5503_v0  ;;  %v5505_v12 = vpop.f32.mrb[238].mxu0  ;;  %v11367_v0 = vld [vmem:[#allocation33_spill] sm:$0xff] }
 0x5ba   : > { %v6156_v10 = vmax.f32 %v6155_v60, %v5855_v30  ;;  %v5859_v14 = vadd.f32 %v11363_v39, %v5505_v12  ;;  %v5507_v34 = vpop.f32.mrb[239].mxu0  ;;  %v11368_v12 = vld [vmem:[#allocation36_spill] sm:$0xff] }
 0x5bb   : > { %v6165_v41 = vmax.f32 %v6164_v15, %v5857_v51  ;;  %v5861_v11 = vadd.f32 %v11364_v45, %v5507_v34 }
 0x5bc   : > { %v10540_v27 = vmax.f32 %v6156_v10, %v5859_v14  ;;  %v11369_v14 = vld [vmem:[#allocation61_spill] sm:$0xff] }
 0x5bd   : > { %v10542_v57 = vmax.f32 %v6165_v41, %v5861_v11 }
 0x5be   : > { %11365 = vst [vmem:[#allocation66_spill] sm:$0xff] %v10540_v27  ;;  %v10544_v17 = vpop.f32.mrb[80].mxu1 }
 0x5bf   : > { %11366 = vst [vmem:[#allocation68_spill] sm:$0xff] %v10542_v57  ;;  %v10546_v21 = vpop.f32.mrb[81].mxu1  ;;  %v5511_v20 = vpop.f32.mrb[240].mxu0 }
 0x5c0   : > { %v10548_v58 = vpop.f32.mrb[82].mxu1  ;;  %v5865_v32 = vadd.f32 %v11367_v0, %v5511_v20  ;;  %v5513_v60 = vpop.f32.mrb[241].mxu0  ;;  %v11371_v20 = vld [vmem:[#allocation59_spill] sm:$0xff] }
 0x5c1   : > { %v10551_v30 = vpop.f32.mrb[83].mxu1  ;;  %v5867_v15 = vadd.f32 %v11368_v12, %v5513_v60  ;;  %v5515_v51 = vpop.f32.mrb[242].mxu0  ;;  %v11373_v60 = vld [vmem:[#allocation60_spill] sm:$0xff] }
 0x5c2   : > { %v5869_v10 = vadd.f32 %v10381_v46, %v5515_v51  ;;  %v5517_v39 = vpop.f32.mrb[243].mxu0 }
 0x5c3   : > { %v5871_v34 = vadd.f32 %v11369_v14, %v5517_v39 }
 0x5c4   : > { %v6173_v41 = vmax.f32 %v5865_v32, %v5869_v10 }
 0x5c5   : > { %v6182_v45 = vmax.f32 %v5867_v15, %v5871_v34 }
 0x5c6   : > { %v10556_v11 = vpop.f32.mrb[84].mxu1 }
 0x5c7   : > { %v10558_v57 = vpop.f32.mrb[85].mxu1  ;;  %v5521_v27 = vpop.f32.mrb[244].mxu0 }
 0x5c8   : > { %v10560_v24 = vpop.f32.mrb[86].mxu1  ;;  %v5875_v0 = vadd.f32 %v11371_v20, %v5521_v27  ;;  %v5523_v53 = vpop.f32.mrb[245].mxu0 }
 0x5c9   : > { %11370 = vst [vmem:[#allocation71_spill] sm:$0xff] %v10560_v24  ;;  %v10563_v61 = vpop.f32.mrb[87].mxu1  ;;  %v5877_v12 = vadd.f32 %v11373_v60, %v5523_v53  ;;  %v5525_v46 = vpop.f32.mrb[246].mxu0 }
 0x5ca   : > { %11372 = vst [vmem:[#allocation73_spill] sm:$0xff] %v10563_v61  ;;  %v6174_v51 = vmax.f32 %v6173_v41, %v5875_v0  ;;  %v5879_v39 = vadd.f32 %v10397_v43, %v5525_v46  ;;  %v5527_v32 = vpop.f32.mrb[247].mxu0 }
 0x5cb   : > { %v6183_v15 = vmax.f32 %v6182_v45, %v5877_v12  ;;  %v5881_v10 = vadd.f32 %v10399_v33, %v5527_v32 }
 0x5cc   : > { %v10568_v14 = vmax.f32 %v6174_v51, %v5879_v39 }
 0x5cd   : > { %v10570_v34 = vmax.f32 %v6183_v15, %v5881_v10 }
 0x5ce   : > { %11374 = vst [vmem:[#allocation70_spill] sm:$0xff] %v10568_v14  ;;  %v10572_v24 = vpop.f32.mrb[88].mxu1 }
 0x5cf   : > { %11375 = vst [vmem:[#allocation72_spill] sm:$0xff] %v10570_v34  ;;  %v10574_v27 = vpop.f32.mrb[89].mxu1  ;;  %v5531_v20 = vpop.f32.mrb[248].mxu0 }
 0x5d0   : > { %v10576_v61 = vpop.f32.mrb[90].mxu1  ;;  %v5885_v53 = vadd.f32 %v10407_v54, %v5531_v20  ;;  %v5533_v41 = vpop.f32.mrb[249].mxu0 }
 0x5d1   : > { %v10579_v0 = vpop.f32.mrb[91].mxu1  ;;  %v5887_v43 = vadd.f32 %v10409_v36, %v5533_v41  ;;  %v5535_v45 = vpop.f32.mrb[250].mxu0 }
 0x5d2   : > { %v5889_v33 = vadd.f32 %v10411_v19, %v5535_v45  ;;  %v5537_v60 = vpop.f32.mrb[251].mxu0 }
 0x5d3   : > { %v5891_v12 = vadd.f32 %v10413_v40, %v5537_v60 }
 0x5d4   : > { %v6191_v46 = vmax.f32 %v5885_v53, %v5889_v33 }
 0x5d5   : > { %v6200_v51 = vmax.f32 %v5887_v43, %v5891_v12 }
 0x5d6   : > { %v10584_v39 = vpop.f32.mrb[92].mxu1 }
 0x5d7   : > { %v10586_v32 = vpop.f32.mrb[93].mxu1  ;;  %v5541_v15 = vpop.f32.mrb[252].mxu0 }
 0x5d8   : > { %v10588_v10 = vpop.f32.mrb[94].mxu1  ;;  %v5895_v54 = vadd.f32 %v10417_v52, %v5541_v15  ;;  %v5543_v20 = vpop.f32.mrb[253].mxu0 }
 0x5d9   : > { %v10591_v34 = vpop.f32.mrb[95].mxu1  ;;  %v5897_v36 = vadd.f32 %v10419_v9, %v5543_v20  ;;  %v5545_v19 = vpop.f32.mrb[254].mxu0 }
 0x5da   : > { %v6192_v41 = vmax.f32 %v6191_v46, %v5895_v54  ;;  %v5899_v40 = vadd.f32 %v10421_v56, %v5545_v19  ;;  %v5547_v53 = vpop.f32.mrb[255].mxu0  ;;  %v11380_v19 = vld [vmem:[#allocation65_spill] sm:$0xff] }
 0x5db   : > { %v6201_v43 = vmax.f32 %v6200_v51, %v5897_v36  ;;  %v5901_v45 = vadd.f32 %v10423_v48, %v5547_v53  ;;  %v11379_v48 = vld [vmem:[#allocation63_spill] sm:$0xff] }
 0x5dc   : > { %v10596_v33 = vmax.f32 %v6192_v41, %v5899_v40 }
 0x5dd   : > { %v10598_v60 = vmax.f32 %v6201_v43, %v5901_v45 }
 0x5de   : > { %11376 = vst [vmem:[#allocation37_spill] sm:$0xff] %v10596_v33  ;;  %v10600_v12 = vpop.f32.mrb[96].mxu1 }
 0x5df   : > { %11377 = vst [vmem:[#allocation40_spill] sm:$0xff] %v10598_v60  ;;  %v10602_v52 = vpop.f32.mrb[97].mxu1  ;;  %v5551_v15 = vpop.f32.mrb[0].mxu0 }
 0x5e0   : > { %v10604_v14 = vpop.f32.mrb[98].mxu1  ;;  %v5905_v9 = vadd.f32 %v10426_v5, %v5551_v15  ;;  %v5553_v46 = vpop.f32.mrb[1].mxu0 }
 0x5e1   : > { %v10607_v54 = vpop.f32.mrb[99].mxu1  ;;  %v5907_v56 = vadd.f32 %v10428_v38, %v5553_v46  ;;  %v5555_v51 = vpop.f32.mrb[2].mxu0 }
 0x5e2   : > { %11378 = vst [vmem:[#allocation75_spill] sm:$0xff] %v10607_v54  ;;  %v5909_v20 = vadd.f32 %v11379_v48, %v5555_v51  ;;  %v5557_v36 = vpop.f32.mrb[3].mxu0 }
 0x5e3   : > { %v5911_v41 = vadd.f32 %v11380_v19, %v5557_v36 }
 0x5e4   : > { %v6209_v40 = vmax.f32 %v5905_v9, %v5909_v20 }
 0x5e5   : > { %v6218_v53 = vmax.f32 %v5907_v56, %v5911_v41 }
 0x5e6   : > { %v10612_v43 = vpop.f32.mrb[100].mxu1 }
 0x5e7   : > { %v10614_v45 = vpop.f32.mrb[101].mxu1  ;;  %v5561_v60 = vpop.f32.mrb[4].mxu0 }
 0x5e8   : > { %v10616_v33 = vpop.f32.mrb[102].mxu1  ;;  %v5915_v5 = vadd.f32 %v10439_v4, %v5561_v60  ;;  %v5563_v15 = vpop.f32.mrb[5].mxu0 }
 0x5e9   : > { %v10619_v54 = vpop.f32.mrb[103].mxu1  ;;  %v5917_v38 = vadd.f32 %v10441_v26, %v5563_v15  ;;  %v5565_v46 = vpop.f32.mrb[6].mxu0 }
 0x5ea   : > { %11381 = vst [vmem:[#allocation77_spill] sm:$0xff] %v10619_v54  ;;  %v6210_v51 = vmax.f32 %v6209_v40, %v5915_v5  ;;  %v5919_v48 = vadd.f32 %v10443_v25, %v5565_v46  ;;  %v5567_v9 = vpop.f32.mrb[7].mxu0 }
 0x5eb   : > { %v6219_v56 = vmax.f32 %v6218_v53, %v5917_v38  ;;  %v5921_v20 = vadd.f32 %v10446_v18, %v5567_v9 }
 0x5ec   : > { %v10624_v36 = vmax.f32 %v6210_v51, %v5919_v48 }
 0x5ed   : > { %v10626_v19 = vmax.f32 %v6219_v56, %v5921_v20 }
 0x5ee   : > { %11382 = vst [vmem:[#allocation74_spill] sm:$0xff] %v10624_v36  ;;  %v10628_v41 = vpop.f32.mrb[104].mxu1 }
 0x5ef   : > { %11383 = vst [vmem:[#allocation76_spill] sm:$0xff] %v10626_v19  ;;  %v10630_v4 = vpop.f32.mrb[105].mxu1  ;;  %v5571_v60 = vpop.f32.mrb[8].mxu0 }
 0x5f0   : > { %v10632_v54 = vpop.f32.mrb[106].mxu1  ;;  %v5925_v26 = vadd.f32 %v10456_v47, %v5571_v60  ;;  %v5573_v40 = vpop.f32.mrb[9].mxu0 }
 0x5f1   : > { %v10635_v5 = vpop.f32.mrb[107].mxu1  ;;  %v5927_v25 = vadd.f32 %v10458_v29, %v5573_v40  ;;  %v5575_v53 = vpop.f32.mrb[10].mxu0 }
 0x5f2   : > { %v5929_v18 = vadd.f32 %v10460_v31, %v5575_v53  ;;  %v5577_v15 = vpop.f32.mrb[11].mxu0 }
 0x5f3   : > { %v5931_v38 = vadd.f32 %v10463_v13, %v5577_v15 }
 0x5f4   : > { %v6227_v46 = vmax.f32 %v5925_v26, %v5929_v18 }
 0x5f5   : > { %v6236_v51 = vmax.f32 %v5927_v25, %v5931_v38 }
 0x5f6   : > { %v10640_v48 = vpop.f32.mrb[108].mxu1 }
 0x5f7   : > { %v10642_v9 = vpop.f32.mrb[109].mxu1  ;;  %v5581_v56 = vpop.f32.mrb[12].mxu0 }
 0x5f8   : > { %v10644_v20 = vpop.f32.mrb[110].mxu1  ;;  %v5935_v47 = vadd.f32 %v10469_v44, %v5581_v56  ;;  %v5583_v60 = vpop.f32.mrb[13].mxu0 }
 0x5f9   : > { %v10647_v19 = vpop.f32.mrb[111].mxu1  ;;  %v5937_v29 = vadd.f32 %v10471_v7, %v5583_v60  ;;  %v5585_v31 = vpop.f32.mrb[14].mxu0 }
 0x5fa   : > { %11384 = vst [vmem:[#allocation79_spill] sm:$0xff] %v10647_v19  ;;  %v6228_v40 = vmax.f32 %v6227_v46, %v5935_v47  ;;  %v5939_v13 = vadd.f32 %v10473_v22, %v5585_v31  ;;  %v5587_v26 = vpop.f32.mrb[15].mxu0 }
 0x5fb   : > { %v6237_v25 = vmax.f32 %v6236_v51, %v5937_v29  ;;  %v5941_v53 = vadd.f32 %v10476_v37, %v5587_v26 }
 0x5fc   : > { %v6229_v18 = vmax.f32 %v6228_v40, %v5939_v13 }
 0x5fd   : > { %v6238_v15 = vmax.f32 %v6237_v25, %v5941_v53 }
 0x5fe   : > { %v10652_v38 = vpop.f32.mrb[112].mxu1  ;;  %v6230_v29 = vrot.slane %v6229_v18, 4 }
 0x5ff   : > { %v10654_v36 = vpop.f32.mrb[113].mxu1  ;;  %v5591_v44 = vpop.f32.mrb[16].mxu0  ;;  %v6239_v40 = vrot.slane %v6238_v15, 4 }
 0x600   : > { %v10656_v56 = vpop.f32.mrb[114].mxu1  ;;  %v5945_v19 = vadd.f32 %v10487_v6, %v5591_v44  ;;  %v5593_v7 = vpop.f32.mrb[17].mxu0  ;;  %v6231_v53 = vmax.f32 %v6229_v18, %v6230_v29 }
 0x601   : > { %v10659_v60 = vpop.f32.mrb[115].mxu1  ;;  %v5947_v22 = vadd.f32 %v10489_v50, %v5593_v7  ;;  %v5595_v46 = vpop.f32.mrb[18].mxu0 }
 0x602   : > { %11385 = vst [vmem:[#allocation81_spill] sm:$0xff] %v10659_v60  ;;  %v5949_v51 = vadd.f32 %v10491_v35, %v5595_v46  ;;  %v5597_v37 = vpop.f32.mrb[19].mxu0  ;;  %v6240_v60 = vmax.f32 %v6238_v15, %v6239_v40 }
 0x603   : > { %v5951_v47 = vadd.f32 %v10494_v49, %v5597_v37 }
 0x604   : > { %v6245_v31 = vmax.f32 %v5945_v19, %v5949_v51  ;;  %v6241_v29 = vrot.slane %v6240_v60, 2 }
 0x605   : > { %v6254_v13 = vmax.f32 %v5947_v22, %v5951_v47 }
 0x606   : > { %v10664_v26 = vpop.f32.mrb[116].mxu1 }
 0x607   : > { %11386 = vst [vmem:[#allocation78_spill] sm:$0xff] %v10664_v26  ;;  %v10666_v25 = vpop.f32.mrb[117].mxu1  ;;  %v5601_v6 = vpop.f32.mrb[20].mxu0 }
 0x608   : > { %11387 = vst [vmem:[#allocation80_spill] sm:$0xff] %v10666_v25  ;;  %v10668_v44 = vpop.f32.mrb[118].mxu1  ;;  %v5955_v50 = vadd.f32 %v10500_v28, %v5601_v6  ;;  %v5603_v7 = vpop.f32.mrb[21].mxu0  ;;  %v6232_v25 = vrot.slane %v6231_v53, 2 }
 0x609   : > { %11388 = vst [vmem:[#allocation39_spill] sm:$0xff] %v10668_v44  ;;  %v10671_v35 = vpop.f32.mrb[119].mxu1  ;;  %v5957_v49 = vadd.f32 %v10502_v55, %v5603_v7  ;;  %v5605_v46 = vpop.f32.mrb[22].mxu0  ;;  %v6242_v7 = vmax.f32 %v6240_v60, %v6241_v29 }
 0x60a   : > { %11389 = vst [vmem:[#allocation42_spill] sm:$0xff] %v10671_v35  ;;  %v6246_v19 = vmax.f32 %v6245_v31, %v5955_v50  ;;  %v5959_v22 = vadd.f32 %v10504_v59, %v5605_v46  ;;  %v5607_v51 = vpop.f32.mrb[23].mxu0  ;;  %v6233_v15 = vmax.f32 %v6231_v53, %v6232_v25 }
 0x60b   : > { %v6255_v37 = vmax.f32 %v6254_v13, %v5957_v49  ;;  %v5961_v47 = vadd.f32 %v10507_v23, %v5607_v51 }
 0x60c   : > { %v6247_v18 = vmax.f32 %v6246_v19, %v5959_v22  ;;  %v6234_v22 = vrot.slane %v6233_v15, 1 }
 0x60d   : > { %v6256_v44 = vmax.f32 %v6255_v37, %v5961_v47  ;;  %v11390_v47 = vld [vmem:[#allocation19_spill] sm:$0xff] }
 0x60e   : > { %v6248_v26 = vrot.slane %v6247_v18, 4 }
 0x60f   : > { %v6257_v28 = vrot.slane %v6256_v44, 4  ;;  %v5611_v6 = vpop.f32.mrb[24].mxu0 }
 0x610   : > { %v6249_v40 = vmax.f32 %v6247_v18, %v6248_v26  ;;  %v5965_v35 = vadd.f32 %v10516_v42, %v5611_v6  ;;  %v5613_v55 = vpop.f32.mrb[25].mxu0  ;;  %v6371_v42 = vld [vmem:[%s10927_s8] sm:$0x3]  ;;  %v6243_v26 = vrot.slane %v6242_v7, 1 }
 0x611   : > { %v6258_v31 = vmax.f32 %v6256_v44, %v6257_v28  ;;  %v5967_v59 = vadd.f32 %v10518_v8, %v5613_v55  ;;  %v5615_v50 = vpop.f32.mrb[26].mxu0  ;;  %v10684_v18 = vrot.slane %v6371_v42, %v11390_v47  ;;  %v11391_v6 = vld [vmem:[#allocation18_spill] sm:$0xff] }
 0x612   : > { %v6250_v13 = vrot.slane %v6249_v40, 2  ;;  %v5969_v23 = vadd.f32 %v10520_v16, %v5615_v50  ;;  %v5617_v49 = vpop.f32.mrb[27].mxu0  ;;  %v6235_v16 = vmax.f32 %v6233_v15, %v6234_v22 }
 0x613   : > { %v6259_v46 = vrot.slane %v6258_v31, 2  ;;  %v5971_v19 = vadd.f32 %v10523_v2, %v5617_v49 }
 0x614   : > { %v6251_v51 = vmax.f32 %v6249_v40, %v6250_v13  ;;  %v6263_v37 = vmax.f32 %v5965_v35, %v5969_v23  ;;  %v10688_v35 = vrot.slane %v6371_v42, %v11391_v6  ;;  %v6244_v40 = vmax.f32 %v6242_v7, %v6243_v26 }
 0x615   : > { %v6260_v60 = vmax.f32 %v6258_v31, %v6259_v46  ;;  %v6272_v25 = vmax.f32 %v5967_v59, %v5971_v19  ;;  %v6399_v19 = vadd.f32 %v10684_v18, %v6235_v16 }
 0x616   : > { %v6252_v53 = vrot.slane %v6251_v51, 1  ;;  %v6400_v7 = vadd.f32 %v10688_v35, %v6244_v40 }
 0x617   : > { %v6261_v8 = vrot.slane %v6260_v60, 1  ;;  %v5621_v44 = vpop.f32.mrb[28].mxu0 }
 0x618   : > { %v6253_v29 = vmax.f32 %v6251_v51, %v6252_v53  ;;  %v5975_v2 = vadd.f32 %v10528_v1, %v5621_v44  ;;  %v5623_v28 = vpop.f32.mrb[29].mxu0 }
 0x619   : > { %v6262_v55 = vmax.f32 %v6260_v60, %v6261_v8  ;;  %v5977_v50 = vadd.f32 %v10530_v3, %v5623_v28  ;;  %v5625_v31 = vpop.f32.mrb[30].mxu0 }
 0x61a   : > { %v6401_v59 = vadd.f32 %v10684_v18, %v6253_v29  ;;  %v6264_v13 = vmax.f32 %v6263_v37, %v5975_v2  ;;  %v5979_v23 = vadd.f32 %v10532_v63, %v5625_v31  ;;  %v5627_v49 = vpop.f32.mrb[31].mxu0 }
 0x61b   : > { %v6402_v15 = vadd.f32 %v10688_v35, %v6262_v55  ;;  %v6273_v46 = vmax.f32 %v6272_v25, %v5977_v50  ;;  %v5981_v1 = vadd.f32 %v10535_v62, %v5627_v49 }
 0x61c   : > { %v6475_v22 = vrot.slane %v6401_v59, 7  ;;  %v6265_v51 = vmax.f32 %v6264_v13, %v5979_v23 }
 0x61d   : > { %v6489_v42 = vrot.slane %v6402_v15, 7  ;;  %v6274_v3 = vmax.f32 %v6273_v46, %v5981_v1 }
 0x61e   : > { %v6476_v26 = vsel %vm2012_vm2, %v6475_v22, %v6399_v19  ;;  %v6266_v60 = vrot.slane %v6265_v51, 4 }
 0x61f   : > { %v6490_v37 = vsel %vm2012_vm2, %v6489_v42, %v6400_v7  ;;  %v6275_v63 = vrot.slane %v6274_v3, 4  ;;  %v5631_v53 = vpop.f32.mrb[32].mxu0 }
 0x620   : > { %v6267_v8 = vmax.f32 %v6265_v51, %v6266_v60  ;;  %v5985_v25 = vadd.f32 %v10544_v17, %v5631_v53  ;;  %v5633_v44 = vpop.f32.mrb[33].mxu0  ;;  %v11392_v51 = vld [vmem:[#allocation71_spill] sm:$0xff]  ;;  %v11393_v60 = vld [vmem:[#allocation73_spill] sm:$0xff] }
 0x621   : > { %v6276_v62 = vmax.f32 %v6274_v3, %v6275_v63  ;;  %v5987_v47 = vadd.f32 %v10546_v21, %v5633_v44  ;;  %v5635_v16 = vpop.f32.mrb[34].mxu0 }
 0x622   : > { %v6268_v29 = vrot.slane %v6267_v8, 2  ;;  %v5989_v2 = vadd.f32 %v10548_v58, %v5635_v16  ;;  %v5637_v28 = vpop.f32.mrb[35].mxu0 }
 0x623   : > { %v6277_v6 = vrot.slane %v6276_v62, 2  ;;  %v5991_v40 = vadd.f32 %v10551_v30, %v5637_v28 }
 0x624   : > { %v6269_v55 = vmax.f32 %v6267_v8, %v6268_v29  ;;  %v6281_v50 = vmax.f32 %v5985_v25, %v5989_v2 }
 0x625   : > { %v6278_v31 = vmax.f32 %v6276_v62, %v6277_v6  ;;  %v6290_v59 = vmax.f32 %v5987_v47, %v5991_v40 }
 0x626   : > { %v6270_v13 = vrot.slane %v6269_v55, 1 }
 0x627   : > { %v6279_v23 = vrot.slane %v6278_v31, 1  ;;  %v5641_v49 = vpop.f32.mrb[36].mxu0 }
 0x628   : > { %v6271_v17 = vmax.f32 %v6269_v55, %v6270_v13  ;;  %v5995_v15 = vadd.f32 %v10556_v11, %v5641_v49  ;;  %v5643_v46 = vpop.f32.mrb[37].mxu0 }
 0x629   : > { %v6280_v21 = vmax.f32 %v6278_v31, %v6279_v23  ;;  %v5997_v1 = vadd.f32 %v10558_v57, %v5643_v46  ;;  %v5645_v19 = vpop.f32.mrb[38].mxu0 }
 0x62a   : > { %v6403_v58 = vadd.f32 %v10684_v18, %v6271_v17  ;;  %v6282_v22 = vmax.f32 %v6281_v50, %v5995_v15  ;;  %v5999_v30 = vadd.f32 %v11392_v51, %v5645_v19  ;;  %v5647_v7 = vpop.f32.mrb[39].mxu0 }
 0x62b   : > { %v6404_v42 = vadd.f32 %v10688_v35, %v6280_v21  ;;  %v6291_v3 = vmax.f32 %v6290_v59, %v5997_v1  ;;  %v6001_v63 = vadd.f32 %v11393_v60, %v5647_v7 }
 0x62c   : > { %v6477_v53 = vrot.slane %v6403_v58, 6  ;;  %v6283_v8 = vmax.f32 %v6282_v22, %v5999_v30 }
 0x62d   : > { %v6491_v25 = vrot.slane %v6404_v42, 6  ;;  %v6292_v11 = vmax.f32 %v6291_v3, %v6001_v63 }
 0x62e   : > { %v6478_v44 = vsel %vm2014_vm3, %v6477_v53, %v6476_v26  ;;  %v6284_v62 = vrot.slane %v6283_v8, 4 }
 0x62f   : > { %v6492_v57 = vsel %vm2014_vm3, %v6491_v25, %v6490_v37  ;;  %v6293_v47 = vrot.slane %v6292_v11, 4  ;;  %v5651_v16 = vpop.f32.mrb[40].mxu0 }
 0x630   : > { %v6285_v29 = vmax.f32 %v6283_v8, %v6284_v62  ;;  %v6005_v2 = vadd.f32 %v10572_v24, %v5651_v16  ;;  %v5653_v28 = vpop.f32.mrb[41].mxu0 }
 0x631   : > { %v6294_v6 = vmax.f32 %v6292_v11, %v6293_v47  ;;  %v6007_v40 = vadd.f32 %v10574_v27, %v5653_v28  ;;  %v5655_v55 = vpop.f32.mrb[42].mxu0 }
 0x632   : > { %v6286_v50 = vrot.slane %v6285_v29, 2  ;;  %v6009_v31 = vadd.f32 %v10576_v61, %v5655_v55  ;;  %v5657_v59 = vpop.f32.mrb[43].mxu0 }
 0x633   : > { %v6295_v13 = vrot.slane %v6294_v6, 2  ;;  %v6011_v26 = vadd.f32 %v10579_v0, %v5657_v59 }
 0x634   : > { %v6287_v23 = vmax.f32 %v6285_v29, %v6286_v50  ;;  %v6299_v49 = vmax.f32 %v6005_v2, %v6009_v31  ;;  %v11394_v50 = vld [vmem:[#allocation75_spill] sm:$0xff] }
 0x635   : > { %v6296_v37 = vmax.f32 %v6294_v6, %v6295_v13  ;;  %v6308_v17 = vmax.f32 %v6007_v40, %v6011_v26 }
 0x636   : > { %v6288_v15 = vrot.slane %v6287_v23, 1 }
 0x637   : > { %v6297_v46 = vrot.slane %v6296_v37, 1  ;;  %v5661_v21 = vpop.f32.mrb[44].mxu0 }
 0x638   : > { %v6289_v24 = vmax.f32 %v6287_v23, %v6288_v15  ;;  %v6015_v1 = vadd.f32 %v10584_v39, %v5661_v21  ;;  %v5663_v19 = vpop.f32.mrb[45].mxu0 }
 0x639   : > { %v6298_v27 = vmax.f32 %v6296_v37, %v6297_v46  ;;  %v6017_v58 = vadd.f32 %v10586_v32, %v5663_v19  ;;  %v5665_v22 = vpop.f32.mrb[46].mxu0 }
 0x63a   : > { %v6405_v61 = vadd.f32 %v10684_v18, %v6289_v24  ;;  %v6300_v51 = vmax.f32 %v6299_v49, %v6015_v1  ;;  %v6019_v0 = vadd.f32 %v10588_v10, %v5665_v22  ;;  %v5667_v30 = vpop.f32.mrb[47].mxu0 }
 0x63b   : > { %v6406_v7 = vadd.f32 %v10688_v35, %v6298_v27  ;;  %v6309_v42 = vmax.f32 %v6308_v17, %v6017_v58  ;;  %v6021_v3 = vadd.f32 %v10591_v34, %v5667_v30  ;;  %v11395_v58 = vld [vmem:[#allocation77_spill] sm:$0xff] }
 0x63c   : > { %v6479_v60 = vrot.slane %v6405_v61, 5  ;;  %v6301_v63 = vmax.f32 %v6300_v51, %v6019_v0 }
 0x63d   : > { %v6493_v53 = vrot.slane %v6406_v7, 5  ;;  %v6310_v39 = vmax.f32 %v6309_v42, %v6021_v3 }
 0x63e   : > { %v6480_v8 = vsel %vm2016_vm4, %v6479_v60, %v6478_v44  ;;  %v6302_v25 = vrot.slane %v6301_v63, 4  ;;  %v11396_v60 = vld [vmem:[#allocation62_spill] sm:$0xff] }
 0x63f   : > { %v6494_v32 = vsel %vm2016_vm4, %v6493_v53, %v6492_v57  ;;  %v6311_v11 = vrot.slane %v6310_v39, 4  ;;  %v5671_v62 = vpop.f32.mrb[48].mxu0 }
 0x640   : > { %v6303_v47 = vmax.f32 %v6301_v63, %v6302_v25  ;;  %v6025_v10 = vadd.f32 %v10600_v12, %v5671_v62  ;;  %v5673_v16 = vpop.f32.mrb[49].mxu0  ;;  %v6104_v63 = vrot.slane %v11396_v60, 4  ;;  %v11397_v25 = vld [vmem:[#allocation64_spill] sm:$0xff] }
 0x641   : > { %v6312_v29 = vmax.f32 %v6310_v39, %v6311_v11  ;;  %v6027_v2 = vadd.f32 %v10602_v52, %v5673_v16  ;;  %v5675_v28 = vpop.f32.mrb[50].mxu0  ;;  %v6113_v11 = vrot.slane %v11397_v25, 4 }
 0x642   : > { %v6304_v34 = vrot.slane %v6303_v47, 2  ;;  %v6029_v6 = vadd.f32 %v10604_v14, %v5675_v28  ;;  %v5677_v40 = vpop.f32.mrb[51].mxu0  ;;  %v6105_v28 = vmax.f32 %v11396_v60, %v6104_v63 }
 0x643   : > { %v6313_v55 = vrot.slane %v6312_v29, 2  ;;  %v6031_v44 = vadd.f32 %v11394_v50, %v5677_v40 }
 0x644   : > { %v6305_v31 = vmax.f32 %v6303_v47, %v6304_v34  ;;  %v6317_v59 = vmax.f32 %v6025_v10, %v6029_v6 }
 0x645   : > { %v6314_v57 = vmax.f32 %v6312_v29, %v6313_v55  ;;  %v6326_v13 = vmax.f32 %v6027_v2, %v6031_v44 }
 0x646   : > { %v6306_v26 = vrot.slane %v6305_v31, 1 }
 0x647   : > { %v6315_v23 = vrot.slane %v6314_v57, 1  ;;  %v5681_v49 = vpop.f32.mrb[52].mxu0 }
 0x648   : > { %v6307_v12 = vmax.f32 %v6305_v31, %v6306_v26  ;;  %v6035_v37 = vadd.f32 %v10612_v43, %v5681_v49  ;;  %v5683_v17 = vpop.f32.mrb[53].mxu0 }
 0x649   : > { %v6316_v52 = vmax.f32 %v6314_v57, %v6315_v23  ;;  %v6037_v15 = vadd.f32 %v10614_v45, %v5683_v17  ;;  %v5685_v46 = vpop.f32.mrb[54].mxu0 }
 0x64a   : > { %v6407_v14 = vadd.f32 %v10684_v18, %v6307_v12  ;;  %v6318_v21 = vmax.f32 %v6317_v59, %v6035_v37  ;;  %v6039_v24 = vadd.f32 %v10616_v33, %v5685_v46  ;;  %v5687_v1 = vpop.f32.mrb[55].mxu0  ;;  %v11398_v46 = vld [vmem:[#allocation79_spill] sm:$0xff] }
 0x64b   : > { %v6408_v19 = vadd.f32 %v10688_v35, %v6316_v52  ;;  %v6327_v27 = vmax.f32 %v6326_v13, %v6037_v15  ;;  %v6041_v22 = vadd.f32 %v11395_v58, %v5687_v1 }
 0x64c   : > { %v6481_v61 = vrot.slane %v6407_v14, 4  ;;  %v6319_v51 = vmax.f32 %v6318_v21, %v6039_v24 }
 0x64d   : > { %v6495_v0 = vrot.slane %v6408_v19, 4  ;;  %v6328_v43 = vmax.f32 %v6327_v27, %v6041_v22  ;;  %v11399_v22 = vld [vmem:[#allocation35_spill] sm:$0xff] }
 0x64e   : > { %v6482_v30 = vsel %vm2018_vm5, %v6481_v61, %v6480_v8  ;;  %v6320_v7 = vrot.slane %v6319_v51, 4  ;;  %v6122_v61 = vrot.slane %v11399_v22, 4 }
 0x64f   : > { %v6496_v45 = vsel %vm2018_vm5, %v6495_v0, %v6494_v32  ;;  %v6329_v42 = vrot.slane %v6328_v43, 4  ;;  %v5691_v3 = vpop.f32.mrb[56].mxu0 }
 0x650   : > { %v6321_v33 = vmax.f32 %v6319_v51, %v6320_v7  ;;  %v6045_v53 = vadd.f32 %v10628_v41, %v5691_v3  ;;  %v5693_v39 = vpop.f32.mrb[57].mxu0  ;;  %v6114_v41 = vmax.f32 %v11397_v25, %v6113_v11 }
 0x651   : > { %v6330_v62 = vmax.f32 %v6328_v43, %v6329_v42  ;;  %v6047_v47 = vadd.f32 %v10630_v4, %v5693_v39  ;;  %v5695_v10 = vpop.f32.mrb[58].mxu0  ;;  %v6106_v4 = vrot.slane %v6105_v28, 2 }
 0x652   : > { %v6322_v16 = vrot.slane %v6321_v33, 2  ;;  %v6049_v8 = vadd.f32 %v10632_v54, %v5695_v10  ;;  %v5697_v29 = vpop.f32.mrb[59].mxu0  ;;  %v6115_v13 = vrot.slane %v6114_v41, 2  ;;  %v11401_v10 = vld [vmem:[#allocation81_spill] sm:$0xff] }
 0x653   : > { %v6331_v2 = vrot.slane %v6330_v62, 2  ;;  %v6051_v32 = vadd.f32 %v10635_v5, %v5697_v29  ;;  %v6107_v21 = vmax.f32 %v6105_v28, %v6106_v4  ;;  %v11402_v29 = vld [vmem:[#allocation67_spill] sm:$0xff] }
 0x654   : > { %v6323_v34 = vmax.f32 %v6321_v33, %v6322_v16  ;;  %v6335_v6 = vmax.f32 %v6045_v53, %v6049_v8  ;;  %v6116_v1 = vmax.f32 %v6114_v41, %v6115_v13 }
 0x655   : > { %v6332_v40 = vmax.f32 %v6330_v62, %v6331_v2  ;;  %v6344_v55 = vmax.f32 %v6047_v47, %v6051_v32  ;;  %v6108_v43 = vrot.slane %v6107_v21, 1 }
 0x656   : > { %v6324_v50 = vrot.slane %v6323_v34, 1  ;;  %v6117_v60 = vrot.slane %v6116_v1, 1 }
 0x657   : > { %v6333_v44 = vrot.slane %v6332_v40, 1  ;;  %v5701_v31 = vpop.f32.mrb[60].mxu0  ;;  %v6109_v8 = vmax.f32 %v6107_v21, %v6108_v43 }
 0x658   : > { %v6325_v59 = vmax.f32 %v6323_v34, %v6324_v50  ;;  %v6055_v57 = vadd.f32 %v10640_v48, %v5701_v31  ;;  %v5703_v54 = vpop.f32.mrb[61].mxu0  ;;  %v6118_v28 = vmax.f32 %v6116_v1, %v6117_v60  ;;  %v11403_v34 = vld [vmem:[#allocation69_spill] sm:$0xff] }
 0x659   : > { %v6334_v26 = vmax.f32 %v6332_v40, %v6333_v44  ;;  %v6057_v5 = vadd.f32 %v10642_v9, %v5703_v54  ;;  %v5705_v23 = vpop.f32.mrb[62].mxu0  ;;  %v10766_v31 = vadd.f32 %v10684_v18, %v6109_v8 }
 0x65a   : > { %v6409_v49 = vadd.f32 %v10684_v18, %v6325_v59  ;;  %v6336_v12 = vmax.f32 %v6335_v6, %v6055_v57  ;;  %v6059_v37 = vadd.f32 %v10644_v20, %v5705_v23  ;;  %v5707_v17 = vpop.f32.mrb[63].mxu0  ;;  %v11404_v57 = vld [vmem:[#allocation78_spill] sm:$0xff] }
 0x65b   : > { %v6410_v52 = vadd.f32 %v10688_v35, %v6334_v26  ;;  %v6345_v15 = vmax.f32 %v6344_v55, %v6057_v5  ;;  %v6061_v14 = vadd.f32 %v11398_v46, %v5707_v17  ;;  %v10771_v26 = vadd.f32 %v10688_v35, %v6118_v28  ;;  %v11406_v46 = vld [vmem:[#allocation39_spill] sm:$0xff] }
 0x65c   : > { %v6483_v24 = vrot.slane %v6409_v49, 3  ;;  %v6337_v48 = vmax.f32 %v6336_v12, %v6059_v37  ;;  %v11405_v49 = vld [vmem:[#allocation80_spill] sm:$0xff] }
 0x65d   : > { %v6497_v19 = vrot.slane %v6410_v52, 3  ;;  %v6346_v27 = vmax.f32 %v6345_v15, %v6061_v14 }
 0x65e   : > { %v10750_v9 = vsel %vm2020_vm6, %v6483_v24, %v6482_v30  ;;  %v6338_v58 = vrot.slane %v6337_v48, 4  ;;  %v11400_v30 = vld [vmem:[#allocation38_spill] sm:$0xff] }
 0x65f   : > { %v10754_v20 = vsel %vm2020_vm6, %v6497_v19, %v6496_v45  ;;  %v6347_v51 = vrot.slane %v6346_v27, 4  ;;  %v5711_v0 = vpop.f32.mrb[64].mxu0  ;;  %v6131_v39 = vrot.slane %v11400_v30, 4  ;;  %v6123_v45 = vmax.f32 %v11399_v22, %v6122_v61  ;;  %v11407_v19 = vld [vmem:[#allocation42_spill] sm:$0xff] }
 0x660   : > { %v6339_v7 = vmax.f32 %v6337_v48, %v6338_v58  ;;  %v6065_v42 = vadd.f32 %v10652_v38, %v5711_v0  ;;  %v5713_v3 = vpop.f32.mrb[65].mxu0  ;;  %v6140_v38 = vrot.slane %v11402_v29, 4 }
 0x661   : > { %v6348_v63 = vmax.f32 %v6346_v27, %v6347_v51  ;;  %v6067_v33 = vadd.f32 %v10654_v36, %v5713_v3  ;;  %v5715_v53 = vpop.f32.mrb[66].mxu0  ;;  %v6149_v36 = vrot.slane %v11403_v34, 4  ;;  %v6132_v40 = vmax.f32 %v11400_v30, %v6131_v39 }
 0x662   : > { %v6340_v25 = vrot.slane %v6339_v7, 2  ;;  %v6069_v11 = vadd.f32 %v10656_v56, %v5715_v53  ;;  %v5717_v62 = vpop.f32.mrb[67].mxu0  ;;  %v6124_v56 = vrot.slane %v6123_v45, 2  ;;  %v6141_v4 = vmax.f32 %v11402_v29, %v6140_v38  ;;  %v11408_v53 = vld [vmem:[#allocation66_spill] sm:$0xff]  ;;  %v11411_v38 = vld [vmem:[#allocation72_spill] sm:$0xff] }
 0x663   : > { %v6349_v47 = vrot.slane %v6348_v63, 2  ;;  %v6071_v16 = vadd.f32 %v11401_v10, %v5717_v62  ;;  %v6150_v5 = vmax.f32 %v11403_v34, %v6149_v36  ;;  %v6133_v17 = vrot.slane %v6132_v40, 2  ;;  %v11410_v10 = vld [vmem:[#allocation70_spill] sm:$0xff] }
 0x664   : > { %v6341_v2 = vmax.f32 %v6339_v7, %v6340_v25  ;;  %v6353_v32 = vmax.f32 %v6065_v42, %v6069_v11  ;;  %v6125_v24 = vmax.f32 %v6123_v45, %v6124_v56  ;;  %v6142_v58 = vrot.slane %v6141_v4, 2  ;;  %v11409_v45 = vld [vmem:[#allocation68_spill] sm:$0xff] }
 0x665   : > { %v6350_v6 = vmax.f32 %v6348_v63, %v6349_v47  ;;  %v6362_v41 = vmax.f32 %v6067_v33, %v6071_v16  ;;  %v6447_v51 = vrot.slane %v10766_v31, 7  ;;  %v6151_v0 = vrot.slane %v6150_v5, 2 }
 0x666   : > { %v6342_v55 = vrot.slane %v6341_v2, 1  ;;  %v6461_v42 = vrot.slane %v10771_v26, 7  ;;  %v10781_v3 = vmax.f32 %v6132_v40, %v6133_v17  ;;  %v6126_v33 = vrot.slane %v6125_v24, 1 }
 0x667   : > { %v6351_v50 = vrot.slane %v6350_v6, 1  ;;  %v5721_v44 = vpop.f32.mrb[68].mxu0  ;;  %v6158_v30 = vrot.slane %v11408_v53, 4  ;;  %v10792_v62 = vmax.f32 %v6141_v4, %v6142_v58  ;;  %v6167_v47 = vrot.slane %v11409_v45, 4  ;;  %v11415_v4 = vld [vmem:[#allocation76_spill] sm:$0xff] }
 0x668   : > { %v6343_v59 = vmax.f32 %v6341_v2, %v6342_v55  ;;  %v6075_v54 = vadd.f32 %v11404_v57, %v5721_v44  ;;  %v5723_v13 = vpop.f32.mrb[69].mxu0  ;;  %v6176_v16 = vrot.slane %v11410_v10, 4  ;;  %v6185_v2 = vrot.slane %v11411_v38, 4 }
 0x669   : > { %v6352_v23 = vmax.f32 %v6350_v6, %v6351_v50  ;;  %v6077_v12 = vadd.f32 %v11405_v49, %v5723_v13  ;;  %v5725_v37 = vpop.f32.mrb[70].mxu0  ;;  %v6159_v44 = vmax.f32 %v11408_v53, %v6158_v30  ;;  %v6135_v13 = vrot.slane %v10781_v3, 1 }
 0x66a   : > { %v6411_v52 = vadd.f32 %v10684_v18, %v6343_v59  ;;  %v6354_v15 = vmax.f32 %v6353_v32, %v6075_v54  ;;  %v6079_v14 = vadd.f32 %v11406_v46, %v5725_v37  ;;  %v5727_v21 = vpop.f32.mrb[71].mxu0  ;;  %v11412_v32 = vld [vmem:[#allocation37_spill] sm:$0xff]  ;;  %v6221_v59 = vrot.slane %v11415_v4, 4 }
 0x66b   : > { %v6412_v48 = vadd.f32 %v10688_v35, %v6352_v23  ;;  %v6363_v1 = vmax.f32 %v6362_v41, %v6077_v12  ;;  %v6081_v27 = vadd.f32 %v11407_v19, %v5727_v21  ;;  %v6194_v28 = vrot.slane %v11412_v32, 4  ;;  %v11414_v41 = vld [vmem:[#allocation74_spill] sm:$0xff] }
 0x66c   : > { %v6485_v22 = vrot.slane %v6411_v52, 2  ;;  %v6355_v61 = vmax.f32 %v6354_v15, %v6079_v14  ;;  %v6212_v40 = vrot.slane %v11414_v41, 4  ;;  %v6177_v23 = vmax.f32 %v11410_v10, %v6176_v16 }
 0x66d   : > { %v6499_v43 = vrot.slane %v6412_v48, 2  ;;  %v6364_v7 = vmax.f32 %v6363_v1, %v6081_v27  ;;  %v10807_v12 = vmax.f32 %v6125_v24, %v6126_v33  ;;  %v6186_v37 = vmax.f32 %v11411_v38, %v6185_v2 }
 0x66e   : > { %v10785_v60 = vsel %vm2022_vm7, %v6485_v22, %v10750_v9  ;;  %v6356_v63 = vrot.slane %v6355_v61, 4  ;;  %v10796_v9 = vmax.f32 %v6150_v5, %v6151_v0  ;;  %v6168_v5 = vmax.f32 %v11409_v45, %v6167_v47 }
 0x66f   : > { %v10790_v39 = vsel %vm2022_vm7, %v6499_v43, %v10754_v20  ;;  %v6365_v25 = vrot.slane %v6364_v7, 4  ;;  %v5764_v11 = vpop.f32.mrb[200].mxu0  ;;  %v11413_v20 = vld [vmem:[#allocation40_spill] sm:$0xff]  ;;  %v6195_v17 = vmax.f32 %v11412_v32, %v6194_v28  ;;  %v6144_v15 = vrot.slane %v10792_v62, 1 }
 0x670   : > { %v6357_v8 = vmax.f32 %v6355_v61, %v6356_v63  ;;  %v5766_v29 = vpop.f32.mrb[201].mxu0  ;;  %v6203_v6 = vrot.slane %v11413_v20, 4  ;;  %v6213_v14 = vmax.f32 %v11414_v41, %v6212_v40  ;;  %v6153_v48 = vrot.slane %v10796_v9, 1 }
 0x671   : > { %v6366_v34 = vmax.f32 %v6364_v7, %v6365_v25  ;;  %v5768_v36 = vpop.f32.mrb[202].mxu0  ;;  %v6160_v1 = vrot.slane %v6159_v44, 2  ;;  %v6222_v24 = vmax.f32 %v11415_v4, %v6221_v59  ;;  %v6169_v58 = vrot.slane %v6168_v5, 2 }
 0x672   : > { %v6358_v55 = vrot.slane %v6357_v8, 2  ;;  %v6083_v56 = vmax.f32 %v5764_v11, %v5768_v36  ;;  %v5770_v50 = vpop.f32.mrb[203].mxu0  ;;  %v6204_v46 = vmax.f32 %v11413_v20, %v6203_v6  ;;  %v6178_v22 = vrot.slane %v6177_v23, 2 }
 0x673   : > { %v6367_v57 = vrot.slane %v6366_v34, 2  ;;  %v6092_v54 = vmax.f32 %v5766_v29, %v5770_v50  ;;  %v6187_v7 = vrot.slane %v6186_v37, 2  ;;  %v6196_v63 = vrot.slane %v6195_v17, 2 }
 0x674   : > { %v6359_v49 = vmax.f32 %v6357_v8, %v6358_v55  ;;  %v6205_v25 = vrot.slane %v6204_v46, 2  ;;  %v6214_v11 = vrot.slane %v6213_v14, 2  ;;  %v6161_v16 = vmax.f32 %v6159_v44, %v6160_v1 }
 0x675   : > { %v6368_v52 = vmax.f32 %v6366_v34, %v6367_v57  ;;  %v6223_v8 = vrot.slane %v6222_v24, 2  ;;  %v6170_v2 = vmax.f32 %v6168_v5, %v6169_v58  ;;  %v6179_v32 = vmax.f32 %v6177_v23, %v6178_v22 }
 0x676   : > { %v6360_v21 = vrot.slane %v6359_v49, 1  ;;  %v6188_v36 = vmax.f32 %v6186_v37, %v6187_v7  ;;  %v6197_v20 = vmax.f32 %v6195_v17, %v6196_v63  ;;  %v6206_v40 = vmax.f32 %v6204_v46, %v6205_v25 }
 0x677   : > { %v6369_v19 = vrot.slane %v6368_v52, 1  ;;  %v5774_v27 = vpop.f32.mrb[204].mxu0  ;;  %v6215_v55 = vmax.f32 %v6213_v14, %v6214_v11  ;;  %v6162_v4 = vrot.slane %v6161_v16, 1  ;;  %v6224_v44 = vmax.f32 %v6222_v24, %v6223_v8 }
 0x678   : > { %v6361_v61 = vmax.f32 %v6359_v49, %v6360_v21  ;;  %v6084_v0 = vmax.f32 %v6083_v56, %v5774_v27  ;;  %v5776_v43 = vpop.f32.mrb[205].mxu0  ;;  %v6171_v5 = vrot.slane %v6170_v2, 1  ;;  %v6180_v23 = vrot.slane %v6179_v32, 1 }
 0x679   : > { %v6370_v33 = vmax.f32 %v6368_v52, %v6369_v19  ;;  %v6093_v53 = vmax.f32 %v6092_v54, %v5776_v43  ;;  %v5778_v30 = vpop.f32.mrb[206].mxu0  ;;  %v6136_v54 = vmax.f32 %v10781_v3, %v6135_v13  ;;  %v6189_v37 = vrot.slane %v6188_v36, 1 }
 0x67a   : > { %v6413_v45 = vadd.f32 %v10684_v18, %v6361_v61  ;;  %v6085_v47 = vmax.f32 %v6084_v0, %v5778_v30  ;;  %v5780_v10 = vpop.f32.mrb[207].mxu0  ;;  %v6198_v17 = vrot.slane %v6197_v20, 1  ;;  %v6154_v46 = vmax.f32 %v10796_v9, %v6153_v48 }
 0x67b   : > { %v6414_v29 = vadd.f32 %v10688_v35, %v6370_v33  ;;  %v6094_v38 = vmax.f32 %v6093_v53, %v5780_v10  ;;  %v6207_v14 = vrot.slane %v6206_v40, 1  ;;  %v6216_v21 = vrot.slane %v6215_v55, 1 }
 0x67c   : > { %v6487_v28 = vrot.slane %v6413_v45, 1  ;;  %v6086_v34 = vrot.slane %v6085_v47, 4  ;;  %v6163_v24 = vmax.f32 %v6161_v16, %v6162_v4  ;;  %v6225_v19 = vrot.slane %v6224_v44, 1 }
 0x67d   : > { %v6501_v6 = vrot.slane %v6414_v29, 1  ;;  %v6095_v41 = vrot.slane %v6094_v38, 4  ;;  %v6388_v13 = vadd.f32 %v10688_v35, %v6136_v54  ;;  %v6172_v27 = vmax.f32 %v6170_v2, %v6171_v5 }
 0x67e   : > { %v6488_v56 = vsel %vm2024_vm8, %v6487_v28, %v10785_v60  ;;  %v6087_v50 = vmax.f32 %v6085_v47, %v6086_v34  ;;  %v6145_v60 = vmax.f32 %v10792_v62, %v6144_v15  ;;  %v6181_v58 = vmax.f32 %v6179_v32, %v6180_v23 }
 0x67f   : > { %6509 = vst [vmem:[%s10823_s24 + $0x10] sm:$0xff] %v6488_v56  ;;  %v6502_v59 = vsel %vm2024_vm8, %v6501_v6, %v10790_v39  ;;  %v6096_v57 = vmax.f32 %v6094_v38, %v6095_v41  ;;  %v6387_v39 = vadd.f32 %v10684_v18, %v10807_v12  ;;  %v6190_v15 = vmax.f32 %v6188_v36, %v6189_v37 }
 0x680   : > { %6510 = vst [vmem:[%s10823_s24 + $0x18] sm:$0xff] %v6502_v59  ;;  %v6088_v49 = vrot.slane %v6087_v50, 2  ;;  %v6389_v62 = vadd.f32 %v10684_v18, %v6145_v60  ;;  %v6199_v61 = vmax.f32 %v6197_v20, %v6198_v17  ;;  %v6390_v9 = vadd.f32 %v10688_v35, %v6154_v46 }
 0x681   : > { %v6097_v52 = vrot.slane %v6096_v57, 2  ;;  %v6208_v48 = vmax.f32 %v6206_v40, %v6207_v14  ;;  %v6217_v43 = vmax.f32 %v6215_v55, %v6216_v21  ;;  %v6449_v63 = vrot.slane %v6387_v39, 6 }
 0x682   : > { %v6089_v1 = vmax.f32 %v6087_v50, %v6088_v49  ;;  %v6391_v12 = vadd.f32 %v10684_v18, %v6163_v24  ;;  %v6226_v33 = vmax.f32 %v6224_v44, %v6225_v19  ;;  %v6463_v30 = vrot.slane %v6388_v13, 6 }
 0x683   : > { %v6098_v3 = vmax.f32 %v6096_v57, %v6097_v52  ;;  %v6392_v25 = vadd.f32 %v10688_v35, %v6172_v27  ;;  %v6393_v11 = vadd.f32 %v10684_v18, %v6181_v58  ;;  %v6451_v47 = vrot.slane %v6389_v62, 5 }
 0x684   : > { %v6090_v22 = vrot.slane %v6089_v1, 1  ;;  %v6394_v10 = vadd.f32 %v10688_v35, %v6190_v15  ;;  %v6395_v16 = vadd.f32 %v10684_v18, %v6199_v61  ;;  %v6465_v29 = vrot.slane %v6390_v9, 5 }
 0x685   : > { %v6099_v0 = vrot.slane %v6098_v3, 1  ;;  %v6396_v38 = vadd.f32 %v10688_v35, %v6208_v48  ;;  %v6397_v2 = vadd.f32 %v10684_v18, %v6217_v43  ;;  %v6453_v28 = vrot.slane %v6391_v12, 4 }
 0x686   : > { %v6091_v7 = vmax.f32 %v6089_v1, %v6090_v22  ;;  %v6398_v34 = vadd.f32 %v10688_v35, %v6226_v33  ;;  %v6467_v6 = vrot.slane %v6392_v25, 4  ;;  %v6455_v41 = vrot.slane %v6393_v11, 3 }
 0x687   : > { %v6100_v53 = vmax.f32 %v6098_v3, %v6099_v0  ;;  %v6457_v31 = vrot.slane %v6395_v16, 2  ;;  %v6471_v26 = vrot.slane %v6396_v38, 2  ;;  %v6459_v56 = vrot.slane %v6397_v2, 1 }
 0x688   : > { %v6383_v45 = vadd.f32 %v10684_v18, %v6091_v7  ;;  %v6469_v18 = vrot.slane %v6394_v10, 3  ;;  %v6473_v4 = vrot.slane %v6398_v34, 1 }
 0x689   : > { %v6384_v8 = vadd.f32 %v10688_v35, %v6100_v53 }
 0x68a   : > { %v6448_v32 = vsel %vm2012_vm2, %v6447_v51, %v6383_v45 }
 0x68b   : > { %v6450_v36 = vsel %vm2014_vm3, %v6449_v63, %v6448_v32  ;;  %v6462_v20 = vsel %vm2012_vm2, %v6461_v42, %v6384_v8 }
 0x68c   : > { %v6452_v40 = vsel %vm2016_vm4, %v6451_v47, %v6450_v36  ;;  %v6464_v55 = vsel %vm2014_vm3, %v6463_v30, %v6462_v20 }
 0x68d   : > { %v6454_v35 = vsel %vm2018_vm5, %v6453_v28, %v6452_v40  ;;  %v6466_v51 = vsel %vm2016_vm4, %v6465_v29, %v6464_v55 }
 0x68e   : > { %v6456_v42 = vsel %vm2020_vm6, %v6455_v41, %v6454_v35  ;;  %v6468_v50 = vsel %vm2018_vm5, %v6467_v6, %v6466_v51 }
 0x68f   : > { %v6458_v44 = vsel %vm2022_vm7, %v6457_v31, %v6456_v42  ;;  %v6470_v59 = vsel %vm2020_vm6, %v6469_v18, %v6468_v50 }
 0x690   : > { %v6460_v57 = vsel %vm2024_vm8, %v6459_v56, %v6458_v44  ;;  %v6472_v54 = vsel %vm2022_vm7, %v6471_v26, %v6470_v59 }
 0x691   : > { %6507 = vst [vmem:[%s10823_s24] sm:$0xff] %v6460_v57  ;;  %v6474_v5 = vsel %vm2024_vm8, %v6473_v4, %v6472_v54 }
 0x692   : > { %6508 = vst [vmem:[%s10823_s24 + $0x8] sm:$0xff] %v6474_v5 }
 0x693   : > { %7704 = shalt.err (!%p7701_p11)
}
 0x694   : > { %s7705_s25 = scalar_lea.hbm %s10867_s28, 512  ;;  %s7709_s15 = scalar_lea.hbm %s10928_s9, 1024 }
 0x695   : > { %p7706_p13 = scmp.ne.s32.totalorder %s10867_s28, %s7705_s25  ;;  %p7710_p6 = scmp.lt.u32.totalorder %s10867_s28, %s10928_s9 }
 0x696   : > { %p7711_p9 = scmp.lt.u32.totalorder %s7709_s15, %s7705_s25  ;;  %p7713_p12 = scmp.lt.u32.totalorder %s7705_s25, %s10867_s28 }
 0x697   : > { %p7707_p5 = pnand %p7706_p13, %p11416_p1 }
 0x698   : > { %p7712_p10 = por %p7711_p9, %p7710_p6 }
 0x699   : > { %p7708_p0 = pneg %p7707_p5 }
 0x69a   : > { %p7714_p2 = por %p7713_p12, %p7712_p10 }
 0x69c   : > { %p7715_p3 = pnand %p7714_p2, %p7708_p0 }
 0x69e   : > { %7718 = shalt.err (!%p7715_p3)
}
 0x69f   : > { %s7770_s21 = smov 256   ;;  %s7771_s13 = smov 16  }
 0x6a0   : > { %7234 = dma.vmem_to_hbm [thread:$0]  (%p11416_p1), %s10869_s26, 512, %s10867_s28, %s10878_s29, %s7770_s21, %s7770_s21, %s7771_s13  }
 0x6a1 PF: > { %p7251_p4 = scmp.ge.s32.totalorder %s7761_s12, 2  ;;  %s6541_s27 = sand.u32 1, %s7749_s30  }
 0x6a2   : > { %p11417_p7 = scmp.ne.s32.totalorder %s11018_s20, 0  ;;  %s6542_s14 = scalar_lea.sflag [#allocation4], %s6541_s27 }
 0x6a4   : > { %p7244_p8 = pnand %p7251_p4, %p11417_p7 }
 0x6a6   : > { %7744 = dma.done.wait (!%p7244_p8), %s6542_s14, 512  }
 0x6a7   : > { %7746 = vsyncadd (!%p7244_p8), %s6542_s14, 4294966784  ;;  %s11418_s12 = sld [smem:[#allocation12_spill]]  ;;  %s11419_s16 = sld [smem:[#allocation11_spill]] }
 0x6a8   : > { %s11420_s11 = sld [smem:[#allocation13_spill]]  ;;  %s11421_s30 = smov %s7753_s10 }
 0x6ad   : > { %p21_p11 = scmp.ge.s32.totalorder %s11418_s12, 4   ;;  %s11422_s10 = smov %s11419_s16 }
 0x6af   :  { %23 = sbr.rel (!%p21_p11) target bundleno = 5 (0x5), region = 100 }
 0x6b6   :  { %6547 = vsyncpa [#allocation3], 1 }
 0x6b7   :  { %6549 = vsyncpa [#allocation3 + $0x1], 1 }
 0x6b8   :  { %6550 = vsyncpa [#allocation6], 1 }
 0x6b9   :  { %6551 = vsyncpa [#allocation4], 1 }
 0x6ba   :  { %6553 = vsyncpa [#allocation4 + $0x1], 1 }

</bundles_post_ra>
